<compile_context>
chip_gen: v7x
topology: tpu7x:2x2x1
jax: 0.10.0
libtpu: 0.0.40
codegen_flags: <defaults>
</compile_context>

<pallas_src>
import functools

import jax
import jax.numpy as jnp
from jax import lax
from jax.experimental import pallas as pl
from jax.experimental.pallas import tpu as pltpu

# ---- model hyperparameters (small, lane-friendly stand-in for block_size=256 / n_embed=384) ----
N_EMBED = 128                      # n_embed stand-in (multiple of 128 -> lane-dense)
HEAD_SIZE = 8                      # head_size (same as the module)
NUM_HEADS = N_EMBED // HEAD_SIZE   # proj is Linear(n_embed, n_embed) => H*hs == n_embed
SEQ_LEN = 16                       # T (<= block_size)
BATCH = 2


def _mha_kernel(x_ref, wqkv_ref, wp_ref, bp_ref, o_ref, *, num_heads, head_size):
    """One batch-block per grid step: fused QKV matmul, head-batched causal softmax
    attention, single full-contraction output projection."""
    bb, T, C = x_ref.shape
    H, hs = num_heads, head_size

    # ---- fused QKV projection: (bb*T, C) @ (C, 3C); bf16 MXU inputs, f32 accumulate ----
    # (softmax scale is already folded into the Q columns of wqkv)
    x2d = x_ref[...].reshape(bb * T, C).astype(jnp.bfloat16)
    qkv = jnp.dot(x2d, wqkv_ref[...], preferred_element_type=jnp.float32)    # (bb*T, 3C) f32

    # ---- one relayout per Q/K/V: lane-aligned 128-wide slice -> head-batched slab ----
    def to_heads(z2d):
        z = z2d.reshape(bb, T, H, hs).astype(jnp.bfloat16)
        return jnp.transpose(z, (0, 2, 1, 3)).reshape(bb * H, T, hs)

    q = to_heads(qkv[:, :C])                  # scale already folded into Wq
    k = to_heads(qkv[:, C:2 * C])
    v = to_heads(qkv[:, 2 * C:])

    # ---- batched scores: heads are a batch dim of one dot_general (no per-head
    #      K transposes; the MXU/batched lowering handles it) ----
    s = jnp.einsum('bqd,bkd->bqk', q, k,
                   preferred_element_type=jnp.float32)                       # (bb*H, T, T)

    # causal mask (TPU needs >=2-D iota); large finite negative -> NaN-safe
    row = lax.broadcasted_iota(jnp.int32, (T, T), 0)
    col = lax.broadcasted_iota(jnp.int32, (T, T), 1)
    s = jnp.where((row >= col)[None, :, :], s, -1e30)

    # row-wise softmax in f32; reciprocal goes to the EUP slot (nearly free)
    m = jnp.max(s, axis=-1, keepdims=True)
    p = jnp.exp(s - m)
    p = p * pl.reciprocal(jnp.sum(p, axis=-1, keepdims=True), approx=True)

    # (attention dropout: identity in eval mode)
    ctx = jnp.einsum('bqk,bkd->bqd', p.astype(jnp.bfloat16), v,
                     preferred_element_type=jnp.float32)                     # (bb*H, T, hs)

    # ---- one relayout back to token-major, then ONE full-K output projection ----
    ctx = ctx.reshape(bb, H, T, hs)
    ctx = jnp.transpose(ctx, (0, 2, 1, 3)).reshape(bb * T, C).astype(jnp.bfloat16)
    out = jnp.dot(ctx, wp_ref[...], preferred_element_type=jnp.float32)      # (bb*T, C)
    out = out + bp_ref[...]                                                  # (1, C) broadcast

    # (final dropout: identity in eval mode)
    o_ref[...] = out.reshape(bb, T, C).astype(o_ref.dtype)                   # lane-dense store


def multi_head_attention(x, wq, wk, wv, wp, bp, batch_block=None):
    """x: (B, T, C); wq/wk/wv: (H, C, hs) (y = x @ W); wp: (C, C) torch layout (out,in); bp: (C,)."""
    B, T, C = x.shape
    H, _, hs = wq.shape
    assert H * hs == C
    scale = float(C) ** (-0.5)    # module uses C**-0.5 with C = n_embed (NOT head_size**-0.5)

    # ---- wrapper-side weight packing (layout plumbing, done once outside the kernel) ----
    # Q|K|V packed into one (C, 3C) bf16 matrix, head-major columns within each third;
    # softmax scale folded into the Q block.
    q_pack = jnp.transpose(wq * scale, (1, 0, 2)).reshape(C, H * hs)
    k_pack = jnp.transpose(wk, (1, 0, 2)).reshape(C, H * hs)
    v_pack = jnp.transpose(wv, (1, 0, 2)).reshape(C, H * hs)
    wqkv = jnp.concatenate([q_pack, k_pack, v_pack], axis=1).astype(jnp.bfloat16)   # (C, 3C)

    wp_t = jnp.transpose(wp).astype(jnp.bfloat16)   # (C, C), applied as ctx @ wp_t
    bp2 = bp.reshape(1, C).astype(jnp.float32)

    # Single grid step by default: per-step overhead dominates at this problem size, so
    # no dual-TC batch split (pass batch_block explicitly when per-TC work is large).
    if batch_block is None:
        batch_block = B
    assert B % batch_block == 0
    grid = (B // batch_block,)

    kernel = functools.partial(_mha_kernel, num_heads=H, head_size=hs)

    return pl.pallas_call(
        kernel,
        out_shape=jax.ShapeDtypeStruct((B, T, C), x.dtype),
        grid_spec=pltpu.PrefetchScalarGridSpec(
            num_scalar_prefetch=0,
            grid=grid,
            in_specs=[
                pl.BlockSpec((batch_block, T, C), lambda i: (i, 0, 0)),   # x: one batch-block
                pl.BlockSpec((C, 3 * C), lambda i: (0, 0)),               # fused QKV weight (resident)
                pl.BlockSpec((C, C), lambda i: (0, 0)),                   # output projection weight
                pl.BlockSpec((1, C), lambda i: (0, 0)),                   # projection bias
            ],
            out_specs=pl.BlockSpec((batch_block, T, C), lambda i: (i, 0, 0)),
        ),
        compiler_params=pltpu.CompilerParams(
            dimension_semantics=("parallel",)),
    )(x, wqkv, wp_t, bp2)


def _init_params(key):
    """Deterministic init mimicking torch.nn.Linear default (uniform(-1/sqrt(in), 1/sqrt(in)))."""
    kq, kk, kv, kpw, kpb = jax.random.split(key, 5)
    bound_in = 1.0 / (N_EMBED ** 0.5)
    # per-head weights, stored already transposed so that y = x @ W  (W: (C, hs))
    wq = jax.random.uniform(kq, (NUM_HEADS, N_EMBED, HEAD_SIZE), jnp.float32,
                            -bound_in, bound_in)
    wk = jax.random.uniform(kk, (NUM_HEADS, N_EMBED, HEAD_SIZE), jnp.float32,
                            -bound_in, bound_in)
    wv = jax.random.uniform(kv, (NUM_HEADS, N_EMBED, HEAD_SIZE), jnp.float32,
                            -bound_in, bound_in)
    # proj: torch layout (out_features, in_features); applied as x @ W.T + b
    wp = jax.random.uniform(kpw, (N_EMBED, N_EMBED), jnp.float32, -bound_in, bound_in)
    bp = jax.random.uniform(kpb, (N_EMBED,), jnp.float32, -bound_in, bound_in)
    return wq, wk, wv, wp, bp


def _reference(x, wq, wk, wv, wp, bp):
    """Pure-JAX reference mirroring the PyTorch forward (eval mode, f32 throughout)."""
    B, T, C = x.shape
    scale = float(C) ** (-0.5)
    causal = jnp.tril(jnp.ones((T, T), dtype=bool))
    outs = []
    for h in range(wq.shape[0]):
        q = x @ wq[h]
        k = x @ wk[h]
        v = x @ wv[h]
        wei = (q @ jnp.swapaxes(k, -2, -1)) * scale
        wei = jnp.where(causal[None], wei, -jnp.inf)
        wei = jax.nn.softmax(wei, axis=-1)
        outs.append(wei @ v)
    out = jnp.concatenate(outs, axis=-1)
    return out @ wp.T + bp


if __name__ == "__main__":
    key = jax.random.PRNGKey(0)
    kx, kp = jax.random.split(key)
    x = jax.random.normal(kx, (BATCH, SEQ_LEN, N_EMBED), jnp.float32)
    wq, wk, wv, wp, bp = _init_params(kp)

    out = multi_head_attention(x, wq, wk, wv, wp, bp)
    out = jax.block_until_ready(out)

    ref = _reference(x, wq, wk, wv, wp, bp)
    assert out.shape == (BATCH, SEQ_LEN, N_EMBED)
    # tolerance accounts for bf16 MXU inputs (f32 accumulation) and the approximate (EUP)
    # reciprocal in the softmax normalization
    assert jnp.allclose(out, ref, atol=2e-2, rtol=2e-2), (
        float(jnp.max(jnp.abs(out - ref))))

    print("KERNEL_OK")
</pallas_src>

<mosaic_0001>
module attributes {stable_mosaic.version = 11 : i64} {
  func.func @_mha_kernel(%arg0: i32, %arg1: memref<2x16x128xf32, #tpu.memory_space<vmem>>, %arg2: memref<128x384xbf16, #tpu.memory_space<vmem>>, %arg3: memref<128x128xbf16, #tpu.memory_space<vmem>>, %arg4: memref<1x128xf32, #tpu.memory_space<vmem>>, %arg5: memref<2x16x128xf32, #tpu.memory_space<vmem>>) attributes {dimension_semantics = [#tpu.dimension_semantics<parallel>], iteration_bounds = array<i64: 1>, scalar_prefetch = 0 : i64, scratch_operands = 0 : i64, tpu.core_type = #tpu.core_type<tc>, window_params = [{transform_indices = @transform_0, window_bounds = array<i64: 2, 16, 128>}, {pipeline_mode = #tpu.pipeline_mode<synchronous>, transform_indices = @transform_1, window_bounds = array<i64: 128, 384>}, {pipeline_mode = #tpu.pipeline_mode<synchronous>, transform_indices = @transform_2, window_bounds = array<i64: 128, 128>}, {pipeline_mode = #tpu.pipeline_mode<synchronous>, transform_indices = @transform_3, window_bounds = array<i64: 1, 128>}, {transform_indices = @transform_4, window_bounds = array<i64: 2, 16, 128>}]} {
    %c0 = arith.constant 0 : index
    %c0_0 = arith.constant 0 : index
    %c0_1 = arith.constant 0 : index
    %0 = vector.load %arg1[%c0, %c0_0, %c0_1] : memref<2x16x128xf32, #tpu.memory_space<vmem>>, vector<2x16x128xf32>
    %1 = vector.shape_cast %0 : vector<2x16x128xf32> to vector<32x128xf32>
    %2 = arith.truncf %1 : vector<32x128xf32> to vector<32x128xbf16>
    %c0_2 = arith.constant 0 : index
    %c0_3 = arith.constant 0 : index
    %3 = vector.load %arg2[%c0_2, %c0_3] : memref<128x384xbf16, #tpu.memory_space<vmem>>, vector<128x384xbf16>
    %cst = arith.constant dense<0.000000e+00> : vector<32x384xf32>
    %4 = tpu.matmul %2, %3, %cst {dimension_numbers = #tpu.dot_dimension_numbers<[1], [0], [0], [1], [0, 0, 1, 1], [], []>} : vector<32x128xbf16>, vector<128x384xbf16>, vector<32x384xf32> -> vector<32x384xf32>
    %5 = vector.extract_strided_slice %4 {offsets = [0, 0], sizes = [32, 128], strides = [1, 1]} : vector<32x384xf32> to vector<32x128xf32>
    %6 = vector.shape_cast %5 : vector<32x128xf32> to vector<2x16x16x8xf32>
    %7 = arith.truncf %6 : vector<2x16x16x8xf32> to vector<2x16x16x8xbf16>
    %8 = tpu.transpose %7, [0, 2, 1, 3] : vector<2x16x16x8xbf16> -> vector<2x16x16x8xbf16>
    %9 = vector.shape_cast %8 : vector<2x16x16x8xbf16> to vector<32x16x8xbf16>
    %10 = vector.extract_strided_slice %4 {offsets = [0, 128], sizes = [32, 128], strides = [1, 1]} : vector<32x384xf32> to vector<32x128xf32>
    %11 = vector.shape_cast %10 : vector<32x128xf32> to vector<2x16x16x8xf32>
    %12 = arith.truncf %11 : vector<2x16x16x8xf32> to vector<2x16x16x8xbf16>
    %13 = tpu.transpose %12, [0, 2, 1, 3] : vector<2x16x16x8xbf16> -> vector<2x16x16x8xbf16>
    %14 = vector.shape_cast %13 : vector<2x16x16x8xbf16> to vector<32x16x8xbf16>
    %15 = vector.extract_strided_slice %4 {offsets = [0, 256], sizes = [32, 128], strides = [1, 1]} : vector<32x384xf32> to vector<32x128xf32>
    %16 = vector.shape_cast %15 : vector<32x128xf32> to vector<2x16x16x8xf32>
    %17 = arith.truncf %16 : vector<2x16x16x8xf32> to vector<2x16x16x8xbf16>
    %18 = tpu.transpose %17, [0, 2, 1, 3] : vector<2x16x16x8xbf16> -> vector<2x16x16x8xbf16>
    %19 = vector.shape_cast %18 : vector<2x16x16x8xbf16> to vector<32x16x8xbf16>
    "tpu.trace_start"() <{level = 10 : i32, message = "bqd,bkd->bqk"}> : () -> ()
    %cst_4 = arith.constant dense<0.000000e+00> : vector<32x16x16xf32>
    %20 = tpu.matmul %9, %14, %cst_4 {dimension_numbers = #tpu.dot_dimension_numbers<[2], [2], [1], [1], [0, 0, 0, 1, 1, 1], [0], [0]>} : vector<32x16x8xbf16>, vector<32x16x8xbf16>, vector<32x16x16xf32> -> vector<32x16x16xf32>
    "tpu.trace_stop"() : () -> ()
    %21 = tpu.iota {dimensions = array<i32: 0>} : vector<16x16xi32>
    %22 = tpu.iota {dimensions = array<i32: 1>} : vector<16x16xi32>
    %23 = arith.cmpi sge, %21, %22 : vector<16x16xi32>
    %24 = vector.shape_cast %23 : vector<16x16xi1> to vector<1x16x16xi1>
    %cst_5 = arith.constant -1.000000e+30 : f32
    %25 = vector.shape_cast %24 : vector<1x16x16xi1> to vector<1x16x16xi1>
    %26 = vector.broadcast %25 : vector<1x16x16xi1> to vector<32x16x16xi1>
    %27 = vector.broadcast %cst_5 : f32 to vector<32x16x16xf32>
    %28 = arith.select %26, %20, %27 : vector<32x16x16xi1>, vector<32x16x16xf32>
    %cst_6 = arith.constant dense<0xFF800000> : vector<32x16xf32>
    %29 = vector.multi_reduction <maximumf>, %28, %cst_6 [2] : vector<32x16x16xf32> to vector<32x16xf32>
    %30 = vector.shape_cast %29 : vector<32x16xf32> to vector<32x16x1xf32>
    %31 = vector.broadcast %30 : vector<32x16x1xf32> to vector<32x16x16xf32>
    %32 = arith.subf %28, %31 : vector<32x16x16xf32>
    %33 = math.exp %32 : vector<32x16x16xf32>
    %cst_7 = arith.constant dense<0.000000e+00> : vector<32x16xf32>
    %34 = vector.multi_reduction <add>, %33, %cst_7 [2] : vector<32x16x16xf32> to vector<32x16xf32>
    %35 = vector.shape_cast %34 : vector<32x16xf32> to vector<32x16x1xf32>
    %36 = tpu.reciprocal %35 {approx = true} : vector<32x16x1xf32> -> vector<32x16x1xf32>
    %37 = vector.broadcast %36 : vector<32x16x1xf32> to vector<32x16x16xf32>
    %38 = arith.mulf %33, %37 : vector<32x16x16xf32>
    %39 = arith.truncf %38 : vector<32x16x16xf32> to vector<32x16x16xbf16>
    "tpu.trace_start"() <{level = 10 : i32, message = "bqk,bkd->bqd"}> : () -> ()
    %cst_8 = arith.constant dense<0.000000e+00> : vector<32x16x8xf32>
    %40 = tpu.matmul %39, %19, %cst_8 {dimension_numbers = #tpu.dot_dimension_numbers<[2], [1], [1], [2], [0, 0, 0, 1, 1, 2], [0], [0]>} : vector<32x16x16xbf16>, vector<32x16x8xbf16>, vector<32x16x8xf32> -> vector<32x16x8xf32>
    "tpu.trace_stop"() : () -> ()
    %41 = vector.shape_cast %40 : vector<32x16x8xf32> to vector<2x16x16x8xf32>
    %42 = tpu.transpose %41, [0, 2, 1, 3] : vector<2x16x16x8xf32> -> vector<2x16x16x8xf32>
    %43 = vector.shape_cast %42 : vector<2x16x16x8xf32> to vector<32x128xf32>
    %44 = arith.truncf %43 : vector<32x128xf32> to vector<32x128xbf16>
    %c0_9 = arith.constant 0 : index
    %c0_10 = arith.constant 0 : index
    %45 = vector.load %arg3[%c0_9, %c0_10] : memref<128x128xbf16, #tpu.memory_space<vmem>>, vector<128x128xbf16>
    %cst_11 = arith.constant dense<0.000000e+00> : vector<32x128xf32>
    %46 = tpu.matmul %44, %45, %cst_11 {dimension_numbers = #tpu.dot_dimension_numbers<[1], [0], [0], [1], [0, 0, 1, 1], [], []>} : vector<32x128xbf16>, vector<128x128xbf16>, vector<32x128xf32> -> vector<32x128xf32>
    %c0_12 = arith.constant 0 : index
    %c0_13 = arith.constant 0 : index
    %47 = vector.load %arg4[%c0_12, %c0_13] : memref<1x128xf32, #tpu.memory_space<vmem>>, vector<1x128xf32>
    %48 = vector.broadcast %47 : vector<1x128xf32> to vector<32x128xf32>
    %49 = arith.addf %46, %48 : vector<32x128xf32>
    %50 = vector.shape_cast %49 : vector<32x128xf32> to vector<2x16x128xf32>
    %c0_14 = arith.constant 0 : index
    %c0_15 = arith.constant 0 : index
    %c0_16 = arith.constant 0 : index
    %51 = vector.load %arg5[%c0_14, %c0_15, %c0_16] : memref<2x16x128xf32, #tpu.memory_space<vmem>>, vector<2x16x128xf32>
    tpu.vector_store %arg5[%c0_14, %c0_15, %c0_16], %50 {strides = array<i32>} : memref<2x16x128xf32, #tpu.memory_space<vmem>>, vector<2x16x128xf32>,
    return
  }
  func.func @transform_0(%arg0: i32) -> (i32, i32, i32) {
    %c0_i32 = arith.constant 0 : i32
    %c0_i32_0 = arith.constant 0 : i32
    %c0_i32_1 = arith.constant 0 : i32
    return %arg0, %c0_i32, %c0_i32_0 : i32, i32, i32
  }
  func.func @transform_1(%arg0: i32) -> (i32, i32) {
    %c0_i32 = arith.constant 0 : i32
    %c0_i32_0 = arith.constant 0 : i32
    %c0_i32_1 = arith.constant 0 : i32
    return %c0_i32, %c0_i32_0 : i32, i32
  }
  func.func @transform_2(%arg0: i32) -> (i32, i32) {
    %c0_i32 = arith.constant 0 : i32
    %c0_i32_0 = arith.constant 0 : i32
    %c0_i32_1 = arith.constant 0 : i32
    return %c0_i32, %c0_i32_0 : i32, i32
  }
  func.func @transform_3(%arg0: i32) -> (i32, i32) {
    %c0_i32 = arith.constant 0 : i32
    %c0_i32_0 = arith.constant 0 : i32
    %c0_i32_1 = arith.constant 0 : i32
    return %c0_i32, %c0_i32_0 : i32, i32
  }
  func.func @transform_4(%arg0: i32) -> (i32, i32, i32) {
    %c0_i32 = arith.constant 0 : i32
    %c0_i32_0 = arith.constant 0 : i32
    %c0_i32_1 = arith.constant 0 : i32
    return %arg0, %c0_i32, %c0_i32_0 : i32, i32, i32
  }
}

</mosaic_0001>

<bundles_post_ra>
// kernel: tpu_custom_call.1
= control target key start
LH: loop header
LB: loop body
LE: loop exit
PB: predicated region body
PF: predicated region fallthrough
CT: control target
= control target key end

     0   :  { %9 = vsyncpa [#allocation3], 0  ;;  %s18764_s0 = inlined_call_operand.hbm [shape: f32[2,16,128], index: 0, kind: input, shape index: {}]   ;;  %s18765_s1 = inlined_call_operand.hbm [shape: bf16[128,384], index: 1, kind: input, shape index: {}]   ;;  %s18766_s2 = inlined_call_operand.hbm [shape: bf16[128,128], index: 2, kind: input, shape index: {}]   ;;  %s18767_s3 = inlined_call_operand.vmem [shape: f32[1,128], index: 3, kind: input, shape index: {}]   ;;  %s18768_s4 = inlined_call_operand.hbm [shape: f32[2,16,128], index: 4, kind: output, shape index: {}]  }
   0x1   :  { %10 = vsyncpa [#allocation6], 0 }
   0x2   :  { %11 = vsyncpa [#allocation4], 0  ;;  %s13947_s15 = smov [#allocation5]   ;;  %s13853_s19 = scalar_lea.hbm %s18765_s1, 3072 }
   0x3   :  { %s29_s16 = sshll.u32 %s13947_s15, 4  ;;  %p13854_p0 = scmp.ne.s32.totalorder %s18765_s1, %s13853_s19  ;;  %s30_s16 = int_to_ptr.vmem [resolvable:$true] %s29_s16 }
   0x4   :  { %p13857_p1 = scmp.lt.u32.totalorder %s13853_s19, %s18765_s1 }
   0x6   :  { %p13859_p2 = pnand %p13857_p1, %p13854_p0 }
   0x8   :  { %13862 = shalt.err (!%p13859_p2)
}
   0x9   :  { %s13863_s24 = scalar_lea.vmem %s30_s16, 3072  ;;  %p13868_p4 = scmp.lt.s32.totalorder %s30_s16, %s30_s16 }
   0xa   :  { %p13864_p3 = scmp.ne.s32.totalorder %s30_s16, %s13863_s24  ;;  %p13869_p5 = scmp.lt.s32.totalorder %s13863_s24, %s13863_s24 }
   0xc   :  { %p13870_p6 = por %p13869_p5, %p13868_p4 }
   0xe   :  { %p13871_p7 = pnand %p13870_p6, %p13864_p3 }
  0x10   :  { %13874 = shalt.err (!%p13871_p7)
}
  0x11   :  { %s13948_s25 = smov 192   ;;  %s13949_s26 = smov 12  }
  0x12   :  { %35 = dma.hbm_to_vmem [thread:$0]  %s18765_s1, 3072, %s30_s16, [#allocation6], %s13948_s25, %s13948_s25, %s13949_s26  }
  0x13   :  { %s13950_s29 = smov [#allocation2]   ;;  %s13875_s7 = scalar_lea.hbm %s18764_s0, 512 }
  0x14   :  { %s17_s30 = sshll.u32 %s13950_s29, 4  ;;  %p13876_p8 = scmp.ne.s32.totalorder %s18764_s0, %s13875_s7  ;;  %s18_s30 = int_to_ptr.vmem [resolvable:$true] %s17_s30 }
  0x15   :  { %p13879_p9 = scmp.lt.u32.totalorder %s13875_s7, %s18764_s0 }
  0x17   :  { %p13881_p10 = pnand %p13879_p9, %p13876_p8 }
  0x19   :  { %13884 = shalt.err (!%p13881_p10)
}
  0x1a   :  { %s13885_s12 = scalar_lea.vmem %s18_s30, 512  ;;  %p13890_p12 = scmp.lt.s32.totalorder %s18_s30, %s18_s30 }
  0x1b   :  { %p13886_p11 = scmp.ne.s32.totalorder %s18_s30, %s13885_s12  ;;  %p13891_p13 = scmp.lt.s32.totalorder %s13885_s12, %s13885_s12 }
  0x1d   :  { %p13892_p0 = por %p13891_p13, %p13890_p12 }
  0x1f   :  { %p13893_p1 = pnand %p13892_p0, %p13886_p11 }
  0x21   :  { %13896 = shalt.err (!%p13893_p1)
}
  0x22   :  { %s13951_s1 = smov 128   ;;  %s13952_s13 = smov 8  }
  0x23   :  { %23 = dma.hbm_to_vmem [thread:$0]  %s18764_s0, 512, %s18_s30, [#allocation3], %s13951_s1, %s13951_s1, %s13952_s13  }
  0x24   :  { %s13953_s16 = smov [#allocation7]   ;;  %s13897_s20 = scalar_lea.hbm %s18766_s2, 1024 }
  0x25   :  { %s41_s17 = sshll.u32 %s13953_s16, 4  ;;  %p13898_p2 = scmp.ne.s32.totalorder %s18766_s2, %s13897_s20  ;;  %s42_s17 = int_to_ptr.vmem [resolvable:$true] %s41_s17 }
  0x26   :  { %p13901_p3 = scmp.lt.u32.totalorder %s13897_s20, %s18766_s2 }
  0x28   :  { %p13903_p4 = pnand %p13901_p3, %p13898_p2 }
  0x2a   :  { %13906 = shalt.err (!%p13903_p4)
}
  0x2b   :  { %s13907_s25 = scalar_lea.vmem %s42_s17, 1024  ;;  %p13912_p6 = scmp.lt.s32.totalorder %s42_s17, %s42_s17 }
  0x2c   :  { %p13908_p5 = scmp.ne.s32.totalorder %s42_s17, %s13907_s25  ;;  %p13913_p7 = scmp.lt.s32.totalorder %s13907_s25, %s13907_s25 }
  0x2e   :  { %p13914_p8 = por %p13913_p7, %p13912_p6 }
  0x30   :  { %p13915_p9 = pnand %p13914_p8, %p13908_p5 }
  0x32   :  { %13918 = shalt.err (!%p13915_p9)
}
  0x33   :  { %s13954_s0 = smov 64   ;;  %s13955_s26 = smov 4  }
  0x34   :  { %47 = dma.hbm_to_vmem [thread:$0]  %s18766_s2, 1024, %s42_s17, [#allocation6], %s13954_s0, %s13954_s0, %s13955_s26  }
  0x35   :  { %13941 = dma.done.wait [#allocation3], 512  }
  0x36   :  { %13942 = vsyncadd [#allocation3], 4294966784 }
  0x37   :  { %13943 = dma.done.wait [#allocation6], 4096  }
  0x38   :  { %13944 = vsyncadd [#allocation6], 4294963200  ;;  %v13956_v0 = vmov 0   ;;  %v13557_v1 = vld [vmem:[#allocation5 + $0x4] ss:$12 sps:$4 sm:$0xff]   ;;  %v61_v11 = vld [vmem:[#allocation2 + $0x8] sm:$0xff]  ;;  %v18769_v49 = vlaneseq }
  0x39   :  { %258 = vmatprep.mubr.bf16.mxu0 %v13956_v0  ;;  %v13559_v2 = vld [vmem:[#allocation5] ss:$12 sps:$4 sm:$0xff]   ;;  %226 = vmatprep.subr.bf16.mxu0 %v13557_v1  ;;  %v13560_v3 = vld [vmem:[#allocation5 + $0x1c] ss:$12 sps:$4 sm:$0xff]   ;;  %v13562_v4 = vld [vmem:[#allocation5 + $0x18] ss:$12 sps:$4 sm:$0xff]  }
  0x3a   :  { %227 = vmatpush1.bf16.msra.mxu0 %v13559_v2  ;;  %v13563_v5 = vld [vmem:[#allocation5 + $0x34] ss:$12 sps:$4 sm:$0xff]   ;;  %v13565_v6 = vld [vmem:[#allocation5 + $0x30] ss:$12 sps:$4 sm:$0xff]   ;;  %v13566_v7 = vld [vmem:[#allocation5 + $0x4c] ss:$12 sps:$4 sm:$0xff]  }
  0x3b   :  { %228 = vmatprep.subr.bf16.mxu0 %v13560_v3  ;;  %v13568_v8 = vld [vmem:[#allocation5 + $0x48] ss:$12 sps:$4 sm:$0xff]   ;;  %v13569_v9 = vld [vmem:[#allocation5 + $0x64] ss:$12 sps:$4 sm:$0xff]   ;;  %v13582_v14 = vld [vmem:[#allocation5 + $0x20] ss:$12 sps:$4 sm:$0xff]  }
  0x3c   :  { %v60_v10 = vld [vmem:[#allocation2] sm:$0xff]  ;;  %v13581_v13 = vld [vmem:[#allocation5 + $0x8] ss:$12 sps:$4 sm:$0xff]   ;;  %v13584_v20 = vld [vmem:[#allocation5 + $0x50] ss:$12 sps:$4 sm:$0xff]   ;;  %s13957_s2 = smov 120  }
  0x3d   :  { %v64_v12 = vpack.c.bf16 %v61_v11, %v60_v10  ;;  %v13571_v15 = vld [vmem:[#allocation5 + $0x60] ss:$12 sps:$4 sm:$0xff]   ;;  %12955 = vmatprep.subr.bf16.mxu1 %v13581_v13  ;;  %v13572_v16 = vld [vmem:[#allocation5 + $0x7c] ss:$12 sps:$4 sm:$0xff]   ;;  %v13583_v17 = vld [vmem:[#allocation5 + $0x38] ss:$12 sps:$4 sm:$0xff]  }
  0x3e   :  { %229 = vmatpush1.bf16.msra.mxu0 %v13562_v4  ;;  %12956 = vmatpush3.bf16.msra.mxu1 %v13581_v13  ;;  %v13574_v18 = vld [vmem:[#allocation5 + $0x78] ss:$12 sps:$4 sm:$0xff]   ;;  %v13575_v19 = vld [vmem:[#allocation5 + $0x94] ss:$12 sps:$4 sm:$0xff]   ;;  %v13577_v21 = vld [vmem:[#allocation5 + $0x90] ss:$12 sps:$4 sm:$0xff]  }
  0x3f   :  { %230 = vmatprep.subr.bf16.mxu0 %v13563_v5  ;;  %12971 = vmatprep.mubr.bf16.mxu1 %v64_v12  ;;  %v13578_v22 = vld [vmem:[#allocation5 + $0xac] ss:$12 sps:$4 sm:$0xff]   ;;  %v13585_v23 = vld [vmem:[#allocation5 + $0x68] ss:$12 sps:$4 sm:$0xff]   ;;  %v13588_v27 = vld [vmem:[#allocation5 + $0xb0] ss:$12 sps:$4 sm:$0xff]  }
  0x40   :  { %12957 = vmatprep.subr.bf16.mxu1 %v13582_v14  ;;  %v13580_v24 = vld [vmem:[#allocation5 + $0xa8] ss:$12 sps:$4 sm:$0xff]   ;;  %v13586_v25 = vld [vmem:[#allocation5 + $0x80] ss:$12 sps:$4 sm:$0xff]   ;;  %v13587_v26 = vld [vmem:[#allocation5 + $0x98] ss:$12 sps:$4 sm:$0xff]  }
  0x41   :  { %v62_v28 = vld [vmem:[#allocation2 + $0x10] sm:$0xff]  ;;  %v63_v29 = vld [vmem:[#allocation2 + $0x18] sm:$0xff]  ;;  %s13958_s29 = smov 112   ;;  %s13959_s30 = smov 104   ;;  %v13970_v47 = vmov 1983009808  }
  0x42   :  { %231 = vmatpush1.bf16.msra.mxu0 %v13565_v6  ;;  %12958 = vmatpush3.bf16.msra.mxu1 %v13582_v14  ;;  %v65_v30 = vpack.c.bf16 %v63_v29, %v62_v28  ;;  %s13960_s5 = smov 96   ;;  %s13961_s6 = smov 88   ;;  %v515_v48 = vunpack.c.l.s4 %v13970_v47  ;;  %v14194_v53 = vshrl.u32 %v18769_v49, 7  ;;  %v13971_v55 = vmov 1934713408  }
  0x43   :  { %232 = vmatprep.subr.bf16.mxu0 %v13566_v7  ;;  %12959 = vmatprep.subr.bf16.mxu1 %v13583_v17  ;;  %s13962_s7 = smov 80   ;;  %s13963_s8 = smov 72   ;;  %v579_v56 = vunpack.c.l.s4 %v13971_v55  ;;  %v18770_v1 = vmov 0.0   ;;  %vm13973_vm0 = vmmov 0   ;;  %vm6192_vm1 = vcmask 64512  }
  0x44   :  { %s13964_s9 = smov 56   ;;  %s13965_s10 = smov 48   ;;  %v516_v52 = vunpack.c.0.s8 %v515_v48  ;;  %18931 = vst [vmem:[#allocation17_spill] sm:$0xff] %v14194_v53  ;;  %vm7772_vm2 = vcmask 130048   ;;  %vm12341_vm5 = vcmask 195584   ;;  %vm12346_vm6 = vcmask 261120  }
  0x45   :  { %s13966_s11 = smov 40   ;;  %s13967_s12 = smov 32   ;;  %v580_v2 = vunpack.c.0.s8 %v579_v56  ;;  %vm12351_vm7 = vcmask 326656   ;;  %vm12356_vm8 = vcmask 392192   ;;  %vm12361_vm9 = vcmask 457728  }
  0x46   :  { %233 = vmatpush1.bf16.msra.mxu0 %v13568_v8  ;;  %12960 = vmatpush3.bf16.msra.mxu1 %v13583_v17  ;;  %s13968_s14 = smov 24   ;;  %s13969_s15 = smov 16   ;;  %v14201_v60 = vsub.s32 %v516_v52, %v14194_v53  ;;  %vm12366_vm10 = vcmask 523264   ;;  %vm12371_vm11 = vcmask 588800   ;;  %vm12376_vm12 = vcmask 654336  }
  0x47   :  { %234 = vmatprep.subr.bf16.mxu0 %v13569_v9  ;;  %12961 = vmatprep.subr.bf16.mxu1 %v13584_v20  ;;  %v14221_v13 = vsub.s32 %v580_v2, %v14194_v53  ;;  %vm12381_vm13 = vcmask 719872   ;;  %vm12386_vm14 = vcmask 785408   ;;  %vm12391_vm15 = vcmask 850944   ;;  %s13974_s18 = smov [#allocation8]  }
  0x48   :  { %18932 = vst [vmem:[#allocation18_spill] sm:$0xff] %v14201_v60  ;;  %s12537_s19 = sshll.u32 %s13974_s18, 4  ;;  %s12538_s19 = int_to_ptr.vmem [resolvable:$true] %s12537_s19 }
  0x49   :  { %18933 = vst [vmem:[#allocation19_spill] sm:$0xff] %v14221_v13  ;;  %s13919_s20 = scalar_lea.vmem %s12538_s19, 512  ;;  %p13924_p11 = scmp.lt.s32.totalorder %s12538_s19, %s12538_s19 }
  0x4a   :  { %235 = vmatpush1.bf16.msra.mxu0 %v13571_v15  ;;  %12962 = vmatpush3.bf16.msra.mxu1 %v13584_v20  ;;  %p13920_p10 = scmp.ne.s32.totalorder %s12538_s19, %s13919_s20  ;;  %p13925_p12 = scmp.lt.s32.totalorder %s13919_s20, %s13919_s20 }
  0x4b   :  { %236 = vmatprep.subr.bf16.mxu0 %v13572_v16  ;;  %12963 = vmatprep.subr.bf16.mxu1 %v13585_v23 }
  0x4c   :  { %p13926_p13 = por %p13925_p12, %p13924_p11 }
  0x4e   :  { %237 = vmatpush1.bf16.msra.mxu0 %v13574_v18  ;;  %12964 = vmatpush3.bf16.msra.mxu1 %v13585_v23  ;;  %p13927_p0 = pnand %p13926_p13, %p13920_p10 }
  0x4f   :  { %238 = vmatprep.subr.bf16.mxu0 %v13575_v19  ;;  %12965 = vmatprep.subr.bf16.mxu1 %v13586_v25 }
  0x52   :  { %239 = vmatpush1.bf16.msra.mxu0 %v13577_v21  ;;  %12966 = vmatpush3.bf16.msra.mxu1 %v13586_v25 }
  0x53   :  { %240 = vmatprep.subr.bf16.mxu0 %v13578_v22  ;;  %12967 = vmatprep.subr.bf16.mxu1 %v13587_v26 }
  0x56   :  { %241 = vmatpush1.bf16.msra.mxu0 %v13580_v24  ;;  %12968 = vmatpush3.bf16.msra.mxu1 %v13587_v26 }
  0x57   :  { %12969 = vmatprep.subr.bf16.mxu1 %v13588_v27  ;;  %12975 = vmatprep.subr.bf16.mxu0 %v18770_v1 }
  0x59   :  { %259 = vmatmul.mubr.bf16.vlgmr.msra.gmra.mrb[0].mxu0 %v64_v12 }
  0x5a   :  { %268 = vmatprep.mubr.bf16.mxu0 %v13956_v0  ;;  %12970 = vmatpush3.bf16.msra.mxu1 %v13588_v27 }
  0x5b   :  { %12987 = vmatprep.subr.bf16.mxu1 %v18770_v1 }
  0x5d   :  { %12972 = vmatmul.mubr.bf16.vlgmr.msra.gmra.mrb[0].mxu1 %v65_v30 }
  0x5e   :  { %12989 = vmatprep.mubr.msk.bf16.mxu1 %vm13973_vm0, %v18770_v1 }
  0x61   :  { %269 = vmatmul.mubr.bf16.gmra.mrb[4].mxu0 %v65_v30 }
  0x62   :  { %12977 = vmatprep.mubr.msk.bf16.mxu0 %vm13973_vm0, %v18770_v1 }
 0x12c   :  { %v14041_v31 = vpop.f32.mrb[0].mxu0 }
 0x12d   :  { %332 = vrot.lane.b32.xlu0 %v14041_v31, %s13957_s2  ;;  %v14045_v32 = vpop.f32.mrb[1].mxu0 }
 0x12e   :  { %2288 = vrot.lane.b32.xlu1 %v14045_v32, %s13958_s29  ;;  %v14049_v33 = vpop.f32.mrb[2].mxu0 }
 0x12f   :  { %v14051_v34 = vpop.f32.mrb[3].mxu0 }
 0x130   :  { %v14069_v39 = vpop.f32.mrb[0].mxu1 }
 0x131   :  { %344 = vrot.lane.b32.xlu0 %v14041_v31, %s13958_s29  ;;  %18929 = vst [vmem:[#allocation15_spill] sm:$0xff] %v14069_v39  ;;  %v14073_v40 = vpop.f32.mrb[1].mxu1 }
 0x132   :  { %334 = vrot.lane.b32.xlu1 %v14049_v33, %s13957_s2  ;;  %v14077_v41 = vpop.f32.mrb[2].mxu1 }
 0x133   :  { %18930 = vst [vmem:[#allocation16_spill] sm:$0xff] %v14077_v41  ;;  %v14079_v42 = vpop.f32.mrb[3].mxu1 }
 0x134   :  { %v14057_v35 = vpop.f32.mrb[4].mxu0 }
 0x135   :  { %356 = vrot.lane.b32.xlu0 %v14041_v31, %s13959_s30  ;;  %v14061_v36 = vpop.f32.mrb[5].mxu0 }
 0x136   :  { %18926 = vst [vmem:[#allocation12_spill] sm:$0xff] %v14061_v36  ;;  %346 = vrot.lane.b32.xlu1 %v14049_v33, %s13958_s29  ;;  %v14065_v37 = vpop.f32.mrb[6].mxu0 }
 0x137   :  { %18927 = vst [vmem:[#allocation13_spill] sm:$0xff] %v14065_v37  ;;  %v14067_v38 = vpop.f32.mrb[7].mxu0 }
 0x138   :  { %18928 = vst [vmem:[#allocation14_spill] sm:$0xff] %v14067_v38 }
 0x139   :  { %368 = vrot.lane.b32.xlu0 %v14041_v31, %s13960_s5 }
 0x13a   :  { %358 = vrot.lane.b32.xlu1 %v14049_v33, %s13959_s30 }
 0x13d   :  { %380 = vrot.lane.b32.xlu0 %v14041_v31, %s13961_s6 }
 0x13e   :  { %370 = vrot.lane.b32.xlu1 %v14049_v33, %s13960_s5 }
 0x141   :  { %392 = vrot.lane.b32.xlu0 %v14041_v31, %s13962_s7 }
 0x142   :  { %382 = vrot.lane.b32.xlu1 %v14049_v33, %s13961_s6 }
 0x145   :  { %404 = vrot.lane.b32.xlu0 %v14041_v31, %s13963_s8 }
 0x146   :  { %394 = vrot.lane.b32.xlu1 %v14049_v33, %s13962_s7 }
 0x149   :  { %416 = vrot.lane.b32.xlu0 %v14041_v31, %s13954_s0 }
 0x14a   :  { %406 = vrot.lane.b32.xlu1 %v14049_v33, %s13963_s8 }
 0x14d   :  { %428 = vrot.lane.b32.xlu0 %v14041_v31, %s13964_s9 }
 0x14e   :  { %418 = vrot.lane.b32.xlu1 %v14049_v33, %s13954_s0 }
 0x151   :  { %440 = vrot.lane.b32.xlu0 %v14041_v31, %s13965_s10 }
 0x152   :  { %430 = vrot.lane.b32.xlu1 %v14049_v33, %s13964_s9 }
 0x155   :  { %452 = vrot.lane.b32.xlu0 %v14041_v31, %s13966_s11 }
 0x156   :  { %442 = vrot.lane.b32.xlu1 %v14049_v33, %s13965_s10 }
 0x159   :  { %464 = vrot.lane.b32.xlu0 %v14041_v31, %s13967_s12 }
 0x15a   :  { %454 = vrot.lane.b32.xlu1 %v14049_v33, %s13966_s11 }
 0x15d   :  { %476 = vrot.lane.b32.xlu0 %v14041_v31, %s13968_s14 }
 0x15e   :  { %466 = vrot.lane.b32.xlu1 %v14049_v33, %s13967_s12 }
 0x161   :  { %488 = vrot.lane.b32.xlu0 %v14041_v31, %s13969_s15 }
 0x162   :  { %478 = vrot.lane.b32.xlu1 %v14049_v33, %s13968_s14 }
 0x165   :  { %500 = vrot.lane.b32.xlu0 %v14041_v31, %s13952_s13 }
 0x166   :  { %490 = vrot.lane.b32.xlu1 %v14049_v33, %s13969_s15 }
 0x169   :  { %2276 = vrot.lane.b32.xlu0 %v14045_v32, %s13957_s2 }
 0x16a   :  { %502 = vrot.lane.b32.xlu1 %v14049_v33, %s13952_s13 }
 0x16d   :  { %2300 = vrot.lane.b32.xlu0 %v14045_v32, %s13959_s30 }
 0x16e   :  { %2290 = vrot.lane.b32.xlu1 %v14051_v34, %s13958_s29 }
 0x171   :  { %2312 = vrot.lane.b32.xlu0 %v14045_v32, %s13960_s5 }
 0x172   :  { %2302 = vrot.lane.b32.xlu1 %v14051_v34, %s13959_s30 }
 0x175   :  { %2324 = vrot.lane.b32.xlu0 %v14045_v32, %s13961_s6 }
 0x176   :  { %2314 = vrot.lane.b32.xlu1 %v14051_v34, %s13960_s5 }
 0x179   :  { %2336 = vrot.lane.b32.xlu0 %v14045_v32, %s13962_s7 }
 0x17a   :  { %2326 = vrot.lane.b32.xlu1 %v14051_v34, %s13961_s6 }
 0x17d   :  { %2348 = vrot.lane.b32.xlu0 %v14045_v32, %s13963_s8 }
 0x17e   :  { %2338 = vrot.lane.b32.xlu1 %v14051_v34, %s13962_s7 }
 0x181   :  { %2360 = vrot.lane.b32.xlu0 %v14045_v32, %s13954_s0 }
 0x182   :  { %2350 = vrot.lane.b32.xlu1 %v14051_v34, %s13963_s8 }
 0x185   :  { %2372 = vrot.lane.b32.xlu0 %v14045_v32, %s13964_s9 }
 0x186   :  { %2362 = vrot.lane.b32.xlu1 %v14051_v34, %s13954_s0 }
 0x189   :  { %2384 = vrot.lane.b32.xlu0 %v14045_v32, %s13965_s10 }
 0x18a   :  { %2374 = vrot.lane.b32.xlu1 %v14051_v34, %s13964_s9 }
 0x18d   :  { %2396 = vrot.lane.b32.xlu0 %v14045_v32, %s13966_s11 }
 0x18e   :  { %2386 = vrot.lane.b32.xlu1 %v14051_v34, %s13965_s10 }
 0x191   :  { %2408 = vrot.lane.b32.xlu0 %v14045_v32, %s13967_s12 }
 0x192   :  { %2398 = vrot.lane.b32.xlu1 %v14051_v34, %s13966_s11 }
 0x195   :  { %2420 = vrot.lane.b32.xlu0 %v14045_v32, %s13968_s14 }
 0x196   :  { %2410 = vrot.lane.b32.xlu1 %v14051_v34, %s13967_s12 }
 0x199   :  { %2432 = vrot.lane.b32.xlu0 %v14045_v32, %s13969_s15 }
 0x19a   :  { %2422 = vrot.lane.b32.xlu1 %v14051_v34, %s13968_s14 }
 0x19d   :  { %2444 = vrot.lane.b32.xlu0 %v14045_v32, %s13952_s13 }
 0x19e   :  { %2434 = vrot.lane.b32.xlu1 %v14051_v34, %s13969_s15 }
 0x19f   :  { %v333_v43 = vpop.permute.xlu0 %332 }
 0x1a0   :  { %v14181_v44 = vpop.permute.xlu1 %2288 }
 0x1a1   :  { %2278 = vrot.lane.b32.xlu0 %v14051_v34, %s13957_s2 }
 0x1a2   :  { %2446 = vrot.lane.b32.xlu1 %v14051_v34, %s13952_s13 }
 0x1a3   :  { %v345_v45 = vpop.permute.xlu0 %344 }
 0x1a4   :  { %v335_v46 = vpop.permute.xlu1 %334  ;;  %v512_v61 = vcombine.low %v14041_v31, %v345_v45  ;;  %v513_v62 = vcombine.high %v14041_v31, %v345_v45 }
 0x1a5   :  { %336 = vrot.lane.b32.xlu0 %v14057_v35, %s13957_s2 }
 0x1a6   :  { %4220 = vrot.lane.b32.xlu1 %v14073_v40, %s13957_s2  ;;  %v520_v8 = vrot.slane %v512_v61, %v14201_v60  ;;  %v527_v9 = vrot.slane %v513_v62, %v14201_v60 }
 0x1a7   :  { %v357_v50 = vpop.permute.xlu0 %356 }
 0x1a8   :  { %v347_v51 = vpop.permute.xlu1 %346  ;;  %v528_v57 = vcombine.low %v333_v43, %v357_v50  ;;  %v529_v59 = vcombine.high %v333_v43, %v357_v50 }
 0x1a9   :  { %348 = vrot.lane.b32.xlu0 %v14057_v35, %s13958_s29  ;;  %v784_v6 = vcombine.low %v14049_v33, %v347_v51  ;;  %v785_v10 = vcombine.high %v14049_v33, %v347_v51 }
 0x1aa   :  { %4232 = vrot.lane.b32.xlu1 %v14073_v40, %s13958_s29  ;;  %v536_v3 = vrot.slane %v528_v57, %v14201_v60  ;;  %v543_v5 = vrot.slane %v529_v59, %v14201_v60 }
 0x1ab   :  { %v369_v54 = vpop.permute.xlu0 %368  ;;  %v792_v19 = vrot.slane %v784_v6, %v14201_v60  ;;  %v14232_v23 = vrot.slane %v785_v10, %v14201_v60 }
 0x1ac   :  { %v359_v58 = vpop.permute.xlu1 %358  ;;  %v576_v14 = vcombine.low %v520_v8, %v536_v3  ;;  %v577_v15 = vcombine.high %v520_v8, %v536_v3  ;;  %v592_v17 = vcombine.low %v527_v9, %v543_v5  ;;  %v593_v18 = vcombine.high %v527_v9, %v543_v5 }
 0x1ad   :  { %360 = vrot.lane.b32.xlu0 %v14057_v35, %s13959_s30  ;;  %v800_v63 = vcombine.low %v335_v46, %v359_v58  ;;  %v801_v7 = vcombine.high %v335_v46, %v359_v58 }
 0x1ae   :  { %4234 = vrot.lane.b32.xlu1 %v14079_v42, %s13958_s29  ;;  %v584_v27 = vrot.slane %v576_v14, %v14221_v13  ;;  %v591_v28 = vrot.slane %v577_v15, %v14221_v13  ;;  %v600_v33 = vrot.slane %v592_v17, %v14221_v13  ;;  %v607_v43 = vrot.slane %v593_v18, %v14221_v13 }
 0x1af   :  { %v381_v0 = vpop.permute.xlu0 %380  ;;  %v808_v11 = vrot.slane %v800_v63, %v14201_v60  ;;  %v14225_v20 = vrot.slane %v801_v7, %v14201_v60 }
 0x1b0   :  { %v371_v4 = vpop.permute.xlu1 %370 }
 0x1b1   :  { %372 = vrot.lane.b32.xlu0 %v14057_v35, %s13960_s5  ;;  %v848_v24 = vcombine.low %v792_v19, %v808_v11  ;;  %v849_v25 = vcombine.high %v792_v19, %v808_v11  ;;  %v864_v45 = vcombine.low %v14232_v23, %v14225_v20  ;;  %v865_v55 = vcombine.high %v14232_v23, %v14225_v20 }
 0x1b2   :  { %338 = vrot.lane.b32.xlu1 %v14065_v37, %s13957_s2 }
 0x1b3   :  { %v393_v12 = vpop.permute.xlu0 %392  ;;  %v14249_v52 = vrot.slane %v848_v24, %v14221_v13 }
 0x1b4   :  { %v383_v16 = vpop.permute.xlu1 %382  ;;  %v544_v21 = vcombine.low %v369_v54, %v393_v12  ;;  %v545_v22 = vcombine.high %v369_v54, %v393_v12  ;;  %v14252_v54 = vrot.slane %v849_v25, %v14221_v13 }
 0x1b5   :  { %384 = vrot.lane.b32.xlu0 %v14057_v35, %s13961_s6 }
 0x1b6   :  { %350 = vrot.lane.b32.xlu1 %v14065_v37, %s13958_s29  ;;  %v552_v47 = vrot.slane %v544_v21, %v14201_v60  ;;  %v559_v48 = vrot.slane %v545_v22, %v14201_v60 }
 0x1b7   :  { %v405_v26 = vpop.permute.xlu0 %404 }
 0x1b8   :  { %v560_v29 = vcombine.low %v381_v0, %v405_v26  ;;  %v561_v30 = vcombine.high %v381_v0, %v405_v26  ;;  %v395_v31 = vpop.permute.xlu1 %394 }
 0x1b9   :  { %v816_v46 = vcombine.low %v371_v4, %v395_v31  ;;  %396 = vrot.lane.b32.xlu0 %v14057_v35, %s13962_s7  ;;  %v817_v56 = vcombine.high %v371_v4, %v395_v31 }
 0x1ba   :  { %v568_v50 = vrot.slane %v560_v29, %v14201_v60  ;;  %v575_v51 = vrot.slane %v561_v30, %v14201_v60  ;;  %362 = vrot.lane.b32.xlu1 %v14065_v37, %s13959_s30 }
 0x1bb   :  { %v14256_v57 = vpop.permute.xlu0 %416  ;;  %v824_v0 = vrot.slane %v816_v46, %v14201_v60  ;;  %v831_v8 = vrot.slane %v817_v56, %v14201_v60 }
 0x1bc   :  { %v608_v58 = vcombine.low %v552_v47, %v568_v50  ;;  %v609_v59 = vcombine.high %v552_v47, %v568_v50  ;;  %v624_v61 = vcombine.low %v559_v48, %v575_v51  ;;  %v625_v62 = vcombine.high %v559_v48, %v575_v51  ;;  %v407_v63 = vpop.permute.xlu1 %406 }
 0x1bd   :  { %v832_v2 = vcombine.low %v383_v16, %v407_v63  ;;  %v833_v3 = vcombine.high %v383_v16, %v407_v63  ;;  %408 = vrot.lane.b32.xlu0 %v14057_v35, %s13963_s8  ;;  %v872_v48 = vrot.slane %v864_v45, %v14221_v13  ;;  %v879_v50 = vrot.slane %v865_v55, %v14221_v13 }
 0x1be   :  { %v616_v5 = vrot.slane %v608_v58, %v14221_v13  ;;  %v623_v6 = vrot.slane %v609_v59, %v14221_v13  ;;  %v632_v4 = vrot.slane %v624_v61, %v14221_v13  ;;  %v639_v7 = vrot.slane %v625_v62, %v14221_v13  ;;  %374 = vrot.lane.b32.xlu1 %v14065_v37, %s13960_s5 }
 0x1bf   :  { %v840_v9 = vrot.slane %v832_v2, %v14201_v60  ;;  %v847_v10 = vrot.slane %v833_v3, %v14201_v60  ;;  %v14270_v11 = vpop.permute.xlu0 %428 }
 0x1c0   :  { %v640_v12 = vcombine.low %v584_v27, %v616_v5  ;;  %v641_v14 = vcombine.high %v584_v27, %v616_v5  ;;  %v642_v15 = vcombine.low %v591_v28, %v623_v6  ;;  %v643_v16 = vcombine.high %v591_v28, %v623_v6  ;;  %v14276_v17 = vpop.permute.xlu1 %418 }
 0x1c1   :  { %v644_v18 = vcombine.low %v600_v33, %v632_v4  ;;  %v645_v19 = vcombine.high %v600_v33, %v632_v4  ;;  %v646_v20 = vcombine.low %v607_v43, %v639_v7  ;;  %v647_v21 = vcombine.high %v607_v43, %v639_v7  ;;  %420 = vrot.lane.b32.xlu0 %v14057_v35, %s13954_s0 }
 0x1c2   :  { %v880_v22 = vcombine.low %v824_v0, %v840_v9  ;;  %v881_v23 = vcombine.high %v824_v0, %v840_v9  ;;  %v896_v24 = vcombine.low %v831_v8, %v847_v10  ;;  %v897_v25 = vcombine.high %v831_v8, %v847_v10  ;;  %386 = vrot.lane.b32.xlu1 %v14065_v37, %s13961_s6 }
 0x1c3   :  { %v12574_v26 = vpack.c.bf16 %v644_v18, %v640_v12  ;;  %v12576_v27 = vpack.c.bf16 %v646_v20, %v642_v15  ;;  %v12582_v29 = vpack.c.bf16 %v645_v19, %v641_v14  ;;  %v12584_v28 = vpack.c.bf16 %v647_v21, %v643_v16  ;;  %v14282_v30 = vpop.permute.xlu0 %440 }
 0x1c4   :  { %v888_v31 = vrot.slane %v880_v22, %v14221_v13  ;;  %v895_v33 = vrot.slane %v881_v23, %v14221_v13  ;;  %v904_v43 = vrot.slane %v896_v24, %v14221_v13  ;;  %v911_v46 = vrot.slane %v897_v25, %v14221_v13  ;;  %v14288_v47 = vpop.permute.xlu1 %430 }
 0x1c5   :  { %432 = vrot.lane.b32.xlu0 %v14057_v35, %s13964_s9  ;;  %v1640_v61 = vrot.slane %v12574_v26, %v14201_v60  ;;  %v1656_v45 = vrot.slane %v12576_v27, %v14201_v60  ;;  %v1776_v55 = vrot.slane %v12582_v29, %v14201_v60  ;;  %v1792_v62 = vrot.slane %v12584_v28, %v14201_v60 }
 0x1c6   :  { %v912_v51 = vcombine.low %v14249_v52, %v888_v31  ;;  %v913_v56 = vcombine.high %v14249_v52, %v888_v31  ;;  %v914_v58 = vcombine.low %v14252_v54, %v895_v33  ;;  %v915_v59 = vcombine.high %v14252_v54, %v895_v33  ;;  %398 = vrot.lane.b32.xlu1 %v14065_v37, %s13962_s7 }
 0x1c7   :  { %v14304_v63 = vpop.permute.xlu0 %452  ;;  %v916_v0 = vcombine.low %v872_v48, %v904_v43  ;;  %v917_v2 = vcombine.high %v872_v48, %v904_v43  ;;  %v918_v52 = vcombine.low %v879_v50, %v911_v46  ;;  %v919_v3 = vcombine.high %v879_v50, %v911_v46 }
 0x1c8   :  { %v14306_v5 = vpop.permute.xlu1 %442  ;;  %v1696_v8 = vcombine.low %v1640_v61, %v1656_v45  ;;  %v1832_v9 = vcombine.low %v1776_v55, %v1792_v62  ;;  %v1697_v21 = vcombine.high %v1640_v61, %v1656_v45  ;;  %v1833_v45 = vcombine.high %v1776_v55, %v1792_v62 }
 0x1c9   :  { %444 = vrot.lane.b32.xlu0 %v14057_v35, %s13965_s10  ;;  %v12578_v54 = vpack.c.bf16 %v916_v0, %v912_v51  ;;  %v12580_v6 = vpack.c.bf16 %v918_v52, %v914_v58  ;;  %v12586_v4 = vpack.c.bf16 %v917_v2, %v913_v56  ;;  %v12588_v7 = vpack.c.bf16 %v919_v3, %v915_v59 }
 0x1ca   :  { %410 = vrot.lane.b32.xlu1 %v14065_v37, %s13963_s8  ;;  %v1704_v24 = vrot.slane %v1696_v8, %v14221_v13  ;;  %v1840_v25 = vrot.slane %v1832_v9, %v14221_v13  ;;  %v1711_v51 = vrot.slane %v1697_v21, %v14221_v13  ;;  %v664_v21 = vcombine.low %v14270_v11, %v14304_v63 }
 0x1cb   :  { %v14312_v10 = vpop.permute.xlu0 %464  ;;  %v1672_v12 = vrot.slane %v12578_v54, %v14201_v60  ;;  %v1688_v14 = vrot.slane %v12580_v6, %v14201_v60  ;;  %v1808_v15 = vrot.slane %v12586_v4, %v14201_v60  ;;  %v1824_v16 = vrot.slane %v12588_v7, %v14201_v60 }
 0x1cc   :  { %v14318_v18 = vpop.permute.xlu1 %454  ;;  %v1847_v6 = vrot.slane %v1833_v45, %v14221_v13 }
 0x1cd   :  { %456 = vrot.lane.b32.xlu0 %v14057_v35, %s13966_s11  ;;  %v1728_v19 = vcombine.low %v1672_v12, %v1688_v14  ;;  %v1864_v20 = vcombine.low %v1808_v15, %v1824_v16  ;;  %v1729_v22 = vcombine.high %v1672_v12, %v1688_v14  ;;  %v1865_v0 = vcombine.high %v1808_v15, %v1824_v16 }
 0x1ce   :  { %422 = vrot.lane.b32.xlu1 %v14065_v37, %s13954_s0 }
 0x1cf   :  { %v14324_v23 = vpop.permute.xlu0 %476  ;;  %v1736_v26 = vrot.slane %v1728_v19, %v14221_v13  ;;  %v1872_v27 = vrot.slane %v1864_v20, %v14221_v13  ;;  %v1743_v48 = vrot.slane %v1729_v22, %v14221_v13  ;;  %v1879_v55 = vrot.slane %v1865_v0, %v14221_v13 }
 0x1d0   :  { %v14330_v29 = vpop.permute.xlu1 %466 }
 0x1d1   :  { %468 = vrot.lane.b32.xlu0 %v14057_v35, %s13967_s12  ;;  %v14336_v28 = vcombine.low %v1704_v24, %v1736_v26  ;;  %v14338_v31 = vcombine.low %v1840_v25, %v1872_v27  ;;  %v14342_v43 = vcombine.high %v1704_v24, %v1736_v26  ;;  %v14344_v46 = vcombine.high %v1840_v25, %v1872_v27 }
 0x1d2   :  { %434 = vrot.lane.b32.xlu1 %v14065_v37, %s13964_s9  ;;  %v14362_v3 = vcombine.low %v1711_v51, %v1743_v48  ;;  %v14378_v9 = vcombine.low %v1847_v6, %v1879_v55  ;;  %v14382_v14 = vcombine.high %v1711_v51, %v1743_v48  ;;  %v14384_v15 = vcombine.high %v1847_v6, %v1879_v55 }
 0x1d3   :  { %v14340_v33 = vpop.permute.xlu0 %488  ;;  %v2179_v59 = vshrl.u32 %v14336_v28, 16  ;;  %v2180_v61 = vshrl.u32 %v14338_v31, 16  ;;  %v2185_v62 = vshrl.u32 %v14342_v43, 16  ;;  %v2186_v4 = vshrl.u32 %v14344_v46, 16 }
 0x1d4   :  { %v14347_v50 = vpop.permute.xlu1 %478  ;;  %18935 = vst [vmem:[#allocation21_spill] sm:$0xff] %v14362_v3  ;;  %18936 = vst [vmem:[#allocation22_spill] sm:$0xff] %v14378_v9  ;;  %v2456_v24 = vcombine.low %v14045_v32, %v14181_v44  ;;  %v648_v25 = vcombine.low %v14256_v57, %v14282_v30  ;;  %v649_v48 = vcombine.high %v14256_v57, %v14282_v30 }
 0x1d5   :  { %480 = vrot.lane.b32.xlu0 %v14057_v35, %s13968_s14  ;;  %v14360_v52 = vpack.i.b16 %v2180_v61, %v2179_v59  ;;  %v14380_v12 = vpack.i.b16 %v2186_v4, %v2185_v62  ;;  %18938 = vst [vmem:[#allocation24_spill] sm:$0xff] %v14382_v14  ;;  %18939 = vst [vmem:[#allocation25_spill] sm:$0xff] %v14384_v15  ;;  %v665_v51 = vcombine.high %v14270_v11, %v14304_v63 }
 0x1d6   :  { %446 = vrot.lane.b32.xlu1 %v14065_v37, %s13965_s10  ;;  %v936_v59 = vcombine.low %v14288_v47, %v14318_v18  ;;  %v680_v61 = vcombine.low %v14312_v10, %v14340_v33  ;;  %v672_v30 = vrot.slane %v664_v21, %v14201_v60  ;;  %v920_v11 = vcombine.low %v14276_v17, %v14306_v5 }
 0x1d7   :  { %v501_v2 = vpop.permute.xlu0 %500  ;;  %18934 = vst [vmem:[#allocation20_spill] sm:$0xff] %v14360_v52  ;;  %18937 = vst [vmem:[#allocation23_spill] sm:$0xff] %v14380_v12  ;;  %v14430_v0 = vrot.slane %v2456_v24, %v14201_v60  ;;  %v679_v55 = vrot.slane %v665_v51, %v14201_v60  ;;  %v921_v62 = vcombine.high %v14276_v17, %v14306_v5 }
 0x1d8   :  { %v14364_v54 = vpop.permute.xlu1 %490  ;;  %v696_v26 = vcombine.low %v14324_v23, %v501_v2  ;;  %v697_v27 = vcombine.high %v14324_v23, %v501_v2  ;;  %v681_v23 = vcombine.high %v14312_v10, %v14340_v33  ;;  %v656_v2 = vrot.slane %v648_v25, %v14201_v60 }
 0x1d9   :  { %2280 = vrot.lane.b32.xlu0 %v14061_v36, %s13957_s2  ;;  %v663_v33 = vrot.slane %v649_v48, %v14201_v60  ;;  %v937_v4 = vcombine.high %v14288_v47, %v14318_v18  ;;  %v944_v21 = vrot.slane %v936_v59, %v14201_v60  ;;  %v688_v24 = vrot.slane %v680_v61, %v14201_v60 }
 0x1da   :  { %458 = vrot.lane.b32.xlu1 %v14065_v37, %s13966_s11  ;;  %v704_v6 = vrot.slane %v696_v26, %v14201_v60  ;;  %v711_v10 = vrot.slane %v697_v27, %v14201_v60  ;;  %v695_v25 = vrot.slane %v681_v23, %v14201_v60  ;;  %v712_v48 = vcombine.low %v656_v2, %v672_v30 }
 0x1db   :  { %v14374_v7 = vpop.permute.xlu0 %2276  ;;  %v713_v51 = vcombine.high %v656_v2, %v672_v30  ;;  %v928_v17 = vrot.slane %v920_v11, %v14201_v60  ;;  %v952_v61 = vcombine.low %v14330_v29, %v14364_v54  ;;  %v728_v23 = vcombine.low %v663_v33, %v679_v55 }
 0x1dc   :  { %v14376_v8 = vpop.permute.xlu1 %502  ;;  %v744_v18 = vcombine.low %v688_v24, %v704_v6  ;;  %v745_v59 = vcombine.high %v688_v24, %v704_v6  ;;  %v760_v49 = vcombine.low %v695_v25, %v711_v10  ;;  %v729_v19 = vcombine.high %v663_v33, %v679_v55 }
 0x1dd   :  { %2292 = vrot.lane.b32.xlu0 %v14061_v36, %s13958_s29  ;;  %v968_v26 = vcombine.low %v14347_v50, %v14376_v8  ;;  %v969_v47 = vcombine.high %v14347_v50, %v14376_v8  ;;  %v761_v16 = vcombine.high %v695_v25, %v711_v10  ;;  %v953_v30 = vcombine.high %v14330_v29, %v14364_v54 }
 0x1de   :  { %470 = vrot.lane.b32.xlu1 %v14065_v37, %s13967_s12  ;;  %v935_v50 = vrot.slane %v921_v62, %v14201_v60  ;;  %v951_v8 = vrot.slane %v937_v4, %v14201_v60  ;;  %v984_v11 = vcombine.low %v928_v17, %v944_v21  ;;  %v720_v24 = vrot.slane %v712_v48, %v14221_v13 }
 0x1df   :  { %v14394_v20 = vpop.permute.xlu0 %2300  ;;  %v976_v2 = vrot.slane %v968_v26, %v14201_v60  ;;  %v727_v33 = vrot.slane %v713_v51, %v14221_v13  ;;  %v985_v10 = vcombine.high %v928_v17, %v944_v21  ;;  %v983_v55 = vrot.slane %v969_v47, %v14201_v60 }
 0x1e0   :  { %v14398_v22 = vpop.permute.xlu1 %2290  ;;  %v752_v54 = vrot.slane %v744_v18, %v14221_v13  ;;  %v759_v62 = vrot.slane %v745_v59, %v14221_v13  ;;  %v768_v4 = vrot.slane %v760_v49, %v14221_v13  ;;  %v960_v25 = vrot.slane %v952_v61, %v14201_v60 }
 0x1e1   :  { %2304 = vrot.lane.b32.xlu0 %v14061_v36, %s13959_s30  ;;  %v736_v26 = vrot.slane %v728_v23, %v14221_v13  ;;  %v743_v48 = vrot.slane %v729_v19, %v14221_v13  ;;  %v775_v21 = vrot.slane %v761_v16, %v14221_v13  ;;  %v967_v51 = vrot.slane %v953_v30, %v14201_v60 }
 0x1e2   :  { %482 = vrot.lane.b32.xlu1 %v14065_v37, %s13968_s14  ;;  %v14488_v17 = vrot.slane %v984_v11, %v14221_v13  ;;  %v1000_v49 = vcombine.low %v935_v50, %v951_v8  ;;  %v1001_v47 = vcombine.high %v935_v50, %v951_v8  ;;  %v1016_v18 = vcombine.low %v960_v25, %v976_v2 }
 0x1e3   :  { %v14420_v45 = vpop.permute.xlu0 %2312  ;;  %v14491_v61 = vrot.slane %v985_v10, %v14221_v13  ;;  %v1017_v23 = vcombine.high %v960_v25, %v976_v2  ;;  %v1032_v58 = vcombine.low %v967_v51, %v983_v55  ;;  %v1033_v19 = vcombine.high %v967_v51, %v983_v55 }
 0x1e4   :  { %v14427_v63 = vpop.permute.xlu1 %2302  ;;  %v776_v16 = vcombine.low %v720_v24, %v752_v54  ;;  %v777_v30 = vcombine.high %v720_v24, %v752_v54  ;;  %v778_v1 = vcombine.low %v727_v33, %v759_v62  ;;  %v780_v57 = vcombine.low %v736_v26, %v768_v4 }
 0x1e5   :  { %2316 = vrot.lane.b32.xlu0 %v14061_v36, %s13960_s5  ;;  %v781_v11 = vcombine.high %v736_v26, %v768_v4  ;;  %v782_v53 = vcombine.low %v743_v48, %v775_v21  ;;  %v2191_v50 = vshrl.u32 %v14362_v3, 16  ;;  %v2192_v8 = vshrl.u32 %v14378_v9, 16 }
 0x1e6   :  { %494 = vrot.lane.b32.xlu1 %v14065_v37, %s13969_s15  ;;  %v1008_v2 = vrot.slane %v1000_v49, %v14221_v13  ;;  %v779_v10 = vcombine.high %v727_v33, %v759_v62  ;;  %v783_v55 = vcombine.high %v743_v48, %v775_v21  ;;  %v1024_v24 = vrot.slane %v1016_v18, %v14221_v13 }
 0x1e7   :  { %v14450_v27 = vpop.permute.xlu0 %2324  ;;  %v1031_v25 = vrot.slane %v1017_v23, %v14221_v13  ;;  %v1040_v4 = vrot.slane %v1032_v58, %v14221_v13  ;;  %v1047_v26 = vrot.slane %v1033_v19, %v14221_v13  ;;  %v14510_v39 = vpack.i.b16 %v2192_v8, %v2191_v50 }
 0x1e8   :  { %v14455_v5 = vpop.permute.xlu1 %2314  ;;  %v1015_v41 = vrot.slane %v1001_v47, %v14221_v13  ;;  %v2472_v33 = vcombine.low %v14374_v7, %v14394_v20  ;;  %v2473_v62 = vcombine.high %v14374_v7, %v14394_v20  ;;  %v12575_v58 = vpack.c.bf16 %v780_v57, %v776_v16 }
 0x1e9   :  { %2328 = vrot.lane.b32.xlu0 %v14061_v36, %s13961_s6  ;;  %18940 = vst [vmem:[#allocation26_spill] sm:$0xff] %v14510_v39  ;;  %v12577_v21 = vpack.c.bf16 %v782_v53, %v778_v1  ;;  %v12583_v49 = vpack.c.bf16 %v781_v11, %v777_v30  ;;  %v12585_v47 = vpack.c.bf16 %v783_v55, %v779_v10 }
 0x1ea   :  { %506 = vrot.lane.b32.xlu1 %v14065_v37, %s13952_s13  ;;  %v1048_v23 = vcombine.low %v14488_v17, %v1024_v24  ;;  %v1049_v19 = vcombine.high %v14488_v17, %v1024_v24  ;;  %v1050_v50 = vcombine.low %v14491_v61, %v1031_v25  ;;  %v1052_v57 = vcombine.low %v1008_v2, %v1040_v4 }
 0x1eb   :  { %v14468_v6 = vpop.permute.xlu0 %2336  ;;  %v1054_v53 = vcombine.low %v1015_v41, %v1047_v26  ;;  %v1053_v16 = vcombine.high %v1008_v2, %v1040_v4  ;;  %v1055_v30 = vcombine.high %v1015_v41, %v1047_v26  ;;  %v18941_v11 = vcombine.high %v14045_v32, %v14181_v44 }
 0x1ec   :  { %v14473_v29 = vpop.permute.xlu1 %2326  ;;  %v2488_v7 = vcombine.low %v14420_v45, %v14468_v6  ;;  %v2489_v1 = vcombine.high %v14420_v45, %v14468_v6  ;;  %v14543_v10 = vrot.slane %v12575_v58, %v14201_v60  ;;  %v2480_v45 = vrot.slane %v2472_v33, %v14201_v60 }
 0x1ed   :  { %2340 = vrot.lane.b32.xlu0 %v14061_v36, %s13962_s7  ;;  %v2471_v8 = vrot.slane %v18941_v11, %v14201_v60  ;;  %v14550_v41 = vrot.slane %v12577_v21, %v14201_v60  ;;  %v2487_v2 = vrot.slane %v2473_v62, %v14201_v60  ;;  %v14560_v55 = vrot.slane %v12585_v47, %v14201_v60 }
 0x1ee   :  { %2282 = vrot.lane.b32.xlu1 %v14067_v38, %s13957_s2  ;;  %v2496_v32 = vrot.slane %v2488_v7, %v14201_v60  ;;  %v12579_v24 = vpack.c.bf16 %v1052_v57, %v1048_v23  ;;  %v2503_v4 = vrot.slane %v2489_v1, %v14201_v60  ;;  %v12587_v33 = vpack.c.bf16 %v1053_v16, %v1049_v19 }
 0x1ef   :  { %v2349_v59 = vpop.permute.xlu0 %2348  ;;  %v2520_v62 = vcombine.low %v14430_v0, %v2480_v45  ;;  %v2536_v7 = vcombine.low %v2471_v8, %v2487_v2  ;;  %v2537_v1 = vcombine.high %v2471_v8, %v2487_v2 }
 0x1f0   :  { %v14493_v56 = vpop.permute.xlu1 %2338  ;;  %v2504_v48 = vcombine.low %v14450_v27, %v2349_v59  ;;  %v2505_v18 = vcombine.high %v14450_v27, %v2349_v59  ;;  %v1051_v59 = vcombine.high %v14491_v61, %v1031_v25  ;;  %v14553_v61 = vrot.slane %v12583_v49, %v14201_v60 }
 0x1f1   :  { %2352 = vrot.lane.b32.xlu0 %v14061_v36, %s13963_s8  ;;  %v12581_v25 = vpack.c.bf16 %v1054_v53, %v1050_v50  ;;  %v2521_v49 = vcombine.high %v14430_v0, %v2480_v45  ;;  %v2728_v50 = vcombine.low %v14051_v34, %v14398_v22  ;;  %v14580_v53 = vrot.slane %v12579_v24, %v14201_v60 }
 0x1f2   :  { %2294 = vrot.lane.b32.xlu1 %v14067_v38, %s13958_s29  ;;  %v2512_v17 = vrot.slane %v2504_v48, %v14201_v60  ;;  %v2519_v6 = vrot.slane %v2505_v18, %v14201_v60  ;;  %v12589_v48 = vpack.c.bf16 %v1055_v30, %v1051_v59  ;;  %v2729_v59 = vcombine.high %v14051_v34, %v14398_v22 }
 0x1f3   :  { %v14503_v54 = vpop.permute.xlu0 %2360  ;;  %v14583_v0 = vrot.slane %v12581_v25, %v14201_v60  ;;  %v14590_v30 = vrot.slane %v12587_v33, %v14201_v60  ;;  %v2528_v8 = vrot.slane %v2520_v62, %v14221_v13  ;;  %v2544_v2 = vrot.slane %v2536_v7, %v14221_v13 }
 0x1f4   :  { %v14508_v51 = vpop.permute.xlu1 %2350  ;;  %v2552_v58 = vcombine.low %v2496_v32, %v2512_v17  ;;  %v2553_v21 = vcombine.high %v2496_v32, %v2512_v17  ;;  %v2568_v18 = vcombine.low %v2503_v4, %v2519_v6  ;;  %v2569_v47 = vcombine.high %v2503_v4, %v2519_v6 }
 0x1f5   :  { %2364 = vrot.lane.b32.xlu0 %v14061_v36, %s13954_s0  ;;  %v14593_v17 = vrot.slane %v12589_v48, %v14201_v60  ;;  %v2535_v6 = vrot.slane %v2521_v49, %v14221_v13  ;;  %v2776_v32 = vcombine.low %v14473_v29, %v14508_v51  ;;  %v2197_v25 = vshrl.u32 %v14382_v14, 16 }
 0x1f6   :  { %2306 = vrot.lane.b32.xlu1 %v14067_v38, %s13959_s30  ;;  %v2560_v11 = vrot.slane %v2552_v58, %v14221_v13  ;;  %v2567_v45 = vrot.slane %v2553_v21, %v14221_v13  ;;  %v2576_v34 = vrot.slane %v2568_v18, %v14221_v13  ;;  %v2583_v22 = vrot.slane %v2569_v47, %v14221_v13 }
 0x1f7   :  { %v14527_v20 = vpop.permute.xlu0 %2372  ;;  %v2198_v4 = vshrl.u32 %v14384_v15, 16  ;;  %v1744_v33 = vcombine.low %v14580_v53, %v14583_v0  ;;  %v2551_v48 = vrot.slane %v2537_v1, %v14221_v13  ;;  %v2760_v58 = vcombine.low %v14455_v5, %v14493_v56 }
 0x1f8   :  { %v14532_v27 = vpop.permute.xlu1 %2362  ;;  %v2777_v21 = vcombine.high %v14473_v29, %v14508_v51  ;;  %v2584_v49 = vcombine.low %v2528_v8, %v2560_v11  ;;  %v2585_v18 = vcombine.high %v2528_v8, %v2560_v11  ;;  %v2586_v47 = vcombine.low %v2535_v6, %v2567_v45 }
 0x1f9   :  { %2376 = vrot.lane.b32.xlu0 %v14061_v36, %s13964_s9  ;;  %v2587_v7 = vcombine.high %v2535_v6, %v2567_v45  ;;  %v2588_v19 = vcombine.low %v2544_v2, %v2576_v34  ;;  %v2589_v23 = vcombine.high %v2544_v2, %v2576_v34  ;;  %v2590_v39 = vcombine.low %v2551_v48, %v2583_v22 }
 0x1fa   :  { %2318 = vrot.lane.b32.xlu1 %v14067_v38, %s13960_s5  ;;  %v2591_v14 = vcombine.high %v2551_v48, %v2583_v22  ;;  %v1880_v1 = vcombine.low %v14590_v30, %v14593_v17  ;;  %v2761_v29 = vcombine.high %v14455_v5, %v14493_v56  ;;  %v2784_v51 = vrot.slane %v2776_v32, %v14201_v60 }
 0x1fb   :  { %v14557_v44 = vpop.permute.xlu0 %2384  ;;  %v14632_v45 = vpack.i.b16 %v2198_v4, %v2197_v25  ;;  %v1848_v8 = vcombine.low %v14553_v61, %v14560_v55  ;;  %v14645_v56 = vrot.slane %v2728_v50, %v14201_v60  ;;  %v14648_v5 = vrot.slane %v2729_v59, %v14201_v60 }
 0x1fc   :  { %v14563_v26 = vpop.permute.xlu1 %2374  ;;  %v2768_v32 = vrot.slane %v2760_v58, %v14201_v60  ;;  %v2791_v25 = vrot.slane %v2777_v21, %v14201_v60  ;;  %v12606_v4 = vpack.c.bf16 %v2588_v19, %v2584_v49  ;;  %v12608_v48 = vpack.c.bf16 %v2590_v39, %v2586_v47 }
 0x1fd   :  { %2388 = vrot.lane.b32.xlu0 %v14061_v36, %s13965_s10  ;;  %18942 = vst [vmem:[#allocation27_spill] sm:$0xff] %v14632_v45  ;;  %v12614_v6 = vpack.c.bf16 %v2589_v23, %v2585_v18  ;;  %v12616_v34 = vpack.c.bf16 %v2591_v14, %v2587_v7  ;;  %v2775_v50 = vrot.slane %v2761_v29, %v14201_v60 }
 0x1fe   :  { %2330 = vrot.lane.b32.xlu1 %v14067_v38, %s13961_s6  ;;  %v2824_v22 = vcombine.low %v2768_v32, %v2784_v51  ;;  %v14660_v59 = vrot.slane %v1744_v33, %v14221_v13  ;;  %v14663_v58 = vrot.slane %v1880_v1, %v14221_v13  ;;  %v2825_v21 = vcombine.high %v2768_v32, %v2784_v51 }
 0x1ff   :  { %v14577_v57 = vpop.permute.xlu0 %2396  ;;  %v18943_v19 = vcombine.low %v14543_v10, %v14550_v41  ;;  %v2840_v18 = vcombine.low %v2775_v50, %v2791_v25  ;;  %v2592_v33 = vcombine.low %v14503_v54, %v14557_v44  ;;  %v2593_v47 = vcombine.high %v14503_v54, %v14557_v44 }
 0x200   :  { %v14587_v16 = vpop.permute.xlu1 %2386  ;;  %v2608_v39 = vcombine.low %v14527_v20, %v14577_v57  ;;  %v2609_v14 = vcombine.high %v14527_v20, %v14577_v57  ;;  %v1856_v7 = vrot.slane %v1848_v8, %v14221_v13  ;;  %v3584_v20 = vrot.slane %v12606_v4, %v14201_v60 }
 0x201   :  { %2400 = vrot.lane.b32.xlu0 %v14061_v36, %s13966_s11  ;;  %v1720_v49 = vrot.slane %v18943_v19, %v14221_v13  ;;  %v3600_v57 = vrot.slane %v12608_v48, %v14201_v60  ;;  %v3720_v1 = vrot.slane %v12614_v6, %v14201_v60  ;;  %v3736_v29 = vrot.slane %v12616_v34, %v14201_v60 }
 0x202   :  { %2342 = vrot.lane.b32.xlu1 %v14067_v38, %s13962_s7  ;;  %v14689_v51 = vrot.slane %v2824_v22, %v14221_v13  ;;  %v2841_v54 = vcombine.high %v2775_v50, %v2791_v25  ;;  %v14697_v8 = vcombine.low %v1856_v7, %v14663_v58  ;;  %v14700_v4 = vrot.slane %v2825_v21, %v14221_v13 }
 0x203   :  { %v14608_v24 = vpop.permute.xlu0 %2408  ;;  %v14694_v32 = vcombine.low %v1720_v49, %v14660_v59  ;;  %v2616_v48 = vrot.slane %v2608_v39, %v14201_v60  ;;  %v2623_v6 = vrot.slane %v2609_v14, %v14201_v60  ;;  %v2864_v34 = vcombine.low %v14532_v27, %v14587_v16 }
 0x204   :  { %v14619_v62 = vpop.permute.xlu1 %2398  ;;  %18945 = vst [vmem:[#allocation29_spill] sm:$0xff] %v14697_v8  ;;  %v14709_v25 = vrot.slane %v2840_v18, %v14221_v13  ;;  %v2600_v50 = vrot.slane %v2592_v33, %v14201_v60  ;;  %v2865_v19 = vcombine.high %v14532_v27, %v14587_v16  ;;  %v2607_v39 = vrot.slane %v2593_v47, %v14201_v60 }
 0x205   :  { %2412 = vrot.lane.b32.xlu0 %v14061_v36, %s13967_s12  ;;  %18944 = vst [vmem:[#allocation28_spill] sm:$0xff] %v14694_v32  ;;  %v2880_v21 = vcombine.low %v14563_v26, %v14619_v62  ;;  %v3640_v14 = vcombine.low %v3584_v20, %v3600_v57  ;;  %v3776_v15 = vcombine.low %v3720_v1, %v3736_v29 }
 0x206   :  { %2354 = vrot.lane.b32.xlu1 %v14067_v38, %s13963_s8  ;;  %v3641_v18 = vcombine.high %v3584_v20, %v3600_v57  ;;  %v14722_v12 = vrot.slane %v2841_v54, %v14221_v13  ;;  %v2881_v27 = vcombine.high %v14563_v26, %v14619_v62  ;;  %v3777_v33 = vcombine.high %v3720_v1, %v3736_v29 }
 0x207   :  { %v14630_v11 = vpop.permute.xlu0 %2420  ;;  %v2657_v3 = vcombine.high %v2600_v50, %v2616_v48  ;;  %v2672_v47 = vcombine.low %v2607_v39, %v2623_v6  ;;  %v14729_v9 = vrot.slane %v2864_v34, %v14201_v60  ;;  %v14734_v20 = vrot.slane %v2865_v19, %v14201_v60 }
 0x208   :  { %v14642_v2 = vpop.permute.xlu1 %2410  ;;  %v2888_v57 = vrot.slane %v2880_v21, %v14201_v60  ;;  %v2673_v1 = vcombine.high %v2607_v39, %v2623_v6  ;;  %v14744_v29 = vrot.slane %v3640_v14, %v14221_v13  ;;  %v14747_v54 = vrot.slane %v3776_v15, %v14221_v13 }
 0x209   :  { %2424 = vrot.lane.b32.xlu0 %v14061_v36, %s13968_s14  ;;  %v2895_v34 = vrot.slane %v2881_v27, %v14201_v60  ;;  %v14758_v6 = vrot.slane %v3777_v33, %v14221_v13  ;;  %v14764_v15 = vrot.slane %v2657_v3, %v14221_v13  ;;  %v14767_v39 = vrot.slane %v2672_v47, %v14221_v13 }
 0x20a   :  { %2366 = vrot.lane.b32.xlu1 %v14067_v38, %s13954_s0  ;;  %v2928_v27 = vcombine.low %v14729_v9, %v2888_v57  ;;  %v2204_v3 = vshrl.u32 %v14697_v8, 16 }
 0x20b   :  { %v14657_v45 = vpop.permute.xlu0 %2432 }
 0x20c   :  { %v14669_v23 = vpop.permute.xlu1 %2422 }
 0x20d   :  { %2436 = vrot.lane.b32.xlu0 %v14061_v36, %s13969_s15 }
 0x20e   :  { %2378 = vrot.lane.b32.xlu1 %v14067_v38, %s13964_s9 }
 0x20f   :  { %v14691_v44 = vpop.permute.xlu0 %2444 }
 0x210   :  { %v14706_v22 = vpop.permute.xlu1 %2434 }
 0x211   :  { %2448 = vrot.lane.b32.xlu0 %v14061_v36, %s13952_s13  ;;  %v2656_v36 = vcombine.low %v2600_v50, %v2616_v48  ;;  %v14750_v48 = vrot.slane %v3641_v18, %v14221_v13  ;;  %v14772_v18 = vcombine.high %v1720_v49, %v14660_v59  ;;  %v14789_v49 = vrot.slane %v2673_v1, %v14221_v13 }
 0x212   :  { %2390 = vrot.lane.b32.xlu1 %v14067_v38, %s13965_s10 }
 0x213   :  { %v2279_v16 = vpop.permute.xlu0 %2278  ;;  %v14761_v21 = vrot.slane %v2656_v36, %v14221_v13  ;;  %18947 = vst [vmem:[#allocation31_spill] sm:$0xff] %v14772_v18  ;;  %v2203_v36 = vshrl.u32 %v14694_v32, 16 }
 0x214   :  { %v14731_v52 = vpop.permute.xlu1 %2446  ;;  %v2744_v26 = vcombine.low %v2279_v16, %v14427_v63  ;;  %v2745_v62 = vcombine.high %v2279_v16, %v14427_v63  ;;  %v14778_v16 = vcombine.high %v1856_v7, %v14663_v58  ;;  %v2929_v58 = vcombine.high %v14729_v9, %v2888_v57 }
 0x215   :  { %492 = vrot.lane.b32.xlu0 %v14057_v35, %s13969_s15  ;;  %v2944_v7 = vcombine.low %v14734_v20, %v2895_v34  ;;  %v2945_v9 = vcombine.high %v14734_v20, %v2895_v34  ;;  %v2640_v20 = vcombine.low %v14630_v11, %v14691_v44  ;;  %v18952_v34 = vcombine.high %v14553_v61, %v14560_v55 }
 0x216   :  { %2402 = vrot.lane.b32.xlu1 %v14067_v38, %s13966_s11  ;;  %v2752_v63 = vrot.slane %v2744_v26, %v14201_v60  ;;  %v2759_v50 = vrot.slane %v2745_v62, %v14201_v60  ;;  %18948 = vst [vmem:[#allocation32_spill] sm:$0xff] %v14778_v16  ;;  %v14842_v55 = vrot.slane %v2929_v58, %v14221_v13 }
 0x217   :  { %v14755_v19 = vpop.permute.xlu0 %336  ;;  %v2641_v58 = vcombine.high %v14630_v11, %v14691_v44 }
 0x218   :  { %v14769_v14 = vpop.permute.xlu1 %4220  ;;  %v2792_v33 = vcombine.low %v14645_v56, %v2752_v63  ;;  %v2793_v47 = vcombine.high %v14645_v56, %v2752_v63  ;;  %v2808_v26 = vcombine.low %v14648_v5, %v2759_v50  ;;  %v2809_v59 = vcombine.high %v14648_v5, %v2759_v50 }
 0x219   :  { %18946 = vst [vmem:[#allocation30_spill] sm:$0xff] %v14769_v14  ;;  %504 = vrot.lane.b32.xlu0 %v14057_v35, %s13952_s13  ;;  %v18949_v56 = vcombine.high %v14543_v10, %v14550_v41  ;;  %v14810_v10 = vpack.i.b16 %v2204_v3, %v2203_v36  ;;  %v18951_v41 = vcombine.high %v14580_v53, %v14583_v0 }
 0x21a   :  { %2414 = vrot.lane.b32.xlu1 %v14067_v38, %s13967_s12  ;;  %v2800_v37 = vrot.slane %v2792_v33, %v14221_v13  ;;  %v2807_v5 = vrot.slane %v2793_v47, %v14221_v13  ;;  %v2816_v50 = vrot.slane %v2808_v26, %v14221_v13  ;;  %v2823_v1 = vrot.slane %v2809_v59, %v14221_v13 }
 0x21b   :  { %v14793_v62 = vpop.permute.xlu0 %348  ;;  %v1727_v63 = vrot.slane %v18949_v56, %v14221_v13  ;;  %18950 = vst [vmem:[#allocation33_spill] sm:$0xff] %v14810_v10  ;;  %v1759_v33 = vrot.slane %v18951_v41, %v14221_v13  ;;  %v14817_v47 = vrot.slane %v2928_v27, %v14221_v13  ;;  %v2624_v26 = vcombine.low %v14608_v24, %v14657_v45 }
 0x21c   :  { %v14803_v14 = vpop.permute.xlu1 %4232  ;;  %v1863_v36 = vrot.slane %v18952_v34, %v14221_v13  ;;  %v2856_v53 = vcombine.low %v2800_v37, %v14689_v51  ;;  %v2857_v0 = vcombine.high %v2800_v37, %v14689_v51  ;;  %v2858_v27 = vcombine.low %v2807_v5, %v14700_v4 }
 0x21d   :  { %4222 = vrot.lane.b32.xlu0 %v14079_v42, %s13957_s2  ;;  %v2859_v3 = vcombine.high %v2807_v5, %v14700_v4  ;;  %v2860_v56 = vcombine.low %v2816_v50, %v14709_v25  ;;  %v2861_v41 = vcombine.high %v2816_v50, %v14709_v25  ;;  %v2862_v57 = vcombine.low %v2823_v1, %v14722_v12 }
 0x21e   :  { %2426 = vrot.lane.b32.xlu1 %v14067_v38, %s13968_s14  ;;  %v2863_v10 = vcombine.high %v2823_v1, %v14722_v12  ;;  %v14845_v37 = vrot.slane %v2944_v7, %v14221_v13  ;;  %v2625_v51 = vcombine.high %v14608_v24, %v14657_v45  ;;  %v18953_v4 = vcombine.high %v14590_v30, %v14593_v17 }
 0x21f   :  { %v14833_v59 = vpop.permute.xlu0 %360  ;;  %v14856_v12 = vrot.slane %v2945_v9, %v14221_v13  ;;  %v2209_v7 = vshrl.u32 %v14772_v18, 16  ;;  %v2210_v24 = vshrl.u32 %v14778_v16, 16  ;;  %v2632_v45 = vrot.slane %v2624_v26, %v14201_v60 }
 0x220   :  { %v14839_v61 = vpop.permute.xlu1 %4234  ;;  %v1895_v25 = vrot.slane %v18953_v4, %v14221_v13  ;;  %v2648_v5 = vrot.slane %v2640_v20, %v14201_v60  ;;  %v14868_v30 = vcombine.low %v1727_v63, %v1759_v33  ;;  %v14870_v17 = vcombine.high %v1727_v63, %v1759_v33 }
 0x221   :  { %4244 = vrot.lane.b32.xlu0 %v14073_v40, %s13959_s30  ;;  %v12610_v1 = vpack.c.bf16 %v2860_v56, %v2856_v53  ;;  %v12612_v9 = vpack.c.bf16 %v2862_v57, %v2858_v27  ;;  %v12618_v11 = vpack.c.bf16 %v2861_v41, %v2857_v0  ;;  %v12620_v44 = vpack.c.bf16 %v2863_v10, %v2859_v3 }
 0x222   :  { %2438 = vrot.lane.b32.xlu1 %v14067_v38, %s13969_s15  ;;  %v14875_v4 = vrot.slane %v2625_v51, %v14201_v60  ;;  %v2912_v26 = vcombine.low %v14669_v23, %v14731_v52  ;;  %v14881_v20 = vcombine.low %v1863_v36, %v1895_v25  ;;  %v14883_v18 = vcombine.high %v1863_v36, %v1895_v25 }
 0x223   :  { %v14866_v50 = vpop.permute.xlu0 %372  ;;  %v14886_v63 = vrot.slane %v2641_v58, %v14201_v60  ;;  %v2896_v57 = vcombine.low %v14642_v2, %v14706_v22  ;;  %v2897_v10 = vcombine.high %v14642_v2, %v14706_v22  ;;  %v14894_v33 = vpack.i.b16 %v2210_v24, %v2209_v7 }
 0x224   :  { %v14872_v34 = vpop.permute.xlu1 %338  ;;  %v2688_v53 = vcombine.low %v2632_v45, %v2648_v5  ;;  %v2689_v0 = vcombine.high %v2632_v45, %v2648_v5  ;;  %v2913_v36 = vcombine.high %v14669_v23, %v14731_v52  ;;  %v1072_v27 = vcombine.low %v14755_v19, %v14833_v59 }
 0x225   :  { %4256 = vrot.lane.b32.xlu0 %v14073_v40, %s13960_s5  ;;  %18954 = vst [vmem:[#allocation34_spill] sm:$0xff] %v14894_v33  ;;  %v14903_v41 = vrot.slane %v12610_v1, %v14201_v60  ;;  %v14906_v2 = vrot.slane %v12612_v9, %v14201_v60  ;;  %v14909_v22 = vrot.slane %v12618_v11, %v14201_v60 }
 0x226   :  { %2450 = vrot.lane.b32.xlu1 %v14067_v38, %s13952_s13  ;;  %v14912_v51 = vrot.slane %v12620_v44, %v14201_v60  ;;  %v14915_v52 = vrot.slane %v2912_v26, %v14201_v60  ;;  %v1056_v23 = vcombine.low %v14057_v35, %v14793_v62  ;;  %v1057_v25 = vcombine.high %v14057_v35, %v14793_v62 }
 0x227   :  { %v385_v3 = vpop.permute.xlu0 %384  ;;  %v1073_v58 = vcombine.high %v14755_v19, %v14833_v59  ;;  %v14926_v7 = vrot.slane %v2896_v57, %v14201_v60  ;;  %v14929_v24 = vrot.slane %v2897_v10, %v14201_v60  ;;  %v3672_v45 = vcombine.low %v14903_v41, %v14906_v2 }
 0x228   :  { %v14900_v56 = vpop.permute.xlu1 %350  ;;  %v3808_v35 = vcombine.low %v14909_v22, %v14912_v51  ;;  %v14938_v19 = vrot.slane %v2688_v53, %v14221_v13  ;;  %v1080_v5 = vrot.slane %v1072_v27, %v14201_v60  ;;  %v14946_v9 = vrot.slane %v2689_v0, %v14221_v13 }
 0x229   :  { %4268 = vrot.lane.b32.xlu0 %v14073_v40, %s13961_s6  ;;  %v14949_v11 = vrot.slane %v2913_v36, %v14201_v60  ;;  %v3680_v44 = vrot.slane %v3672_v45, %v14221_v13  ;;  %v1064_v53 = vrot.slane %v1056_v23, %v14201_v60  ;;  %v1071_v27 = vrot.slane %v1057_v25, %v14201_v60 }
 0x22a   :  { %4246 = vrot.lane.b32.xlu1 %v14079_v42, %s13959_s30  ;;  %v3816_v26 = vrot.slane %v3808_v35, %v14221_v13  ;;  %v1087_v59 = vrot.slane %v1073_v58, %v14201_v60 }
 0x22b   :  { %v397_v1 = vpop.permute.xlu0 %396  ;;  %v14963_v0 = vcombine.low %v14744_v29, %v3680_v44  ;;  %v14969_v45 = vcombine.high %v14744_v29, %v3680_v44  ;;  %v1120_v23 = vcombine.low %v1064_v53, %v1080_v5  ;;  %v1121_v25 = vcombine.high %v1064_v53, %v1080_v5 }
 0x22c   :  { %v14953_v57 = vpop.permute.xlu1 %362  ;;  %v14966_v36 = vcombine.low %v14747_v54, %v3816_v26  ;;  %v14972_v35 = vcombine.high %v14747_v54, %v3816_v26  ;;  %v1088_v58 = vcombine.low %v14866_v50, %v397_v1  ;;  %v1089_v10 = vcombine.high %v14866_v50, %v397_v1 }
 0x22d   :  { %4280 = vrot.lane.b32.xlu0 %v14073_v40, %s13962_s7  ;;  %v1136_v26 = vcombine.low %v1071_v27, %v1087_v59  ;;  %v1137_v16 = vcombine.high %v1071_v27, %v1087_v59 }
 0x22e   :  { %4258 = vrot.lane.b32.xlu1 %v14079_v42, %s13960_s5  ;;  %v4122_v38 = vpack.i.b16 %v14966_v36, %v14963_v0  ;;  %v4128_v29 = vpack.i.b16 %v14972_v35, %v14969_v45  ;;  %v1096_v32 = vrot.slane %v1088_v58, %v14201_v60  ;;  %v1103_v5 = vrot.slane %v1089_v10, %v14201_v60 }
 0x22f   :  { %v409_v62 = vpop.permute.xlu0 %408  ;;  %v1128_v10 = vrot.slane %v1120_v23, %v14221_v13 }
 0x230   :  { %v1104_v44 = vcombine.low %v385_v3, %v409_v62  ;;  %v1105_v33 = vcombine.high %v385_v3, %v409_v62  ;;  %v14982_v54 = vpop.permute.xlu1 %374  ;;  %v6197_v50 = vsel %vm6192_vm1, %v4122_v38, 0  ;;  %v6291_v1 = vsel %vm6192_vm1, %v4128_v29, 0 }
 0x231   :  { %18955 = vst [vmem:[#allocation35_spill] sm:$0xff] %v14982_v54  ;;  %4292 = vrot.lane.b32.xlu0 %v14073_v40, %s13963_s8  ;;  %12976 = vmatpush3.bf16.xpose.msra.mxu0 %v6197_v50  ;;  %v18957_v29 = vmov 0.0   ;;  %v1135_v3 = vrot.slane %v1121_v25, %v14221_v13  ;;  %v1144_v62 = vrot.slane %v1136_v26, %v14221_v13  ;;  %v4124_v26 = vshrl.u32 %v14966_v36, 16 }
 0x232   :  { %v1112_v53 = vrot.slane %v1104_v44, %v14201_v60  ;;  %v1119_v8 = vrot.slane %v1105_v33, %v14201_v60  ;;  %4270 = vrot.lane.b32.xlu1 %v14079_v42, %s13961_s6  ;;  %12988 = vmatpush3.bf16.xpose.msra.mxu1 %v6291_v1  ;;  %v1151_v54 = vrot.slane %v1137_v16, %v14221_v13  ;;  %v4123_v1 = vshrl.u32 %v14963_v0, 16 }
 0x233   :  { %v15000_v38 = vpop.permute.xlu0 %420  ;;  %12981 = vmatprep.subr.bf16.mxu0 %v18957_v29  ;;  %12999 = vmatprep.subr.bf16.mxu1 %v18957_v29  ;;  %v3809_v16 = vcombine.high %v14909_v22, %v14912_v51 }
 0x234   :  { %18956 = vst [vmem:[#allocation36_spill] sm:$0xff] %v15000_v38  ;;  %v1152_v27 = vcombine.low %v1096_v32, %v1112_v53  ;;  %v1153_v33 = vcombine.high %v1096_v32, %v1112_v53  ;;  %v1168_v58 = vcombine.low %v1103_v5, %v1119_v8  ;;  %v15004_v44 = vpop.permute.xlu1 %386  ;;  %v1169_v59 = vcombine.high %v1103_v5, %v1119_v8 }
 0x235   :  { %18958 = vst [vmem:[#allocation37_spill] sm:$0xff] %v15004_v44  ;;  %4306 = vrot.lane.b32.xlu0 %v14079_v42, %s13954_s0  ;;  %v3673_v8 = vcombine.high %v14903_v41, %v14906_v2  ;;  %v18959_v41 = vpack.i.b16 %v14338_v31, %v14336_v28  ;;  %v18960_v2 = vpack.i.b16 %v14344_v46, %v14342_v43 }
 0x236   :  { %v1160_v50 = vrot.slane %v1152_v27, %v14221_v13  ;;  %v1167_v23 = vrot.slane %v1153_v33, %v14221_v13  ;;  %v1176_v32 = vrot.slane %v1168_v58, %v14221_v13  ;;  %v1183_v25 = vrot.slane %v1169_v59, %v14221_v13  ;;  %4282 = vrot.lane.b32.xlu1 %v14079_v42, %s13962_s7 }
 0x237   :  { %v15024_v5 = vpop.permute.xlu0 %432  ;;  %v4125_v22 = vpack.i.b16 %v4124_v26, %v4123_v1  ;;  %v3687_v51 = vrot.slane %v3673_v8, %v14221_v13  ;;  %v18963_v8 = vcombine.low %v14875_v4, %v14886_v63 }
 0x238   :  { %v1184_v53 = vcombine.low %v1128_v10, %v1160_v50  ;;  %v1185_v0 = vcombine.high %v1128_v10, %v1160_v50  ;;  %v1186_v27 = vcombine.low %v1135_v3, %v1167_v23  ;;  %v1187_v33 = vcombine.high %v1135_v3, %v1167_v23  ;;  %v15026_v58 = vpop.permute.xlu1 %398  ;;  %12978 = vmatmul.mubr.msk.bf16.vlgmr.msra.gmra.mrb[8].mxu0 %vm6192_vm1, %v18959_v41 }
 0x239   :  { %v1188_v59 = vcombine.low %v1144_v62, %v1176_v32  ;;  %v1189_v38 = vcombine.high %v1144_v62, %v1176_v32  ;;  %v1190_v36 = vcombine.low %v1151_v54, %v1183_v25  ;;  %v1191_v44 = vcombine.high %v1151_v54, %v1183_v25  ;;  %12990 = vmatmul.mubr.msk.bf16.vlgmr.msra.gmra.mrb[4].mxu1 %vm6192_vm1, %v18960_v2 }
 0x23a   :  { %v3823_v3 = vrot.slane %v3809_v16, %v14221_v13  ;;  %v2215_v10 = vshrl.u32 %v14868_v30, 16  ;;  %12983 = vmatprep.mubr.msk.bf16.mxu0 %vm13973_vm0, %v18957_v29  ;;  %v6244_v31 = vsel %vm6192_vm1, %v4125_v22, 0  ;;  %v15045_v43 = vcombine.low %v14750_v48, %v3687_v51  ;;  %13001 = vmatprep.mubr.msk.bf16.mxu1 %vm13973_vm0, %v18957_v29 }
 0x23b   :  { %v12590_v62 = vpack.c.bf16 %v1188_v59, %v1184_v53  ;;  %v12592_v50 = vpack.c.bf16 %v1190_v36, %v1186_v27  ;;  %v12598_v54 = vpack.c.bf16 %v1189_v38, %v1185_v0  ;;  %v12600_v23 = vpack.c.bf16 %v1191_v44, %v1187_v33  ;;  %v15041_v28 = vpop.permute.xlu0 %444  ;;  %4328 = vrot.lane.b32.xlu0 %v14073_v40, %s13965_s10 }
 0x23c   :  { %v15048_v46 = vcombine.low %v14758_v6, %v3823_v3  ;;  %v4129_v38 = vshrl.u32 %v14969_v45, 16  ;;  %v15055_v44 = vpop.permute.xlu1 %410  ;;  %12982 = vmatpush3.bf16.xpose.msra.mxu0 %v6244_v31  ;;  %v15073_v45 = vrot.slane %v18963_v8, %v14221_v13  ;;  %v18964_v16 = vcombine.high %v14875_v4, %v14886_v63  ;;  %4294 = vrot.lane.b32.xlu1 %v14079_v42, %s13963_s8 }
 0x23d   :  { %v15058_v32 = vrot.slane %v12590_v62, %v14201_v60  ;;  %v15061_v1 = vrot.slane %v12592_v50, %v14201_v60  ;;  %v15064_v25 = vrot.slane %v12598_v54, %v14201_v60  ;;  %v15067_v26 = vrot.slane %v12600_v23, %v14201_v60  ;;  %12993 = vmatprep.subr.bf16.mxu0 %v18957_v29 }
 0x23e   :  { %v15079_v53 = vrot.slane %v18964_v16, %v14221_v13  ;;  %v4134_v0 = vpack.i.b16 %v15048_v46, %v15045_v43  ;;  %v4130_v27 = vshrl.u32 %v14972_v35, 16  ;;  %v18965_v41 = vcombine.low %v14926_v7, %v14915_v52 }
 0x23f   :  { %18961 = vst [vmem:[#allocation38_spill] sm:$0xff] %v15064_v25  ;;  %18962 = vst [vmem:[#allocation39_spill] sm:$0xff] %v15067_v26  ;;  %v15095_v36 = vpop.permute.xlu0 %456  ;;  %v15105_v62 = vcombine.high %v14750_v48, %v3687_v51  ;;  %4340 = vrot.lane.b32.xlu0 %v14073_v40, %s13966_s11  ;;  %v18966_v54 = vcombine.high %v14926_v7, %v14915_v52  ;;  %v18967_v31 = vcombine.low %v14929_v24, %v14949_v11  ;;  %v18985_v26 = vld [vmem:[#allocation16_spill] sm:$0xff] }
 0x240   :  { %v15101_v2 = vrot.slane %v18965_v41, %v14221_v13  ;;  %v6385_v35 = vsel %vm6192_vm1, %v4134_v0, 0  ;;  %v4131_v22 = vpack.i.b16 %v4130_v27, %v4129_v38  ;;  %v15109_v50 = vpop.permute.xlu1 %422  ;;  %v18968_v48 = vcombine.high %v14929_v24, %v14949_v11  ;;  %4304 = vrot.lane.b32.xlu1 %v14073_v40, %s13954_s0 }
 0x241   :  { %v2975_v23 = vrot.slane %v18966_v54, %v14221_v13  ;;  %v2984_v8 = vrot.slane %v18967_v31, %v14221_v13  ;;  %13000 = vmatpush3.bf16.xpose.msra.mxu1 %v6385_v35  ;;  %v15124_v38 = vcombine.high %v14758_v6, %v3823_v3  ;;  %v2720_v16 = vcombine.low %v14761_v21, %v14938_v19 }
 0x242   :  { %v2991_v51 = vrot.slane %v18968_v48, %v14221_v13  ;;  %v2724_v52 = vcombine.low %v14767_v39, %v15073_v45  ;;  %13011 = vmatprep.subr.bf16.mxu1 %v18957_v29  ;;  %v2216_v7 = vshrl.u32 %v14881_v20, 16  ;;  %v2221_v24 = vshrl.u32 %v14870_v17, 16 }
 0x243   :  { %v2721_v11 = vcombine.high %v14761_v21, %v14938_v19  ;;  %v2722_v6 = vcombine.low %v14764_v15, %v14946_v9  ;;  %v2723_v3 = vcombine.high %v14764_v15, %v14946_v9  ;;  %v4140_v0 = vpack.i.b16 %v15124_v38, %v15105_v62  ;;  %v15143_v27 = vpop.permute.xlu0 %468  ;;  %v18969_v19 = vld [vmem:[#allocation20_spill] sm:$0xff]  ;;  %4352 = vrot.lane.b32.xlu0 %v14073_v40, %s13967_s12 }
 0x244   :  { %v2725_v41 = vcombine.high %v14767_v39, %v15073_v45  ;;  %v2726_v35 = vcombine.low %v14789_v49, %v15079_v53  ;;  %v2992_v21 = vcombine.low %v14817_v47, %v15101_v2  ;;  %12984 = vmatmul.mubr.msk.bf16.vlgmr.msra.gmra.mrb[12].mxu0 %vm6192_vm1, %v18969_v19  ;;  %v6338_v54 = vsel %vm6192_vm1, %v4131_v22, 0  ;;  %v15156_v15 = vpop.permute.xlu1 %434  ;;  %4316 = vrot.lane.b32.xlu1 %v14073_v40, %s13964_s9 }
 0x245   :  { %v2994_v9 = vcombine.low %v14842_v55, %v2975_v23  ;;  %v2996_v39 = vcombine.low %v14845_v37, %v2984_v8  ;;  %v2998_v45 = vcombine.low %v14856_v12, %v2991_v51  ;;  %12994 = vmatpush3.bf16.xpose.msra.mxu0 %v6338_v54  ;;  %12995 = vmatprep.mubr.msk.bf16.mxu0 %vm13973_vm0, %v18957_v29  ;;  %v2222_v31 = vshrl.u32 %v14883_v18, 16 }
 0x246   :  { %v2727_v22 = vcombine.high %v14789_v49, %v15079_v53  ;;  %v12607_v48 = vpack.c.bf16 %v2724_v52, %v2720_v16  ;;  %v2993_v19 = vcombine.high %v14817_v47, %v15101_v2  ;;  %v2995_v63 = vcombine.high %v14842_v55, %v2975_v23  ;;  %13005 = vmatprep.subr.bf16.mxu0 %v18957_v29  ;;  %v18970_v53 = vld [vmem:[#allocation22_spill] sm:$0xff]  ;;  %v18971_v55 = vld [vmem:[#allocation21_spill] sm:$0xff] }
 0x247   :  { %v2997_v59 = vcombine.high %v14845_v37, %v2984_v8  ;;  %v2999_v54 = vcombine.high %v14856_v12, %v2991_v51  ;;  %v4135_v4 = vshrl.u32 %v15045_v43, 16  ;;  %v4136_v33 = vshrl.u32 %v15048_v46, 16  ;;  %v15176_v49 = vpop.permute.xlu0 %480  ;;  %4364 = vrot.lane.b32.xlu0 %v14073_v40, %s13968_s14  ;;  %v18982_v23 = vld [vmem:[#allocation26_spill] sm:$0xff] }
 0x248   :  { %v4400_v47 = vcombine.low %v14073_v40, %v14803_v14  ;;  %v18972_v2 = vpack.i.b16 %v18970_v53, %v18971_v55  ;;  %v6479_v37 = vsel %vm6192_vm1, %v4140_v0, 0  ;;  %v15185_v12 = vpop.permute.xlu1 %446  ;;  %v12609_v46 = vpack.c.bf16 %v2726_v35, %v2722_v6  ;;  %4318 = vrot.lane.b32.xlu1 %v14079_v42, %s13964_s9 }
 0x249   :  { %v12611_v8 = vpack.c.bf16 %v2996_v39, %v2992_v21  ;;  %v12613_v51 = vpack.c.bf16 %v2998_v45, %v2994_v9  ;;  %v15193_v16 = vpack.i.b16 %v2216_v7, %v2215_v10  ;;  %v12615_v52 = vpack.c.bf16 %v2725_v41, %v2721_v11 }
 0x24a   :  { %13002 = vmatmul.mubr.msk.bf16.vlgmr.msra.gmra.mrb[8].mxu1 %vm6192_vm1, %v18972_v2  ;;  %v12617_v53 = vpack.c.bf16 %v2727_v22, %v2723_v3  ;;  %v4401_v0 = vcombine.high %v14073_v40, %v14803_v14  ;;  %v15199_v55 = vpack.i.b16 %v2222_v31, %v2221_v24  ;;  %v12619_v2 = vpack.c.bf16 %v2997_v59, %v2993_v19  ;;  %v18974_v14 = vld [vmem:[#allocation13_spill] sm:$0xff] }
 0x24b   :  { %13012 = vmatpush3.bf16.xpose.msra.mxu1 %v6479_v37  ;;  %13013 = vmatprep.mubr.msk.bf16.mxu1 %vm13973_vm0, %v18957_v29  ;;  %v12621_v43 = vpack.c.bf16 %v2999_v54, %v2995_v63  ;;  %v4137_v6 = vpack.i.b16 %v4136_v33, %v4135_v4  ;;  %v15203_v35 = vrot.slane %v12607_v48, %v14201_v60  ;;  %v15205_v10 = vpop.permute.xlu0 %2280  ;;  %v18975_v63 = vld [vmem:[#allocation23_spill] sm:$0xff] }
 0x24c   :  { %13023 = vmatprep.subr.bf16.mxu1 %v18957_v29  ;;  %v15208_v7 = vrot.slane %v4400_v47, %v14201_v60  ;;  %v1328_v11 = vcombine.low %v18974_v14, %v14900_v56  ;;  %v1329_v24 = vcombine.high %v18974_v14, %v14900_v56  ;;  %v1344_v59 = vcombine.low %v14872_v34, %v14953_v57  ;;  %v15218_v33 = vpop.permute.xlu1 %458  ;;  %v18977_v47 = vld [vmem:[#allocation37_spill] sm:$0xff] }
 0x24d   :  { %12996 = vmatmul.mubr.msk.bf16.vlgmr.msra.gmra.mrb[16].mxu0 %vm6192_vm1, %v18975_v63  ;;  %v6432_v4 = vsel %vm6192_vm1, %v4137_v6, 0  ;;  %v15222_v3 = vrot.slane %v12609_v46, %v14201_v60  ;;  %v15225_v41 = vrot.slane %v12611_v8, %v14201_v60  ;;  %v15228_v21 = vrot.slane %v12613_v51, %v14201_v60  ;;  %v18978_v46 = vld [vmem:[#allocation25_spill] sm:$0xff]  ;;  %v18979_v8 = vld [vmem:[#allocation24_spill] sm:$0xff]  ;;  %4376 = vrot.lane.b32.xlu0 %v14073_v40, %s13969_s15 }
 0x24e   :  { %18973 = vst [vmem:[#allocation20_spill] sm:$0xff] %v15208_v7  ;;  %v15235_v56 = vrot.slane %v4401_v0, %v14201_v60  ;;  %v4672_v9 = vcombine.low %v14079_v42, %v14839_v61  ;;  %v4673_v39 = vcombine.high %v14079_v42, %v14839_v61  ;;  %v1345_v45 = vcombine.high %v14872_v34, %v14953_v57 }
 0x24f   :  { %13006 = vmatpush3.bf16.xpose.msra.mxu0 %v6432_v4  ;;  %v3656_v31 = vcombine.low %v15203_v35, %v15222_v3  ;;  %v3688_v22 = vcombine.low %v15225_v41, %v15228_v21  ;;  %v15248_v48 = vrot.slane %v12615_v52, %v14201_v60  ;;  %v15251_v19 = vrot.slane %v12617_v53, %v14201_v60  ;;  %v15255_v61 = vpop.permute.xlu0 %2292 }
 0x250   :  { %18976 = vst [vmem:[#allocation22_spill] sm:$0xff] %v15235_v56  ;;  %13007 = vmatprep.mubr.msk.bf16.mxu0 %vm13973_vm0, %v18957_v29  ;;  %v1336_v34 = vrot.slane %v1328_v11, %v14201_v60  ;;  %v15259_v57 = vrot.slane %v1329_v24, %v14201_v60  ;;  %v1352_v54 = vrot.slane %v1344_v59, %v14201_v60  ;;  %v15268_v52 = vpop.permute.xlu1 %470 }
 0x251   :  { %v1376_v37 = vcombine.low %v18977_v47, %v15055_v44  ;;  %v18980_v51 = vpack.i.b16 %v18978_v46, %v18979_v8  ;;  %v1377_v53 = vcombine.high %v18977_v47, %v15055_v44  ;;  %v3696_v0 = vrot.slane %v3688_v22, %v14221_v13  ;;  %13017 = vmatprep.subr.bf16.mxu0 %v18957_v29 }
 0x252   :  { %v15274_v6 = vrot.slane %v12619_v2, %v14201_v60  ;;  %v15277_v14 = vrot.slane %v12621_v43, %v14201_v60  ;;  %v15282_v11 = vrot.slane %v1345_v45, %v14201_v60  ;;  %v3664_v24 = vrot.slane %v3656_v31, %v14221_v13  ;;  %v18981_v43 = vld [vmem:[#allocation35_spill] sm:$0xff]  ;;  %4330 = vrot.lane.b32.xlu1 %v14079_v42, %s13965_s10 }
 0x253   :  { %13014 = vmatmul.mubr.msk.bf16.vlgmr.msra.gmra.mrb[12].mxu1 %vm6192_vm1, %v18980_v51  ;;  %v3792_v59 = vcombine.low %v15248_v48, %v15251_v19  ;;  %v4141_v44 = vshrl.u32 %v15105_v62, 16  ;;  %v1360_v2 = vcombine.low %v18981_v43, %v15026_v58  ;;  %v1361_v63 = vcombine.high %v18981_v43, %v15026_v58  ;;  %v15300_v31 = vpop.permute.xlu0 %2304  ;;  %4388 = vrot.lane.b32.xlu0 %v14073_v40, %s13952_s13 }
 0x254   :  { %13025 = vmatprep.mubr.msk.bf16.mxu1 %vm13973_vm0, %v18957_v29  ;;  %v3824_v4 = vcombine.low %v15274_v6, %v15277_v14  ;;  %v4142_v45 = vshrl.u32 %v15124_v38, 16  ;;  %v1392_v22 = vcombine.low %v1336_v34, %v1352_v54  ;;  %v1393_v47 = vcombine.high %v1336_v34, %v1352_v54  ;;  %v15303_v8 = vpop.permute.xlu1 %482 }
 0x255   :  { %v1384_v62 = vrot.slane %v1376_v37, %v14201_v60  ;;  %v3708_v46 = vcombine.low %v3664_v24, %v3696_v0  ;;  %v1391_v51 = vrot.slane %v1377_v53, %v14201_v60  ;;  %v3800_v58 = vrot.slane %v3792_v59, %v14221_v13 }
 0x256   :  { %v3832_v43 = vrot.slane %v3824_v4, %v14221_v13  ;;  %13008 = vmatmul.mubr.msk.bf16.vlgmr.msra.gmra.mrb[20].mxu0 %vm6192_vm1, %v18982_v23  ;;  %v4143_v56 = vpack.i.b16 %v4142_v45, %v4141_v44  ;;  %v15311_v38 = vrot.slane %v4672_v9, %v14201_v60  ;;  %v15314_v34 = vrot.slane %v4673_v39, %v14201_v60 }
 0x257   :  { %v1408_v54 = vcombine.low %v15259_v57, %v15282_v11  ;;  %13019 = vmatprep.mubr.msk.bf16.mxu0 %vm13973_vm0, %v18957_v29  ;;  %v1368_v37 = vrot.slane %v1360_v2, %v14201_v60  ;;  %v1375_v23 = vrot.slane %v1361_v63, %v14201_v60  ;;  %4342 = vrot.lane.b32.xlu1 %v14079_v42, %s13966_s11  ;;  %v15327_v39 = vpop.permute.xlu0 %2316  ;;  %v4147_v2 = vshrl.u32 %v3708_v46, 16 }
 0x258   :  { %18983 = vst [vmem:[#allocation21_spill] sm:$0xff] %v15311_v38  ;;  %18984 = vst [vmem:[#allocation13_spill] sm:$0xff] %v15314_v34  ;;  %v3844_v53 = vcombine.low %v3800_v58, %v3832_v43  ;;  %v6526_v9 = vsel %vm6192_vm1, %v4143_v56, 0  ;;  %v15330_v59 = vrot.slane %v1392_v22, %v14221_v13  ;;  %v15333_v40 = vrot.slane %v1393_v47, %v14221_v13  ;;  %v15337_v63 = vpop.permute.xlu1 %494 }
 0x259   :  { %v1409_v44 = vcombine.high %v15259_v57, %v15282_v11  ;;  %13018 = vmatpush3.bf16.xpose.msra.mxu0 %v6526_v9  ;;  %v1424_v4 = vcombine.low %v1368_v37, %v1384_v62  ;;  %v1425_v56 = vcombine.high %v1368_v37, %v1384_v62  ;;  %v1440_v45 = vcombine.low %v1375_v23, %v1391_v51  ;;  %v18986_v57 = vld [vmem:[#allocation36_spill] sm:$0xff] }
 0x25a   :  { %v4146_v34 = vpack.i.b16 %v3844_v53, %v3708_v46  ;;  %13029 = vmatprep.subr.bf16.mxu0 %v18957_v29  ;;  %v1441_v38 = vcombine.high %v1375_v23, %v1391_v51  ;;  %v3709_v7 = vcombine.high %v3664_v24, %v3696_v0  ;;  %v3845_v22 = vcombine.high %v3800_v58, %v3832_v43 }
 0x25b   :  { %4226 = vrot.lane.b32.xlu0 %v18985_v26, %s13957_s2  ;;  %v4148_v47 = vshrl.u32 %v3844_v53, 16  ;;  %v15343_v25 = vrot.slane %v1408_v54, %v14221_v13  ;;  %v1192_v11 = vcombine.low %v18986_v57, %v15041_v28  ;;  %v1193_v62 = vcombine.high %v18986_v57, %v15041_v28  ;;  %4354 = vrot.lane.b32.xlu1 %v14079_v42, %s13967_s12  ;;  %v15352_v0 = vpop.permute.xlu0 %2328 }
 0x25c   :  { %v6573_v46 = vsel %vm6192_vm1, %v4146_v34, 0  ;;  %v1208_v24 = vcombine.low %v15024_v5, %v15095_v36  ;;  %v3689_v58 = vcombine.high %v15225_v41, %v15228_v21  ;;  %v3825_v43 = vcombine.high %v15274_v6, %v15277_v14  ;;  %v15360_v54 = vpop.permute.xlu1 %506 }
 0x25d   :  { %13024 = vmatpush3.bf16.xpose.msra.mxu1 %v6573_v46  ;;  %v4149_v51 = vpack.i.b16 %v4148_v47, %v4147_v2  ;;  %v15363_v28 = vrot.slane %v1424_v4, %v14221_v13  ;;  %v1209_v34 = vcombine.high %v15024_v5, %v15095_v36  ;;  %v3657_v37 = vcombine.high %v15203_v35, %v15222_v3  ;;  %v18987_v5 = vld [vmem:[#allocation15_spill] sm:$0xff]  ;;  %v18989_v46 = vld [vmem:[#allocation29_spill] sm:$0xff] }
 0x25e   :  { %13035 = vmatprep.subr.bf16.mxu1 %v18957_v29  ;;  %v3793_v23 = vcombine.high %v15248_v48, %v15251_v19  ;;  %v15373_v41 = vrot.slane %v1425_v56, %v14221_v13  ;;  %v15376_v21 = vrot.slane %v1440_v45, %v14221_v13  ;;  %v15379_v6 = vrot.slane %v1441_v38, %v14221_v13  ;;  %v18988_v36 = vld [vmem:[#allocation27_spill] sm:$0xff] }
 0x25f   :  { %v4152_v14 = vpack.i.b16 %v3845_v22, %v3709_v7  ;;  %4248 = vrot.lane.b32.xlu0 %v18987_v5, %s13959_s30  ;;  %v6620_v35 = vsel %vm6192_vm1, %v4149_v51, 0  ;;  %v15387_v3 = vrot.slane %v3689_v58, %v14221_v13  ;;  %v15390_v48 = vrot.slane %v3825_v43, %v14221_v13  ;;  %4366 = vrot.lane.b32.xlu1 %v14079_v42, %s13968_s14  ;;  %v15394_v38 = vpop.permute.xlu0 %2340 }
 0x260   :  { %13020 = vmatmul.mubr.msk.bf16.vlgmr.msra.gmra.mrb[24].mxu0 %vm6192_vm1, %v18988_v36  ;;  %v4153_v19 = vshrl.u32 %v3709_v7, 16  ;;  %v1423_v53 = vrot.slane %v1409_v44, %v14221_v13  ;;  %v15398_v9 = vrot.slane %v1192_v11, %v14201_v60  ;;  %v15401_v2 = vrot.slane %v1208_v24, %v14201_v60  ;;  %v15405_v56 = vpop.permute.xlu1 %2282  ;;  %v18990_v24 = vld [vmem:[#allocation28_spill] sm:$0xff] }
 0x261   :  { %13030 = vmatpush3.bf16.xpose.msra.mxu0 %v6620_v35  ;;  %13031 = vmatprep.mubr.msk.bf16.mxu0 %vm13973_vm0, %v18957_v29  ;;  %v4154_v4 = vshrl.u32 %v3845_v22, 16  ;;  %v15408_v45 = vrot.slane %v1193_v62, %v14201_v60  ;;  %v15411_v7 = vrot.slane %v1209_v34, %v14201_v60  ;;  %v3671_v44 = vrot.slane %v3657_v37, %v14221_v13 }
 0x262   :  { %v3807_v47 = vrot.slane %v3793_v23, %v14221_v13  ;;  %13041 = vmatprep.subr.bf16.mxu0 %v18957_v29  ;;  %v1456_v57 = vcombine.low %v15330_v59, %v15363_v28  ;;  %v1458_v22 = vcombine.low %v15333_v40, %v15373_v41  ;;  %v1460_v11 = vcombine.low %v15343_v25, %v15376_v21 }
 0x263   :  { %v1462_v62 = vcombine.low %v1423_v53, %v15379_v6  ;;  %4260 = vrot.lane.b32.xlu0 %v18987_v5, %s13960_s5  ;;  %v18991_v51 = vpack.i.b16 %v18989_v46, %v18990_v24  ;;  %v6667_v58 = vsel %vm6192_vm1, %v4152_v14, 0  ;;  %v3710_v43 = vcombine.low %v3671_v44, %v15387_v3  ;;  %v15432_v23 = vpop.permute.xlu0 %2352  ;;  %4378 = vrot.lane.b32.xlu1 %v14079_v42, %s13969_s15 }
 0x264   :  { %v3846_v34 = vcombine.low %v3807_v47, %v15390_v48  ;;  %v4155_v37 = vpack.i.b16 %v4154_v4, %v4153_v19  ;;  %v1457_v36 = vcombine.high %v15330_v59, %v15363_v28  ;;  %v1256_v35 = vcombine.low %v15398_v9, %v15401_v2  ;;  %v15442_v14 = vpop.permute.xlu1 %2294 }
 0x265   :  { %13026 = vmatmul.mubr.msk.bf16.vlgmr.msra.gmra.mrb[16].mxu1 %vm6192_vm1, %v18991_v51  ;;  %v1257_v46 = vcombine.high %v15398_v9, %v15401_v2  ;;  %v1459_v19 = vcombine.high %v15333_v40, %v15373_v41  ;;  %v1461_v4 = vcombine.high %v15343_v25, %v15376_v21  ;;  %v1463_v59 = vcombine.high %v1423_v53, %v15379_v6  ;;  %v18992_v25 = vld [vmem:[#allocation33_spill] sm:$0xff] }
 0x266   :  { %13036 = vmatpush3.bf16.xpose.msra.mxu1 %v6667_v58  ;;  %13037 = vmatprep.mubr.msk.bf16.mxu1 %vm13973_vm0, %v18957_v29  ;;  %v12594_v28 = vpack.c.bf16 %v1460_v11, %v1456_v57  ;;  %v12596_v9 = vpack.c.bf16 %v1462_v62, %v1458_v22  ;;  %v1272_v2 = vcombine.low %v15408_v45, %v15411_v7  ;;  %v6714_v41 = vsel %vm6192_vm1, %v4155_v37, 0 }
 0x267   :  { %13047 = vmatprep.subr.bf16.mxu1 %v18957_v29  ;;  %v1480_v24 = vcombine.low %v15156_v15, %v15218_v33  ;;  %4272 = vrot.lane.b32.xlu0 %v18987_v5, %s13961_s6  ;;  %v4158_v40 = vpack.i.b16 %v3846_v34, %v3710_v43  ;;  %v4159_v21 = vshrl.u32 %v3710_v43, 16  ;;  %v4160_v6 = vshrl.u32 %v3846_v34, 16  ;;  %v15461_v53 = vpop.permute.xlu0 %2364 }
 0x268   :  { %13032 = vmatmul.mubr.msk.bf16.vlgmr.msra.gmra.mrb[28].mxu0 %vm6192_vm1, %v18992_v25  ;;  %v15464_v57 = vrot.slane %v1256_v35, %v14221_v13  ;;  %v1273_v22 = vcombine.high %v15408_v45, %v15411_v7  ;;  %v1464_v11 = vcombine.low %v15109_v50, %v15185_v12  ;;  %v15472_v62 = vpop.permute.xlu1 %2306  ;;  %v12602_v51 = vpack.c.bf16 %v1461_v4, %v1457_v36 }
 0x269   :  { %13042 = vmatpush3.bf16.xpose.msra.mxu0 %v6714_v41  ;;  %13043 = vmatprep.mubr.msk.bf16.mxu0 %vm13973_vm0, %v18957_v29  ;;  %v12604_v58 = vpack.c.bf16 %v1463_v59, %v1459_v19  ;;  %v1481_v43 = vcombine.high %v15156_v15, %v15218_v33  ;;  %v15480_v45 = vrot.slane %v12594_v28, %v14201_v60  ;;  %v18994_v15 = vld [vmem:[#allocation32_spill] sm:$0xff]  ;;  %v18995_v33 = vld [vmem:[#allocation31_spill] sm:$0xff] }
 0x26a   :  { %18993 = vst [vmem:[#allocation23_spill] sm:$0xff] %v15464_v57  ;;  %4390 = vrot.lane.b32.xlu1 %v14079_v42, %s13952_s13  ;;  %13053 = vmatprep.subr.bf16.mxu0 %v18957_v29  ;;  %v15483_v7 = vrot.slane %v12596_v9, %v14201_v60  ;;  %v1465_v34 = vcombine.high %v15109_v50, %v15185_v12  ;;  %v6761_v42 = vsel %vm6192_vm1, %v4158_v40, 0  ;;  %v18997_v12 = vld [vmem:[#allocation12_spill] sm:$0xff] }
 0x26b   :  { %v1488_v37 = vrot.slane %v1480_v24, %v14201_v60  ;;  %4284 = vrot.lane.b32.xlu0 %v18987_v5, %s13962_s7  ;;  %v18996_v36 = vpack.i.b16 %v18994_v15, %v18995_v33  ;;  %v15496_v35 = vcombine.high %v3671_v44, %v15387_v3  ;;  %v15499_v19 = vcombine.high %v3807_v47, %v15390_v48  ;;  %v15508_v9 = vpop.permute.xlu0 %2376 }
 0x26c   :  { %v4161_v4 = vpack.i.b16 %v4160_v6, %v4159_v21  ;;  %v1472_v50 = vrot.slane %v1464_v11, %v14201_v60  ;;  %v3000_v59 = vcombine.low %v18997_v12, %v15255_v61  ;;  %v3001_v28 = vcombine.high %v18997_v12, %v15255_v61  ;;  %v15510_v3 = vpop.permute.xlu1 %2318 }
 0x26d   :  { %13038 = vmatmul.mubr.msk.bf16.vlgmr.msra.gmra.mrb[20].mxu1 %vm6192_vm1, %v18996_v36  ;;  %v15513_v48 = vrot.slane %v1257_v46, %v14221_v13  ;;  %v1495_v44 = vrot.slane %v1481_v43, %v14201_v60  ;;  %v3016_v47 = vcombine.low %v15205_v10, %v15300_v31  ;;  %v3017_v24 = vcombine.high %v15205_v10, %v15300_v31  ;;  %v19001_v31 = vld [vmem:[#allocation34_spill] sm:$0xff] }
 0x26e   :  { %13048 = vmatpush3.bf16.xpose.msra.mxu1 %v6761_v42  ;;  %13049 = vmatprep.mubr.msk.bf16.mxu1 %vm13973_vm0, %v18957_v29  ;;  %v15522_v61 = vrot.slane %v1272_v2, %v14221_v13  ;;  %v15525_v40 = vrot.slane %v1273_v22, %v14221_v13  ;;  %v1528_v25 = vcombine.low %v1472_v50, %v1488_v37  ;;  %v6808_v2 = vsel %vm6192_vm1, %v4161_v4, 0 }
 0x26f   :  { %18998 = vst [vmem:[#allocation37_spill] sm:$0xff] %v15513_v48  ;;  %13059 = vmatprep.subr.bf16.mxu1 %v18957_v29  ;;  %v1529_v41 = vcombine.high %v1472_v50, %v1488_v37  ;;  %4224 = vrot.lane.b32.xlu1 %v18987_v5, %s13957_s2  ;;  %v15530_v46 = vrot.slane %v12602_v51, %v14201_v60  ;;  %v15563_v50 = vpop.permute.xlu0 %2388 }
 0x270   :  { %18999 = vst [vmem:[#allocation25_spill] sm:$0xff] %v15522_v61  ;;  %19000 = vst [vmem:[#allocation24_spill] sm:$0xff] %v15525_v40  ;;  %v1479_v21 = vrot.slane %v1465_v34, %v14201_v60  ;;  %v4164_v10 = vpack.i.b16 %v15499_v19, %v15496_v35  ;;  %13044 = vmatmul.mubr.msk.bf16.vlgmr.msra.gmra.mrb[32].mxu0 %vm6192_vm1, %v19001_v31  ;;  %v15541_v22 = vrot.slane %v12604_v58, %v14201_v60  ;;  %v15545_v43 = vpop.permute.xlu1 %2330 }
 0x271   :  { %v3008_v11 = vrot.slane %v3000_v59, %v14201_v60  ;;  %v3015_v51 = vrot.slane %v3001_v28, %v14201_v60  ;;  %13054 = vmatpush3.bf16.xpose.msra.mxu0 %v6808_v2  ;;  %v3024_v15 = vrot.slane %v3016_v47, %v14201_v60  ;;  %v3031_v33 = vrot.slane %v3017_v24, %v14201_v60 }
 0x272   :  { %v1544_v34 = vcombine.low %v1479_v21, %v1495_v44  ;;  %v1545_v37 = vcombine.high %v1479_v21, %v1495_v44  ;;  %4296 = vrot.lane.b32.xlu0 %v18987_v5, %s13963_s8  ;;  %v15552_v36 = vrot.slane %v1528_v25, %v14221_v13  ;;  %v15555_v58 = vrot.slane %v1529_v41, %v14221_v13 }
 0x273   :  { %v1496_v42 = vcombine.low %v15268_v52, %v15337_v63  ;;  %v1512_v4 = vcombine.low %v15303_v8, %v15360_v54  ;;  %4236 = vrot.lane.b32.xlu1 %v18987_v5, %s13958_s29  ;;  %v19002_v12 = vpack.i.b16 %v14881_v20, %v14868_v30  ;;  %v6855_v59 = vsel %vm6192_vm1, %v4164_v10, 0  ;;  %13055 = vmatprep.mubr.msk.bf16.mxu0 %vm13973_vm0, %v18957_v29 }
 0x274   :  { %v1513_v28 = vcombine.high %v15303_v8, %v15360_v54  ;;  %v4165_v44 = vshrl.u32 %v15496_v35, 16  ;;  %v4166_v47 = vshrl.u32 %v15499_v19, 16  ;;  %v1497_v24 = vcombine.high %v15268_v52, %v15337_v63  ;;  %v15582_v25 = vpop.permute.xlu1 %2342  ;;  %13065 = vmatprep.subr.bf16.mxu0 %v18957_v29 }
 0x275   :  { %13050 = vmatmul.mubr.msk.bf16.vlgmr.msra.gmra.mrb[24].mxu1 %vm6192_vm1, %v19002_v12  ;;  %v3048_v30 = vcombine.low %v15352_v0, %v15432_v23  ;;  %v3049_v20 = vcombine.high %v15352_v0, %v15432_v23  ;;  %v15585_v8 = vrot.slane %v1544_v34, %v14221_v13  ;;  %v3064_v54 = vcombine.low %v3008_v11, %v3024_v15 }
 0x276   :  { %13060 = vmatpush3.bf16.xpose.msra.mxu1 %v6855_v59  ;;  %13061 = vmatprep.mubr.msk.bf16.mxu1 %vm13973_vm0, %v18957_v29  ;;  %v3065_v35 = vcombine.high %v3008_v11, %v3024_v15  ;;  %v3080_v19 = vcombine.low %v3015_v51, %v3031_v33  ;;  %v3081_v52 = vcombine.high %v3015_v51, %v3031_v33  ;;  %v15609_v11 = vpop.permute.xlu0 %2400 }
 0x277   :  { %v1520_v63 = vrot.slane %v1512_v4, %v14201_v60  ;;  %v3032_v41 = vcombine.low %v15327_v39, %v15394_v38  ;;  %v3033_v0 = vcombine.high %v15327_v39, %v15394_v38  ;;  %4310 = vrot.lane.b32.xlu0 %v18985_v26, %s13954_s0  ;;  %v15597_v23 = vrot.slane %v1545_v37, %v14221_v13 }
 0x278   :  { %v1527_v21 = vrot.slane %v1513_v28, %v14201_v60  ;;  %13056 = vmatmul.mubr.msk.bf16.vlgmr.msra.gmra.mrb[36].mxu0 %vm6192_vm1, %v15193_v16  ;;  %v4167_v10 = vpack.i.b16 %v4166_v47, %v4165_v44  ;;  %v1504_v31 = vrot.slane %v1496_v42, %v14201_v60  ;;  %v1511_v2 = vrot.slane %v1497_v24, %v14201_v60  ;;  %v2355_v51 = vpop.permute.xlu1 %2354 }
 0x279   :  { %v3056_v39 = vrot.slane %v3048_v30, %v14201_v60  ;;  %v3063_v38 = vrot.slane %v3049_v20, %v14201_v60  ;;  %4238 = vrot.lane.b32.xlu1 %v18985_v26, %s13958_s29  ;;  %v15612_v34 = vrot.slane %v3064_v54, %v14221_v13  ;;  %v15615_v16 = vrot.slane %v3065_v35, %v14221_v13 }
 0x27a   :  { %v15618_v37 = vrot.slane %v3080_v19, %v14221_v13  ;;  %v6902_v15 = vsel %vm6192_vm1, %v4167_v10, 0  ;;  %13067 = vmatprep.mubr.msk.bf16.mxu0 %vm13973_vm0, %v18957_v29  ;;  %13071 = vmatprep.subr.bf16.mxu1 %v18957_v29  ;;  %v15625_v33 = vrot.slane %v3081_v52, %v14221_v13  ;;  %v1560_v42 = vcombine.low %v1504_v31, %v1520_v63  ;;  %v19004_v19 = vld [vmem:[#allocation14_spill] sm:$0xff] }
 0x27b   :  { %v3040_v4 = vrot.slane %v3032_v41, %v14201_v60  ;;  %v3047_v12 = vrot.slane %v3033_v0, %v14201_v60  ;;  %13066 = vmatpush3.bf16.xpose.msra.mxu0 %v6902_v15  ;;  %v1561_v59 = vcombine.high %v1504_v31, %v1520_v63  ;;  %v1576_v28 = vcombine.low %v1511_v2, %v1527_v21 }
 0x27c   :  { %v1577_v44 = vcombine.high %v1511_v2, %v1527_v21  ;;  %v19003_v47 = vpack.i.b16 %v14883_v18, %v14870_v17  ;;  %4332 = vrot.lane.b32.xlu0 %v18987_v5, %s13965_s10  ;;  %v15637_v35 = vpop.permute.xlu1 %2366  ;;  %v3272_v52 = vcombine.low %v19004_v19, %v15442_v14  ;;  %v3273_v18 = vcombine.high %v19004_v19, %v15442_v14  ;;  %v15652_v21 = vpop.permute.xlu0 %2412 }
 0x27d   :  { %v3096_v24 = vcombine.low %v3040_v4, %v3056_v39  ;;  %v3097_v30 = vcombine.high %v3040_v4, %v3056_v39  ;;  %v3112_v20 = vcombine.low %v3047_v12, %v3063_v38  ;;  %v3113_v54 = vcombine.high %v3047_v12, %v3063_v38  ;;  %4250 = vrot.lane.b32.xlu1 %v18985_v26, %s13959_s30 }
 0x27e   :  { %13062 = vmatmul.mubr.msk.bf16.vlgmr.msra.gmra.mrb[28].mxu1 %vm6192_vm1, %v19003_v47  ;;  %v3288_v17 = vcombine.low %v15405_v56, %v15472_v62  ;;  %v3289_v63 = vcombine.high %v15405_v56, %v15472_v62  ;;  %13077 = vmatprep.subr.bf16.mxu0 %v18957_v29  ;;  %v3304_v41 = vcombine.low %v15510_v3, %v15582_v25 }
 0x27f   :  { %v3305_v0 = vcombine.high %v15510_v3, %v15582_v25  ;;  %v3320_v10 = vcombine.low %v15545_v43, %v2355_v51  ;;  %v3321_v14 = vcombine.high %v15545_v43, %v2355_v51  ;;  %13073 = vmatprep.mubr.msk.bf16.mxu1 %vm13973_vm0, %v18957_v29  ;;  %v15659_v31 = vrot.slane %v1560_v42, %v14221_v13 }
 0x280   :  { %v15662_v56 = vrot.slane %v1561_v59, %v14221_v13  ;;  %v15665_v62 = vrot.slane %v1576_v28, %v14221_v13  ;;  %v15668_v3 = vrot.slane %v1577_v44, %v14221_v13  ;;  %4344 = vrot.lane.b32.xlu0 %v18987_v5, %s13966_s11  ;;  %v15673_v43 = vrot.slane %v3096_v24, %v14221_v13  ;;  %v15682_v38 = vpop.permute.xlu1 %2378 }
 0x281   :  { %v15676_v25 = vrot.slane %v3097_v30, %v14221_v13  ;;  %4262 = vrot.lane.b32.xlu1 %v18985_v26, %s13960_s5  ;;  %v3328_v2 = vrot.slane %v3320_v10, %v14201_v60  ;;  %v3335_v39 = vrot.slane %v3321_v14, %v14201_v60  ;;  %v3296_v51 = vrot.slane %v3288_v17, %v14201_v60 }
 0x282   :  { %v3303_v15 = vrot.slane %v3289_v63, %v14201_v60  ;;  %13068 = vmatmul.mubr.msk.bf16.vlgmr.msra.gmra.mrb[40].mxu0 %vm6192_vm1, %v15199_v55  ;;  %v3312_v42 = vrot.slane %v3304_v41, %v14201_v60  ;;  %v3319_v4 = vrot.slane %v3305_v0, %v14201_v60  ;;  %v15691_v12 = vrot.slane %v3112_v20, %v14221_v13 }
 0x283   :  { %v15694_v59 = vrot.slane %v3113_v54, %v14221_v13  ;;  %v3280_v28 = vrot.slane %v3272_v52, %v14201_v60  ;;  %v3287_v44 = vrot.slane %v3273_v18, %v14201_v60  ;;  %13079 = vmatprep.mubr.msk.bf16.mxu0 %vm13973_vm0, %v18957_v29  ;;  %v1592_v20 = vcombine.low %v15552_v36, %v15659_v31  ;;  %v15712_v18 = vpop.permute.xlu0 %2424 }
 0x284   :  { %4356 = vrot.lane.b32.xlu0 %v18987_v5, %s13967_s12  ;;  %v3368_v55 = vcombine.low %v3312_v42, %v3328_v2  ;;  %v3369_v47 = vcombine.high %v3312_v42, %v3328_v2  ;;  %v3384_v24 = vcombine.low %v3319_v4, %v3335_v39  ;;  %v3385_v30 = vcombine.high %v3319_v4, %v3335_v39  ;;  %v15714_v17 = vpop.permute.xlu1 %2390 }
 0x285   :  { %v1593_v54 = vcombine.high %v15552_v36, %v15659_v31  ;;  %v1594_v19 = vcombine.low %v15555_v58, %v15662_v56  ;;  %v1596_v52 = vcombine.low %v15585_v8, %v15665_v62  ;;  %4274 = vrot.lane.b32.xlu1 %v18985_v26, %s13961_s6  ;;  %v3336_v63 = vcombine.low %v3280_v28, %v3296_v51 }
 0x286   :  { %v3337_v41 = vcombine.high %v3280_v28, %v3296_v51  ;;  %v3352_v0 = vcombine.low %v3287_v44, %v3303_v15  ;;  %v3353_v10 = vcombine.high %v3287_v44, %v3303_v15  ;;  %v3128_v36 = vcombine.low %v15612_v34, %v15673_v43 }
 0x287   :  { %v3130_v14 = vcombine.low %v15615_v16, %v15676_v25  ;;  %v3132_v31 = vcombine.low %v15618_v37, %v15691_v12  ;;  %v3134_v2 = vcombine.low %v15625_v33, %v15694_v59  ;;  %v3376_v39 = vrot.slane %v3368_v55, %v14221_v13 }
 0x288   :  { %v3383_v42 = vrot.slane %v3369_v47, %v14221_v13  ;;  %v3392_v51 = vrot.slane %v3384_v24, %v14221_v13  ;;  %v3399_v15 = vrot.slane %v3385_v30, %v14221_v13  ;;  %4368 = vrot.lane.b32.xlu0 %v18987_v5, %s13968_s14  ;;  %v1597_v4 = vcombine.high %v15585_v8, %v15665_v62  ;;  %v15740_v47 = vpop.permute.xlu1 %2402 }
 0x289   :  { %v1598_v28 = vcombine.low %v15597_v23, %v15668_v3  ;;  %v3129_v44 = vcombine.high %v15612_v34, %v15673_v43  ;;  %v3131_v55 = vcombine.high %v15615_v16, %v15676_v25  ;;  %4286 = vrot.lane.b32.xlu1 %v18985_v26, %s13962_s7  ;;  %v3344_v24 = vrot.slane %v3336_v63, %v14221_v13  ;;  %v15750_v25 = vpop.permute.xlu0 %2436 }
 0x28a   :  { %v3351_v30 = vrot.slane %v3337_v41, %v14221_v13  ;;  %v3360_v8 = vrot.slane %v3352_v0, %v14221_v13  ;;  %v3367_v62 = vrot.slane %v3353_v10, %v14221_v13  ;;  %v3133_v6 = vcombine.high %v15618_v37, %v15691_v12 }
 0x28b   :  { %v3135_v34 = vcombine.high %v15625_v33, %v15694_v59  ;;  %v12622_v16 = vpack.c.bf16 %v3132_v31, %v3128_v36  ;;  %v12624_v43 = vpack.c.bf16 %v3134_v2, %v3130_v14  ;;  %v3400_v40 = vcombine.low %v3344_v24, %v3376_v39 }
 0x28c   :  { %v3402_v61 = vcombine.low %v3351_v30, %v3383_v42  ;;  %v3404_v48 = vcombine.low %v3360_v8, %v3392_v51  ;;  %v3406_v63 = vcombine.low %v3367_v62, %v3399_v15  ;;  %4380 = vrot.lane.b32.xlu0 %v18987_v5, %s13969_s15  ;;  %v3401_v41 = vcombine.high %v3344_v24, %v3376_v39  ;;  %v15756_v37 = vpop.permute.xlu1 %2414 }
 0x28d   :  { %v3403_v0 = vcombine.high %v3351_v30, %v3383_v42  ;;  %v3405_v10 = vcombine.high %v3360_v8, %v3392_v51  ;;  %v3407_v57 = vcombine.high %v3367_v62, %v3399_v15  ;;  %4298 = vrot.lane.b32.xlu1 %v18985_v26, %s13963_s8  ;;  %v1595_v12 = vcombine.high %v15555_v58, %v15662_v56 }
 0x28e   :  { %v1599_v59 = vcombine.high %v15597_v23, %v15668_v3  ;;  %v12595_v36 = vpack.c.bf16 %v1596_v52, %v1592_v20  ;;  %v2136_v14 = vcombine.low %v15530_v46, %v15541_v22  ;;  %v12597_v31 = vpack.c.bf16 %v1598_v28, %v1594_v19  ;;  %v2449_v23 = vpop.permute.xlu0 %2448 }
 0x28f   :  { %v12603_v2 = vpack.c.bf16 %v1597_v4, %v1593_v54  ;;  %v12630_v39 = vpack.c.bf16 %v3133_v6, %v3129_v44  ;;  %v12632_v42 = vpack.c.bf16 %v3135_v34, %v3131_v55  ;;  %v3152_v51 = vcombine.low %v15508_v9, %v15609_v11 }
 0x290   :  { %v12626_v15 = vpack.c.bf16 %v3404_v48, %v3400_v40  ;;  %v12628_v24 = vpack.c.bf16 %v3406_v63, %v3402_v61  ;;  %4392 = vrot.lane.b32.xlu0 %v18987_v5, %s13952_s13  ;;  %v12634_v58 = vpack.c.bf16 %v3405_v10, %v3401_v41  ;;  %v12636_v56 = vpack.c.bf16 %v3407_v57, %v3403_v0  ;;  %v15778_v20 = vpop.permute.xlu1 %2426 }
 0x291   :  { %4308 = vrot.lane.b32.xlu1 %v18987_v5, %s13954_s0  ;;  %v15773_v3 = vrot.slane %v12622_v16, %v14201_v60  ;;  %v15776_v6 = vrot.slane %v12624_v43, %v14201_v60  ;;  %v15783_v61 = vrot.slane %v12595_v36, %v14201_v60  ;;  %v12605_v40 = vpack.c.bf16 %v1599_v59, %v1595_v12 }
 0x292   :  { %v3136_v57 = vcombine.low %v15461_v53, %v15563_v50  ;;  %v15788_v54 = vrot.slane %v12597_v31, %v14201_v60  ;;  %v15791_v19 = vrot.slane %v12603_v2, %v14201_v60  ;;  %v3153_v52 = vcombine.high %v15508_v9, %v15609_v11 }
 0x293   :  { %19005 = vst [vmem:[#allocation35_spill] sm:$0xff] %v15783_v61  ;;  %v15796_v4 = vrot.slane %v12630_v39, %v14201_v60  ;;  %v3160_v28 = vrot.slane %v3152_v51, %v14201_v60  ;;  %v3184_v44 = vcombine.low %v15712_v18, %v2449_v23  ;;  %v15801_v55 = vrot.slane %v12626_v15, %v14201_v60 }
 0x294   :  { %19006 = vst [vmem:[#allocation26_spill] sm:$0xff] %v15788_v54  ;;  %19007 = vst [vmem:[#allocation36_spill] sm:$0xff] %v15791_v19  ;;  %v15804_v30 = vrot.slane %v12628_v24, %v14201_v60  ;;  %v3912_v8 = vcombine.low %v15773_v3, %v15776_v6  ;;  %v15811_v9 = vrot.slane %v12632_v42, %v14201_v60  ;;  %v15834_v59 = vpop.permute.xlu1 %2438 }
 0x295   :  { %4320 = vrot.lane.b32.xlu1 %v18987_v5, %s13964_s9  ;;  %v15814_v11 = vrot.slane %v12634_v58, %v14201_v60  ;;  %v15817_v62 = vrot.slane %v12636_v56, %v14201_v60  ;;  %v15820_v34 = vrot.slane %v12605_v40, %v14201_v60  ;;  %v3137_v16 = vcombine.high %v15461_v53, %v15563_v50  ;;  %v493_v56 = vpop.permute.xlu0 %492 }
 0x296   :  { %v3144_v43 = vrot.slane %v3136_v57, %v14201_v60  ;;  %v3944_v63 = vcombine.low %v15801_v55, %v15804_v30  ;;  %v3168_v41 = vcombine.low %v15652_v21, %v15750_v25  ;;  %v3185_v0 = vcombine.high %v15712_v18, %v2449_v23 }
 0x297   :  { %19008 = vst [vmem:[#allocation27_spill] sm:$0xff] %v15820_v34  ;;  %v4048_v10 = vcombine.low %v15796_v4, %v15811_v9  ;;  %v4080_v12 = vcombine.low %v15814_v11, %v15817_v62  ;;  %v3167_v53 = vrot.slane %v3153_v52, %v14201_v60  ;;  %v3169_v36 = vcombine.high %v15652_v21, %v15750_v25 }
 0x298   :  { %v3200_v50 = vcombine.low %v3144_v43, %v3160_v28  ;;  %v3192_v31 = vrot.slane %v3184_v44, %v14201_v60  ;;  %v15843_v18 = vrot.slane %v3912_v8, %v14221_v13  ;;  %v15846_v2 = vrot.slane %v3944_v63, %v14221_v13 }
 0x299   :  { %4322 = vrot.lane.b32.xlu1 %v18985_v26, %s13964_s9  ;;  %v15849_v39 = vrot.slane %v4048_v10, %v14221_v13  ;;  %v15852_v42 = vrot.slane %v4080_v12, %v14221_v13  ;;  %v3151_v15 = vrot.slane %v3137_v16, %v14201_v60  ;;  %v3176_v24 = vrot.slane %v3168_v41, %v14201_v60  ;;  %v15877_v10 = vpop.permute.xlu1 %2450 }
 0x29a   :  { %v3199_v58 = vrot.slane %v3185_v0, %v14201_v60  ;;  %v3976_v23 = vcombine.low %v15843_v18, %v15846_v2  ;;  %v3201_v57 = vcombine.high %v3144_v43, %v3160_v28  ;;  %v15868_v52 = vrot.slane %v3200_v50, %v14221_v13 }
 0x29b   :  { %v4112_v40 = vcombine.low %v15849_v39, %v15852_v42  ;;  %v3216_v44 = vcombine.low %v3151_v15, %v3167_v53  ;;  %v3217_v8 = vcombine.high %v3151_v15, %v3167_v53  ;;  %v3183_v63 = vrot.slane %v3169_v36, %v14201_v60 }
 0x29c   :  { %v3232_v16 = vcombine.low %v3176_v24, %v3192_v31  ;;  %v3408_v41 = vcombine.low %v15637_v35, %v15714_v17  ;;  %v3409_v0 = vcombine.high %v15637_v35, %v15714_v17  ;;  %v3233_v28 = vcombine.high %v3176_v24, %v3192_v31 }
 0x29d   :  { %4334 = vrot.lane.b32.xlu1 %v18985_v26, %s13965_s10  ;;  %v4170_v43 = vpack.i.b16 %v4112_v40, %v3976_v23  ;;  %v4171_v12 = vshrl.u32 %v3976_v23, 16  ;;  %v4172_v50 = vshrl.u32 %v4112_v40, 16  ;;  %v3248_v25 = vcombine.low %v3183_v63, %v3199_v58 }
 0x29e   :  { %v3249_v53 = vcombine.high %v3183_v63, %v3199_v58  ;;  %v1224_v36 = vcombine.low %v15143_v27, %v493_v56  ;;  %v1225_v15 = vcombine.high %v15143_v27, %v493_v56  ;;  %v3424_v51 = vcombine.low %v15682_v38, %v15740_v47  ;;  %v505_v56 = vpop.permute.xlu0 %504 }
 0x29f   :  { %v3425_v35 = vcombine.high %v15682_v38, %v15740_v47  ;;  %v6949_v17 = vsel %vm6192_vm1, %v4170_v43, 0  ;;  %v4173_v21 = vpack.i.b16 %v4172_v50, %v4171_v12  ;;  %v15887_v31 = vrot.slane %v3201_v57, %v14221_v13 }
 0x2a0   :  { %v15890_v24 = vrot.slane %v3216_v44, %v14221_v13  ;;  %v15893_v58 = vrot.slane %v3217_v8, %v14221_v13  ;;  %v15896_v27 = vrot.slane %v3408_v41, %v14201_v60  ;;  %13072 = vmatpush3.bf16.xpose.msra.mxu1 %v6949_v17  ;;  %v15899_v23 = vrot.slane %v3232_v16, %v14221_v13  ;;  %v15923_v16 = vpop.permute.xlu1 %4246 }
 0x2a1   :  { %v15902_v38 = vrot.slane %v3233_v28, %v14221_v13  ;;  %v15905_v47 = vrot.slane %v3409_v0, %v14201_v60  ;;  %4346 = vrot.lane.b32.xlu1 %v18985_v26, %s13966_s11  ;;  %v6996_v40 = vsel %vm6192_vm1, %v4173_v21, 0  ;;  %13083 = vmatprep.subr.bf16.mxu1 %v18957_v29  ;;  %v15912_v57 = vrot.slane %v3248_v25, %v14221_v13 }
 0x2a2   :  { %v15915_v44 = vrot.slane %v3249_v53, %v14221_v13  ;;  %v15918_v8 = vrot.slane %v1224_v36, %v14201_v60  ;;  %v15921_v63 = vrot.slane %v1225_v15, %v14201_v60  ;;  %13078 = vmatpush3.bf16.xpose.msra.mxu0 %v6996_v40  ;;  %19009 = vst [vmem:[#allocation29_spill] sm:$0xff] %v15923_v16  ;;  %v19013_v53 = vld [vmem:[#allocation39_spill] sm:$0xff] }
 0x2a3   :  { %v3432_v41 = vrot.slane %v3424_v51, %v14201_v60  ;;  %v3439_v21 = vrot.slane %v3425_v35, %v14201_v60  ;;  %v1240_v0 = vcombine.low %v15176_v49, %v505_v56  ;;  %v1241_v25 = vcombine.high %v15176_v49, %v505_v56  ;;  %13089 = vmatprep.subr.bf16.mxu0 %v18957_v29  ;;  %v19012_v51 = vld [vmem:[#allocation38_spill] sm:$0xff] }
 0x2a4   :  { %v19010_v28 = vcombine.low %v15058_v32, %v15061_v1  ;;  %v19011_v12 = vcombine.low %v15480_v45, %v15483_v7  ;;  %v19014_v36 = vcombine.low %v19012_v51, %v19013_v53  ;;  %v15952_v49 = vrot.slane %v2136_v14, %v14221_v13  ;;  %v15976_v61 = vpop.permute.xlu1 %4258 }
 0x2a5   :  { %v3264_v35 = vcombine.low %v15868_v52, %v15899_v23  ;;  %4358 = vrot.lane.b32.xlu1 %v18985_v26, %s13967_s12  ;;  %v3977_v56 = vcombine.high %v15843_v18, %v15846_v2  ;;  %v4113_v40 = vcombine.high %v15849_v39, %v15852_v42  ;;  %v1248_v48 = vrot.slane %v1240_v0, %v14201_v60 }
 0x2a6   :  { %v15934_v43 = vrot.slane %v19010_v28, %v14221_v13  ;;  %v15940_v50 = vrot.slane %v19011_v12, %v14221_v13  ;;  %v15946_v15 = vrot.slane %v19014_v36, %v14221_v13  ;;  %v3266_v28 = vcombine.low %v15887_v31, %v15902_v38  ;;  %v15968_v12 = vpop.permute.xlu0 %4222  ;;  %19016 = vst [vmem:[#allocation33_spill] sm:$0xff] %v15976_v61 }
 0x2a7   :  { %19015 = vst [vmem:[#allocation28_spill] sm:$0xff] %v15968_v12  ;;  %v1255_v18 = vrot.slane %v1241_v25, %v14201_v60  ;;  %v4176_v2 = vpack.i.b16 %v4113_v40, %v3977_v56  ;;  %v4177_v39 = vshrl.u32 %v3977_v56, 16  ;;  %v4178_v54 = vshrl.u32 %v4113_v40, 16 }
 0x2a8   :  { %v2032_v36 = vcombine.low %v15934_v43, %v15940_v50  ;;  %v2168_v17 = vcombine.low %v15946_v15, %v15952_v49  ;;  %v3268_v14 = vcombine.low %v15890_v24, %v15912_v57  ;;  %v3270_v34 = vcombine.low %v15893_v58, %v15915_v44 }
 0x2a9   :  { %v3472_v0 = vcombine.low %v15896_v27, %v3432_v41  ;;  %4370 = vrot.lane.b32.xlu1 %v18985_v26, %s13968_s14  ;;  %v3473_v25 = vcombine.high %v15896_v27, %v3432_v41  ;;  %v4179_v40 = vpack.i.b16 %v4178_v54, %v4177_v39  ;;  %v3488_v19 = vcombine.low %v15905_v47, %v3439_v21 }
 0x2aa   :  { %v2226_v42 = vpack.i.b16 %v2168_v17, %v2032_v36  ;;  %v2227_v33 = vshrl.u32 %v2032_v36, 16  ;;  %v2228_v5 = vshrl.u32 %v2168_v17, 16  ;;  %v7043_v17 = vsel %vm6192_vm1, %v4176_v2, 0  ;;  %v15999_v2 = vpop.permute.xlu0 %4244 }
 0x2ab   :  { %v3271_v36 = vcombine.high %v15893_v58, %v15915_v44  ;;  %v3489_v61 = vcombine.high %v15905_v47, %v3439_v21  ;;  %v3456_v12 = vcombine.low %v15778_v20, %v15877_v10  ;;  %v1288_v16 = vcombine.low %v15918_v8, %v1248_v48 }
 0x2ac   :  { %13074 = vmatmul.mubr.msk.bf16.vlgmr.msra.gmra.mrb[32].mxu1 %vm6192_vm1, %v2226_v42  ;;  %v2229_v56 = vpack.i.b16 %v2228_v5, %v2227_v33  ;;  %v1289_v27 = vcombine.high %v15918_v8, %v1248_v48  ;;  %v1304_v41 = vcombine.low %v15921_v63, %v1255_v18  ;;  %v7090_v5 = vsel %vm6192_vm1, %v4179_v40, 0 }
 0x2ad   :  { %13084 = vmatpush3.bf16.xpose.msra.mxu1 %v7043_v17  ;;  %13085 = vmatprep.mubr.msk.bf16.mxu1 %vm13973_vm0, %v18957_v29  ;;  %v1305_v33 = vcombine.high %v15921_v63, %v1255_v18  ;;  %v3440_v54 = vcombine.low %v15756_v37, %v15834_v59  ;;  %v3441_v47 = vcombine.high %v15756_v37, %v15834_v59  ;;  %v16024_v63 = vpop.permute.xlu1 %4270 }
 0x2ae   :  { %13080 = vmatmul.mubr.msk.bf16.vlgmr.msra.gmra.mrb[44].mxu0 %vm6192_vm1, %v2229_v56  ;;  %v3457_v48 = vcombine.high %v15778_v20, %v15877_v10  ;;  %v16012_v8 = vpack.c.bf16 %v3268_v14, %v3264_v35  ;;  %v16014_v21 = vpack.c.bf16 %v3270_v34, %v3266_v28  ;;  %v16017_v39 = vrot.slane %v3472_v0, %v14221_v13  ;;  %v19017_v34 = vld [vmem:[#allocation30_spill] sm:$0xff]  ;;  %v16056_v0 = vpop.permute.xlu0 %4256 }
 0x2af   :  { %13090 = vmatpush3.bf16.xpose.msra.mxu0 %v7090_v5  ;;  %v16020_v42 = vrot.slane %v3473_v25, %v14221_v13  ;;  %4382 = vrot.lane.b32.xlu1 %v18985_v26, %s13969_s15  ;;  %v16027_v37 = vrot.slane %v3488_v19, %v14221_v13  ;;  %v16030_v20 = vrot.slane %v3489_v61, %v14221_v13 }
 0x2b0   :  { %v4416_v59 = vcombine.low %v19017_v34, %v15999_v2  ;;  %v3464_v10 = vrot.slane %v3456_v12, %v14201_v60  ;;  %13095 = vmatprep.subr.bf16.mxu1 %v18957_v29  ;;  %v16037_v35 = vrot.slane %v1288_v16, %v14221_v13  ;;  %v16040_v28 = vrot.slane %v1289_v27, %v14221_v13 }
 0x2b1   :  { %v16043_v14 = vrot.slane %v1304_v41, %v14221_v13  ;;  %v4417_v61 = vcombine.high %v19017_v34, %v15999_v2  ;;  %13091 = vmatprep.mubr.msk.bf16.mxu0 %vm13973_vm0, %v18957_v29  ;;  %v16050_v19 = vrot.slane %v1305_v33, %v14221_v13  ;;  %v3448_v12 = vrot.slane %v3440_v54, %v14201_v60 }
 0x2b2   :  { %v3455_v16 = vrot.slane %v3441_v47, %v14201_v60  ;;  %v3471_v18 = vrot.slane %v3457_v48, %v14201_v60  ;;  %13101 = vmatprep.subr.bf16.mxu0 %v18957_v29  ;;  %v2033_v25 = vcombine.high %v15934_v43, %v15940_v50  ;;  %v2169_v17 = vcombine.high %v15946_v15, %v15952_v49  ;;  %v16072_v49 = vpop.permute.xlu1 %4282 }
 0x2b3   :  { %v3913_v56 = vcombine.high %v15773_v3, %v15776_v6  ;;  %v3945_v40 = vcombine.high %v15801_v55, %v15804_v30  ;;  %v3504_v27 = vcombine.low %v3448_v12, %v3464_v10  ;;  %v3505_v41 = vcombine.high %v3448_v12, %v3464_v10  ;;  %v19020_v10 = vld [vmem:[#allocation23_spill] sm:$0xff] }
 0x2b4   :  { %v4049_v5 = vcombine.high %v15796_v4, %v15811_v9  ;;  %v4081_v33 = vcombine.high %v15814_v11, %v15817_v62  ;;  %v2232_v54 = vpack.i.b16 %v2169_v17, %v2033_v25  ;;  %v2233_v15 = vshrl.u32 %v2033_v25, 16 }
 0x2b5   :  { %v3927_v43 = vrot.slane %v3913_v56, %v14221_v13  ;;  %v3959_v50 = vrot.slane %v3945_v40, %v14221_v13  ;;  %v3520_v3 = vcombine.low %v3455_v16, %v3471_v18  ;;  %v2234_v30 = vshrl.u32 %v2169_v17, 16  ;;  %v16093_v17 = vpop.permute.xlu0 %4268 }
 0x2b6   :  { %v4063_v6 = vrot.slane %v4049_v5, %v14221_v13  ;;  %v4095_v55 = vrot.slane %v4081_v33, %v14221_v13  ;;  %v3521_v47 = vcombine.high %v3455_v16, %v3471_v18  ;;  %13086 = vmatmul.mubr.msk.bf16.vlgmr.msra.gmra.mrb[36].mxu1 %vm6192_vm1, %v2232_v54  ;;  %v19018_v9 = vcombine.high %v15058_v32, %v15061_v1 }
 0x2b7   :  { %v3978_v4 = vcombine.low %v3927_v43, %v3959_v50  ;;  %v19019_v62 = vcombine.high %v15480_v45, %v15483_v7  ;;  %v1320_v12 = vcombine.low %v19020_v10, %v16037_v35  ;;  %v1321_v16 = vcombine.high %v19020_v10, %v16037_v35  ;;  %13097 = vmatprep.mubr.msk.bf16.mxu1 %vm13973_vm0, %v18957_v29 }
 0x2b8   :  { %v16081_v11 = vrot.slane %v19018_v9, %v14221_v13  ;;  %v4114_v18 = vcombine.low %v4063_v6, %v4095_v55  ;;  %v2235_v25 = vpack.i.b16 %v2234_v30, %v2233_v15  ;;  %v19021_v45 = vcombine.high %v19012_v51, %v19013_v53  ;;  %v19024_v30 = vld [vmem:[#allocation25_spill] sm:$0xff] }
 0x2b9   :  { %v2015_v48 = vrot.slane %v19019_v62, %v14221_v13  ;;  %v4183_v32 = vshrl.u32 %v3978_v4, 16  ;;  %v19022_v56 = vcombine.high %v15530_v46, %v15541_v22  ;;  %v16105_v40 = vrot.slane %v3504_v27, %v14221_v13  ;;  %v16119_v22 = vpop.permute.xlu1 %4294  ;;  %v19023_v27 = vld [vmem:[#allocation37_spill] sm:$0xff]  ;;  %v19025_v62 = vld [vmem:[#allocation24_spill] sm:$0xff] }
 0x2ba   :  { %v2119_v7 = vrot.slane %v19021_v45, %v14221_v13  ;;  %v16108_v5 = vrot.slane %v3520_v3, %v14221_v13  ;;  %v4182_v33 = vpack.i.b16 %v4114_v18, %v3978_v4  ;;  %13092 = vmatmul.mubr.msk.bf16.vlgmr.msra.gmra.mrb[48].mxu0 %vm6192_vm1, %v2235_v25  ;;  %v4184_v54 = vshrl.u32 %v4114_v18, 16 }
 0x2bb   :  { %v2034_v1 = vcombine.low %v16081_v11, %v2015_v48  ;;  %v2151_v35 = vrot.slane %v19022_v56, %v14221_v13  ;;  %v16112_v15 = vrot.slane %v3505_v41, %v14221_v13  ;;  %v16115_v51 = vrot.slane %v3521_v47, %v14221_v13  ;;  %13103 = vmatprep.mubr.msk.bf16.mxu0 %vm13973_vm0, %v18957_v29 }
 0x2bc   :  { %v3979_v46 = vcombine.high %v3927_v43, %v3959_v50  ;;  %v1322_v3 = vcombine.low %v19023_v27, %v16040_v28  ;;  %v1324_v4 = vcombine.low %v19024_v30, %v16043_v14  ;;  %v7137_v9 = vsel %vm6192_vm1, %v4182_v33, 0 }
 0x2bd   :  { %v2170_v53 = vcombine.low %v2119_v7, %v2151_v35  ;;  %v4185_v41 = vpack.i.b16 %v4184_v54, %v4183_v32  ;;  %v1325_v47 = vcombine.high %v19024_v30, %v16043_v14  ;;  %v1326_v10 = vcombine.low %v19025_v62, %v16050_v19  ;;  %13096 = vmatpush3.bf16.xpose.msra.mxu1 %v7137_v9  ;;  %v16169_v30 = vpop.permute.xlu1 %4304 }
 0x2be   :  { %v4115_v43 = vcombine.high %v4063_v6, %v4095_v55  ;;  %v19026_v50 = vcombine.high %v15868_v52, %v15899_v23  ;;  %v19027_v25 = vcombine.high %v15890_v24, %v15912_v57  ;;  %v3536_v56 = vcombine.low %v16017_v39, %v16105_v40  ;;  %13107 = vmatprep.subr.bf16.mxu1 %v18957_v29  ;;  %v16156_v55 = vpop.permute.xlu0 %4280 }
 0x2bf   :  { %v2238_v18 = vpack.i.b16 %v2170_v53, %v2034_v1  ;;  %v3540_v32 = vcombine.low %v16027_v37, %v16108_v5  ;;  %v7184_v14 = vsel %vm6192_vm1, %v4185_v41, 0  ;;  %v19028_v6 = vcombine.high %v15887_v31, %v15902_v38  ;;  %19029 = vst [vmem:[#allocation32_spill] sm:$0xff] %v16169_v30 }
 0x2c0   :  { %v12631_v45 = vpack.c.bf16 %v19027_v25, %v19026_v50  ;;  %v4424_v24 = vrot.slane %v4416_v59, %v14201_v60  ;;  %v3538_v23 = vcombine.low %v16020_v42, %v16112_v15  ;;  %v3542_v57 = vcombine.low %v16030_v20, %v16115_v51  ;;  %13102 = vmatpush3.bf16.xpose.msra.mxu0 %v7184_v14 }
 0x2c1   :  { %v12633_v52 = vpack.c.bf16 %v3271_v36, %v19028_v6  ;;  %v1323_v31 = vcombine.high %v19023_v27, %v16040_v28  ;;  %v1327_v58 = vcombine.high %v19025_v62, %v16050_v19  ;;  %v16166_v38 = vrot.slane %v4417_v61, %v14201_v60  ;;  %13113 = vmatprep.subr.bf16.mxu0 %v18957_v29  ;;  %v19034_v6 = vld [vmem:[#allocation27_spill] sm:$0xff] }
 0x2c2   :  { %v4188_v44 = vpack.i.b16 %v4115_v43, %v3979_v46  ;;  %v12591_v36 = vpack.c.bf16 %v1324_v4, %v1320_v12  ;;  %v12593_v59 = vpack.c.bf16 %v1326_v10, %v1322_v3  ;;  %v12599_v33 = vpack.c.bf16 %v1325_v47, %v1321_v16  ;;  %v19033_v4 = vld [vmem:[#allocation28_spill] sm:$0xff] }
 0x2c3   :  { %v2239_v54 = vshrl.u32 %v2034_v1, 16  ;;  %v3537_v28 = vcombine.high %v16017_v39, %v16105_v40  ;;  %v3539_v19 = vcombine.high %v16020_v42, %v16112_v15  ;;  %v3541_v2 = vcombine.high %v16027_v37, %v16108_v5  ;;  %v16190_v37 = vpop.permute.xlu0 %4292 }
 0x2c4   :  { %v12627_v34 = vpack.c.bf16 %v3540_v32, %v3536_v56  ;;  %v12629_v61 = vpack.c.bf16 %v3542_v57, %v3538_v23  ;;  %v2240_v27 = vshrl.u32 %v2170_v53, 16  ;;  %v4189_v9 = vshrl.u32 %v3979_v46, 16  ;;  %13098 = vmatmul.mubr.msk.bf16.vlgmr.msra.gmra.mrb[40].mxu1 %vm6192_vm1, %v2238_v18  ;;  %v16211_v46 = vpop.permute.xlu1 %4316 }
 0x2c5   :  { %v4190_v41 = vshrl.u32 %v4115_v43, 16  ;;  %v7231_v12 = vsel %vm6192_vm1, %v4188_v44, 0  ;;  %v16180_v16 = vcombine.high %v16081_v11, %v2015_v48  ;;  %v16182_v1 = vcombine.high %v2119_v7, %v2151_v35  ;;  %13109 = vmatprep.mubr.msk.bf16.mxu1 %vm13973_vm0, %v18957_v29  ;;  %v19030_v48 = vld [vmem:[#allocation20_spill] sm:$0xff]  ;;  %19031 = vst [vmem:[#allocation31_spill] sm:$0xff] %v16211_v46 }
 0x2c6   :  { %v16186_v39 = vrot.slane %v16012_v8, %v14201_v60  ;;  %v3543_v42 = vcombine.high %v16030_v20, %v16115_v51  ;;  %13108 = vmatpush3.bf16.xpose.msra.mxu1 %v7231_v12  ;;  %v2241_v40 = vpack.i.b16 %v2240_v27, %v2239_v54  ;;  %v12601_v15 = vpack.c.bf16 %v1327_v58, %v1323_v31  ;;  %v19036_v31 = vld [vmem:[#allocation22_spill] sm:$0xff] }
 0x2c7   :  { %v4191_v5 = vpack.i.b16 %v4190_v41, %v4189_v9  ;;  %v2244_v11 = vpack.i.b16 %v16182_v1, %v16180_v16  ;;  %13119 = vmatprep.subr.bf16.mxu1 %v18957_v29  ;;  %v16199_v8 = vrot.slane %v16014_v21, %v14201_v60  ;;  %v16202_v20 = vrot.slane %v12627_v34, %v14201_v60  ;;  %v19032_v21 = vld [vmem:[#allocation29_spill] sm:$0xff]  ;;  %v16250_v44 = vpop.permute.xlu0 %4306 }
 0x2c8   :  { %v4464_v7 = vcombine.low %v19030_v48, %v4424_v24  ;;  %v4465_v35 = vcombine.high %v19030_v48, %v4424_v24  ;;  %13104 = vmatmul.mubr.msk.bf16.vlgmr.msra.gmra.mrb[52].mxu0 %vm6192_vm1, %v2241_v40  ;;  %v16209_v53 = vrot.slane %v12629_v61, %v14201_v60  ;;  %v16214_v3 = vrot.slane %v12591_v36, %v14201_v60  ;;  %v19035_v24 = vld [vmem:[#allocation36_spill] sm:$0xff] }
 0x2c9   :  { %v7278_v51 = vsel %vm6192_vm1, %v4191_v5, 0  ;;  %v4688_v47 = vcombine.low %v19033_v4, %v19032_v21  ;;  %13115 = vmatprep.mubr.msk.bf16.mxu0 %vm13973_vm0, %v18957_v29  ;;  %v3928_v62 = vcombine.low %v16186_v39, %v16199_v8  ;;  %v12635_v10 = vpack.c.bf16 %v3541_v2, %v3537_v28  ;;  %19037 = vst [vmem:[#allocation12_spill] sm:$0xff] %v16250_v44  ;;  %v16270_v2 = vpop.permute.xlu1 %4318  ;;  %v19039_v5 = vld [vmem:[#allocation21_spill] sm:$0xff] }
 0x2ca   :  { %13114 = vmatpush3.bf16.xpose.msra.mxu0 %v7278_v51  ;;  %v12637_v18 = vpack.c.bf16 %v3543_v42, %v3539_v19  ;;  %v3960_v43 = vcombine.low %v16202_v20, %v16209_v53  ;;  %v16225_v50 = vrot.slane %v12631_v45, %v14201_v60  ;;  %v16229_v25 = vrot.slane %v12593_v59, %v14201_v60 }
 0x2cb   :  { %13125 = vmatprep.subr.bf16.mxu0 %v18957_v29  ;;  %v16232_v56 = vrot.slane %v12599_v33, %v14201_v60  ;;  %v16235_v32 = vrot.slane %v12601_v15, %v14201_v60  ;;  %v16238_v14 = vrot.slane %v12633_v52, %v14201_v60  ;;  %v16243_v45 = vrot.slane %v4464_v7, %v14221_v13  ;;  %v16294_v51 = vpop.permute.xlu0 %4328 }
 0x2cc   :  { %v16246_v57 = vrot.slane %v4465_v35, %v14221_v13  ;;  %v4480_v58 = vcombine.low %v19036_v31, %v16166_v38  ;;  %v4481_v36 = vcombine.high %v19036_v31, %v16166_v38  ;;  %v4689_v52 = vcombine.high %v19033_v4, %v19032_v21  ;;  %19038 = vst [vmem:[#allocation34_spill] sm:$0xff] %v16270_v2 }
 0x2cd   :  { %v4696_v59 = vrot.slane %v4688_v47, %v14201_v60  ;;  %13110 = vmatmul.mubr.msk.bf16.vlgmr.msra.gmra.mrb[44].mxu1 %vm6192_vm1, %v2244_v11  ;;  %v3936_v33 = vrot.slane %v3928_v62, %v14221_v13  ;;  %v3968_v54 = vrot.slane %v3960_v43, %v14221_v13  ;;  %v16261_v28 = vrot.slane %v12635_v10, %v14201_v60  ;;  %v16307_v31 = vpop.permute.xlu1 %4330 }
 0x2ce   :  { %v16264_v19 = vrot.slane %v12637_v18, %v14201_v60  ;;  %v4064_v38 = vcombine.low %v16225_v50, %v16238_v14  ;;  %13121 = vmatprep.mubr.msk.bf16.mxu1 %vm13973_vm0, %v18957_v29  ;;  %v1984_v34 = vcombine.low %v16214_v3, %v16229_v25  ;;  %v2120_v27 = vcombine.low %v16232_v56, %v16235_v32 }
 0x2cf   :  { %v2245_v9 = vshrl.u32 %v16180_v16, 16  ;;  %v16282_v12 = vrot.slane %v4480_v58, %v14221_v13  ;;  %v3980_v42 = vcombine.low %v3936_v33, %v3968_v54  ;;  %v4736_v15 = vcombine.low %v19039_v5, %v4696_v59  ;;  %19040 = vst [vmem:[#allocation14_spill] sm:$0xff] %v16294_v51  ;;  %19041 = vst [vmem:[#allocation38_spill] sm:$0xff] %v16307_v31 }
 0x2d0   :  { %v4096_v40 = vcombine.low %v16261_v28, %v16264_v19  ;;  %v4737_v11 = vcombine.high %v19039_v5, %v4696_v59  ;;  %v4448_v48 = vcombine.low %v16093_v17, %v16190_v37  ;;  %v2246_v7 = vshrl.u32 %v16182_v1, 16 }
 0x2d1   :  { %v4703_v16 = vrot.slane %v4689_v52, %v14201_v60  ;;  %v4449_v35 = vcombine.high %v16093_v17, %v16190_v37  ;;  %v4072_v21 = vrot.slane %v4064_v38, %v14221_v13  ;;  %v4432_v47 = vcombine.low %v16056_v0, %v16156_v55  ;;  %v16339_v30 = vpop.permute.xlu1 %4342 }
 0x2d2   :  { %v4104_v4 = vrot.slane %v4096_v40, %v14221_v13  ;;  %v4433_v62 = vcombine.high %v16056_v0, %v16156_v55  ;;  %v2247_v10 = vpack.i.b16 %v2246_v7, %v2245_v9  ;;  %v1992_v1 = vrot.slane %v1984_v34, %v14221_v13  ;;  %v19042_v55 = vld [vmem:[#allocation35_spill] sm:$0xff]  ;;  %19048 = vst [vmem:[#allocation30_spill] sm:$0xff] %v16339_v30 }
 0x2d3   :  { %v16304_v18 = vrot.slane %v4481_v36, %v14221_v13  ;;  %v4195_v17 = vshrl.u32 %v3980_v42, 16  ;;  %v2128_v37 = vrot.slane %v2120_v27, %v14221_v13  ;;  %v16310_v58 = vrot.slane %v4736_v15, %v14221_v13  ;;  %v19043_v36 = vld [vmem:[#allocation26_spill] sm:$0xff]  ;;  %v19046_v15 = vld [vmem:[#allocation13_spill] sm:$0xff] }
 0x2d4   :  { %v4116_v43 = vcombine.low %v4072_v21, %v4104_v4  ;;  %v16313_v52 = vrot.slane %v4737_v11, %v14221_v13  ;;  %v4456_v0 = vrot.slane %v4448_v48, %v14201_v60  ;;  %13116 = vmatmul.mubr.msk.bf16.vlgmr.msra.gmra.mrb[56].mxu0 %vm6192_vm1, %v2247_v10  ;;  %v19044_v59 = vcombine.low %v19042_v55, %v19043_v36 }
 0x2d5   :  { %v4463_v34 = vrot.slane %v4449_v35, %v14201_v60  ;;  %v19045_v40 = vcombine.low %v19035_v24, %v19034_v6  ;;  %13127 = vmatprep.mubr.msk.bf16.mxu0 %vm13973_vm0, %v18957_v29  ;;  %v4752_v11 = vcombine.low %v19046_v15, %v4703_v16  ;;  %v4440_v48 = vrot.slane %v4432_v47, %v14201_v60 }
 0x2d6   :  { %v2024_v38 = vrot.slane %v19044_v59, %v14221_v13  ;;  %v4194_v27 = vpack.i.b16 %v4116_v43, %v3980_v42  ;;  %v4196_v9 = vshrl.u32 %v4116_v43, 16  ;;  %v4447_v7 = vrot.slane %v4433_v62, %v14201_v60  ;;  %v16331_v59 = vpop.permute.xlu0 %4340 }
 0x2d7   :  { %v2160_v5 = vrot.slane %v19045_v40, %v14221_v13  ;;  %19047 = vst [vmem:[#allocation39_spill] sm:$0xff] %v16331_v59  ;;  %v3981_v23 = vcombine.high %v3936_v33, %v3968_v54  ;;  %v4753_v41 = vcombine.high %v19046_v15, %v4703_v16  ;;  %v4496_v40 = vcombine.low %v4440_v48, %v4456_v0  ;;  %v19049_v33 = vld [vmem:[#allocation33_spill] sm:$0xff] }
 0x2d8   :  { %v2036_v10 = vcombine.low %v1992_v1, %v2024_v38  ;;  %v7325_v42 = vsel %vm6192_vm1, %v4194_v27, 0  ;;  %v4197_v35 = vpack.i.b16 %v4196_v9, %v4195_v17  ;;  %v4720_v61 = vcombine.low %v16024_v63, %v16119_v22 }
 0x2d9   :  { %v2172_v43 = vcombine.low %v2128_v37, %v2160_v5  ;;  %13120 = vmatpush3.bf16.xpose.msra.mxu1 %v7325_v42  ;;  %v4117_v2 = vcombine.high %v4072_v21, %v4104_v4  ;;  %v4497_v44 = vcombine.high %v4440_v48, %v4456_v0  ;;  %v4512_v47 = vcombine.low %v4447_v7, %v4463_v34 }
 0x2da   :  { %v7372_v62 = vsel %vm6192_vm1, %v4197_v35, 0  ;;  %13131 = vmatprep.subr.bf16.mxu1 %v18957_v29  ;;  %v4201_v31 = vshrl.u32 %v3981_v23, 16  ;;  %v4513_v17 = vcombine.high %v4447_v7, %v4463_v34  ;;  %v4704_v54 = vcombine.low %v19049_v33, %v16072_v49 }
 0x2db   :  { %v4721_v16 = vcombine.high %v16024_v63, %v16119_v22  ;;  %13126 = vmatpush3.bf16.xpose.msra.mxu0 %v7372_v62  ;;  %v4202_v27 = vshrl.u32 %v4117_v2, 16  ;;  %v16346_v21 = vrot.slane %v4752_v11, %v14221_v13  ;;  %v4200_v4 = vpack.i.b16 %v4117_v2, %v3981_v23  ;;  %v16364_v2 = vpop.permute.xlu0 %4352  ;;  %v16375_v62 = vpop.permute.xlu1 %4354 }
 0x2dc   :  { %v2251_v0 = vshrl.u32 %v2036_v10, 16  ;;  %v2252_v9 = vshrl.u32 %v2172_v43, 16  ;;  %13137 = vmatprep.subr.bf16.mxu0 %v18957_v29  ;;  %v16350_v15 = vrot.slane %v4753_v41, %v14221_v13  ;;  %v16353_v34 = vrot.slane %v4496_v40, %v14221_v13  ;;  %19050 = vst [vmem:[#allocation23_spill] sm:$0xff] %v16364_v2  ;;  %19051 = vst [vmem:[#allocation37_spill] sm:$0xff] %v16375_v62 }
 0x2dd   :  { %v4705_v48 = vcombine.high %v19049_v33, %v16072_v49  ;;  %v4728_v63 = vrot.slane %v4720_v61, %v14201_v60  ;;  %v16359_v22 = vrot.slane %v4497_v44, %v14221_v13  ;;  %v16362_v23 = vrot.slane %v4512_v47, %v14221_v13 }
 0x2de   :  { %v2250_v11 = vpack.i.b16 %v2172_v43, %v2036_v10  ;;  %v4203_v7 = vpack.i.b16 %v4202_v27, %v4201_v31  ;;  %v16367_v41 = vrot.slane %v4513_v17, %v14221_v13  ;;  %v4712_v42 = vrot.slane %v4704_v54, %v14201_v60 }
 0x2df   :  { %v4735_v35 = vrot.slane %v4721_v16, %v14201_v60  ;;  %v3961_v49 = vcombine.high %v16202_v20, %v16209_v53  ;;  %v7419_v44 = vsel %vm6192_vm1, %v4200_v4, 0  ;;  %v2253_v61 = vpack.i.b16 %v2252_v9, %v2251_v0  ;;  %v16394_v17 = vpop.permute.xlu0 %4364 }
 0x2e0   :  { %13122 = vmatmul.mubr.msk.bf16.vlgmr.msra.gmra.mrb[48].mxu1 %vm6192_vm1, %v2250_v11  ;;  %v2037_v40 = vcombine.high %v1992_v1, %v2024_v38  ;;  %v2173_v47 = vcombine.high %v2128_v37, %v2160_v5  ;;  %v4719_v31 = vrot.slane %v4705_v48, %v14201_v60  ;;  %v4768_v10 = vcombine.low %v4712_v42, %v4728_v63  ;;  %v16410_v48 = vpop.permute.xlu1 %4366 }
 0x2e1   :  { %13132 = vmatpush3.bf16.xpose.msra.mxu1 %v7419_v44  ;;  %13133 = vmatprep.mubr.msk.bf16.mxu1 %vm13973_vm0, %v18957_v29  ;;  %v3929_v43 = vcombine.high %v16186_v39, %v16199_v8  ;;  %v4528_v20 = vcombine.low %v16243_v45, %v16353_v34  ;;  %v4529_v53 = vcombine.high %v16243_v45, %v16353_v34  ;;  %v7466_v37 = vsel %vm6192_vm1, %v4203_v7, 0 }
 0x2e2   :  { %v4769_v1 = vcombine.high %v4712_v42, %v4728_v63  ;;  %13128 = vmatmul.mubr.msk.bf16.vlgmr.msra.gmra.mrb[60].mxu0 %vm6192_vm1, %v2253_v61  ;;  %13143 = vmatprep.subr.bf16.mxu1 %v18957_v29  ;;  %v4784_v38 = vcombine.low %v4719_v31, %v4735_v35  ;;  %v4785_v5 = vcombine.high %v4719_v31, %v4735_v35  ;;  %v2257_v33 = vshrl.u32 %v2037_v40, 16 }
 0x2e3   :  { %13138 = vmatpush3.bf16.xpose.msra.mxu0 %v7466_v37  ;;  %13139 = vmatprep.mubr.msk.bf16.mxu0 %vm13973_vm0, %v18957_v29  ;;  %v3975_v39 = vrot.slane %v3961_v49, %v14221_v13  ;;  %v4530_v8 = vcombine.low %v16246_v57, %v16359_v22  ;;  %19052 = vst [vmem:[#allocation25_spill] sm:$0xff] %v16394_v17  ;;  %v2258_v54 = vshrl.u32 %v2173_v47, 16  ;;  %19053 = vst [vmem:[#allocation24_spill] sm:$0xff] %v16410_v48 }
 0x2e4   :  { %v4065_v45 = vcombine.high %v16225_v50, %v16238_v14  ;;  %13149 = vmatprep.subr.bf16.mxu0 %v18957_v29  ;;  %v4531_v16 = vcombine.high %v16246_v57, %v16359_v22  ;;  %v4532_v27 = vcombine.low %v16282_v12, %v16362_v23  ;;  %v4776_v4 = vrot.slane %v4768_v10, %v14221_v13 }
 0x2e5   :  { %v3943_v0 = vrot.slane %v3929_v43, %v14221_v13  ;;  %v4533_v9 = vcombine.high %v16282_v12, %v16362_v23  ;;  %v4783_v34 = vrot.slane %v4769_v1, %v14221_v13  ;;  %v2256_v50 = vpack.i.b16 %v2173_v47, %v2037_v40  ;;  %v16437_v40 = vpop.permute.xlu0 %4376 }
 0x2e6   :  { %v4097_v14 = vcombine.high %v16261_v28, %v16264_v19  ;;  %v4534_v57 = vcombine.low %v16304_v18, %v16367_v41  ;;  %v4792_v63 = vrot.slane %v4784_v38, %v14221_v13  ;;  %v4799_v22 = vrot.slane %v4785_v5, %v14221_v13  ;;  %19056 = vst [vmem:[#allocation20_spill] sm:$0xff] %v16437_v40 }
 0x2e7   :  { %v3982_v11 = vcombine.low %v3943_v0, %v3975_v39  ;;  %v4535_v7 = vcombine.high %v16304_v18, %v16367_v41  ;;  %v4079_v12 = vrot.slane %v4065_v45, %v14221_v13  ;;  %v2259_v28 = vpack.i.b16 %v2258_v54, %v2257_v33 }
 0x2e8   :  { %13134 = vmatmul.mubr.msk.bf16.vlgmr.msra.gmra.mrb[52].mxu1 %vm6192_vm1, %v2256_v50  ;;  %v4111_v23 = vrot.slane %v4097_v14, %v14221_v13  ;;  %v4800_v19 = vcombine.low %v16310_v58, %v4776_v4  ;;  %v4801_v42 = vcombine.high %v16310_v58, %v4776_v4  ;;  %v19054_v35 = vcombine.high %v16214_v3, %v16229_v25 }
 0x2e9   :  { %13145 = vmatprep.mubr.msk.bf16.mxu1 %vm13973_vm0, %v18957_v29  ;;  %v19055_v18 = vcombine.high %v16232_v56, %v16235_v32  ;;  %v4802_v44 = vcombine.low %v16313_v52, %v4783_v34  ;;  %v4803_v61 = vcombine.high %v16313_v52, %v4783_v34  ;;  %v19057_v3 = vcombine.high %v19042_v55, %v19043_v36  ;;  %v16454_v36 = vpop.permute.xlu1 %4378 }
 0x2ea   :  { %v1999_v49 = vrot.slane %v19054_v35, %v14221_v13  ;;  %v4118_v58 = vcombine.low %v4079_v12, %v4111_v23  ;;  %13140 = vmatmul.mubr.msk.bf16.vlgmr.msra.gmra.mrb[64].mxu0 %vm6192_vm1, %v2259_v28  ;;  %v4804_v47 = vcombine.low %v16346_v21, %v4792_v63  ;;  %v4806_v56 = vcombine.low %v16350_v15, %v4799_v22 }
 0x2eb   :  { %v16433_v41 = vrot.slane %v19055_v18, %v14221_v13  ;;  %v2031_v25 = vrot.slane %v19057_v3, %v14221_v13  ;;  %v4207_v32 = vshrl.u32 %v3982_v11, 16  ;;  %v19058_v31 = vcombine.high %v19035_v24, %v19034_v6  ;;  %13151 = vmatprep.mubr.msk.bf16.mxu0 %vm13973_vm0, %v18957_v29  ;;  %19059 = vst [vmem:[#allocation29_spill] sm:$0xff] %v16454_v36 }
 0x2ec   :  { %v4805_v10 = vcombine.high %v16346_v21, %v4792_v63  ;;  %v4807_v43 = vcombine.high %v16350_v15, %v4799_v22  ;;  %v4206_v1 = vpack.i.b16 %v4118_v58, %v3982_v11  ;;  %v4208_v37 = vshrl.u32 %v4118_v58, 16  ;;  %v16458_v63 = vpop.permute.xlu0 %4388 }
 0x2ed   :  { %v2167_v52 = vrot.slane %v19058_v31, %v14221_v13  ;;  %v2038_v55 = vcombine.low %v1999_v49, %v2031_v25  ;;  %v3983_v5 = vcombine.high %v3943_v0, %v3975_v39  ;;  %v4119_v45 = vcombine.high %v4079_v12, %v4111_v23  ;;  %19060 = vst [vmem:[#allocation28_spill] sm:$0xff] %v16458_v63 }
 0x2ee   :  { %v12638_v33 = vpack.c.bf16 %v4532_v27, %v4528_v20  ;;  %v12640_v54 = vpack.c.bf16 %v4534_v57, %v4530_v8  ;;  %v7513_v6 = vsel %vm6192_vm1, %v4206_v1, 0  ;;  %v12646_v24 = vpack.c.bf16 %v4533_v9, %v4529_v53 }
 0x2ef   :  { %v2174_v38 = vcombine.low %v16433_v41, %v2167_v52  ;;  %v12642_v4 = vpack.c.bf16 %v4804_v47, %v4800_v19  ;;  %v12644_v34 = vpack.c.bf16 %v4806_v56, %v4802_v44  ;;  %13144 = vmatpush3.bf16.xpose.msra.mxu1 %v7513_v6  ;;  %v4209_v21 = vpack.i.b16 %v4208_v37, %v4207_v32 }
 0x2f0   :  { %v12648_v50 = vpack.c.bf16 %v4535_v7, %v4531_v16  ;;  %v12650_v15 = vpack.c.bf16 %v4805_v10, %v4801_v42  ;;  %v12652_v14 = vpack.c.bf16 %v4807_v43, %v4803_v61  ;;  %13155 = vmatprep.subr.bf16.mxu1 %v18957_v29  ;;  %v2263_v22 = vshrl.u32 %v2038_v55, 16  ;;  %v16468_v16 = vpop.permute.xlu1 %4390  ;;  %v16493_v61 = vpop.permute.xlu0 %4226 }
 0x2f1   :  { %v7560_v39 = vsel %vm6192_vm1, %v4209_v21, 0  ;;  %v2264_v0 = vshrl.u32 %v2174_v38, 16  ;;  %v4213_v20 = vshrl.u32 %v3983_v5, 16  ;;  %v4214_v8 = vshrl.u32 %v4119_v45, 16  ;;  %19061 = vst [vmem:[#allocation27_spill] sm:$0xff] %v16468_v16 }
 0x2f2   :  { %13150 = vmatpush3.bf16.xpose.msra.mxu0 %v7560_v39  ;;  %v4212_v27 = vpack.i.b16 %v4119_v45, %v3983_v5  ;;  %v16463_v53 = vrot.slane %v12638_v33, %v14201_v60  ;;  %v16466_v9 = vrot.slane %v12640_v54, %v14201_v60  ;;  %v2262_v57 = vpack.i.b16 %v2174_v38, %v2038_v55 }
 0x2f3   :  { %13161 = vmatprep.subr.bf16.mxu0 %v18957_v29  ;;  %v16472_v11 = vrot.slane %v12642_v4, %v14201_v60  ;;  %v16475_v7 = vrot.slane %v12644_v34, %v14201_v60  ;;  %v16478_v12 = vrot.slane %v12646_v24, %v14201_v60  ;;  %v16483_v28 = vrot.slane %v12648_v50, %v14201_v60 }
 0x2f4   :  { %v5584_v23 = vcombine.low %v16463_v53, %v16466_v9  ;;  %v16486_v19 = vrot.slane %v12650_v15, %v14201_v60  ;;  %v16489_v42 = vrot.slane %v12652_v14, %v14201_v60  ;;  %v2265_v35 = vpack.i.b16 %v2264_v0, %v2263_v22  ;;  %v16517_v43 = vpop.permute.xlu1 %4224  ;;  %v4249_v5 = vpop.permute.xlu0 %4248 }
 0x2f5   :  { %v4215_v18 = vpack.i.b16 %v4214_v8, %v4213_v20  ;;  %v5616_v44 = vcombine.low %v16472_v11, %v16475_v7  ;;  %v7607_v58 = vsel %vm6192_vm1, %v4212_v27, 0  ;;  %v2039_v3 = vcombine.high %v1999_v49, %v2031_v25 }
 0x2f6   :  { %13146 = vmatmul.mubr.msk.bf16.vlgmr.msra.gmra.mrb[56].mxu1 %vm6192_vm1, %v2262_v57  ;;  %v5720_v47 = vcombine.low %v16478_v12, %v16483_v28  ;;  %v5752_v56 = vcombine.low %v16486_v19, %v16489_v42  ;;  %v2175_v32 = vcombine.high %v16433_v41, %v2167_v52  ;;  %v16505_v31 = vrot.slane %v5584_v23, %v14221_v13 }
 0x2f7   :  { %13156 = vmatpush3.bf16.xpose.msra.mxu1 %v7607_v58  ;;  %13157 = vmatprep.mubr.msk.bf16.mxu1 %vm13973_vm0, %v18957_v29  ;;  %v16508_v10 = vrot.slane %v5616_v44, %v14221_v13  ;;  %v7654_v41 = vsel %vm6192_vm1, %v4215_v18, 0  ;;  %v2269_v55 = vshrl.u32 %v2039_v3, 16 }
 0x2f8   :  { %13167 = vmatprep.subr.bf16.mxu1 %v18957_v29  ;;  %v16512_v49 = vrot.slane %v5720_v47, %v14221_v13  ;;  %v16515_v25 = vrot.slane %v5752_v56, %v14221_v13  ;;  %v2270_v37 = vshrl.u32 %v2175_v32, 16  ;;  %v2268_v45 = vpack.i.b16 %v2175_v32, %v2039_v3  ;;  %v4237_v6 = vpop.permute.xlu1 %4236  ;;  %v4261_v34 = vpop.permute.xlu0 %4260  ;;  %v19062_v47 = vld [vmem:[#allocation15_spill] sm:$0xff] }
 0x2f9   :  { %13152 = vmatmul.mubr.msk.bf16.vlgmr.msra.gmra.mrb[68].mxu0 %vm6192_vm1, %v2265_v35  ;;  %v5648_v52 = vcombine.low %v16505_v31, %v16508_v10  ;;  %v4944_v56 = vcombine.low %v19062_v47, %v4237_v6  ;;  %v4945_v32 = vcombine.high %v19062_v47, %v4237_v6 }
 0x2fa   :  { %13162 = vmatpush3.bf16.xpose.msra.mxu0 %v7654_v41  ;;  %13163 = vmatprep.mubr.msk.bf16.mxu0 %vm13973_vm0, %v18957_v29  ;;  %v5784_v1 = vcombine.low %v16512_v49, %v16515_v25  ;;  %v2271_v24 = vpack.i.b16 %v2270_v37, %v2269_v55  ;;  %v4960_v55 = vcombine.low %v16517_v43, %v4249_v5 }
 0x2fb   :  { %13173 = vmatprep.subr.bf16.mxu0 %v18957_v29  ;;  %v6068_v38 = vshrl.u32 %v5648_v52, 16  ;;  %v4961_v37 = vcombine.high %v16517_v43, %v4249_v5 }
 0x2fc   :  { %v6066_v33 = vpack.i.b16 %v5784_v1, %v5648_v52  ;;  %v6069_v54 = vshrl.u32 %v5784_v1, 16  ;;  %v4239_v21 = vpop.permute.xlu1 %4238  ;;  %v4273_v50 = vpop.permute.xlu0 %4272 }
 0x2fe   :  { %13158 = vmatmul.mubr.msk.bf16.vlgmr.msra.gmra.mrb[60].mxu1 %vm6192_vm1, %v2268_v45  ;;  %v6070_v4 = vpack.i.b16 %v6069_v54, %v6068_v38 }
 0x2ff   :  { %13168 = vmatpush3.bf16.msra.mxu1 %v6066_v33  ;;  %13169 = vmatprep.mubr.msk.bf16.mxu1 %vm13973_vm0, %v18957_v29 }
 0x300   :  { %13179 = vmatprep.subr.bf16.mxu1 %v18957_v29  ;;  %v16536_v15 = vpop.permute.xlu1 %4250  ;;  %v4285_v14 = vpop.permute.xlu0 %4284 }
 0x301   :  { %13164 = vmatmul.mubr.msk.bf16.vlgmr.msra.gmra.mrb[72].mxu0 %vm6192_vm1, %v2271_v24  ;;  %v4976_v41 = vcombine.low %v4261_v34, %v4285_v14  ;;  %v4977_v52 = vcombine.high %v4261_v34, %v4285_v14  ;;  %v4952_v24 = vrot.slane %v4944_v56, %v14201_v60 }
 0x302   :  { %13174 = vmatpush3.bf16.msra.mxu0 %v6070_v4  ;;  %13175 = vmatprep.mubr.msk.bf16.mxu0 %vm13973_vm0, %v18957_v29  ;;  %v4959_v4 = vrot.slane %v4945_v32, %v14201_v60 }
 0x303   :  { %13185 = vmatprep.subr.bf16.mxu0 %v18957_v29  ;;  %v4984_v34 = vrot.slane %v4976_v41, %v14201_v60 }
 0x304   :  { %v16542_v0 = vpop.permute.xlu1 %4262  ;;  %v4297_v18 = vpop.permute.xlu0 %4296 }
 0x305   :  { %v4992_v44 = vcombine.low %v4273_v50, %v4297_v18  ;;  %v4993_v58 = vcombine.high %v4273_v50, %v4297_v18  ;;  %v4991_v50 = vrot.slane %v4977_v52, %v14201_v60  ;;  %v5217_v18 = vcombine.high %v18985_v26, %v4239_v21 }
 0x307   :  { %v5000_v45 = vrot.slane %v4992_v44, %v14201_v60  ;;  %v5007_v33 = vrot.slane %v4993_v58, %v14201_v60 }
 0x308   :  { %v16548_v3 = vpop.permute.xlu1 %4274 }
 0x309   :  { %v5040_v58 = vcombine.low %v4984_v34, %v5000_v45  ;;  %v5041_v47 = vcombine.high %v4984_v34, %v5000_v45  ;;  %v5056_v56 = vcombine.low %v4991_v50, %v5007_v33  ;;  %v5057_v32 = vcombine.high %v4991_v50, %v5007_v33 }
 0x30a   :  { %v16582_v33 = vrot.slane %v5217_v18, %v14201_v60 }
 0x30b   :  { %v16538_v22 = vpop.f32.mrb[8].mxu0  ;;  %v16590_v34 = vrot.slane %v5040_v58, %v14221_v13 }
 0x30c   :  { %v16540_v39 = vpop.f32.mrb[4].mxu1  ;;  %v12979_v20 = vpop.f32.mrb[9].mxu0 }
 0x30d   :  { %v12991_v8 = vpop.f32.mrb[5].mxu1  ;;  %v16544_v27 = vpop.f32.mrb[10].mxu0  ;;  %v19063_v20 = vlaneseq }
 0x30e   :  { %v16546_v57 = vpop.f32.mrb[6].mxu1  ;;  %v12980_v23 = vpop.f32.mrb[11].mxu0  ;;  %v4968_v8 = vrot.slane %v4960_v55, %v14201_v60  ;;  %v5232_v55 = vcombine.low %v16493_v61, %v16536_v15 }
 0x30f   :  { %v12992_v35 = vpop.f32.mrb[7].mxu1  ;;  %v16564_v14 = vpop.permute.xlu1 %4286  ;;  %v7701_v43 = vand.u32 127, %v19063_v20  ;;  %v4975_v23 = vrot.slane %v4961_v37, %v14201_v60  ;;  %v19064_v20 = vld [vmem:[#allocation17_spill] sm:$0xff]  ;;  %v5233_v37 = vcombine.high %v16493_v61, %v16536_v15  ;;  %v16593_v61 = vrot.slane %v5041_v47, %v14221_v13 }
 0x310   :  { %v5216_v35 = vcombine.low %v18985_v26, %v4239_v21  ;;  %v5008_v52 = vcombine.low %v4952_v24, %v4968_v8  ;;  %v7699_v29 = vadd.s32 8, %v19064_v20  ;;  %v16596_v15 = vrot.slane %v5056_v56, %v14221_v13 }
 0x311   :  { %vm16585_vm3 = vcmp.ge.s32.totalorder %v19064_v20, %v7701_v43  ;;  %v16617_v56 = vrot.slane %v5232_v55, %v14201_v60 }
 0x312   :  { %v16579_v45 = vrot.slane %v5216_v35, %v14201_v60  ;;  %vm16612_vm4 = vcmp.ge.s32.totalorder %v7699_v29, %v7701_v43  ;;  %v5248_v29 = vcombine.low %v16542_v0, %v16564_v14 }
 0x313   :  { %v4299_v50 = vpop.permute.xlu1 %4298 }
 0x314   :  { %v5264_v43 = vcombine.low %v16548_v3, %v4299_v50 }
 0x317   :  { %v16552_v1 = vpop.f32.mrb[12].mxu0 }
 0x318   :  { %v12985_v38 = vpop.f32.mrb[13].mxu0 }
 0x319   :  { %v16558_v54 = vpop.f32.mrb[14].mxu0  ;;  %v5009_v38 = vcombine.high %v4952_v24, %v4968_v8 }
 0x31a   :  { %v12986_v6 = vpop.f32.mrb[15].mxu0 }
 0x31b   :  { %v5024_v6 = vcombine.low %v4959_v4, %v4975_v23  ;;  %v16607_v35 = vrot.slane %v5009_v38, %v14221_v13  ;;  %v16630_v38 = vsel %vm16585_vm3, %v16540_v39, -1e+30  ;;  %v16645_v39 = vsel %vm16612_vm4, %v16544_v27, -1e+30 }
 0x31c   :  { %v7785_v20 = vsel %vm7772_vm2, %v16630_v38, -inf  ;;  %v16662_v27 = vsel %vm16585_vm3, %v16552_v1, -1e+30  ;;  %v7776_v1 = vsel %vm7772_vm2, %v16645_v39, -inf }
 0x31d   :  { %v6421_v5 = vpop.f32.mrb[8].mxu1  ;;  %v16610_v18 = vrot.slane %v5024_v6, %v14221_v13  ;;  %7786 = vmax.xlane.f32.xlu1 %v7785_v20  ;;  %v5272_v20 = vrot.slane %v5264_v43, %v14201_v60  ;;  %v7779_v43 = vsel %vm7772_vm2, %v16662_v27, -inf }
 0x31e   :  { %v13003_v44 = vpop.f32.mrb[9].mxu1 }
 0x31f   :  { %v16571_v41 = vpop.f32.mrb[10].mxu1  ;;  %v5025_v44 = vcombine.high %v4959_v4, %v4975_v23  ;;  %v16599_v4 = vrot.slane %v5057_v32, %v14221_v13  ;;  %v16604_v23 = vrot.slane %v5008_v52, %v14221_v13  ;;  %v16620_v32 = vrot.slane %v5233_v37, %v14201_v60 }
 0x320   :  { %v13004_v62 = vpop.f32.mrb[11].mxu1  ;;  %v6374_v21 = vpop.f32.mrb[16].mxu0  ;;  %v16625_v52 = vsel %vm16585_vm3, %v16538_v22, -1e+30  ;;  %v5249_v22 = vcombine.high %v16542_v0, %v16564_v14  ;;  %v5265_v37 = vcombine.high %v16548_v3, %v4299_v50  ;;  %v16672_v50 = vsel %vm16585_vm3, %v6421_v5, -1e+30 }
 0x321   :  { %v12997_v62 = vpop.f32.mrb[17].mxu0  ;;  %v7773_v6 = vsel %vm7772_vm2, %v16625_v52, -inf  ;;  %v16653_v26 = vrot.slane %v5025_v44, %v14221_v13  ;;  %v16683_v3 = vcombine.high %v16505_v31, %v16508_v10  ;;  %v5256_v0 = vrot.slane %v5248_v29, %v14201_v60  ;;  %7777 = vmax.xlane.f32.xlu1 %v7776_v1 }
 0x322   :  { %v16601_v8 = vpop.f32.mrb[18].mxu0  ;;  %v16650_v62 = vsel %vm16612_vm4, %v16546_v57, -1e+30  ;;  %7774 = vmax.xlane.f32.xlu0 %v7773_v6  ;;  %v5263_v44 = vrot.slane %v5249_v22, %v14201_v60  ;;  %v5279_v5 = vrot.slane %v5265_v37, %v14201_v60  ;;  %v7797_v57 = vsel %vm7772_vm2, %v16672_v50, -inf }
 0x323   :  { %v12998_v47 = vpop.f32.mrb[19].mxu0  ;;  %19069 = vst [vmem:[#allocation36_spill] sm:$0xff] %v16683_v3  ;;  %v16694_v31 = vcombine.high %v16512_v49, %v16515_v25  ;;  %v6076_v10 = vshrl.u32 %v16683_v3, 16  ;;  %v5585_v29 = vcombine.high %v16463_v53, %v16466_v9  ;;  %v16701_v22 = vsel %vm16585_vm3, %v6374_v21, -1e+30 }
 0x324   :  { %v5721_v1 = vcombine.high %v16478_v12, %v16483_v28  ;;  %v5753_v49 = vcombine.high %v16486_v19, %v16489_v42  ;;  %v5312_v25 = vcombine.low %v5256_v0, %v5272_v20  ;;  %v5313_v42 = vcombine.high %v5256_v0, %v5272_v20 }
 0x325   :  { %19070 = vst [vmem:[#allocation22_spill] sm:$0xff] %v16694_v31  ;;  %v6077_v9 = vshrl.u32 %v16694_v31, 16  ;;  %v5599_v21 = vrot.slane %v5585_v29, %v14221_v13  ;;  %7798 = vmax.xlane.f32.xlu1 %v7797_v57  ;;  %v7791_v53 = vsel %vm7772_vm2, %v16701_v22, -inf  ;;  %v16740_v0 = vsel %vm16612_vm4, %v16571_v41, -1e+30 }
 0x326   :  { %v6515_v55 = vpop.f32.mrb[12].mxu1  ;;  %v5735_v28 = vrot.slane %v5721_v1, %v14221_v13  ;;  %v5767_v19 = vrot.slane %v5753_v49, %v14221_v13  ;;  %v5297_v41 = vcombine.high %v16582_v33, %v16620_v32  ;;  %v19081_v31 = vcombine.low %v16604_v23, %v16590_v34 }
 0x327   :  { %v13015_v47 = vpop.f32.mrb[13].mxu1  ;;  %v16725_v29 = vpack.i.b16 %v6077_v9, %v6076_v10  ;;  %v16744_v20 = vsel %vm16585_vm3, %v6515_v55, -1e+30  ;;  %v16755_v9 = vrot.slane %v5312_v25, %v14221_v13 }
 0x328   :  { %v16674_v6 = vpop.f32.mrb[14].mxu1  ;;  %v7788_v47 = vsel %vm7772_vm2, %v16650_v62, -inf  ;;  %v7809_v10 = vsel %vm7772_vm2, %v16744_v20, -inf }
 0x329   :  { %7789 = vmax.xlane.f32.xlu0 %v7788_v47  ;;  %v13016_v14 = vpop.f32.mrb[15].mxu1  ;;  %v6468_v36 = vpop.f32.mrb[20].mxu0  ;;  %19071 = vst [vmem:[#allocation21_spill] sm:$0xff] %v16725_v29  ;;  %7792 = vmax.xlane.f32.xlu1 %v7791_v53 }
 0x32a   :  { %v13009_v37 = vpop.f32.mrb[21].mxu0  ;;  %v5617_v14 = vcombine.high %v16472_v11, %v16475_v7  ;;  %v16718_v11 = vsel %vm16612_vm4, %v16558_v54, -1e+30  ;;  %v16729_v54 = vcombine.low %v5735_v28, %v5767_v19 }
 0x32b   :  { %v16709_v47 = vpop.f32.mrb[22].mxu0  ;;  %v5328_v37 = vcombine.low %v5263_v44, %v5279_v5  ;;  %v7782_v1 = vsel %vm7772_vm2, %v16718_v11, -inf }
 0x32c   :  { %v13010_v7 = vpop.f32.mrb[23].mxu0  ;;  %v5631_v12 = vrot.slane %v5617_v14, %v14221_v13  ;;  %19073 = vst [vmem:[#allocation26_spill] sm:$0xff] %v16729_v54  ;;  %v5329_v14 = vcombine.high %v5263_v44, %v5279_v5  ;;  %v6085_v44 = vshrl.u32 %v16729_v54, 16  ;;  %v7800_v5 = vsel %vm7772_vm2, %v16740_v0, -inf }
 0x32d   :  { %7780 = vmax.xlane.f32.xlu0 %v7779_v43  ;;  %v16733_v43 = vcombine.high %v5735_v28, %v5767_v19  ;;  %v16760_v7 = vrot.slane %v5313_v42, %v14221_v13  ;;  %v16765_v28 = vsel %vm16585_vm3, %v6468_v36, -1e+30  ;;  %v5078_v36 = vcombine.low %v16653_v26, %v16599_v4  ;;  %7810 = vmax.xlane.f32.xlu1 %v7809_v10 }
 0x32e   :  { %v16727_v3 = vcombine.low %v5599_v21, %v5631_v12  ;;  %v16731_v57 = vcombine.high %v5599_v21, %v5631_v12  ;;  %v5336_v12 = vrot.slane %v5328_v37, %v14221_v13  ;;  %v5343_v25 = vrot.slane %v5329_v14, %v14221_v13 }
 0x32f   :  { %19075 = vst [vmem:[#allocation33_spill] sm:$0xff] %v16733_v43  ;;  %v6093_v53 = vshrl.u32 %v16733_v43, 16  ;;  %v5076_v37 = vcombine.low %v16610_v18, %v16596_v15  ;;  %v19078_v14 = vcombine.low %v16579_v45, %v16617_v56  ;;  %v5073_v10 = vcombine.high %v16604_v23, %v16590_v34 }
 0x330   :  { %19072 = vst [vmem:[#allocation35_spill] sm:$0xff] %v16727_v3  ;;  %19074 = vst [vmem:[#allocation13_spill] sm:$0xff] %v16731_v57  ;;  %v6084_v49 = vshrl.u32 %v16727_v3, 16  ;;  %v6092_v21 = vshrl.u32 %v16731_v57, 16  ;;  %v5079_v3 = vcombine.high %v16653_v26, %v16599_v4  ;;  %v16817_v54 = vsel %vm16612_vm4, %v16674_v6, -1e+30 }
 0x331   :  { %7783 = vmax.xlane.f32.xlu0 %v7782_v1  ;;  %v12654_v30 = vpack.c.bf16 %v5076_v37, %v19081_v31  ;;  %v7812_v34 = vsel %vm7772_vm2, %v16817_v54, -inf }
 0x332   :  { %v16767_v1 = vpack.i.b16 %v6085_v44, %v6084_v49  ;;  %v16776_v42 = vpack.i.b16 %v6093_v53, %v6092_v21  ;;  %v5288_v49 = vrot.slane %v19078_v14, %v14221_v13  ;;  %v16789_v44 = vsel %vm16612_vm4, %v16601_v8, -1e+30 }
 0x333   :  { %v6562_v55 = vpop.f32.mrb[24].mxu0  ;;  %v19079_v53 = vcombine.high %v16579_v45, %v16617_v56  ;;  %v5311_v14 = vrot.slane %v5297_v41, %v14221_v13 }
 0x334   :  { %v13021_v19 = vpop.f32.mrb[25].mxu0  ;;  %19076 = vst [vmem:[#allocation15_spill] sm:$0xff] %v16767_v1  ;;  %19077 = vst [vmem:[#allocation17_spill] sm:$0xff] %v16776_v42  ;;  %v19080_v42 = vcombine.low %v16582_v33, %v16620_v32  ;;  %v7803_v1 = vsel %vm7772_vm2, %v16765_v28, -inf  ;;  %v5344_v45 = vcombine.low %v5288_v49, %v16755_v9  ;;  %v7794_v32 = vsel %vm7772_vm2, %v16789_v44, -inf }
 0x335   :  { %v16774_v57 = vpop.f32.mrb[26].mxu0  ;;  %7801 = vmax.xlane.f32.xlu0 %v7800_v5  ;;  %v5295_v19 = vrot.slane %v19079_v53, %v14221_v13  ;;  %v5075_v5 = vcombine.high %v16607_v35, %v16593_v61  ;;  %v5350_v33 = vcombine.low %v5311_v14, %v5343_v25  ;;  %7804 = vmax.xlane.f32.xlu1 %v7803_v1 }
 0x336   :  { %v13022_v21 = vpop.f32.mrb[27].mxu0  ;;  %v5304_v43 = vrot.slane %v19080_v42, %v14221_v13  ;;  %v5077_v42 = vcombine.high %v16610_v18, %v16596_v15  ;;  %v19082_v15 = vcombine.low %v16607_v35, %v16593_v61  ;;  %v5345_v4 = vcombine.high %v5288_v49, %v16755_v9 }
 0x337   :  { %v5346_v21 = vcombine.low %v5295_v19, %v16760_v7  ;;  %v5351_v48 = vcombine.high %v5311_v14, %v5343_v25  ;;  %v12664_v31 = vpack.c.bf16 %v5079_v3, %v5075_v5  ;;  %v5800_v25 = vrot.slane %v12654_v30, %v14201_v60 }
 0x338   :  { %v6609_v8 = vpop.f32.mrb[16].mxu1  ;;  %v5348_v53 = vcombine.low %v5304_v43, %v5336_v12  ;;  %v12656_v26 = vpack.c.bf16 %v5078_v36, %v19082_v15  ;;  %v5349_v18 = vcombine.high %v5304_v43, %v5336_v12  ;;  %v12662_v35 = vpack.c.bf16 %v5077_v42, %v5073_v10 }
 0x339   :  { %v13027_v56 = vpop.f32.mrb[17].mxu1  ;;  %7795 = vmax.xlane.f32.xlu0 %v7794_v32  ;;  %v5347_v32 = vcombine.high %v5295_v19, %v16760_v7  ;;  %v12660_v16 = vpack.c.bf16 %v5350_v33, %v5346_v21  ;;  %v16844_v43 = vsel %vm16612_vm4, %v16709_v47, -1e+30  ;;  %v5952_v21 = vrot.slane %v12664_v31, %v14201_v60 }
 0x33a   :  { %v6612_v41 = vpop.f32.mrb[18].mxu1  ;;  %v16821_v56 = vsel %vm16585_vm3, %v6609_v8, -1e+30  ;;  %v16833_v8 = vsel %vm16585_vm3, %v6562_v55, -1e+30  ;;  %v12658_v1 = vpack.c.bf16 %v5348_v53, %v5344_v45  ;;  %v12666_v55 = vpack.c.bf16 %v5349_v18, %v5345_v4 }
 0x33b   :  { %v13028_v29 = vpop.f32.mrb[19].mxu1  ;;  %v6656_v6 = vpop.f32.mrb[28].mxu0  ;;  %v7821_v61 = vsel %vm7772_vm2, %v16821_v56, -inf  ;;  %v7815_v7 = vsel %vm7772_vm2, %v16833_v8, -inf  ;;  %v5816_v37 = vrot.slane %v12656_v26, %v14201_v60  ;;  %v12668_v36 = vpack.c.bf16 %v5351_v48, %v5347_v32 }
 0x33c   :  { %v13033_v29 = vpop.f32.mrb[29].mxu0  ;;  %7822 = vmax.xlane.f32.xlu1 %v7821_v61  ;;  %v7806_v3 = vsel %vm7772_vm2, %v16844_v43, -inf  ;;  %v16854_v47 = vsel %vm16612_vm4, %v6612_v41, -1e+30  ;;  %v5832_v14 = vrot.slane %v12658_v1, %v14201_v60  ;;  %v5848_v10 = vrot.slane %v12660_v16, %v14201_v60 }
 0x33d   :  { %v16839_v23 = vpop.f32.mrb[30].mxu0  ;;  %7813 = vmax.xlane.f32.xlu0 %v7812_v34  ;;  %v5856_v48 = vcombine.low %v5800_v25, %v5816_v37  ;;  %v5936_v45 = vrot.slane %v12662_v35, %v14201_v60  ;;  %v5968_v41 = vrot.slane %v12666_v55, %v14201_v60  ;;  %v16868_v16 = vsel %vm16612_vm4, %v16774_v57, -1e+30 }
 0x33e   :  { %v13034_v9 = vpop.f32.mrb[31].mxu0  ;;  %v5888_v33 = vcombine.low %v5832_v14, %v5848_v10  ;;  %v16872_v42 = vsel %vm16585_vm3, %v6656_v6, -1e+30  ;;  %v5984_v26 = vrot.slane %v12668_v36, %v14201_v60  ;;  %v7824_v18 = vsel %vm7772_vm2, %v16854_v47, -inf }
 0x33f   :  { %v5992_v4 = vcombine.low %v5936_v45, %v5952_v21  ;;  %v5864_v1 = vrot.slane %v5856_v48, %v14221_v13  ;;  %v5857_v35 = vcombine.high %v5800_v25, %v5816_v37  ;;  %v7827_v31 = vsel %vm7772_vm2, %v16872_v42, -inf }
 0x340   :  { %v6703_v12 = vpop.f32.mrb[20].mxu1  ;;  %7816 = vmax.xlane.f32.xlu1 %v7815_v7  ;;  %v5896_v57 = vrot.slane %v5888_v33, %v14221_v13  ;;  %v6024_v61 = vcombine.low %v5968_v41, %v5984_v26  ;;  %v5993_v48 = vcombine.high %v5936_v45, %v5952_v21  ;;  %v6025_v33 = vcombine.high %v5968_v41, %v5984_v26 }
 0x341   :  { %v13039_v49 = vpop.f32.mrb[21].mxu1  ;;  %7807 = vmax.xlane.f32.xlu0 %v7806_v3  ;;  %v16860_v30 = vsel %vm16585_vm3, %v6703_v12, -1e+30  ;;  %v7818_v12 = vsel %vm7772_vm2, %v16868_v16, -inf }
 0x342   :  { %v6706_v19 = vpop.f32.mrb[22].mxu1  ;;  %v7833_v32 = vsel %vm7772_vm2, %v16860_v30, -inf  ;;  %v16889_v55 = vcombine.low %v5864_v1, %v5896_v57  ;;  %v16891_v7 = vcombine.high %v5864_v1, %v5896_v57  ;;  %v6000_v49 = vrot.slane %v5992_v4, %v14221_v13 }
 0x343   :  { %v13040_v5 = vpop.f32.mrb[23].mxu1  ;;  %v6750_v53 = vpop.f32.mrb[32].mxu0  ;;  %v16885_v6 = vsel %vm16612_vm4, %v6706_v19, -1e+30  ;;  %v6032_v3 = vrot.slane %v6024_v61, %v14221_v13  ;;  %v5889_v19 = vcombine.high %v5832_v14, %v5848_v10  ;;  %v6007_v1 = vrot.slane %v5993_v48, %v14221_v13 }
 0x344   :  { %v13045_v15 = vpop.f32.mrb[33].mxu0  ;;  %7834 = vmax.xlane.f32.xlu1 %v7833_v32  ;;  %19083 = vst [vmem:[#allocation40_spill] sm:$0xff] %v16889_v55  ;;  %19084 = vst [vmem:[#allocation41_spill] sm:$0xff] %v16891_v7  ;;  %v7836_v25 = vsel %vm7772_vm2, %v16885_v6, -inf  ;;  %v5871_v5 = vrot.slane %v5857_v35, %v14221_v13  ;;  %v6039_v57 = vrot.slane %v6025_v33, %v14221_v13  ;;  %v6132_v45 = vshrl.u32 %v16889_v55, 16 }
 0x345   :  { %v16879_v29 = vpop.f32.mrb[34].mxu0  ;;  %7825 = vmax.xlane.f32.xlu0 %v7824_v18  ;;  %v16904_v32 = vcombine.low %v6000_v49, %v6032_v3  ;;  %v16906_v4 = vcombine.high %v6000_v49, %v6032_v3  ;;  %v5903_v14 = vrot.slane %v5889_v19, %v14221_v13  ;;  %v6140_v21 = vshrl.u32 %v16891_v7, 16 }
 0x346   :  { %v13046_v34 = vpop.f32.mrb[35].mxu0  ;;  %v16915_v41 = vsel %vm16585_vm3, %v6750_v53, -1e+30  ;;  %v16932_v49 = vsel %vm16612_vm4, %v16839_v23, -1e+30  ;;  %v16936_v48 = vcombine.high %v6007_v1, %v6039_v57 }
 0x347   :  { %19085 = vst [vmem:[#allocation42_spill] sm:$0xff] %v16904_v32  ;;  %19086 = vst [vmem:[#allocation43_spill] sm:$0xff] %v16906_v4  ;;  %v16921_v35 = vcombine.low %v5871_v5, %v5903_v14  ;;  %v6141_v53 = vshrl.u32 %v16906_v4, 16  ;;  %v16934_v19 = vcombine.high %v5871_v5, %v5903_v14 }
 0x348   :  { %v6797_v9 = vpop.f32.mrb[24].mxu1  ;;  %7828 = vmax.xlane.f32.xlu1 %v7827_v31  ;;  %19090 = vst [vmem:[#allocation47_spill] sm:$0xff] %v16936_v48 }
 0x349   :  { %v13051_v36 = vpop.f32.mrb[25].mxu1  ;;  %7819 = vmax.xlane.f32.xlu0 %v7818_v12  ;;  %v16902_v15 = vsel %vm16585_vm3, %v6797_v9, -1e+30  ;;  %19087 = vst [vmem:[#allocation44_spill] sm:$0xff] %v16921_v35  ;;  %v16925_v12 = vcombine.low %v6007_v1, %v6039_v57  ;;  %19089 = vst [vmem:[#allocation46_spill] sm:$0xff] %v16934_v19  ;;  %v6148_v33 = vshrl.u32 %v16921_v35, 16  ;;  %v16945_v23 = vpack.i.b16 %v6141_v53, %v6140_v21 }
 0x34a   :  { %v6800_v37 = vpop.f32.mrb[26].mxu1  ;;  %v7845_v31 = vsel %vm7772_vm2, %v16902_v15, -inf  ;;  %v6133_v36 = vshrl.u32 %v16904_v32, 16  ;;  %v6156_v1 = vshrl.u32 %v16934_v19, 16  ;;  %v7830_v57 = vsel %vm7772_vm2, %v16932_v49, -inf }
 0x34b   :  { %v13052_v18 = vpop.f32.mrb[27].mxu1  ;;  %v6844_v10 = vpop.f32.mrb[36].mxu0  ;;  %19088 = vst [vmem:[#allocation45_spill] sm:$0xff] %v16925_v12  ;;  %19092 = vst [vmem:[#allocation49_spill] sm:$0xff] %v16945_v23  ;;  %v6149_v14 = vshrl.u32 %v16925_v12, 16 }
 0x34c   :  { %v13057_v26 = vpop.f32.mrb[37].mxu0  ;;  %7846 = vmax.xlane.f32.xlu1 %v7845_v31  ;;  %v7839_v18 = vsel %vm7772_vm2, %v16915_v41, -inf  ;;  %v16943_v34 = vpack.i.b16 %v6133_v36, %v6132_v45  ;;  %v16956_v45 = vsel %vm16612_vm4, %v6800_v37, -1e+30  ;;  %v16968_v5 = vsel %vm16585_vm3, %v6844_v10, -1e+30 }
 0x34d   :  { %v6847_v9 = vpop.f32.mrb[38].mxu0  ;;  %7837 = vmax.xlane.f32.xlu0 %v7836_v25  ;;  %v16962_v53 = vpack.i.b16 %v6149_v14, %v6148_v33  ;;  %v7848_v61 = vsel %vm7772_vm2, %v16956_v45, -inf }
 0x34e   :  { %v13058_v3 = vpop.f32.mrb[39].mxu0  ;;  %19091 = vst [vmem:[#allocation48_spill] sm:$0xff] %v16943_v34 }
 0x34f   :  { %v6157_v3 = vshrl.u32 %v16936_v48, 16  ;;  %19093 = vst [vmem:[#allocation50_spill] sm:$0xff] %v16962_v53  ;;  %v17017_v48 = vpop.permute.xlu1 %4308 }
 0x350   :  { %7840 = vmax.xlane.f32.xlu1 %v7839_v18  ;;  %v7851_v18 = vsel %vm7772_vm2, %v16968_v5, -inf  ;;  %19095 = vst [vmem:[#allocation52_spill] sm:$0xff] %v17017_v48 }
 0x351   :  { %v6891_v26 = vpop.f32.mrb[28].mxu1  ;;  %7831 = vmax.xlane.f32.xlu0 %v7830_v57 }
 0x352   :  { %v13063_v25 = vpop.f32.mrb[29].mxu1  ;;  %v16960_v21 = vsel %vm16585_vm3, %v6891_v26, -1e+30  ;;  %v16977_v26 = vsel %vm16612_vm4, %v16879_v29, -1e+30 }
 0x353   :  { %v6894_v31 = vpop.f32.mrb[30].mxu1  ;;  %v16964_v25 = vpack.i.b16 %v6157_v3, %v6156_v1  ;;  %v7857_v37 = vsel %vm7772_vm2, %v16960_v21, -inf  ;;  %v7842_v1 = vsel %vm7772_vm2, %v16977_v26, -inf }
 0x354   :  { %v13064_v36 = vpop.f32.mrb[31].mxu1  ;;  %7858 = vmax.xlane.f32.xlu1 %v7857_v37  ;;  %v16985_v3 = vsel %vm16612_vm4, %v6894_v31, -1e+30 }
 0x355   :  { %19094 = vst [vmem:[#allocation51_spill] sm:$0xff] %v16964_v25  ;;  %v6938_v57 = vpop.f32.mrb[40].mxu0  ;;  %7849 = vmax.xlane.f32.xlu0 %v7848_v61  ;;  %v7860_v29 = vsel %vm7772_vm2, %v16985_v3, -inf  ;;  %v16991_v61 = vsel %vm16612_vm4, %v6847_v9, -1e+30 }
 0x356   :  { %v13069_v33 = vpop.f32.mrb[41].mxu0  ;;  %v7854_v36 = vsel %vm7772_vm2, %v16991_v61, -inf  ;;  %v17003_v9 = vsel %vm16585_vm3, %v6938_v57, -1e+30 }
 0x357   :  { %v6941_v10 = vpop.f32.mrb[42].mxu0  ;;  %v7863_v57 = vsel %vm7772_vm2, %v17003_v9, -inf }
 0x358   :  { %v13070_v14 = vpop.f32.mrb[43].mxu0  ;;  %7852 = vmax.xlane.f32.xlu1 %v7851_v18  ;;  %v17013_v53 = vsel %vm16612_vm4, %v6941_v10, -1e+30 }
 0x359   :  { %7843 = vmax.xlane.f32.xlu0 %v7842_v1 }
 0x35d   :  { %7861 = vmax.xlane.f32.xlu0 %v7860_v29 }
 0x361   :  { %7855 = vmax.xlane.f32.xlu0 %v7854_v36 }
 0x37f   :  { %v6985_v37 = vpop.f32.mrb[32].mxu1 }
 0x380   :  { %v16997_v33 = vsel %vm16585_vm3, %v6985_v37, -1e+30  ;;  %v13075_v31 = vpop.f32.mrb[33].mxu1 }
 0x381   :  { %v7869_v18 = vsel %vm7772_vm2, %v16997_v33, -inf  ;;  %v6988_v14 = vpop.f32.mrb[34].mxu1  ;;  %v7032_v1 = vpop.f32.mrb[44].mxu0 }
 0x382   :  { %v17007_v29 = vsel %vm16612_vm4, %v6988_v14, -1e+30  ;;  %v13076_v36 = vpop.f32.mrb[35].mxu1  ;;  %7870 = vmax.xlane.f32.xlu1 %v7869_v18  ;;  %v13081_v25 = vpop.f32.mrb[45].mxu0  ;;  %v7866_v18 = vsel %vm7772_vm2, %v17013_v53, -inf }
 0x383   :  { %v7872_v37 = vsel %vm7772_vm2, %v17007_v29, -inf  ;;  %v7035_v31 = vpop.f32.mrb[46].mxu0  ;;  %v17021_v14 = vpop.permute.xlu1 %4320 }
 0x384   :  { %7873 = vmax.xlane.f32.xlu0 %v7872_v37  ;;  %v13082_v19 = vpop.f32.mrb[47].mxu0  ;;  %19096 = vst [vmem:[#allocation53_spill] sm:$0xff] %v17021_v14  ;;  %v17027_v37 = vpop.permute.xlu0 %4310 }
 0x385   :  { %19097 = vst [vmem:[#allocation54_spill] sm:$0xff] %v17027_v37  ;;  %v17043_v37 = vsel %vm16612_vm4, %v7035_v31, -1e+30 }
 0x386   :  { %7864 = vmax.xlane.f32.xlu1 %v7863_v57  ;;  %v17033_v57 = vsel %vm16585_vm3, %v7032_v1, -1e+30 }
 0x387   :  { %v7875_v1 = vsel %vm7772_vm2, %v17033_v57, -inf  ;;  %v17047_v12 = vpop.permute.xlu1 %4322 }
 0x388   :  { %7867 = vmax.xlane.f32.xlu0 %v7866_v18  ;;  %19098 = vst [vmem:[#allocation55_spill] sm:$0xff] %v17047_v12 }
 0x389   :  { %v7079_v25 = vpop.f32.mrb[36].mxu1 }
 0x38a   :  { %v17025_v36 = vsel %vm16585_vm3, %v7079_v25, -1e+30  ;;  %v13087_v10 = vpop.f32.mrb[37].mxu1 }
 0x38b   :  { %v7881_v19 = vsel %vm7772_vm2, %v17025_v36, -inf  ;;  %v7082_v23 = vpop.f32.mrb[38].mxu1 }
 0x38c   :  { %v17037_v18 = vsel %vm16612_vm4, %v7082_v23, -1e+30  ;;  %v13088_v14 = vpop.f32.mrb[39].mxu1  ;;  %7882 = vmax.xlane.f32.xlu1 %v7881_v19  ;;  %v7878_v23 = vsel %vm7772_vm2, %v17043_v37, -inf  ;;  %v17053_v19 = vpop.permute.xlu1 %4334 }
 0x38d   :  { %v7126_v48 = vpop.f32.mrb[48].mxu0  ;;  %v7884_v25 = vsel %vm7772_vm2, %v17037_v18, -inf  ;;  %v17051_v14 = vpop.permute.xlu0 %4332  ;;  %19100 = vst [vmem:[#allocation57_spill] sm:$0xff] %v17053_v19 }
 0x38e   :  { %v13093_v10 = vpop.f32.mrb[49].mxu0  ;;  %7885 = vmax.xlane.f32.xlu0 %v7884_v25  ;;  %19099 = vst [vmem:[#allocation56_spill] sm:$0xff] %v17051_v14  ;;  %v17065_v12 = vsel %vm16585_vm3, %v7126_v48, -1e+30 }
 0x38f   :  { %v7129_v34 = vpop.f32.mrb[50].mxu0  ;;  %19103 = vst [vmem:[#allocation60_spill] sm:$0xff] %v17065_v12  ;;  %v7887_v48 = vsel %vm7772_vm2, %v17065_v12, -inf }
 0x390   :  { %v13094_v35 = vpop.f32.mrb[51].mxu0  ;;  %7876 = vmax.xlane.f32.xlu1 %v7875_v1  ;;  %v17077_v55 = vpop.permute.xlu1 %4346 }
 0x391   :  { %v17059_v7 = vpop.permute.xlu0 %4344  ;;  %19106 = vst [vmem:[#allocation63_spill] sm:$0xff] %v17077_v55 }
 0x392   :  { %7879 = vmax.xlane.f32.xlu0 %v7878_v23  ;;  %19102 = vst [vmem:[#allocation59_spill] sm:$0xff] %v17059_v7  ;;  %v17075_v7 = vsel %vm16612_vm4, %v7129_v34, -1e+30 }
 0x393   :  { %19105 = vst [vmem:[#allocation62_spill] sm:$0xff] %v17075_v7 }
 0x395   :  { %v17083_v32 = vpop.permute.xlu0 %4356 }
 0x396   :  { %19107 = vst [vmem:[#allocation64_spill] sm:$0xff] %v17083_v32  ;;  %v17099_v32 = vpop.permute.xlu1 %4358 }
 0x397   :  { %v7173_v10 = vpop.f32.mrb[40].mxu1  ;;  %19111 = vst [vmem:[#allocation68_spill] sm:$0xff] %v17099_v32 }
 0x398   :  { %v17057_v31 = vsel %vm16585_vm3, %v7173_v10, -1e+30  ;;  %v13099_v25 = vpop.f32.mrb[41].mxu1 }
 0x399   :  { %19101 = vst [vmem:[#allocation58_spill] sm:$0xff] %v17057_v31  ;;  %v7893_v35 = vsel %vm7772_vm2, %v17057_v31, -inf  ;;  %v7176_v1 = vpop.f32.mrb[42].mxu1 }
 0x39a   :  { %v17069_v23 = vsel %vm16612_vm4, %v7176_v1, -1e+30  ;;  %v13100_v14 = vpop.f32.mrb[43].mxu1  ;;  %7894 = vmax.xlane.f32.xlu1 %v7893_v35  ;;  %v17107_v40 = vpop.permute.xlu1 %4370 }
 0x39b   :  { %19104 = vst [vmem:[#allocation61_spill] sm:$0xff] %v17069_v23  ;;  %v7220_v19 = vpop.f32.mrb[52].mxu0  ;;  %v7896_v10 = vsel %vm7772_vm2, %v17069_v23, -inf  ;;  %v7890_v14 = vsel %vm7772_vm2, %v17075_v7, -inf  ;;  %19113 = vst [vmem:[#allocation70_spill] sm:$0xff] %v17107_v40 }
 0x39c   :  { %v13105_v25 = vpop.f32.mrb[53].mxu0  ;;  %7897 = vmax.xlane.f32.xlu0 %v7896_v10 }
 0x39d   :  { %v7223_v4 = vpop.f32.mrb[54].mxu0 }
 0x39e   :  { %v13106_v1 = vpop.f32.mrb[55].mxu0  ;;  %7888 = vmax.xlane.f32.xlu1 %v7887_v48 }
 0x39f   :  { %v17093_v1 = vsel %vm16585_vm3, %v7220_v19, -1e+30 }
 0x3a0   :  { %v7267_v35 = vpop.f32.mrb[44].mxu1  ;;  %7891 = vmax.xlane.f32.xlu0 %v7890_v14  ;;  %19109 = vst [vmem:[#allocation66_spill] sm:$0xff] %v17093_v1  ;;  %v7899_v14 = vsel %vm7772_vm2, %v17093_v1, -inf }
 0x3a1   :  { %v17087_v25 = vsel %vm16585_vm3, %v7267_v35, -1e+30  ;;  %v13111_v34 = vpop.f32.mrb[45].mxu1 }
 0x3a2   :  { %19108 = vst [vmem:[#allocation65_spill] sm:$0xff] %v17087_v25  ;;  %v7905_v10 = vsel %vm7772_vm2, %v17087_v25, -inf  ;;  %v7270_v55 = vpop.f32.mrb[46].mxu1  ;;  %v17105_v34 = vpop.permute.xlu0 %4368 }
 0x3a3   :  { %v17097_v48 = vsel %vm16612_vm4, %v7270_v55, -1e+30  ;;  %v13112_v13 = vpop.f32.mrb[47].mxu1  ;;  %7906 = vmax.xlane.f32.xlu1 %v7905_v10  ;;  %19112 = vst [vmem:[#allocation69_spill] sm:$0xff] %v17105_v34  ;;  %v17111_v10 = vpop.permute.xlu1 %4382 }
 0x3a4   :  { %19110 = vst [vmem:[#allocation67_spill] sm:$0xff] %v17097_v48  ;;  %v7908_v35 = vsel %vm7772_vm2, %v17097_v48, -inf  ;;  %19115 = vst [vmem:[#allocation72_spill] sm:$0xff] %v17111_v10 }
 0x3a5   :  { %7909 = vmax.xlane.f32.xlu0 %v7908_v35 }
 0x3a6   :  { %v17109_v13 = vpop.permute.xlu0 %4380 }
 0x3a7   :  { %7900 = vmax.xlane.f32.xlu1 %v7899_v14  ;;  %v7314_v19 = vpop.f32.mrb[56].mxu0  ;;  %19114 = vst [vmem:[#allocation71_spill] sm:$0xff] %v17109_v13 }
 0x3a8   :  { %v13117_v2 = vpop.f32.mrb[57].mxu0  ;;  %v17135_v46 = vsel %vm16585_vm3, %v7314_v19, -1e+30 }
 0x3a9   :  { %v7317_v55 = vpop.f32.mrb[58].mxu0  ;;  %19120 = vst [vmem:[#allocation77_spill] sm:$0xff] %v17135_v46 }
 0x3aa   :  { %v13118_v17 = vpop.f32.mrb[59].mxu0  ;;  %v17113_v32 = vpop.permute.xlu0 %4392 }
 0x3ab   :  { %19116 = vst [vmem:[#allocation73_spill] sm:$0xff] %v17113_v32  ;;  %v17119_v34 = vpop.xlane.xlu1 %7786  ;;  %v17125_v17 = vsel %vm16612_vm4, %v7223_v4, -1e+30 }
 0x3ac   :  { %19118 = vst [vmem:[#allocation75_spill] sm:$0xff] %v17125_v17  ;;  %v7969_v23 = vsub.f32 %v16630_v38, %v17119_v34 }
 0x3af   :  { %v7775_v51 = vpop.xlane.xlu0 %7774  ;;  %v7778_v4 = vpop.xlane.xlu1 %7777 }
 0x3b3   :  { %v7361_v63 = vpop.f32.mrb[48].mxu1 }
 0x3b4   :  { %v17117_v35 = vsel %vm16585_vm3, %v7361_v63, -1e+30  ;;  %v13123_v60 = vpop.f32.mrb[49].mxu1 }
 0x3b5   :  { %19117 = vst [vmem:[#allocation74_spill] sm:$0xff] %v17117_v35  ;;  %v7917_v2 = vsel %vm7772_vm2, %v17117_v35, -inf  ;;  %v7364_v14 = vpop.f32.mrb[50].mxu1  ;;  %v7408_v40 = vpop.f32.mrb[60].mxu0  ;;  %v7902_v35 = vsel %vm7772_vm2, %v17125_v17, -inf }
 0x3b6   :  { %v17129_v10 = vsel %vm16612_vm4, %v7364_v14, -1e+30  ;;  %v13124_v13 = vpop.f32.mrb[51].mxu1  ;;  %7918 = vmax.xlane.f32.xlu0 %v7917_v2  ;;  %v13129_v63 = vpop.f32.mrb[61].mxu0  ;;  %v7911_v2 = vsel %vm7772_vm2, %v17135_v46, -inf }
 0x3b7   :  { %19119 = vst [vmem:[#allocation76_spill] sm:$0xff] %v17129_v10  ;;  %v7920_v60 = vsel %vm7772_vm2, %v17129_v10, -inf  ;;  %v7411_v32 = vpop.f32.mrb[62].mxu0  ;;  %v17141_v13 = vsel %vm16612_vm4, %v7317_v55, -1e+30  ;;  %v17145_v63 = vpop.xlane.xlu0 %7789 }
 0x3b8   :  { %7921 = vmax.xlane.f32.xlu1 %v7920_v60  ;;  %v13130_v59 = vpop.f32.mrb[63].mxu0  ;;  %19121 = vst [vmem:[#allocation78_spill] sm:$0xff] %v17141_v13  ;;  %v17151_v60 = vpop.xlane.xlu1 %7798  ;;  %v7914_v17 = vsel %vm7772_vm2, %v17141_v13, -inf }
 0x3ba   :  { %7903 = vmax.xlane.f32.xlu0 %v7902_v35 }
 0x3bb   :  { %v7455_v14 = vpop.f32.mrb[52].mxu1 }
 0x3bc   :  { %v17149_v19 = vsel %vm16585_vm3, %v7455_v14, -1e+30  ;;  %v13135_v59 = vpop.f32.mrb[53].mxu1  ;;  %7912 = vmax.xlane.f32.xlu1 %v7911_v2  ;;  %v17163_v25 = vpop.xlane.xlu1 %7792 }
 0x3bd   :  { %19122 = vst [vmem:[#allocation79_spill] sm:$0xff] %v17149_v19  ;;  %v7458_v55 = vpop.f32.mrb[54].mxu1  ;;  %v7502_v10 = vpop.f32.mrb[64].mxu0  ;;  %v7929_v14 = vsel %vm7772_vm2, %v17149_v19, -inf }
 0x3be   :  { %v17157_v35 = vsel %vm16612_vm4, %v7458_v55, -1e+30  ;;  %v13136_v46 = vpop.f32.mrb[55].mxu1  ;;  %7915 = vmax.xlane.f32.xlu0 %v7914_v17  ;;  %v13141_v1 = vpop.f32.mrb[65].mxu0  ;;  %v17169_v55 = vsel %vm16585_vm3, %v7408_v40, -1e+30 }
 0x3bf   :  { %19123 = vst [vmem:[#allocation80_spill] sm:$0xff] %v17157_v35  ;;  %v7505_v48 = vpop.f32.mrb[66].mxu0  ;;  %v17161_v59 = vpop.xlane.xlu0 %7780  ;;  %v7932_v13 = vsel %vm7772_vm2, %v17157_v35, -inf  ;;  %19124 = vst [vmem:[#allocation81_spill] sm:$0xff] %v17169_v55  ;;  %v7923_v17 = vsel %vm7772_vm2, %v17169_v55, -inf }
 0x3c0   :  { %7930 = vmax.xlane.f32.xlu1 %v7929_v14  ;;  %v13142_v2 = vpop.f32.mrb[67].mxu0  ;;  %v17173_v1 = vpop.xlane.xlu1 %7810  ;;  %v17179_v14 = vsel %vm16612_vm4, %v7411_v32, -1e+30 }
 0x3c1   :  { %19125 = vst [vmem:[#allocation82_spill] sm:$0xff] %v17179_v14  ;;  %v7926_v35 = vsel %vm7772_vm2, %v17179_v14, -inf  ;;  %v17198_v14 = vsel %vm16585_vm3, %v7502_v10, -1e+30  ;;  %v17211_v10 = vsel %vm16612_vm4, %v7505_v48, -1e+30 }
 0x3c2   :  { %7933 = vmax.xlane.f32.xlu0 %v7932_v13  ;;  %v7965_v13 = vsub.f32 %v16625_v52, %v7775_v51  ;;  %v7966_v51 = vsub.f32 %v16645_v39, %v7778_v4  ;;  %v7935_v4 = vsel %vm7772_vm2, %v17198_v14, -inf  ;;  %v7938_v38 = vsel %vm7772_vm2, %v17211_v10, -inf }
 0x3c3   :  { %v17171_v46 = vpop.xlane.xlu0 %7783  ;;  %v8037_v48 = vmul.f32 1.442695, %v7969_v23 }
 0x3c4   :  { %v17190_v55 = vpop.xlane.xlu1 %7804  ;;  %v8029_v31 = vmul.f32 1.442695, %v7965_v13 }
 0x3c6   :  { %7924 = vmax.xlane.f32.xlu0 %v7923_v17  ;;  %13597 = vpow2.f32 %v8029_v31  ;;  %v7968_v31 = vsub.f32 %v16718_v11, %v17171_v46 }
 0x3c7   :  { %v17181_v2 = vpop.xlane.xlu0 %7801 }
 0x3c9   :  { %v7549_v40 = vpop.f32.mrb[56].mxu1  ;;  %v17221_v13 = vpop.xlane.xlu1 %7822 }
 0x3ca   :  { %v17188_v19 = vsel %vm16585_vm3, %v7549_v40, -1e+30  ;;  %v13147_v7 = vpop.f32.mrb[57].mxu1  ;;  %7927 = vmax.xlane.f32.xlu0 %v7926_v35 }
 0x3cb   :  { %19126 = vst [vmem:[#allocation83_spill] sm:$0xff] %v17188_v19  ;;  %v7941_v32 = vsel %vm7772_vm2, %v17188_v19, -inf  ;;  %v7552_v17 = vpop.f32.mrb[58].mxu1  ;;  %v17194_v12 = vpop.xlane.xlu0 %7795 }
 0x3cc   :  { %v17203_v52 = vsel %vm16612_vm4, %v7552_v17, -1e+30  ;;  %v7596_v7 = vpop.f32.mrb[68].mxu0  ;;  %v13148_v35 = vpop.f32.mrb[59].mxu1  ;;  %7942 = vmax.xlane.f32.xlu1 %v7941_v32  ;;  %v7970_v32 = vsub.f32 %v16650_v62, %v17145_v63 }
 0x3cd   :  { %19127 = vst [vmem:[#allocation84_spill] sm:$0xff] %v17203_v52  ;;  %v7944_v40 = vsel %vm7772_vm2, %v17203_v52, -inf  ;;  %v13153_v19 = vpop.f32.mrb[69].mxu0 }
 0x3ce   :  { %v7599_v39 = vpop.f32.mrb[70].mxu0  ;;  %7945 = vmax.xlane.f32.xlu0 %v7944_v40  ;;  %v8031_v19 = vmul.f32 1.442695, %v7966_v51  ;;  %v7967_v40 = vsub.f32 %v16662_v27, %v17161_v59  ;;  %v8039_v63 = vmul.f32 1.442695, %v7970_v32 }
 0x3cf   :  { %v13154_v17 = vpop.f32.mrb[71].mxu0  ;;  %v17217_v35 = vpop.xlane.xlu0 %7813  ;;  %v17249_v11 = vsel %vm16612_vm4, %v7599_v39, -1e+30 }
 0x3d0   :  { %7936 = vmax.xlane.f32.xlu1 %v7935_v4  ;;  %13599 = vpow2.f32 %v8031_v19  ;;  %v17233_v17 = vsel %vm16585_vm3, %v7596_v7, -1e+30  ;;  %v7973_v7 = vsub.f32 %v16672_v50, %v17151_v60  ;;  %v8033_v19 = vmul.f32 1.442695, %v7967_v40 }
 0x3d1   :  { %v7643_v34 = vpop.f32.mrb[60].mxu1  ;;  %13601 = vpow2.f32 %v8037_v48  ;;  %v7974_v50 = vsub.f32 %v16740_v0, %v17181_v2  ;;  %v7950_v60 = vsel %vm7772_vm2, %v17249_v11, -inf  ;;  %v7971_v40 = vsub.f32 %v16701_v22, %v17163_v25 }
 0x3d2   :  { %v17227_v52 = vsel %vm16585_vm3, %v7643_v34, -1e+30  ;;  %v13159_v62 = vpop.f32.mrb[61].mxu1  ;;  %7939 = vmax.xlane.f32.xlu0 %v7938_v38  ;;  %13603 = vpow2.f32 %v8039_v63  ;;  %v8045_v39 = vmul.f32 1.442695, %v7973_v7  ;;  %v7972_v2 = vsub.f32 %v16789_v44, %v17194_v12 }
 0x3d3   :  { %v7953_v51 = vsel %vm7772_vm2, %v17227_v52, -inf  ;;  %v7646_v4 = vpop.f32.mrb[62].mxu1  ;;  %v17243_v34 = vpop.xlane.xlu0 %7807  ;;  %v7947_v62 = vsel %vm7772_vm2, %v17233_v17, -inf  ;;  %13605 = vpow2.f32 %v8033_v19  ;;  %v8047_v0 = vmul.f32 1.442695, %v7974_v50 }
 0x3d4   :  { %v17239_v27 = vsel %vm16612_vm4, %v7646_v4, -1e+30  ;;  %v7690_v23 = vpop.f32.mrb[72].mxu0  ;;  %v13160_v59 = vpop.f32.mrb[63].mxu1  ;;  %7954 = vmax.xlane.f32.xlu1 %v7953_v51  ;;  %v8043_v44 = vmul.f32 1.442695, %v7972_v2  ;;  %v7978_v12 = vsub.f32 %v16817_v54, %v17217_v35 }
 0x3d5   :  { %v7956_v32 = vsel %vm7772_vm2, %v17239_v27, -inf  ;;  %v13165_v38 = vpop.f32.mrb[73].mxu0  ;;  %v17253_v4 = vpop.xlane.xlu1 %7816  ;;  %v8035_v59 = vmul.f32 1.442695, %v7968_v31  ;;  %v17257_v48 = vsel %vm16585_vm3, %v7690_v23, -1e+30 }
 0x3d6   :  { %v7693_v46 = vpop.f32.mrb[74].mxu0  ;;  %7957 = vmax.xlane.f32.xlu0 %v7956_v32  ;;  %v7959_v24 = vsel %vm7772_vm2, %v17257_v48, -inf  ;;  %v17271_v23 = vpop.eup %13597  ;;  %v8041_v32 = vmul.f32 1.442695, %v7971_v40  ;;  %v7977_v38 = vsub.f32 %v16744_v20, %v17173_v1  ;;  %v7975_v1 = vsub.f32 %v16765_v28, %v17190_v55 }
 0x3d7   :  { %v13166_v51 = vpop.f32.mrb[75].mxu0  ;;  %v17267_v63 = vsel %vm16612_vm4, %v7693_v46, -1e+30  ;;  %v7826_v31 = vpop.xlane.xlu0 %7825  ;;  %13607 = vpow2.f32 %v8035_v59  ;;  %v8157_v7 = vsel %vm7772_vm2, %v17271_v23, 0.0  ;;  %v8055_v35 = vmul.f32 1.442695, %v7978_v12 }
 0x3d8   :  { %7948 = vmax.xlane.f32.xlu1 %v7947_v62  ;;  %v7962_v22 = vsel %vm7772_vm2, %v17267_v63, -inf  ;;  %13609 = vpow2.f32 %v8045_v39  ;;  %v8053_v20 = vmul.f32 1.442695, %v7977_v38  ;;  %v8049_v28 = vmul.f32 1.442695, %v7975_v1 }
 0x3d9   :  { %v17277_v25 = vpop.xlane.xlu1 %7834  ;;  %13611 = vpow2.f32 %v8047_v0  ;;  %v7981_v55 = vsub.f32 %v16821_v56, %v17221_v13  ;;  %v7979_v13 = vsub.f32 %v16833_v8, %v17253_v4 }
 0x3da   :  { %7951 = vmax.xlane.f32.xlu0 %v7950_v60  ;;  %v17279_v58 = vpop.eup %13599  ;;  %13613 = vpow2.f32 %v8041_v32  ;;  %v7976_v60 = vsub.f32 %v16844_v43, %v17243_v34  ;;  %v7982_v34 = vsub.f32 %v16854_v47, %v7826_v31  ;;  %v7985_v31 = vsub.f32 %v16860_v30, %v17277_v25 }
 0x3db   :  { %v17285_v19 = vpop.eup %13601  ;;  %v17289_v46 = vpop.xlane.xlu0 %7819  ;;  %v8160_v62 = vsel %vm7772_vm2, %v17279_v58, 0.0  ;;  %13615 = vpow2.f32 %v8043_v44  ;;  %v8061_v56 = vmul.f32 1.442695, %v7981_v55  ;;  %v8057_v8 = vmul.f32 1.442695, %v7979_v13 }
 0x3dc   :  { %7960 = vmax.xlane.f32.xlu1 %v7959_v24  ;;  %v17293_v51 = vpop.eup %13603  ;;  %v8169_v59 = vsel %vm7772_vm2, %v17285_v19, 0.0  ;;  %13617 = vpow2.f32 %v8053_v20  ;;  %v8051_v43 = vmul.f32 1.442695, %v7976_v60  ;;  %v8063_v47 = vmul.f32 1.442695, %v7982_v34 }
 0x3dd   :  { %v17299_v50 = vpop.xlane.xlu1 %7828  ;;  %v17301_v54 = vpop.eup %13605  ;;  %v8172_v39 = vsel %vm7772_vm2, %v17293_v51, 0.0  ;;  %13619 = vpow2.f32 %v8055_v35  ;;  %v8069_v30 = vmul.f32 1.442695, %v7985_v31  ;;  %v7980_v25 = vsub.f32 %v16868_v16, %v17289_v46 }
 0x3de   :  { %7963 = vmax.xlane.f32.xlu0 %v7962_v22  ;;  %v8163_v24 = vsel %vm7772_vm2, %v17301_v54, 0.0  ;;  %13621 = vpow2.f32 %v8049_v28  ;;  %v7983_v28 = vsub.f32 %v16872_v42, %v17299_v50 }
 0x3df   :  { %v7838_v0 = vpop.xlane.xlu0 %7837  ;;  %13623 = vpow2.f32 %v8051_v43  ;;  %v8059_v16 = vmul.f32 1.442695, %v7980_v25 }
 0x3e0   :  { %8158 = vadd.xlane.f32.xlu1 %v8157_v7  ;;  %13625 = vpow2.f32 %v8061_v56  ;;  %v7986_v4 = vsub.f32 %v16885_v6, %v7838_v0  ;;  %v8065_v42 = vmul.f32 1.442695, %v7983_v28 }
 0x3e1   :  { %v17307_v40 = vpop.eup %13607  ;;  %v7847_v22 = vpop.xlane.xlu1 %7846  ;;  %13627 = vpow2.f32 %v8063_v47 }
 0x3e2   :  { %8161 = vadd.xlane.f32.xlu0 %v8160_v62  ;;  %v17313_v2 = vpop.eup %13609  ;;  %v8166_v32 = vsel %vm7772_vm2, %v17307_v40, 0.0  ;;  %13629 = vpow2.f32 %v8057_v8  ;;  %v8071_v6 = vmul.f32 1.442695, %v7986_v4  ;;  %v7989_v50 = vsub.f32 %v16902_v15, %v7847_v22 }
 0x3e3   :  { %v17318_v38 = vpop.eup %13611  ;;  %v8181_v7 = vsel %vm7772_vm2, %v17313_v2, 0.0  ;;  %v7832_v12 = vpop.xlane.xlu0 %7831  ;;  %13631 = vpow2.f32 %v8069_v30 }
 0x3e4   :  { %8170 = vadd.xlane.f32.xlu1 %v8169_v59  ;;  %v17324_v44 = vpop.eup %13613  ;;  %v8184_v62 = vsel %vm7772_vm2, %v17318_v38, 0.0  ;;  %v7984_v46 = vsub.f32 %v16932_v49, %v7832_v12  ;;  %13633 = vpow2.f32 %v8071_v6 }
 0x3e5   :  { %v17330_v20 = vpop.eup %13615  ;;  %v8175_v1 = vsel %vm7772_vm2, %v17324_v44, 0.0  ;;  %v7841_v59 = vpop.xlane.xlu1 %7840  ;;  %13635 = vpow2.f32 %v8059_v16 }
 0x3e6   :  { %8173 = vadd.xlane.f32.xlu0 %v8172_v39  ;;  %v17335_v35 = vpop.eup %13617  ;;  %v8178_v60 = vsel %vm7772_vm2, %v17330_v20, 0.0  ;;  %13637 = vpow2.f32 %v8065_v42 }
 0x3e7   :  { %v17341_v39 = vpop.eup %13619  ;;  %v7850_v55 = vpop.xlane.xlu0 %7849 }
 0x3e8   :  { %8164 = vadd.xlane.f32.xlu1 %v8163_v24  ;;  %v8193_v24 = vsel %vm7772_vm2, %v17335_v35, 0.0  ;;  %v17347_v0 = vpop.eup %13621  ;;  %v8196_v34 = vsel %vm7772_vm2, %v17341_v39, 0.0  ;;  %v7990_v49 = vsub.f32 %v16956_v45, %v7850_v55 }
 0x3e9   :  { %v7859_v43 = vpop.xlane.xlu1 %7858  ;;  %v8187_v56 = vsel %vm7772_vm2, %v17347_v0, 0.0 }
 0x3ea   :  { %8167 = vadd.xlane.f32.xlu0 %v8166_v32  ;;  %v17352_v32 = vpop.eup %13623  ;;  %v7993_v15 = vsub.f32 %v16960_v21, %v7859_v43  ;;  %v8079_v45 = vmul.f32 1.442695, %v7990_v49 }
 0x3eb   :  { %v17357_v13 = vpop.eup %13625  ;;  %v7844_v47 = vpop.xlane.xlu0 %7843  ;;  %v8190_v31 = vsel %vm7772_vm2, %v17352_v32, 0.0 }
 0x3ec   :  { %8182 = vadd.xlane.f32.xlu1 %v8181_v7  ;;  %v8067_v7 = vmul.f32 1.442695, %v7984_v46  ;;  %v17362_v12 = vpop.eup %13627  ;;  %v8205_v8 = vsel %vm7772_vm2, %v17357_v13, 0.0 }
 0x3ed   :  { %v7853_v22 = vpop.xlane.xlu1 %7852  ;;  %v17367_v4 = vpop.eup %13629  ;;  %v8208_v30 = vsel %vm7772_vm2, %v17362_v12, 0.0 }
 0x3ee   :  { %8185 = vadd.xlane.f32.xlu0 %v8184_v62  ;;  %v8077_v62 = vmul.f32 1.442695, %v7989_v50  ;;  %13639 = vpow2.f32 %v8067_v7  ;;  %v17372_v25 = vpop.eup %13631  ;;  %v7991_v21 = vsub.f32 %v16968_v5, %v7853_v22  ;;  %v8199_v28 = vsel %vm7772_vm2, %v17367_v4, 0.0 }
 0x3ef   :  { %19128 = vst [vmem:[#allocation85_spill] sm:$0xff] %v17372_v25  ;;  %v7862_v6 = vpop.xlane.xlu0 %7861  ;;  %v17377_v55 = vpop.eup %13633 }
 0x3f0   :  { %8176 = vadd.xlane.f32.xlu1 %v8175_v1  ;;  %v7987_v1 = vsub.f32 %v16915_v41, %v7841_v59  ;;  %13641 = vpow2.f32 %v8077_v62  ;;  %19129 = vst [vmem:[#allocation86_spill] sm:$0xff] %v17377_v55  ;;  %v7988_v41 = vsub.f32 %v16977_v26, %v7844_v47  ;;  %v8217_v59 = vsel %vm7772_vm2, %v17372_v25, 0.0  ;;  %v17382_v16 = vpop.eup %13635 }
 0x3f1   :  { %13643 = vpow2.f32 %v8079_v45  ;;  %v8081_v46 = vmul.f32 1.442695, %v7991_v21  ;;  %v8220_v5 = vsel %vm7772_vm2, %v17377_v55, 0.0  ;;  %v17386_v43 = vpop.eup %13637  ;;  %v7994_v42 = vsub.f32 %v16985_v3, %v7862_v6 }
 0x3f2   :  { %8179 = vadd.xlane.f32.xlu0 %v8178_v60  ;;  %v8085_v60 = vmul.f32 1.442695, %v7993_v15  ;;  %19130 = vst [vmem:[#allocation87_spill] sm:$0xff] %v17386_v43  ;;  %v8202_v50 = vsel %vm7772_vm2, %v17382_v16, 0.0  ;;  %v8211_v7 = vsel %vm7772_vm2, %v17386_v43, 0.0 }
 0x3f3   :  { %v7856_v26 = vpop.xlane.xlu0 %7855  ;;  %v8087_v47 = vmul.f32 1.442695, %v7994_v42 }
 0x3f4   :  { %8194 = vadd.xlane.f32.xlu1 %v8193_v24  ;;  %v8073_v24 = vmul.f32 1.442695, %v7987_v1  ;;  %13645 = vpow2.f32 %v8085_v60 }
 0x3f6   :  { %8197 = vadd.xlane.f32.xlu0 %v8196_v34  ;;  %13647 = vpow2.f32 %v8073_v24  ;;  %v8075_v34 = vmul.f32 1.442695, %v7988_v41 }
 0x3f7   :  { %13649 = vpow2.f32 %v8081_v46 }
 0x3f8   :  { %8188 = vadd.xlane.f32.xlu1 %v8187_v56  ;;  %v17391_v56 = vpop.eup %13639  ;;  %13651 = vpow2.f32 %v8075_v34 }
 0x3f9   :  { %19131 = vst [vmem:[#allocation88_spill] sm:$0xff] %v17391_v56  ;;  %v8214_v3 = vsel %vm7772_vm2, %v17391_v56, 0.0  ;;  %13653 = vpow2.f32 %v8087_v47 }
 0x3fa   :  { %8191 = vadd.xlane.f32.xlu0 %v8190_v31  ;;  %v17395_v49 = vpop.eup %13641  ;;  %v7992_v31 = vsub.f32 %v16991_v61, %v7856_v26 }
 0x3fb   :  { %19132 = vst [vmem:[#allocation89_spill] sm:$0xff] %v17395_v49  ;;  %v17400_v62 = vpop.eup %13643  ;;  %v8229_v15 = vsel %vm7772_vm2, %v17395_v49, 0.0 }
 0x3fc   :  { %8206 = vadd.xlane.f32.xlu1 %v8205_v8  ;;  %19133 = vst [vmem:[#allocation90_spill] sm:$0xff] %v17400_v62  ;;  %v8083_v8 = vmul.f32 1.442695, %v7992_v31  ;;  %v8232_v45 = vsel %vm7772_vm2, %v17400_v62, 0.0 }
 0x3fe   :  { %8209 = vadd.xlane.f32.xlu0 %v8208_v30  ;;  %v17404_v22 = vpop.eup %13645  ;;  %13655 = vpow2.f32 %v8083_v8 }
 0x3ff   :  { %19134 = vst [vmem:[#allocation91_spill] sm:$0xff] %v17404_v22  ;;  %v8241_v61 = vsel %vm7772_vm2, %v17404_v22, 0.0  ;;  %v19196_v22 = vld [vmem:[#allocation29_spill] sm:$0xff] }
 0x400   :  { %8200 = vadd.xlane.f32.xlu1 %v8199_v28  ;;  %v17408_v1 = vpop.eup %13647 }
 0x401   :  { %19135 = vst [vmem:[#allocation92_spill] sm:$0xff] %v17408_v1  ;;  %v17412_v60 = vpop.eup %13649  ;;  %v8223_v6 = vsel %vm7772_vm2, %v17408_v1, 0.0 }
 0x402   :  { %8218 = vadd.xlane.f32.xlu0 %v8217_v59  ;;  %19136 = vst [vmem:[#allocation93_spill] sm:$0xff] %v17412_v60  ;;  %v17417_v24 = vpop.eup %13651  ;;  %v8235_v46 = vsel %vm7772_vm2, %v17412_v60, 0.0  ;;  %v19195_v60 = vld [vmem:[#allocation34_spill] sm:$0xff] }
 0x403   :  { %19137 = vst [vmem:[#allocation94_spill] sm:$0xff] %v17417_v24  ;;  %v17425_v26 = vpop.eup %13653 }
 0x404   :  { %8221 = vadd.xlane.f32.xlu1 %v8220_v5  ;;  %19138 = vst [vmem:[#allocation95_spill] sm:$0xff] %v17425_v26 }
 0x406   :  { %8203 = vadd.xlane.f32.xlu0 %v8202_v50 }
 0x408   :  { %8212 = vadd.xlane.f32.xlu1 %v8211_v7  ;;  %v17430_v31 = vpop.eup %13655 }
 0x409   :  { %19139 = vst [vmem:[#allocation96_spill] sm:$0xff] %v17430_v31 }
 0x40a   :  { %8215 = vadd.xlane.f32.xlu0 %v8214_v3 }
 0x40c   :  { %8230 = vadd.xlane.f32.xlu1 %v8229_v15  ;;  %v8238_v15 = vsel %vm7772_vm2, %v17430_v31, 0.0 }
 0x40e   :  { %8233 = vadd.xlane.f32.xlu0 %v8232_v45 }
 0x40f   :  { %v7871_v30 = vpop.xlane.xlu1 %7870 }
 0x410   :  { %8242 = vadd.xlane.f32.xlu1 %v8241_v61  ;;  %v7997_v21 = vsub.f32 %v16997_v33, %v7871_v30  ;;  %v8226_v33 = vsel %vm7772_vm2, %v17417_v24, 0.0 }
 0x411   :  { %v7874_v28 = vpop.xlane.xlu0 %7873 }
 0x412   :  { %8224 = vadd.xlane.f32.xlu0 %v8223_v6  ;;  %v8093_v41 = vmul.f32 1.442695, %v7997_v21  ;;  %v7998_v59 = vsub.f32 %v17007_v29, %v7874_v28  ;;  %v8244_v29 = vsel %vm7772_vm2, %v17425_v26, 0.0 }
 0x413   :  { %v7865_v5 = vpop.xlane.xlu1 %7864 }
 0x414   :  { %8236 = vadd.xlane.f32.xlu1 %v8235_v46  ;;  %13657 = vpow2.f32 %v8093_v41  ;;  %v8095_v34 = vmul.f32 1.442695, %v7998_v59  ;;  %v7995_v42 = vsub.f32 %v17003_v9, %v7865_v5 }
 0x415   :  { %v7868_v7 = vpop.xlane.xlu0 %7867 }
 0x416   :  { %8227 = vadd.xlane.f32.xlu0 %v8226_v33  ;;  %13659 = vpow2.f32 %v8095_v34  ;;  %v8089_v50 = vmul.f32 1.442695, %v7995_v42  ;;  %v7996_v47 = vsub.f32 %v17013_v53, %v7868_v7 }
 0x418   :  { %13661 = vpow2.f32 %v8089_v50  ;;  %v8091_v8 = vmul.f32 1.442695, %v7996_v47  ;;  %v19143_v50 = vld [vmem:[#allocation58_spill] sm:$0xff] }
 0x419   :  { %v7883_v3 = vpop.xlane.xlu1 %7882 }
 0x41a   :  { %8245 = vadd.xlane.f32.xlu0 %v8244_v29  ;;  %v8001_v9 = vsub.f32 %v17025_v36, %v7883_v3 }
 0x41b   :  { %v7886_v45 = vpop.xlane.xlu0 %7885 }
 0x41c   :  { %v8101_v30 = vmul.f32 1.442695, %v8001_v9  ;;  %v8002_v21 = vsub.f32 %v17037_v18, %v7886_v45 }
 0x41d   :  { %v7877_v6 = vpop.xlane.xlu1 %7876 }
 0x41e   :  { %v17435_v61 = vpop.eup %13657  ;;  %8239 = vadd.xlane.f32.xlu0 %v8238_v15  ;;  %13663 = vpow2.f32 %v8101_v30  ;;  %v8103_v41 = vmul.f32 1.442695, %v8002_v21  ;;  %v7999_v36 = vsub.f32 %v17033_v57, %v7877_v6  ;;  %v19146_v15 = vld [vmem:[#allocation61_spill] sm:$0xff]  ;;  %v19148_v6 = vld [vmem:[#allocation60_spill] sm:$0xff] }
 0x41f   :  { %19140 = vst [vmem:[#allocation97_spill] sm:$0xff] %v17435_v61  ;;  %v8253_v53 = vsel %vm7772_vm2, %v17435_v61, 0.0  ;;  %13665 = vpow2.f32 %v8091_v8  ;;  %v7880_v59 = vpop.xlane.xlu0 %7879 }
 0x420   :  { %v17440_v28 = vpop.eup %13659  ;;  %8254 = vadd.xlane.f32.xlu1 %v8253_v53  ;;  %13667 = vpow2.f32 %v8103_v41  ;;  %v8097_v18 = vmul.f32 1.442695, %v7999_v36  ;;  %v8000_v34 = vsub.f32 %v17043_v37, %v7880_v59 }
 0x421   :  { %19141 = vst [vmem:[#allocation98_spill] sm:$0xff] %v17440_v28  ;;  %v8256_v46 = vsel %vm7772_vm2, %v17440_v28, 0.0 }
 0x422   :  { %v17445_v5 = vpop.eup %13661  ;;  %8257 = vadd.xlane.f32.xlu0 %v8256_v46  ;;  %13669 = vpow2.f32 %v8097_v18  ;;  %v8099_v33 = vmul.f32 1.442695, %v8000_v34  ;;  %v19150_v18 = vld [vmem:[#allocation62_spill] sm:$0xff] }
 0x423   :  { %19142 = vst [vmem:[#allocation99_spill] sm:$0xff] %v17445_v5  ;;  %v8247_v42 = vsel %vm7772_vm2, %v17445_v5, 0.0 }
 0x424   :  { %8248 = vadd.xlane.f32.xlu1 %v8247_v42  ;;  %13671 = vpow2.f32 %v8099_v33 }
 0x427   :  { %v7895_v57 = vpop.xlane.xlu1 %7894 }
 0x428   :  { %v8005_v7 = vsub.f32 %v19143_v50, %v7895_v57  ;;  %v17451_v29 = vpop.eup %13663 }
 0x429   :  { %19144 = vst [vmem:[#allocation58_spill] sm:$0xff] %v17451_v29  ;;  %v7898_v47 = vpop.xlane.xlu0 %7897  ;;  %v17453_v3 = vpop.eup %13665  ;;  %v8265_v37 = vsel %vm7772_vm2, %v17451_v29, 0.0  ;;  %v19187_v29 = vld [vmem:[#allocation23_spill] sm:$0xff] }
 0x42a   :  { %19145 = vst [vmem:[#allocation100_spill] sm:$0xff] %v17453_v3  ;;  %v8109_v9 = vmul.f32 1.442695, %v8005_v7  ;;  %v8006_v8 = vsub.f32 %v19146_v15, %v7898_v47  ;;  %v17458_v45 = vpop.eup %13667  ;;  %8266 = vadd.xlane.f32.xlu0 %v8265_v37  ;;  %v8250_v42 = vsel %vm7772_vm2, %v17453_v3, 0.0  ;;  %v19152_v7 = vld [vmem:[#allocation65_spill] sm:$0xff]  ;;  %v19153_v37 = vld [vmem:[#allocation67_spill] sm:$0xff] }
 0x42b   :  { %19147 = vst [vmem:[#allocation61_spill] sm:$0xff] %v17458_v45  ;;  %v7889_v30 = vpop.xlane.xlu1 %7888  ;;  %v8268_v41 = vsel %vm7772_vm2, %v17458_v45, 0.0 }
 0x42c   :  { %13673 = vpow2.f32 %v8109_v9  ;;  %v8111_v21 = vmul.f32 1.442695, %v8006_v8  ;;  %v8003_v53 = vsub.f32 %v19148_v6, %v7889_v30  ;;  %v17463_v36 = vpop.eup %13669  ;;  %8269 = vadd.xlane.f32.xlu1 %v8268_v41  ;;  %v19154_v41 = vld [vmem:[#allocation66_spill] sm:$0xff] }
 0x42d   :  { %19149 = vst [vmem:[#allocation60_spill] sm:$0xff] %v17463_v36  ;;  %v7892_v59 = vpop.xlane.xlu0 %7891  ;;  %v8259_v9 = vsel %vm7772_vm2, %v17463_v36, 0.0 }
 0x42e   :  { %13675 = vpow2.f32 %v8111_v21  ;;  %v8105_v46 = vmul.f32 1.442695, %v8003_v53  ;;  %v8004_v34 = vsub.f32 %v19150_v18, %v7892_v59  ;;  %v17468_v33 = vpop.eup %13671  ;;  %8251 = vadd.xlane.f32.xlu0 %v8250_v42 }
 0x42f   :  { %19151 = vst [vmem:[#allocation62_spill] sm:$0xff] %v17468_v33  ;;  %v8262_v21 = vsel %vm7772_vm2, %v17468_v33, 0.0 }
 0x430   :  { %v7907_v57 = vpop.xlane.xlu1 %7906  ;;  %13677 = vpow2.f32 %v8105_v46  ;;  %v8107_v50 = vmul.f32 1.442695, %v8004_v34  ;;  %8260 = vadd.xlane.f32.xlu1 %v8259_v9 }
 0x431   :  { %v8009_v47 = vsub.f32 %v19152_v7, %v7907_v57 }
 0x432   :  { %v7910_v15 = vpop.xlane.xlu0 %7909  ;;  %13679 = vpow2.f32 %v8107_v50  ;;  %8263 = vadd.xlane.f32.xlu0 %v8262_v21 }
 0x433   :  { %v8117_v8 = vmul.f32 1.442695, %v8009_v47  ;;  %v8010_v30 = vsub.f32 %v19153_v37, %v7910_v15 }
 0x434   :  { %v7901_v6 = vpop.xlane.xlu1 %7900 }
 0x435   :  { %13681 = vpow2.f32 %v8117_v8  ;;  %v8119_v53 = vmul.f32 1.442695, %v8010_v30  ;;  %v8007_v59 = vsub.f32 %v19154_v41, %v7901_v6  ;;  %v19162_v6 = vld [vmem:[#allocation74_spill] sm:$0xff] }
 0x436   :  { %v17477_v46 = vpop.eup %13673 }
 0x437   :  { %19155 = vst [vmem:[#allocation65_spill] sm:$0xff] %v17477_v46  ;;  %v8113_v18 = vmul.f32 1.442695, %v8007_v59  ;;  %13683 = vpow2.f32 %v8119_v53  ;;  %v8277_v34 = vsel %vm7772_vm2, %v17477_v46, 0.0 }
 0x438   :  { %v17481_v42 = vpop.eup %13675  ;;  %8278 = vadd.xlane.f32.xlu1 %v8277_v34  ;;  %v19163_v34 = vld [vmem:[#allocation76_spill] sm:$0xff] }
 0x439   :  { %19156 = vst [vmem:[#allocation67_spill] sm:$0xff] %v17481_v42  ;;  %13685 = vpow2.f32 %v8113_v18  ;;  %v8280_v57 = vsel %vm7772_vm2, %v17481_v42, 0.0 }
 0x43a   :  { %v17485_v50 = vpop.eup %13677  ;;  %8281 = vadd.xlane.f32.xlu0 %v8280_v57 }
 0x43b   :  { %19157 = vst [vmem:[#allocation66_spill] sm:$0xff] %v17485_v50  ;;  %v8271_v47 = vsel %vm7772_vm2, %v17485_v50, 0.0 }
 0x43c   :  { %v17487_v7 = vpop.eup %13679 }
 0x43d   :  { %19158 = vst [vmem:[#allocation101_spill] sm:$0xff] %v17487_v7  ;;  %v8274_v37 = vsel %vm7772_vm2, %v17487_v7, 0.0 }
 0x43e   :  { %8272 = vadd.xlane.f32.xlu0 %v8271_v47 }
 0x43f   :  { %v17491_v9 = vpop.eup %13681 }
 0x440   :  { %19159 = vst [vmem:[#allocation102_spill] sm:$0xff] %v17491_v9  ;;  %v8289_v15 = vsel %vm7772_vm2, %v17491_v9, 0.0  ;;  %v19164_v9 = vld [vmem:[#allocation75_spill] sm:$0xff] }
 0x441   :  { %8290 = vadd.xlane.f32.xlu1 %v8289_v15  ;;  %v17495_v8 = vpop.eup %13683 }
 0x442   :  { %19160 = vst [vmem:[#allocation103_spill] sm:$0xff] %v17495_v8  ;;  %8275 = vadd.xlane.f32.xlu0 %v8274_v37  ;;  %v8292_v47 = vsel %vm7772_vm2, %v17495_v8, 0.0  ;;  %v19167_v8 = vld [vmem:[#allocation79_spill] sm:$0xff] }
 0x443   :  { %v17499_v30 = vpop.eup %13685  ;;  %v7919_v21 = vpop.xlane.xlu0 %7918 }
 0x444   :  { %19161 = vst [vmem:[#allocation104_spill] sm:$0xff] %v17499_v30  ;;  %v8013_v53 = vsub.f32 %v19162_v6, %v7919_v21  ;;  %v8283_v41 = vsel %vm7772_vm2, %v17499_v30, 0.0  ;;  %v19165_v21 = vld [vmem:[#allocation77_spill] sm:$0xff] }
 0x445   :  { %v7922_v59 = vpop.xlane.xlu1 %7921  ;;  %8284 = vadd.xlane.f32.xlu1 %v8283_v41  ;;  %v19166_v41 = vld [vmem:[#allocation78_spill] sm:$0xff] }
 0x446   :  { %v8125_v18 = vmul.f32 1.442695, %v8013_v53  ;;  %v8014_v57 = vsub.f32 %v19163_v34, %v7922_v59  ;;  %8293 = vadd.xlane.f32.xlu0 %v8292_v47 }
 0x447   :  { %v7904_v15 = vpop.xlane.xlu0 %7903 }
 0x448   :  { %13687 = vpow2.f32 %v8125_v18  ;;  %v8008_v7 = vsub.f32 %v19164_v9, %v7904_v15  ;;  %v8127_v50 = vmul.f32 1.442695, %v8014_v57 }
 0x449   :  { %v7913_v37 = vpop.xlane.xlu1 %7912 }
 0x44a   :  { %v8115_v42 = vmul.f32 1.442695, %v8008_v7  ;;  %v8011_v6 = vsub.f32 %v19165_v21, %v7913_v37 }
 0x44b   :  { %v7916_v46 = vpop.xlane.xlu0 %7915 }
 0x44c   :  { %13689 = vpow2.f32 %v8115_v42  ;;  %v8121_v30 = vmul.f32 1.442695, %v8011_v6  ;;  %v8012_v53 = vsub.f32 %v19166_v41, %v7916_v46  ;;  %v19169_v42 = vld [vmem:[#allocation81_spill] sm:$0xff] }
 0x44d   :  { %13691 = vpow2.f32 %v8127_v50  ;;  %v7931_v59 = vpop.xlane.xlu1 %7930 }
 0x44e   :  { %13693 = vpow2.f32 %v8121_v30  ;;  %v8123_v34 = vmul.f32 1.442695, %v8012_v53  ;;  %v8017_v36 = vsub.f32 %v19167_v8, %v7931_v59 }
 0x44f   :  { %v17511_v47 = vpop.xlane.xlu0 %7933 }
 0x450   :  { %13695 = vpow2.f32 %v8123_v34  ;;  %v8133_v9 = vmul.f32 1.442695, %v8017_v36  ;;  %v19173_v36 = vld [vmem:[#allocation82_spill] sm:$0xff] }
 0x452   :  { %v17513_v18 = vpop.eup %13687  ;;  %13697 = vpow2.f32 %v8133_v9 }
 0x453   :  { %19168 = vst [vmem:[#allocation74_spill] sm:$0xff] %v17513_v18  ;;  %v7925_v7 = vpop.xlane.xlu0 %7924  ;;  %v8301_v57 = vsel %vm7772_vm2, %v17513_v18, 0.0 }
 0x454   :  { %v8015_v15 = vsub.f32 %v19169_v42, %v7925_v7  ;;  %8302 = vadd.xlane.f32.xlu1 %v8301_v57  ;;  %v19175_v57 = vld [vmem:[#allocation39_spill] sm:$0xff] }
 0x455   :  { %v19176_v42 = vld [vmem:[#allocation31_spill] sm:$0xff] }
 0x456   :  { %v17518_v46 = vpop.eup %13689  ;;  %v8129_v50 = vmul.f32 1.442695, %v8015_v15  ;;  %v4552_v15 = vcombine.low %v19176_v42, %v19175_v57 }
 0x457   :  { %19170 = vst [vmem:[#allocation76_spill] sm:$0xff] %v17518_v46  ;;  %v17520_v30 = vpop.eup %13691  ;;  %v7928_v8 = vpop.xlane.xlu0 %7927  ;;  %v8286_v37 = vsel %vm7772_vm2, %v17518_v46, 0.0  ;;  %v19180_v46 = vld [vmem:[#allocation84_spill] sm:$0xff] }
 0x458   :  { %19171 = vst [vmem:[#allocation75_spill] sm:$0xff] %v17520_v30  ;;  %v17524_v21 = vpop.eup %13693  ;;  %13699 = vpow2.f32 %v8129_v50  ;;  %v8016_v6 = vsub.f32 %v19173_v36, %v7928_v8  ;;  %8287 = vadd.xlane.f32.xlu0 %v8286_v37  ;;  %v8304_v9 = vsel %vm7772_vm2, %v17520_v30, 0.0  ;;  %v4553_v8 = vcombine.high %v19176_v42, %v19175_v57  ;;  %v19177_v36 = vld [vmem:[#allocation14_spill] sm:$0xff] }
 0x459   :  { %19172 = vst [vmem:[#allocation77_spill] sm:$0xff] %v17524_v21  ;;  %v17527_v41 = vpop.xlane.xlu1 %7942  ;;  %v8295_v53 = vsel %vm7772_vm2, %v17524_v21, 0.0  ;;  %v19181_v57 = vld [vmem:[#allocation18_spill] sm:$0xff] }
 0x45a   :  { %v8131_v59 = vmul.f32 1.442695, %v8016_v6  ;;  %8296 = vadd.xlane.f32.xlu1 %v8295_v53  ;;  %v17533_v7 = vpop.eup %13695  ;;  %v19178_v6 = vld [vmem:[#allocation32_spill] sm:$0xff]  ;;  %v17556_v5 = vrot.slane %v4553_v8, %v19181_v57 }
 0x45b   :  { %v7946_v34 = vpop.xlane.xlu0 %7945  ;;  %19174 = vst [vmem:[#allocation78_spill] sm:$0xff] %v17533_v7  ;;  %v4536_v53 = vcombine.low %v19178_v6, %v19177_v36  ;;  %v8298_v30 = vsel %vm7772_vm2, %v17533_v7, 0.0 }
 0x45c   :  { %13701 = vpow2.f32 %v8131_v59  ;;  %8305 = vadd.xlane.f32.xlu0 %v8304_v9  ;;  %v17544_v21 = vpop.eup %13697  ;;  %v4537_v59 = vcombine.high %v19178_v6, %v19177_v36  ;;  %v8022_v33 = vsub.f32 %v19180_v46, %v7946_v34  ;;  %v19184_v6 = vld [vmem:[#allocation28_spill] sm:$0xff] }
 0x45d   :  { %v7937_v50 = vpop.xlane.xlu1 %7936  ;;  %19179 = vst [vmem:[#allocation79_spill] sm:$0xff] %v17544_v21  ;;  %v4544_v45 = vrot.slane %v4536_v53, %v19181_v57  ;;  %v19185_v53 = vld [vmem:[#allocation25_spill] sm:$0xff] }
 0x45e   :  { %v8019_v37 = vsub.f32 %v17198_v14, %v7937_v50  ;;  %v4560_v14 = vrot.slane %v4552_v15, %v19181_v57 }
 0x45f   :  { %v7940_v18 = vpop.xlane.xlu0 %7939 }
 0x460   :  { %v8137_v9 = vmul.f32 1.442695, %v8019_v37  ;;  %v8020_v3 = vsub.f32 %v17211_v10, %v7940_v18  ;;  %8299 = vadd.xlane.f32.xlu0 %v8298_v30  ;;  %v8313_v10 = vsel %vm7772_vm2, %v17544_v21, 0.0  ;;  %v4551_v18 = vrot.slane %v4537_v59, %v19181_v57 }
 0x461   :  { %v17551_v42 = vpop.xlane.xlu1 %7954  ;;  %v8143_v30 = vmul.f32 1.442695, %v8022_v33  ;;  %v4600_v34 = vcombine.low %v4544_v45, %v4560_v14  ;;  %v4585_v33 = vcombine.high %v19185_v53, %v19184_v6 }
 0x462   :  { %v17553_v50 = vpop.eup %13699  ;;  %13703 = vpow2.f32 %v8137_v9  ;;  %v8139_v7 = vmul.f32 1.442695, %v8020_v3  ;;  %v4601_v3 = vcombine.high %v4544_v45, %v4560_v14  ;;  %v4616_v37 = vcombine.low %v4551_v18, %v17556_v5  ;;  %v19188_v14 = vld [vmem:[#allocation19_spill] sm:$0xff] }
 0x463   :  { %19182 = vst [vmem:[#allocation81_spill] sm:$0xff] %v17553_v50  ;;  %v7958_v36 = vpop.xlane.xlu0 %7957  ;;  %v8307_v46 = vsel %vm7772_vm2, %v17553_v50, 0.0  ;;  %v4584_v9 = vcombine.low %v19185_v53, %v19184_v6  ;;  %v19186_v50 = vld [vmem:[#allocation20_spill] sm:$0xff]  ;;  %v4617_v28 = vcombine.high %v4551_v18, %v17556_v5  ;;  %v4599_v5 = vrot.slane %v4585_v33, %v19181_v57  ;;  %v19191_v18 = vld [vmem:[#allocation27_spill] sm:$0xff]  ;;  %v19197_v33 = vld [vmem:[#allocation37_spill] sm:$0xff] }
 0x464   :  { %13705 = vpow2.f32 %v8139_v7  ;;  %8308 = vadd.xlane.f32.xlu1 %v8307_v46  ;;  %8314 = vadd.xlane.f32.xlu0 %v8313_v10  ;;  %v4568_v21 = vcombine.low %v19187_v29, %v19186_v50  ;;  %v8026_v46 = vsub.f32 %v17239_v27, %v7958_v36  ;;  %v17580_v10 = vrot.slane %v4600_v34, %v19188_v14  ;;  %v19189_v34 = vld [vmem:[#allocation38_spill] sm:$0xff]  ;;  %v19190_v53 = vld [vmem:[#allocation12_spill] sm:$0xff] }
 0x465   :  { %v17564_v15 = vpop.xlane.xlu1 %7948  ;;  %13707 = vpow2.f32 %v8143_v30  ;;  %v4569_v61 = vcombine.high %v19187_v29, %v19186_v50  ;;  %v17588_v6 = vrot.slane %v4601_v3, %v19188_v14  ;;  %v17591_v30 = vrot.slane %v4616_v37, %v19188_v14  ;;  %v19192_v29 = vld [vmem:[#allocation24_spill] sm:$0xff] }
 0x466   :  { %v17566_v8 = vpop.eup %13701  ;;  %v4592_v27 = vrot.slane %v4584_v9, %v19181_v57  ;;  %v4576_v36 = vrot.slane %v4568_v21, %v19181_v57  ;;  %v4856_v50 = vcombine.low %v19192_v29, %v19191_v18  ;;  %v4857_v3 = vcombine.high %v19192_v29, %v19191_v18 }
 0x467   :  { %19183 = vst [vmem:[#allocation82_spill] sm:$0xff] %v17566_v8  ;;  %v7952_v7 = vpop.xlane.xlu0 %7951  ;;  %v8310_v59 = vsel %vm7772_vm2, %v17566_v8, 0.0  ;;  %v8151_v37 = vmul.f32 1.442695, %v8026_v46  ;;  %v4583_v21 = vrot.slane %v4569_v61, %v19181_v57  ;;  %v4840_v24 = vcombine.low %v19197_v33, %v19196_v22 }
 0x468   :  { %v8024_v45 = vsub.f32 %v17249_v11, %v7952_v7  ;;  %8311 = vadd.xlane.f32.xlu0 %v8310_v59  ;;  %v4808_v7 = vcombine.low %v19190_v53, %v19189_v34  ;;  %v4809_v46 = vcombine.high %v19190_v53, %v19189_v34  ;;  %v4841_v61 = vcombine.high %v19197_v33, %v19196_v22 }
 0x469   :  { %v17585_v31 = vpop.xlane.xlu1 %7960  ;;  %v4633_v18 = vcombine.high %v4576_v36, %v4592_v27  ;;  %v4864_v29 = vrot.slane %v4856_v50, %v19181_v57  ;;  %v4648_v43 = vcombine.low %v4583_v21, %v4599_v5  ;;  %v4871_v56 = vrot.slane %v4857_v3, %v19181_v57 }
 0x46a   :  { %v8147_v11 = vmul.f32 1.442695, %v8024_v45  ;;  %v19194_v45 = vld [vmem:[#allocation30_spill] sm:$0xff]  ;;  %v17625_v53 = vrot.slane %v4617_v28, %v19188_v14  ;;  %v4855_v3 = vrot.slane %v4841_v61, %v19181_v57 }
 0x46b   :  { %v7964_v59 = vpop.xlane.xlu0 %7963  ;;  %v4824_v26 = vcombine.low %v19195_v60, %v19194_v45 }
 0x46c   :  { %v17600_v8 = vpop.eup %13703  ;;  %13709 = vpow2.f32 %v8147_v11  ;;  %v8028_v9 = vsub.f32 %v17267_v63, %v7964_v59  ;;  %v4632_v11 = vcombine.low %v4576_v36, %v4592_v27  ;;  %v4825_v63 = vcombine.high %v19195_v60, %v19194_v45 }
 0x46d   :  { %19193 = vst [vmem:[#allocation39_spill] sm:$0xff] %v17600_v8  ;;  %v8159_v1 = vpop.xlane.xlu1 %8158  ;;  %v8319_v49 = vsel %vm7772_vm2, %v17600_v8, 0.0  ;;  %v4832_v60 = vrot.slane %v4824_v26, %v19181_v57  ;;  %v4649_v36 = vcombine.high %v4583_v21, %v4599_v5  ;;  %v17639_v26 = vrot.slane %v4633_v18, %v19188_v14 }
 0x46e   :  { %v17612_v62 = vpop.eup %13705  ;;  %8320 = vadd.xlane.f32.xlu0 %v8319_v49  ;;  %13711 = vrcp.f32 %v8159_v1  ;;  %v8155_v34 = vmul.f32 1.442695, %v8028_v9  ;;  %v4848_v49 = vrot.slane %v4840_v24, %v19181_v57  ;;  %v4816_v1 = vrot.slane %v4808_v7, %v19181_v57 }
 0x46f   :  { %19198 = vst [vmem:[#allocation31_spill] sm:$0xff] %v17612_v62  ;;  %v8162_v59 = vpop.xlane.xlu0 %8161  ;;  %v8322_v8 = vsel %vm7772_vm2, %v17612_v62, 0.0  ;;  %13713 = vpow2.f32 %v8151_v37  ;;  %v17629_v27 = vpop.eup %13707  ;;  %v4839_v50 = vrot.slane %v4825_v63, %v19181_v57  ;;  %v4823_v37 = vrot.slane %v4809_v46, %v19181_v57  ;;  %v19200_v46 = vld [vmem:[#allocation16_spill] sm:$0xff] }
 0x470   :  { %13715 = vrcp.f32 %v8162_v59  ;;  %19199 = vst [vmem:[#allocation14_spill] sm:$0xff] %v17629_v27  ;;  %v17636_v28 = vrot.slane %v4632_v11, %v19188_v14  ;;  %v4904_v24 = vcombine.low %v4848_v49, %v4864_v29  ;;  %v17642_v45 = vrot.slane %v4648_v43, %v19188_v14 }
 0x471   :  { %v8171_v22 = vpop.xlane.xlu1 %8170  ;;  %v4905_v7 = vcombine.high %v4848_v49, %v4864_v29  ;;  %v4920_v5 = vcombine.low %v4855_v3, %v4871_v56  ;;  %13717 = vpow2.f32 %v8155_v34  ;;  %v4872_v21 = vcombine.low %v4816_v1, %v4832_v60 }
 0x472   :  { %8323 = vadd.xlane.f32.xlu0 %v8322_v8  ;;  %v4921_v33 = vcombine.high %v4855_v3, %v4871_v56  ;;  %v8328_v8 = vsel %vm7772_vm2, %v17629_v27, 0.0  ;;  %v17651_v61 = vrot.slane %v4649_v36, %v19188_v14  ;;  %v4873_v43 = vcombine.high %v4816_v1, %v4832_v60 }
 0x473   :  { %v8174_v9 = vpop.xlane.xlu0 %8173  ;;  %v4888_v18 = vcombine.low %v4823_v37, %v4839_v50  ;;  %v4889_v29 = vcombine.high %v4823_v37, %v4839_v50  ;;  %v4912_v56 = vrot.slane %v4904_v24, %v19188_v14  ;;  %v4664_v49 = vcombine.low %v17580_v10, %v17636_v28 }
 0x474   :  { %13719 = vrcp.f32 %v8174_v9  ;;  %v4919_v3 = vrot.slane %v4905_v7, %v19188_v14  ;;  %v4928_v36 = vrot.slane %v4920_v5, %v19188_v14  ;;  %v4665_v1 = vcombine.high %v17580_v10, %v17636_v28 }
 0x475   :  { %v8165_v63 = vpop.xlane.xlu1 %8164  ;;  %4394 = vrot.lane.b32.xlu1 %v19200_v46, %s13952_s13  ;;  %v4666_v50 = vcombine.low %v17588_v6, %v17639_v26  ;;  %v4935_v37 = vrot.slane %v4921_v33, %v19188_v14  ;;  %v4668_v7 = vcombine.low %v17591_v30, %v17642_v45  ;;  %v4669_v5 = vcombine.high %v17591_v30, %v17642_v45 }
 0x476   :  { %v17648_v11 = vpop.eup %13709  ;;  %13721 = vrcp.f32 %v8165_v63  ;;  %8329 = vadd.xlane.f32.xlu0 %v8328_v8  ;;  %v4887_v63 = vrot.slane %v4873_v43, %v19188_v14  ;;  %v4896_v10 = vrot.slane %v4888_v18, %v19188_v14  ;;  %v4903_v33 = vrot.slane %v4889_v29, %v19188_v14 }
 0x477   :  { %19201 = vst [vmem:[#allocation32_spill] sm:$0xff] %v17648_v11  ;;  %13723 = vrcp.f32 %v8171_v22  ;;  %v8168_v59 = vpop.xlane.xlu0 %8167  ;;  %v8334_v34 = vsel %vm7772_vm2, %v17648_v11, 0.0  ;;  %v4880_v22 = vrot.slane %v4872_v21, %v19188_v14  ;;  %v4670_v21 = vcombine.low %v17625_v53, %v17651_v61 }
 0x478   :  { %13725 = vrcp.f32 %v8168_v59  ;;  %v13712_v60 = vpop.eup %13711  ;;  %v4938_v11 = vcombine.low %v4887_v63, %v4919_v3  ;;  %v4940_v27 = vcombine.low %v4896_v10, %v4928_v36  ;;  %v4941_v45 = vcombine.high %v4896_v10, %v4928_v36 }
 0x479   :  { %v8183_v24 = vpop.xlane.xlu1 %8182  ;;  %v17666_v9 = vpop.eup %13713  ;;  %v4936_v8 = vcombine.low %v4880_v22, %v4912_v56  ;;  %v4937_v46 = vcombine.high %v4880_v22, %v4912_v56  ;;  %v8413_v62 = vmul.f32 %v13712_v60, %v17271_v23  ;;  %v4942_v43 = vcombine.low %v4903_v33, %v4935_v37 }
 0x47a   :  { %8335 = vadd.xlane.f32.xlu0 %v8334_v34  ;;  %v13716_v28 = vpop.eup %13715  ;;  %v8340_v18 = vsel %vm7772_vm2, %v17666_v9, 0.0  ;;  %v4939_v25 = vcombine.high %v4887_v63, %v4919_v3  ;;  %v4943_v29 = vcombine.high %v4903_v33, %v4935_v37  ;;  %v4667_v23 = vcombine.high %v17588_v6, %v17639_v26  ;;  %v19202_v63 = vld [vmem:[#allocation22_spill] sm:$0xff]  ;;  %v19203_v33 = vld [vmem:[#allocation36_spill] sm:$0xff] }
 0x47b   :  { %v8186_v59 = vpop.xlane.xlu0 %8185  ;;  %v8414_v30 = vmul.f32 %v13716_v28, %v17279_v58  ;;  %v17681_v34 = vpop.eup %13717  ;;  %v4671_v58 = vcombine.high %v17625_v53, %v17651_v61  ;;  %v12639_v10 = vpack.c.bf16 %v4668_v7, %v4664_v49  ;;  %v12641_v28 = vpack.c.bf16 %v4670_v21, %v4666_v50  ;;  %v19206_v50 = vld [vmem:[#allocation80_spill] sm:$0xff] }
 0x47c   :  { %13727 = vrcp.f32 %v8186_v59  ;;  %v12643_v59 = vpack.c.bf16 %v4940_v27, %v4936_v8  ;;  %v12651_v37 = vpack.c.bf16 %v4941_v45, %v4937_v46  ;;  %v8346_v6 = vsel %vm7772_vm2, %v17681_v34, 0.0 }
 0x47d   :  { %v8177_v55 = vpop.xlane.xlu1 %8176  ;;  %v8477_v56 = vpack.c.bf16 %v8414_v30, %v8413_v62  ;;  %v19204_v30 = vpack.i.b16 %v19202_v63, %v19203_v33  ;;  %v19205_v53 = vmov 0.0   ;;  %v12647_v61 = vpack.c.bf16 %v4669_v5, %v4665_v1 }
 0x47e   :  { %13729 = vrcp.f32 %v8177_v55  ;;  %8341 = vadd.xlane.f32.xlu0 %v8340_v18  ;;  %v13720_v22 = vpop.eup %13719  ;;  %v12645_v55 = vpack.c.bf16 %v4942_v43, %v4938_v11  ;;  %v12653_v27 = vpack.c.bf16 %v4943_v29, %v4939_v25  ;;  %v12649_v11 = vpack.c.bf16 %v4671_v58, %v4667_v23  ;;  %v19208_v58 = vld [vmem:[#allocation21_spill] sm:$0xff] }
 0x47f   :  { %13731 = vrcp.f32 %v8183_v24  ;;  %v8180_v36 = vpop.xlane.xlu0 %8179  ;;  %13170 = vmatmul.mubr.msk.bf16.vlgmr.msra.gmra.mrb[64].mxu1 %vm7772_vm2, %v8477_v56  ;;  %v8418_v49 = vmul.f32 %v13720_v22, %v17293_v51  ;;  %v8018_v24 = vsub.f32 %v19206_v50, %v17511_v47  ;;  %v17703_v45 = vrot.slane %v12639_v10, %v19181_v57 }
 0x480   :  { %v13722_v60 = vpop.eup %13721  ;;  %13733 = vrcp.f32 %v8180_v36  ;;  %13180 = vmatpush3.bf16.msra.mxu1 %v19204_v30  ;;  %13181 = vmatprep.mubr.msk.bf16.mxu1 %vm13973_vm0, %v19205_v53  ;;  %v17706_v25 = vrot.slane %v12641_v28, %v19181_v57  ;;  %v17709_v51 = vrot.slane %v12643_v59, %v19181_v57  ;;  %v17712_v47 = vrot.slane %v12645_v55, %v19181_v57  ;;  %v19209_v28 = vld [vmem:[#allocation26_spill] sm:$0xff]  ;;  %v19210_v59 = vld [vmem:[#allocation35_spill] sm:$0xff] }
 0x481   :  { %v13724_v3 = vpop.eup %13723  ;;  %v8195_v62 = vpop.xlane.xlu1 %8194  ;;  %13191 = vmatprep.subr.bf16.mxu1 %v19205_v53  ;;  %v8415_v7 = vmul.f32 %v13722_v60, %v17301_v54  ;;  %v17715_v54 = vrot.slane %v12651_v37, %v19181_v57  ;;  %v17720_v18 = vrot.slane %v12653_v27, %v19181_v57  ;;  %v8135_v56 = vmul.f32 1.442695, %v8018_v24 }
 0x482   :  { %v13726_v26 = vpop.eup %13725  ;;  %8347 = vadd.xlane.f32.xlu0 %v8346_v6  ;;  %v8417_v46 = vmul.f32 %v13724_v3, %v17285_v19  ;;  %v19207_v19 = vld [vmem:[#allocation83_spill] sm:$0xff]  ;;  %v17726_v36 = vrot.slane %v12647_v61, %v19181_v57  ;;  %v19211_v3 = vpack.i.b16 %v19209_v28, %v19210_v59  ;;  %v5632_v55 = vcombine.low %v17709_v51, %v17712_v47 }
 0x483   :  { %v8416_v21 = vmul.f32 %v13726_v26, %v17307_v40  ;;  %v8198_v8 = vpop.xlane.xlu0 %8197  ;;  %v8021_v40 = vsub.f32 %v19207_v19, %v17527_v41  ;;  %v17729_v41 = vrot.slane %v12649_v11, %v19181_v57  ;;  %v5600_v33 = vcombine.low %v17703_v45, %v17706_v25  ;;  %v19214_v19 = vld [vmem:[#allocation13_spill] sm:$0xff] }
 0x484   :  { %13735 = vrcp.f32 %v8198_v8  ;;  %v8479_v43 = vpack.c.bf16 %v8418_v49, %v8417_v46  ;;  %v5768_v30 = vcombine.low %v17715_v54, %v17720_v18  ;;  %v8023_v6 = vsub.f32 %v17233_v17, %v17564_v15  ;;  %v19212_v46 = vld [vmem:[#allocation15_spill] sm:$0xff] }
 0x485   :  { %v8189_v1 = vpop.xlane.xlu1 %8188  ;;  %v8478_v5 = vpack.c.bf16 %v8416_v21, %v8415_v7  ;;  %v5736_v49 = vcombine.low %v17726_v36, %v17729_v41  ;;  %v17755_v24 = vrot.slane %v5632_v55, %v19188_v14  ;;  %v8025_v17 = vsub.f32 %v17227_v52, %v17551_v42  ;;  %v19213_v42 = vld [vmem:[#allocation33_spill] sm:$0xff] }
 0x486   :  { %13737 = vrcp.f32 %v8189_v1  ;;  %v13728_v29 = vpop.eup %13727  ;;  %v8145_v7 = vmul.f32 1.442695, %v8023_v6  ;;  %v5608_v21 = vrot.slane %v5600_v33, %v19188_v14 }
 0x487   :  { %13739 = vrcp.f32 %v8195_v62  ;;  %13176 = vmatmul.mubr.msk.bf16.vlgmr.msra.gmra.mrb[76].mxu0 %vm7772_vm2, %v8478_v5  ;;  %v8192_v22 = vpop.xlane.xlu0 %8191  ;;  %13182 = vmatmul.mubr.msk.bf16.vlgmr.msra.gmra.mrb[68].mxu1 %vm7772_vm2, %v8479_v43  ;;  %v8141_v62 = vmul.f32 1.442695, %v8021_v40  ;;  %v8422_v63 = vmul.f32 %v13728_v29, %v17318_v38  ;;  %v5744_v1 = vrot.slane %v5736_v49, %v19188_v14 }
 0x488   :  { %v13730_v23 = vpop.eup %13729  ;;  %13186 = vmatpush3.bf16.msra.mxu0 %v19208_v58  ;;  %13741 = vrcp.f32 %v8192_v22  ;;  %13192 = vmatpush3.bf16.msra.mxu1 %v19211_v3  ;;  %v19215_v40 = vpack.i.b16 %v19213_v42, %v19214_v19  ;;  %v17771_v43 = vcombine.low %v5608_v21, %v17755_v24  ;;  %v8027_v58 = vsub.f32 %v17257_v48, %v17585_v31 }
 0x489   :  { %v13732_v60 = vpop.eup %13731  ;;  %v8207_v10 = vpop.xlane.xlu1 %8206  ;;  %13187 = vmatprep.mubr.msk.bf16.mxu0 %vm13973_vm0, %v19205_v53  ;;  %13193 = vmatprep.mubr.msk.bf16.mxu1 %vm13973_vm0, %v19205_v53  ;;  %13743 = vpow2.f32 %v8135_v56  ;;  %v8419_v26 = vmul.f32 %v13730_v23, %v17324_v44  ;;  %v8149_v56 = vmul.f32 1.442695, %v8025_v17 }
 0x48a   :  { %v13734_v37 = vpop.eup %13733  ;;  %13197 = vmatprep.subr.bf16.mxu0 %v19205_v53  ;;  %13203 = vmatprep.subr.bf16.mxu1 %v19205_v53  ;;  %v8421_v27 = vmul.f32 %v13732_v60, %v17313_v2 }
 0x48b   :  { %v8420_v61 = vmul.f32 %v13734_v37, %v17330_v20  ;;  %v8210_v38 = vpop.xlane.xlu0 %8209  ;;  %v5776_v20 = vrot.slane %v5768_v30, %v19188_v14  ;;  %v5633_v30 = vcombine.high %v17709_v51, %v17712_v47 }
 0x48c   :  { %13745 = vrcp.f32 %v8210_v38  ;;  %v8481_v44 = vpack.c.bf16 %v8422_v63, %v8421_v27  ;;  %v8153_v63 = vmul.f32 1.442695, %v8027_v58  ;;  %v17805_v27 = vcombine.high %v5608_v21, %v17755_v24 }
 0x48d   :  { %v8201_v11 = vpop.xlane.xlu1 %8200  ;;  %v8480_v50 = vpack.c.bf16 %v8420_v61, %v8419_v26  ;;  %13747 = vpow2.f32 %v8141_v62  ;;  %v17777_v23 = vcombine.low %v5744_v1, %v5776_v20  ;;  %v5769_v26 = vcombine.high %v17715_v54, %v17720_v18 }
 0x48e   :  { %v13736_v15 = vpop.eup %13735  ;;  %13749 = vrcp.f32 %v8207_v10  ;;  %v17807_v49 = vcombine.high %v5744_v1, %v5776_v20  ;;  %v5601_v18 = vcombine.high %v17703_v45, %v17706_v25 }
 0x48f   :  { %13188 = vmatmul.mubr.msk.bf16.vlgmr.msra.gmra.mrb[80].mxu0 %vm7772_vm2, %v8480_v50  ;;  %v8219_v2 = vpop.xlane.xlu0 %8218  ;;  %13194 = vmatmul.mubr.msk.bf16.vlgmr.msra.gmra.mrb[72].mxu1 %vm7772_vm2, %v8481_v44  ;;  %v8426_v22 = vmul.f32 %v13736_v15, %v17341_v39  ;;  %13751 = vrcp.f32 %v8201_v11  ;;  %v6098_v48 = vpack.i.b16 %v17777_v23, %v17771_v43  ;;  %v17820_v11 = vrot.slane %v5633_v30, %v19188_v14  ;;  %v19221_v30 = vld [vmem:[#allocation90_spill] sm:$0xff] }
 0x490   :  { %v13738_v8 = vpop.eup %13737  ;;  %13198 = vmatpush3.bf16.msra.mxu0 %v19212_v46  ;;  %13204 = vmatpush3.bf16.msra.mxu1 %v19215_v40  ;;  %13753 = vpow2.f32 %v8145_v7  ;;  %v5737_v50 = vcombine.high %v17726_v36, %v17729_v41  ;;  %v6101_v44 = vshrl.u32 %v17777_v23, 16  ;;  %v5783_v20 = vrot.slane %v5769_v26, %v19188_v14 }
 0x491   :  { %v13740_v5 = vpop.eup %13739  ;;  %v8222_v52 = vpop.xlane.xlu1 %8221  ;;  %13199 = vmatprep.mubr.msk.bf16.mxu0 %vm13973_vm0, %v19205_v53  ;;  %13205 = vmatprep.mubr.msk.bf16.mxu1 %vm13973_vm0, %v19205_v53  ;;  %v8423_v60 = vmul.f32 %v13738_v8, %v17347_v0  ;;  %v6106_v25 = vpack.i.b16 %v17807_v49, %v17805_v27 }
 0x492   :  { %v13742_v29 = vpop.eup %13741  ;;  %13209 = vmatprep.subr.bf16.mxu0 %v19205_v53  ;;  %13215 = vmatprep.subr.bf16.mxu1 %v19205_v53  ;;  %v8425_v39 = vmul.f32 %v13740_v5, %v17335_v35  ;;  %v19216_v35 = vld [vmem:[#allocation17_spill] sm:$0xff] }
 0x493   :  { %v8424_v10 = vmul.f32 %v13742_v29, %v17352_v32  ;;  %v8204_v28 = vpop.xlane.xlu0 %8203  ;;  %v17785_v59 = vpop.eup %13743  ;;  %v19217_v5 = vld [vmem:[#allocation85_spill] sm:$0xff] }
 0x494   :  { %13755 = vrcp.f32 %v8204_v28  ;;  %v8483_v37 = vpack.c.bf16 %v8426_v22, %v8425_v39  ;;  %v8316_v31 = vsel %vm7772_vm2, %v17785_v59, 0.0  ;;  %v6108_v39 = vshrl.u32 %v17805_v27, 16 }
 0x495   :  { %v8213_v3 = vpop.xlane.xlu1 %8212  ;;  %13757 = vrcp.f32 %v8219_v2  ;;  %v8482_v55 = vpack.c.bf16 %v8424_v10, %v8423_v60  ;;  %v19219_v60 = vld [vmem:[#allocation88_spill] sm:$0xff] }
 0x496   :  { %13759 = vpow2.f32 %v8149_v56  ;;  %v13746_v62 = vpop.eup %13745  ;;  %v19218_v56 = vld [vmem:[#allocation86_spill] sm:$0xff] }
 0x497   :  { %13761 = vrcp.f32 %v8222_v52  ;;  %13200 = vmatmul.mubr.msk.bf16.vlgmr.msra.gmra.mrb[84].mxu0 %vm7772_vm2, %v8482_v55  ;;  %v8216_v0 = vpop.xlane.xlu0 %8215  ;;  %v17790_v32 = vpop.eup %13747  ;;  %13206 = vmatmul.mubr.msk.bf16.vlgmr.msra.gmra.mrb[76].mxu1 %vm7772_vm2, %v8483_v37  ;;  %v8430_v6 = vmul.f32 %v13746_v62, %v17362_v12  ;;  %v19220_v37 = vld [vmem:[#allocation87_spill] sm:$0xff] }
 0x498   :  { %13210 = vmatpush3.bf16.msra.mxu0 %v19216_v35  ;;  %13763 = vrcp.f32 %v8216_v0  ;;  %v13750_v33 = vpop.eup %13749  ;;  %13216 = vmatpush3.bf16.msra.mxu1 %v6098_v48  ;;  %v8325_v47 = vsel %vm7772_vm2, %v17790_v32, 0.0 }
 0x499   :  { %8317 = vadd.xlane.f32.xlu1 %v8316_v31  ;;  %13765 = vrcp.f32 %v8213_v3  ;;  %13217 = vmatprep.mubr.msk.bf16.mxu1 %vm13973_vm0, %v19205_v53  ;;  %v8231_v61 = vpop.xlane.xlu1 %8230  ;;  %v13752_v12 = vpop.eup %13751  ;;  %v8429_v51 = vmul.f32 %v13750_v33, %v17357_v13  ;;  %v6100_v13 = vshrl.u32 %v17771_v43, 16  ;;  %v6109_v3 = vshrl.u32 %v17807_v49, 16 }
 0x49a   :  { %13227 = vmatprep.subr.bf16.mxu1 %v19205_v53  ;;  %13767 = vpow2.f32 %v8153_v63  ;;  %13211 = vmatprep.mubr.msk.bf16.mxu0 %vm13973_vm0, %v19205_v53  ;;  %v17815_v54 = vpop.eup %13753  ;;  %v8427_v7 = vmul.f32 %v13752_v12, %v17367_v4  ;;  %v5615_v4 = vrot.slane %v5601_v18, %v19188_v14  ;;  %v19222_v12 = vld [vmem:[#allocation89_spill] sm:$0xff] }
 0x49b   :  { %v8234_v38 = vpop.xlane.xlu0 %8233  ;;  %13221 = vmatprep.subr.bf16.mxu0 %v19205_v53  ;;  %v8485_v17 = vpack.c.bf16 %v8430_v6, %v8429_v51  ;;  %v8331_v36 = vsel %vm7772_vm2, %v17815_v54, 0.0  ;;  %v6102_v42 = vpack.i.b16 %v6101_v44, %v6100_v13  ;;  %v6110_v26 = vpack.i.b16 %v6109_v3, %v6108_v39  ;;  %v19223_v13 = vld [vmem:[#allocation92_spill] sm:$0xff] }
 0x49c   :  { %13769 = vrcp.f32 %v8234_v38  ;;  %v5654_v40 = vcombine.low %v5615_v4, %v17820_v11  ;;  %v5655_v38 = vcombine.high %v5615_v4, %v17820_v11  ;;  %v19224_v11 = vld [vmem:[#allocation94_spill] sm:$0xff] }
 0x49d   :  { %8326 = vadd.xlane.f32.xlu1 %v8325_v47  ;;  %13771 = vrcp.f32 %v8231_v61  ;;  %v8243_v8 = vpop.xlane.xlu1 %8242 }
 0x49e   :  { %v13756_v24 = vpop.eup %13755 }
 0x49f   :  { %v13758_v15 = vpop.eup %13757  ;;  %v8428_v45 = vmul.f32 %v13756_v24, %v17382_v16  ;;  %v8225_v2 = vpop.xlane.xlu0 %8224  ;;  %13218 = vmatmul.mubr.msk.bf16.vlgmr.msra.gmra.mrb[80].mxu1 %vm7772_vm2, %v8485_v17  ;;  %v5751_v16 = vrot.slane %v5737_v50, %v19188_v14  ;;  %v6116_v24 = vshrl.u32 %v5654_v40, 16 }
 0x4a0   :  { %v17831_v21 = vpop.eup %13759  ;;  %13228 = vmatpush3.bf16.msra.mxu1 %v6106_v25  ;;  %v8433_v52 = vmul.f32 %v13758_v15, %v19217_v5  ;;  %13773 = vrcp.f32 %v8225_v2  ;;  %13229 = vmatprep.mubr.msk.bf16.mxu1 %vm13973_vm0, %v19205_v53 }
 0x4a1   :  { %v13762_v41 = vpop.eup %13761  ;;  %8332 = vadd.xlane.f32.xlu1 %v8331_v36  ;;  %v8484_v46 = vpack.c.bf16 %v8428_v45, %v8427_v7  ;;  %13239 = vmatprep.subr.bf16.mxu1 %v19205_v53  ;;  %v5790_v43 = vcombine.low %v5751_v16, %v5783_v20  ;;  %v8337_v23 = vsel %vm7772_vm2, %v17831_v21, 0.0  ;;  %v8237_v63 = vpop.xlane.xlu1 %8236  ;;  %v5791_v27 = vcombine.high %v5751_v16, %v5783_v20 }
 0x4a2   :  { %v13764_v1 = vpop.eup %13763  ;;  %v8434_v22 = vmul.f32 %v13762_v41, %v19218_v56  ;;  %v19225_v41 = vld [vmem:[#allocation91_spill] sm:$0xff] }
 0x4a3   :  { %13212 = vmatmul.mubr.msk.bf16.vlgmr.msra.gmra.mrb[88].mxu0 %vm7772_vm2, %v8484_v46  ;;  %v8228_v19 = vpop.xlane.xlu0 %8227  ;;  %v13766_v29 = vpop.eup %13765  ;;  %v8432_v10 = vmul.f32 %v13764_v1, %v19219_v60  ;;  %v6114_v48 = vpack.i.b16 %v5790_v43, %v5654_v40  ;;  %v6117_v17 = vshrl.u32 %v5790_v43, 16  ;;  %v6122_v15 = vpack.i.b16 %v5791_v27, %v5655_v38  ;;  %v19226_v46 = vld [vmem:[#allocation95_spill] sm:$0xff]  ;;  %v19228_v43 = vld [vmem:[#allocation96_spill] sm:$0xff] }
 0x4a4   :  { %13222 = vmatpush3.bf16.msra.mxu0 %v6102_v42  ;;  %13775 = vrcp.f32 %v8228_v19  ;;  %13223 = vmatprep.mubr.msk.bf16.mxu0 %vm13973_vm0, %v19205_v53  ;;  %v17849_v58 = vpop.eup %13767  ;;  %v8487_v28 = vpack.c.bf16 %v8434_v22, %v8433_v52  ;;  %v8431_v62 = vmul.f32 %v13766_v29, %v19220_v37  ;;  %v6124_v52 = vshrl.u32 %v5655_v38, 16  ;;  %v19227_v19 = vld [vmem:[#allocation93_spill] sm:$0xff]  ;;  %v19230_v60 = vld [vmem:[#allocation40_spill] sm:$0xff] }
 0x4a5   :  { %8338 = vadd.xlane.f32.xlu1 %v8337_v23  ;;  %13233 = vmatprep.subr.bf16.mxu0 %v19205_v53  ;;  %13777 = vrcp.f32 %v8243_v8  ;;  %v8343_v35 = vsel %vm7772_vm2, %v17849_v58, 0.0  ;;  %v6118_v36 = vpack.i.b16 %v6117_v17, %v6116_v24  ;;  %v6125_v42 = vshrl.u32 %v5791_v27, 16  ;;  %v19229_v23 = vld [vmem:[#allocation42_spill] sm:$0xff]  ;;  %v19232_v37 = vld [vmem:[#allocation97_spill] sm:$0xff] }
 0x4a6   :  { %v13770_v55 = vpop.eup %13769  ;;  %v8486_v33 = vpack.c.bf16 %v8432_v10, %v8431_v62  ;;  %v19231_v10 = vpack.i.b16 %v19229_v23, %v19230_v60 }
 0x4a7   :  { %v8246_v0 = vpop.xlane.xlu0 %8245  ;;  %13230 = vmatmul.mubr.msk.bf16.vlgmr.msra.gmra.mrb[84].mxu1 %vm7772_vm2, %v8487_v28  ;;  %v13772_v31 = vpop.eup %13771  ;;  %v8438_v6 = vmul.f32 %v13770_v55, %v19221_v30  ;;  %v6126_v55 = vpack.i.b16 %v6125_v42, %v6124_v52  ;;  %v19246_v42 = vld [vmem:[#allocation60_spill] sm:$0xff] }
 0x4a8   :  { %13779 = vrcp.f32 %v8246_v0  ;;  %13240 = vmatpush3.bf16.msra.mxu1 %v6114_v48  ;;  %13241 = vmatprep.mubr.msk.bf16.mxu1 %vm13973_vm0, %v19205_v53  ;;  %v8437_v51 = vmul.f32 %v13772_v31, %v19222_v12 }
 0x4a9   :  { %8344 = vadd.xlane.f32.xlu1 %v8343_v35  ;;  %13781 = vrcp.f32 %v8237_v63  ;;  %13251 = vmatprep.subr.bf16.mxu1 %v19205_v53  ;;  %v19233_v63 = vld [vmem:[#allocation98_spill] sm:$0xff] }
 0x4aa   :  { %v13774_v49 = vpop.eup %13773  ;;  %v8489_v50 = vpack.c.bf16 %v8438_v6, %v8437_v51  ;;  %v19234_v6 = vld [vmem:[#allocation43_spill] sm:$0xff]  ;;  %v19237_v51 = vld [vmem:[#allocation58_spill] sm:$0xff] }
 0x4ab   :  { %13224 = vmatmul.mubr.msk.bf16.vlgmr.msra.gmra.mrb[92].mxu0 %vm7772_vm2, %v8486_v33  ;;  %v8240_v61 = vpop.xlane.xlu0 %8239  ;;  %v8435_v44 = vmul.f32 %v13774_v49, %v19223_v13  ;;  %v19239_v13 = vld [vmem:[#allocation99_spill] sm:$0xff] }
 0x4ac   :  { %13234 = vmatpush3.bf16.msra.mxu0 %v6110_v26  ;;  %13783 = vrcp.f32 %v8240_v61  ;;  %13235 = vmatprep.mubr.msk.bf16.mxu0 %vm13973_vm0, %v19205_v53  ;;  %v19235_v26 = vld [vmem:[#allocation41_spill] sm:$0xff] }
 0x4ad   :  { %13245 = vmatprep.subr.bf16.mxu0 %v19205_v53  ;;  %v8255_v47 = vpop.xlane.xlu1 %8254  ;;  %v19236_v61 = vpack.i.b16 %v19234_v6, %v19235_v26  ;;  %v19255_v26 = vld [vmem:[#allocation102_spill] sm:$0xff] }
 0x4ae   :  { %v13776_v18 = vpop.eup %13775  ;;  %13785 = vrcp.f32 %v8255_v47 }
 0x4af   :  { %v8436_v20 = vmul.f32 %v13776_v18, %v19224_v11  ;;  %v8258_v7 = vpop.xlane.xlu0 %8257  ;;  %v13778_v45 = vpop.eup %13777  ;;  %13242 = vmatmul.mubr.msk.bf16.vlgmr.msra.gmra.mrb[88].mxu1 %vm7772_vm2, %v8489_v50  ;;  %v19238_v18 = vld [vmem:[#allocation61_spill] sm:$0xff]  ;;  %v19240_v11 = vld [vmem:[#allocation100_spill] sm:$0xff] }
 0x4b0   :  { %13787 = vrcp.f32 %v8258_v7  ;;  %13252 = vmatpush3.bf16.msra.mxu1 %v6122_v15  ;;  %13253 = vmatprep.mubr.msk.bf16.mxu1 %vm13973_vm0, %v19205_v53  ;;  %v8441_v8 = vmul.f32 %v13778_v45, %v19225_v41 }
 0x4b1   :  { %v8488_v25 = vpack.c.bf16 %v8436_v20, %v8435_v44  ;;  %13263 = vmatprep.subr.bf16.mxu1 %v19205_v53  ;;  %v8249_v56 = vpop.xlane.xlu1 %8248 }
 0x4b2   :  { %v13780_v2 = vpop.eup %13779 }
 0x4b3   :  { %v8442_v4 = vmul.f32 %v13780_v2, %v19226_v46  ;;  %13236 = vmatmul.mubr.msk.bf16.vlgmr.msra.gmra.mrb[96].mxu0 %vm7772_vm2, %v8488_v25  ;;  %v13782_v16 = vpop.eup %13781  ;;  %v19241_v2 = vld [vmem:[#allocation45_spill] sm:$0xff]  ;;  %v19244_v46 = vld [vmem:[#allocation48_spill] sm:$0xff] }
 0x4b4   :  { %13246 = vmatpush3.bf16.msra.mxu0 %v6118_v36  ;;  %13247 = vmatprep.mubr.msk.bf16.mxu0 %vm13973_vm0, %v19205_v53  ;;  %v8439_v40 = vmul.f32 %v13782_v16, %v19227_v19  ;;  %v19242_v36 = vld [vmem:[#allocation44_spill] sm:$0xff] }
 0x4b5   :  { %v8491_v1 = vpack.c.bf16 %v8442_v4, %v8441_v8  ;;  %13257 = vmatprep.subr.bf16.mxu0 %v19205_v53  ;;  %v19243_v41 = vpack.i.b16 %v19241_v2, %v19242_v36  ;;  %v19245_v4 = vld [vmem:[#allocation62_spill] sm:$0xff]  ;;  %v19264_v2 = vld [vmem:[#allocation71_spill] sm:$0xff]  ;;  %v19265_v36 = vld [vmem:[#allocation64_spill] sm:$0xff] }
 0x4b6   :  { %v13784_v5 = vpop.eup %13783 }
 0x4b7   :  { %v8440_v29 = vmul.f32 %v13784_v5, %v19228_v43  ;;  %13254 = vmatmul.mubr.msk.bf16.vlgmr.msra.gmra.mrb[92].mxu1 %vm7772_vm2, %v8491_v1  ;;  %v8267_v39 = vpop.xlane.xlu0 %8266 }
 0x4b8   :  { %v13786_v22 = vpop.eup %13785  ;;  %13264 = vmatpush3.bf16.msra.mxu1 %v19231_v10  ;;  %13265 = vmatprep.mubr.msk.bf16.mxu1 %vm13973_vm0, %v19205_v53  ;;  %13789 = vrcp.f32 %v8267_v39  ;;  %v19249_v10 = vld [vmem:[#allocation49_spill] sm:$0xff] }
 0x4b9   :  { %v8490_v28 = vpack.c.bf16 %v8440_v29, %v8439_v40  ;;  %13275 = vmatprep.subr.bf16.mxu1 %v19205_v53  ;;  %v8445_v62 = vmul.f32 %v13786_v22, %v19232_v37  ;;  %13791 = vrcp.f32 %v8249_v56  ;;  %v8270_v0 = vpop.xlane.xlu1 %8269  ;;  %v19247_v29 = vld [vmem:[#allocation65_spill] sm:$0xff]  ;;  %v19248_v22 = vld [vmem:[#allocation67_spill] sm:$0xff] }
 0x4ba   :  { %v13788_v3 = vpop.eup %13787  ;;  %13793 = vrcp.f32 %v8270_v0  ;;  %v19254_v0 = vld [vmem:[#allocation101_spill] sm:$0xff] }
 0x4bb   :  { %13248 = vmatmul.mubr.msk.bf16.vlgmr.msra.gmra.mrb[100].mxu0 %vm7772_vm2, %v8490_v28  ;;  %v8446_v48 = vmul.f32 %v13788_v3, %v19233_v63  ;;  %v8252_v35 = vpop.xlane.xlu0 %8251  ;;  %v19250_v3 = vld [vmem:[#allocation47_spill] sm:$0xff]  ;;  %v19253_v63 = vld [vmem:[#allocation66_spill] sm:$0xff] }
 0x4bc   :  { %13258 = vmatpush3.bf16.msra.mxu0 %v6126_v55  ;;  %13259 = vmatprep.mubr.msk.bf16.mxu0 %vm13973_vm0, %v19205_v53  ;;  %13795 = vrcp.f32 %v8252_v35  ;;  %v19251_v55 = vld [vmem:[#allocation46_spill] sm:$0xff] }
 0x4bd   :  { %v8493_v31 = vpack.c.bf16 %v8446_v48, %v8445_v62  ;;  %13269 = vmatprep.subr.bf16.mxu0 %v19205_v53  ;;  %v8261_v33 = vpop.xlane.xlu1 %8260  ;;  %v19252_v37 = vpack.i.b16 %v19250_v3, %v19251_v55  ;;  %v19266_v3 = vld [vmem:[#allocation63_spill] sm:$0xff] }
 0x4be   :  { %v19267_v55 = vld [vmem:[#allocation55_spill] sm:$0xff] }
 0x4bf   :  { %13266 = vmatmul.mubr.msk.bf16.vlgmr.msra.gmra.mrb[96].mxu1 %vm7772_vm2, %v8493_v31  ;;  %v8264_v30 = vpop.xlane.xlu0 %8263 }
 0x4c0   :  { %13276 = vmatpush3.bf16.msra.mxu1 %v19236_v61  ;;  %13277 = vmatprep.mubr.msk.bf16.mxu1 %vm13973_vm0, %v19205_v53  ;;  %13797 = vrcp.f32 %v8264_v30 }
 0x4c1   :  { %13287 = vmatprep.subr.bf16.mxu1 %v19205_v53  ;;  %13799 = vrcp.f32 %v8261_v33 }
 0x4c2   :  { %v13790_v38 = vpop.eup %13789 }
 0x4c3   :  { %v13792_v27 = vpop.eup %13791  ;;  %v8449_v47 = vmul.f32 %v13790_v38, %v19237_v51  ;;  %v19256_v38 = vld [vmem:[#allocation103_spill] sm:$0xff]  ;;  %v19259_v51 = vld [vmem:[#allocation53_spill] sm:$0xff] }
 0x4c4   :  { %v13794_v49 = vpop.eup %13793  ;;  %v8443_v44 = vmul.f32 %v13792_v27, %v19239_v13 }
 0x4c5   :  { %v8279_v12 = vpop.xlane.xlu1 %8278  ;;  %v8450_v50 = vmul.f32 %v13794_v49, %v19238_v18  ;;  %v19257_v49 = vld [vmem:[#allocation50_spill] sm:$0xff] }
 0x4c6   :  { %13801 = vrcp.f32 %v8279_v12  ;;  %v13796_v24 = vpop.eup %13795  ;;  %v19258_v12 = vld [vmem:[#allocation59_spill] sm:$0xff] }
 0x4c7   :  { %v8282_v17 = vpop.xlane.xlu0 %8281  ;;  %v8444_v20 = vmul.f32 %v13796_v24, %v19240_v11  ;;  %v8495_v15 = vpack.c.bf16 %v8450_v50, %v8449_v47  ;;  %v5096_v47 = vcombine.low %v19259_v51, %v19258_v12  ;;  %v5097_v50 = vcombine.high %v19259_v51, %v19258_v12  ;;  %v19260_v24 = vld [vmem:[#allocation73_spill] sm:$0xff]  ;;  %v19262_v11 = vld [vmem:[#allocation56_spill] sm:$0xff] }
 0x4c8   :  { %13803 = vrcp.f32 %v8282_v17  ;;  %v19261_v17 = vld [vmem:[#allocation69_spill] sm:$0xff] }
 0x4c9   :  { %13278 = vmatmul.mubr.msk.bf16.vlgmr.msra.gmra.mrb[100].mxu1 %vm7772_vm2, %v8495_v15  ;;  %v8492_v7 = vpack.c.bf16 %v8444_v20, %v8443_v44  ;;  %v5128_v13 = vcombine.low %v19261_v17, %v19260_v24  ;;  %v5129_v44 = vcombine.high %v19261_v17, %v19260_v24  ;;  %v19263_v20 = vld [vmem:[#allocation52_spill] sm:$0xff] }
 0x4ca   :  { %v13798_v45 = vpop.eup %13797  ;;  %13288 = vmatpush3.bf16.msra.mxu1 %v19243_v41  ;;  %13289 = vmatprep.mubr.msk.bf16.mxu1 %vm13973_vm0, %v19205_v53  ;;  %v5080_v15 = vcombine.low %v19263_v20, %v19262_v11  ;;  %v5112_v41 = vcombine.low %v19265_v36, %v19264_v2  ;;  %v19271_v24 = vld [vmem:[#allocation76_spill] sm:$0xff] }
 0x4cb   :  { %v8273_v25 = vpop.xlane.xlu0 %8272  ;;  %13260 = vmatmul.mubr.msk.bf16.vlgmr.msra.gmra.mrb[104].mxu0 %vm7772_vm2, %v8492_v7  ;;  %13299 = vmatprep.subr.bf16.mxu1 %v19205_v53  ;;  %v13800_v8 = vpop.eup %13799  ;;  %v8448_v16 = vmul.f32 %v13798_v45, %v19245_v4  ;;  %v5081_v7 = vcombine.high %v19263_v20, %v19262_v11  ;;  %v5111_v4 = vrot.slane %v5097_v50, %v19181_v57 }
 0x4cc   :  { %13270 = vmatpush3.bf16.msra.mxu0 %v19244_v46  ;;  %13271 = vmatprep.mubr.msk.bf16.mxu0 %vm13973_vm0, %v19205_v53  ;;  %13805 = vrcp.f32 %v8273_v25  ;;  %v8447_v19 = vmul.f32 %v13800_v8, %v19246_v42  ;;  %v5113_v8 = vcombine.high %v19265_v36, %v19264_v2  ;;  %v5104_v46 = vrot.slane %v5096_v47, %v19181_v57 }
 0x4cd   :  { %13281 = vmatprep.subr.bf16.mxu0 %v19205_v53 }
 0x4ce   :  { %v8291_v1 = vpop.xlane.xlu1 %8290  ;;  %v8494_v43 = vpack.c.bf16 %v8448_v16, %v8447_v19  ;;  %v5136_v16 = vrot.slane %v5128_v13, %v19181_v57 }
 0x4cf   :  { %v8276_v5 = vpop.xlane.xlu0 %8275 }
 0x4d0   :  { %v13802_v52 = vpop.eup %13801  ;;  %13807 = vrcp.f32 %v8276_v5  ;;  %v5088_v5 = vrot.slane %v5080_v15, %v19181_v57 }
 0x4d1   :  { %13809 = vrcp.f32 %v8291_v1  ;;  %v8453_v56 = vmul.f32 %v13802_v52, %v19247_v29  ;;  %v5143_v1 = vrot.slane %v5129_v44, %v19181_v57  ;;  %v5095_v52 = vrot.slane %v5081_v7, %v19181_v57 }
 0x4d2   :  { %v13804_v40 = vpop.eup %13803  ;;  %v8285_v6 = vpop.xlane.xlu1 %8284  ;;  %v5144_v29 = vcombine.low %v5088_v5, %v5104_v46 }
 0x4d3   :  { %v8454_v23 = vmul.f32 %v13804_v40, %v19248_v22  ;;  %v8294_v60 = vpop.xlane.xlu0 %8293  ;;  %13272 = vmatmul.mubr.msk.bf16.vlgmr.msra.gmra.mrb[108].mxu0 %vm7772_vm2, %v8494_v43  ;;  %v5120_v40 = vrot.slane %v5112_v41, %v19181_v57  ;;  %v5127_v43 = vrot.slane %v5113_v8, %v19181_v57  ;;  %v5160_v22 = vcombine.low %v5095_v52, %v5111_v4 }
 0x4d4   :  { %13811 = vrcp.f32 %v8294_v60  ;;  %13282 = vmatpush3.bf16.msra.mxu0 %v19249_v10  ;;  %13283 = vmatprep.mubr.msk.bf16.mxu0 %vm13973_vm0, %v19205_v53 }
 0x4d5   :  { %v8497_v28 = vpack.c.bf16 %v8454_v23, %v8453_v56  ;;  %13293 = vmatprep.subr.bf16.mxu0 %v19205_v53  ;;  %13813 = vrcp.f32 %v8285_v6  ;;  %v5145_v56 = vcombine.high %v5088_v5, %v5104_v46  ;;  %v5161_v23 = vcombine.high %v5095_v52, %v5111_v4  ;;  %v19272_v46 = vld [vmem:[#allocation72_spill] sm:$0xff] }
 0x4d6   :  { %v13806_v39 = vpop.eup %13805  ;;  %v5176_v60 = vcombine.low %v5120_v40, %v5136_v16  ;;  %v5177_v10 = vcombine.high %v5120_v40, %v5136_v16  ;;  %v5168_v6 = vrot.slane %v5160_v22, %v19188_v14  ;;  %v19273_v4 = vld [vmem:[#allocation68_spill] sm:$0xff]  ;;  %v19274_v22 = vld [vmem:[#allocation70_spill] sm:$0xff] }
 0x4d7   :  { %13290 = vmatmul.mubr.msk.bf16.vlgmr.msra.gmra.mrb[104].mxu1 %vm7772_vm2, %v8497_v28  ;;  %v8451_v48 = vmul.f32 %v13806_v39, %v19253_v63  ;;  %v5192_v28 = vcombine.low %v5127_v43, %v5143_v1  ;;  %v5193_v39 = vcombine.high %v5127_v43, %v5143_v1  ;;  %v5384_v16 = vcombine.low %v19273_v4, %v19272_v46 }
 0x4d8   :  { %13300 = vmatpush3.bf16.msra.mxu1 %v19252_v37  ;;  %13301 = vmatprep.mubr.msk.bf16.mxu1 %vm13973_vm0, %v19205_v53  ;;  %v5368_v37 = vcombine.low %v19267_v55, %v19266_v3  ;;  %v5385_v1 = vcombine.high %v19273_v4, %v19272_v46 }
 0x4d9   :  { %13311 = vmatprep.subr.bf16.mxu1 %v19205_v53  ;;  %v5207_v51 = vrot.slane %v5193_v39, %v19188_v14 }
 0x4da   :  { %v13808_v62 = vpop.eup %13807  ;;  %v5376_v47 = vrot.slane %v5368_v37, %v19181_v57 }
 0x4db   :  { %v8452_v35 = vmul.f32 %v13808_v62, %v19254_v0  ;;  %v13810_v31 = vpop.eup %13809  ;;  %v19268_v0 = vld [vmem:[#allocation57_spill] sm:$0xff] }
 0x4dc   :  { %v8457_v61 = vmul.f32 %v13810_v31, %v19255_v26  ;;  %v5175_v26 = vrot.slane %v5161_v23, %v19188_v14 }
 0x4dd   :  { %v8496_v33 = vpack.c.bf16 %v8452_v35, %v8451_v48  ;;  %v5152_v48 = vrot.slane %v5144_v29, %v19188_v14  ;;  %v19269_v35 = vld [vmem:[#allocation54_spill] sm:$0xff] }
 0x4de   :  { %v13812_v30 = vpop.eup %13811  ;;  %v5352_v31 = vcombine.low %v19269_v35, %v19268_v0  ;;  %v5353_v12 = vcombine.high %v19269_v35, %v19268_v0 }
 0x4df   :  { %v8458_v27 = vmul.f32 %v13812_v30, %v19256_v38  ;;  %13284 = vmatmul.mubr.msk.bf16.vlgmr.msra.gmra.mrb[112].mxu0 %vm7772_vm2, %v8496_v33  ;;  %v13814_v63 = vpop.eup %13813  ;;  %v5369_v33 = vcombine.high %v19267_v55, %v19266_v3  ;;  %v5159_v30 = vrot.slane %v5145_v56, %v19188_v14  ;;  %v5184_v38 = vrot.slane %v5176_v60, %v19188_v14 }
 0x4e0   :  { %13294 = vmatpush3.bf16.msra.mxu0 %v19257_v49  ;;  %13295 = vmatprep.mubr.msk.bf16.mxu0 %vm13973_vm0, %v19205_v53  ;;  %v5200_v49 = vrot.slane %v5192_v28, %v19188_v14  ;;  %v5360_v11 = vrot.slane %v5352_v31, %v19181_v57  ;;  %v5367_v8 = vrot.slane %v5353_v12, %v19181_v57 }
 0x4e1   :  { %v8499_v18 = vpack.c.bf16 %v8458_v27, %v8457_v61  ;;  %13305 = vmatprep.subr.bf16.mxu0 %v19205_v53  ;;  %v17957_v45 = vpop.xlane.xlu1 %8302  ;;  %v5191_v27 = vrot.slane %v5177_v10, %v19188_v14  ;;  %v5208_v44 = vcombine.low %v5152_v48, %v5184_v38  ;;  %v5383_v20 = vrot.slane %v5369_v33, %v19181_v57  ;;  %v19275_v10 = vld [vmem:[#allocation51_spill] sm:$0xff]  ;;  %v19276_v33 = vld [vmem:[#allocation77_spill] sm:$0xff] }
 0x4e2   :  { %v5212_v7 = vcombine.low %v5168_v6, %v5200_v49  ;;  %v5209_v41 = vcombine.high %v5152_v48, %v5184_v38  ;;  %v5213_v52 = vcombine.high %v5168_v6, %v5200_v49  ;;  %v5416_v40 = vcombine.low %v5360_v11, %v5376_v47  ;;  %v19277_v6 = vld [vmem:[#allocation78_spill] sm:$0xff] }
 0x4e3   :  { %13302 = vmatmul.mubr.msk.bf16.vlgmr.msra.gmra.mrb[108].mxu1 %vm7772_vm2, %v8499_v18  ;;  %v19270_v18 = vld [vmem:[#allocation104_spill] sm:$0xff]  ;;  %v5210_v15 = vcombine.low %v5159_v30, %v5191_v27  ;;  %v5211_v5 = vcombine.high %v5159_v30, %v5191_v27  ;;  %v5417_v56 = vcombine.high %v5360_v11, %v5376_v47  ;;  %v5432_v3 = vcombine.low %v5367_v8, %v5383_v20 }
 0x4e4   :  { %13313 = vmatprep.mubr.msk.bf16.mxu1 %vm13973_vm0, %v19205_v53  ;;  %v8455_v50 = vmul.f32 %v13814_v63, %v19270_v18  ;;  %v12655_v28 = vpack.c.bf16 %v5212_v7, %v5208_v44  ;;  %v5433_v55 = vcombine.high %v5367_v8, %v5383_v20  ;;  %v5399_v63 = vrot.slane %v5385_v1, %v19181_v57 }
 0x4e5   :  { %v8288_v25 = vpop.xlane.xlu0 %8287  ;;  %v12663_v35 = vpack.c.bf16 %v5213_v52, %v5209_v41  ;;  %v5431_v47 = vrot.slane %v5417_v56, %v19188_v14  ;;  %v5440_v18 = vrot.slane %v5432_v3, %v19188_v14 }
 0x4e6   :  { %13815 = vrcp.f32 %v8288_v25  ;;  %v5214_v25 = vcombine.low %v5175_v26, %v5207_v51  ;;  %v5447_v20 = vrot.slane %v5433_v55, %v19188_v14 }
 0x4e7   :  { %v8297_v42 = vpop.xlane.xlu1 %8296 }
 0x4e8   :  { %13817 = vrcp.f32 %v8297_v42  ;;  %v5215_v42 = vcombine.high %v5175_v26, %v5207_v51  ;;  %v12657_v39 = vpack.c.bf16 %v5214_v25, %v5210_v15  ;;  %v5424_v51 = vrot.slane %v5416_v40, %v19188_v14 }
 0x4e9   :  { %v17971_v19 = vpop.xlane.xlu0 %8305  ;;  %v18029_v15 = vrot.slane %v12655_v28, %v19181_v57 }
 0x4ea   :  { %v12665_v31 = vpack.c.bf16 %v5215_v42, %v5211_v5  ;;  %v18032_v7 = vrot.slane %v12657_v39, %v19181_v57  ;;  %v5943_v5 = vrot.slane %v12663_v35, %v19181_v57 }
 0x4ec   :  { %v5959_v52 = vrot.slane %v12665_v31, %v19181_v57 }
 0x4ed   :  { %v8300_v62 = vpop.xlane.xlu0 %8299 }
 0x4ee   :  { %13819 = vrcp.f32 %v8300_v62  ;;  %v5392_v62 = vrot.slane %v5384_v16, %v19181_v57 }
 0x4ef   :  { %13821 = vrcp.f32 %v17957_v45 }
 0x4f0   :  { %v13816_v61 = vpop.eup %13815  ;;  %13823 = vrcp.f32 %v17971_v19 }
 0x4f1   :  { %v8456_v17 = vmul.f32 %v13816_v61, %v19271_v24  ;;  %v17994_v13 = vpop.xlane.xlu1 %8308  ;;  %v17998_v2 = vpop.xlane.xlu0 %8314 }
 0x4f2   :  { %v13818_v29 = vpop.eup %13817 }
 0x4f3   :  { %v8498_v36 = vpack.c.bf16 %v8456_v17, %v8455_v50  ;;  %v8459_v30 = vmul.f32 %v13818_v29, %v19276_v33 }
 0x4f5   :  { %v4395_v43 = vpop.permute.xlu1 %4394  ;;  %13296 = vmatmul.mubr.msk.bf16.vlgmr.msra.gmra.mrb[116].mxu0 %vm7772_vm2, %v8498_v36  ;;  %v8312_v61 = vpop.xlane.xlu0 %8311 }
 0x4f6   :  { %v5400_v23 = vcombine.low %v19274_v22, %v4395_v43  ;;  %v5401_v60 = vcombine.high %v19274_v22, %v4395_v43  ;;  %13306 = vmatpush3.bf16.msra.mxu0 %v19275_v10  ;;  %13307 = vmatprep.mubr.msk.bf16.mxu0 %vm13973_vm0, %v19205_v53  ;;  %13825 = vrcp.f32 %v8312_v61  ;;  %v6008_v10 = vcombine.low %v5943_v5, %v5959_v52  ;;  %v19278_v61 = vld [vmem:[#allocation75_spill] sm:$0xff] }
 0x4f7   :  { %13317 = vmatprep.subr.bf16.mxu0 %v19205_v53  ;;  %13827 = vrcp.f32 %v17994_v13 }
 0x4f8   :  { %v13820_v37 = vpop.eup %13819  ;;  %v5408_v48 = vrot.slane %v5400_v23, %v19181_v57  ;;  %v5415_v0 = vrot.slane %v5401_v60, %v19181_v57  ;;  %v5872_v23 = vcombine.low %v18029_v15, %v18032_v7 }
 0x4f9   :  { %v8460_v26 = vmul.f32 %v13820_v37, %v19277_v6  ;;  %v13822_v55 = vpop.eup %13821 }
 0x4fa   :  { %v5448_v38 = vcombine.low %v5392_v62, %v5408_v48  ;;  %v5449_v27 = vcombine.high %v5392_v62, %v5408_v48  ;;  %v5464_v49 = vcombine.low %v5399_v63, %v5415_v0  ;;  %v5465_v12 = vcombine.high %v5399_v63, %v5415_v0  ;;  %v13824_v62 = vpop.eup %13823 }
 0x4fb   :  { %v8500_v50 = vpack.c.bf16 %v8460_v26, %v8459_v30  ;;  %v8321_v16 = vpop.xlane.xlu0 %8320  ;;  %v5880_v37 = vrot.slane %v5872_v23, %v19188_v14  ;;  %v6016_v63 = vrot.slane %v6008_v10, %v19188_v14 }
 0x4fc   :  { %v5456_v24 = vrot.slane %v5448_v38, %v19188_v14  ;;  %v5463_v17 = vrot.slane %v5449_v27, %v19188_v14  ;;  %v5472_v44 = vrot.slane %v5464_v49, %v19188_v14  ;;  %v5479_v11 = vrot.slane %v5465_v12, %v19188_v14 }
 0x4fd   :  { %13308 = vmatmul.mubr.msk.bf16.vlgmr.msra.gmra.mrb[120].mxu0 %vm7772_vm2, %v8500_v50  ;;  %v8462_v38 = vmul.f32 %v13824_v62, %v19278_v61  ;;  %v19279_v50 = vld [vmem:[#allocation74_spill] sm:$0xff] }
 0x4fe   :  { %v5480_v25 = vcombine.low %v5424_v51, %v5456_v24  ;;  %v5481_v36 = vcombine.high %v5424_v51, %v5456_v24  ;;  %v5482_v41 = vcombine.low %v5431_v47, %v5463_v17  ;;  %13319 = vmatprep.mubr.msk.bf16.mxu0 %vm13973_vm0, %v19205_v53  ;;  %v5483_v8 = vcombine.high %v5431_v47, %v5463_v17  ;;  %v19280_v17 = vld [vmem:[#allocation82_spill] sm:$0xff] }
 0x4ff   :  { %v5484_v46 = vcombine.low %v5440_v18, %v5472_v44  ;;  %v5485_v4 = vcombine.high %v5440_v18, %v5472_v44  ;;  %v5486_v45 = vcombine.low %v5447_v20, %v5479_v11  ;;  %v5487_v1 = vcombine.high %v5447_v20, %v5479_v11  ;;  %v8324_v28 = vpop.xlane.xlu0 %8323 }
 0x500   :  { %13829 = vrcp.f32 %v8324_v28  ;;  %v13826_v31 = vpop.eup %13825  ;;  %v5873_v47 = vcombine.high %v18029_v15, %v18032_v7  ;;  %v6009_v18 = vcombine.high %v5943_v5, %v5959_v52  ;;  %v8461_v24 = vmul.f32 %v13822_v55, %v19279_v50 }
 0x501   :  { %v12659_v42 = vpack.c.bf16 %v5484_v46, %v5480_v25  ;;  %v12661_v40 = vpack.c.bf16 %v5486_v45, %v5482_v41  ;;  %v12667_v19 = vpack.c.bf16 %v5485_v4, %v5481_v36  ;;  %v12669_v43 = vpack.c.bf16 %v5487_v1, %v5483_v8  ;;  %v13828_v49 = vpop.eup %13827  ;;  %v19281_v8 = vld [vmem:[#allocation81_spill] sm:$0xff] }
 0x502   :  { %13831 = vrcp.f32 %v8321_v16  ;;  %v8464_v44 = vmul.f32 %v13826_v31, %v19280_v17  ;;  %v8463_v46 = vmul.f32 %v13828_v49, %v19281_v8  ;;  %v8501_v4 = vpack.c.bf16 %v8462_v38, %v8461_v24  ;;  %v19286_v24 = vld [vmem:[#allocation32_spill] sm:$0xff] }
 0x503   :  { %v5839_v29 = vrot.slane %v12659_v42, %v19181_v57  ;;  %v5855_v56 = vrot.slane %v12661_v40, %v19181_v57  ;;  %v5975_v22 = vrot.slane %v12667_v19, %v19181_v57  ;;  %v5991_v60 = vrot.slane %v12669_v43, %v19181_v57  ;;  %v19282_v19 = vld [vmem:[#allocation31_spill] sm:$0xff]  ;;  %v8330_v28 = vpop.xlane.xlu0 %8329 }
 0x504   :  { %v5887_v7 = vrot.slane %v5873_v47, %v19188_v14  ;;  %v6023_v45 = vrot.slane %v6009_v18, %v19188_v14  ;;  %v8502_v16 = vpack.c.bf16 %v8464_v44, %v8463_v46  ;;  %13833 = vrcp.f32 %v17998_v2  ;;  %v19285_v18 = vld [vmem:[#allocation14_spill] sm:$0xff] }
 0x505   :  { %v5904_v39 = vcombine.low %v5839_v29, %v5855_v56  ;;  %v6040_v3 = vcombine.low %v5975_v22, %v5991_v60  ;;  %v5905_v35 = vcombine.high %v5839_v29, %v5855_v56  ;;  %v6041_v26 = vcombine.high %v5975_v22, %v5991_v60  ;;  %v19283_v22 = vld [vmem:[#allocation39_spill] sm:$0xff] }
 0x507   :  { %v5912_v13 = vrot.slane %v5904_v39, %v19188_v14  ;;  %v6048_v48 = vrot.slane %v6040_v3, %v19188_v14  ;;  %v5919_v11 = vrot.slane %v5905_v35, %v19188_v14  ;;  %v6055_v41 = vrot.slane %v6041_v26, %v19188_v14  ;;  %v8336_v39 = vpop.xlane.xlu0 %8335 }
 0x509   :  { %v5924_v0 = vcombine.low %v5880_v37, %v5912_v13  ;;  %v6060_v33 = vcombine.low %v6016_v63, %v6048_v48  ;;  %v5925_v30 = vcombine.high %v5880_v37, %v5912_v13  ;;  %v6061_v6 = vcombine.high %v6016_v63, %v6048_v48  ;;  %v19284_v48 = vld [vmem:[#allocation79_spill] sm:$0xff] }
 0x50a   :  { %v13830_v1 = vpop.eup %13829  ;;  %v5926_v52 = vcombine.low %v5887_v7, %v5919_v11  ;;  %v6062_v42 = vcombine.low %v6023_v45, %v6055_v41  ;;  %v5927_v26 = vcombine.high %v5887_v7, %v5919_v11  ;;  %v6063_v61 = vcombine.high %v6023_v45, %v6055_v41 }
 0x50b   :  { %v6164_v27 = vshrl.u32 %v5924_v0, 16  ;;  %v6162_v12 = vpack.i.b16 %v6060_v33, %v5924_v0  ;;  %v6165_v51 = vshrl.u32 %v6060_v33, 16  ;;  %v6172_v25 = vshrl.u32 %v5925_v30, 16  ;;  %v8342_v37 = vpop.xlane.xlu0 %8341 }
 0x50c   :  { %v6173_v36 = vshrl.u32 %v6061_v6, 16  ;;  %v6170_v15 = vpack.i.b16 %v6061_v6, %v5925_v30  ;;  %v13832_v40 = vpop.eup %13831  ;;  %v8468_v43 = vmul.f32 %v13830_v1, %v19282_v19  ;;  %v6180_v29 = vshrl.u32 %v5926_v52, 16 }
 0x50d   :  { %13312 = vmatpush3.bf16.msra.mxu1 %v6162_v12  ;;  %v6166_v20 = vpack.i.b16 %v6165_v51, %v6164_v27  ;;  %v6181_v56 = vshrl.u32 %v6062_v42, 16  ;;  %v8467_v23 = vmul.f32 %v13832_v40, %v19283_v22  ;;  %v6178_v6 = vpack.i.b16 %v6062_v42, %v5926_v52 }
 0x50e   :  { %13323 = vmatprep.subr.bf16.mxu1 %v19205_v53  ;;  %v6174_v5 = vpack.i.b16 %v6173_v36, %v6172_v25  ;;  %v13834_v62 = vpop.eup %13833  ;;  %v6188_v51 = vshrl.u32 %v5927_v26, 16  ;;  %v6189_v47 = vshrl.u32 %v6063_v61, 16  ;;  %v6186_v36 = vpack.i.b16 %v6063_v61, %v5927_v26 }
 0x50f   :  { %13318 = vmatpush3.bf16.msra.mxu0 %v6166_v20  ;;  %v8504_v60 = vpack.c.bf16 %v8468_v43, %v8467_v23  ;;  %v6182_v10 = vpack.i.b16 %v6181_v56, %v6180_v29  ;;  %v8465_v0 = vmul.f32 %v13834_v62, %v19284_v48  ;;  %v8348_v35 = vpop.xlane.xlu0 %8347 }
 0x510   :  { %13314 = vmatmul.mubr.msk.bf16.vlgmr.msra.gmra.mrb[112].mxu1 %vm7772_vm2, %v8501_v4  ;;  %13329 = vmatprep.subr.bf16.mxu0 %v19205_v53  ;;  %v6190_v41 = vpack.i.b16 %v6189_v47, %v6188_v51 }
 0x511   :  { %13324 = vmatpush3.bf16.msra.mxu1 %v6170_v15  ;;  %13325 = vmatprep.mubr.msk.bf16.mxu1 %vm13973_vm0, %v19205_v53 }
 0x512   :  { %13320 = vmatmul.mubr.msk.bf16.vlgmr.msra.gmra.mrb[124].mxu0 %vm7772_vm2, %v8502_v16  ;;  %13335 = vmatprep.subr.bf16.mxu1 %v19205_v53 }
 0x513   :  { %13330 = vmatpush3.bf16.msra.mxu0 %v6174_v5  ;;  %13331 = vmatprep.mubr.msk.bf16.mxu0 %vm13973_vm0, %v19205_v53 }
 0x514   :  { %13341 = vmatprep.subr.bf16.mxu0 %v19205_v53 }
 0x51a   :  { %13332 = vmatmul.mubr.msk.bf16.vlgmr.msra.gmra.mrb[128].mxu0 %vm7772_vm2, %v8504_v60 }
 0x51b   :  { %13342 = vmatpush3.bf16.msra.mxu0 %v6182_v10  ;;  %13343 = vmatprep.mubr.msk.bf16.mxu0 %vm13973_vm0, %v19205_v53 }
 0x51c   :  { %13353 = vmatprep.subr.bf16.mxu0 %v19205_v53 }
 0x526   :  { %v8318_v3 = vpop.xlane.xlu1 %8317 }
 0x527   :  { %13835 = vrcp.f32 %v8318_v3 }
 0x52a   :  { %v8327_v55 = vpop.xlane.xlu1 %8326 }
 0x52b   :  { %13837 = vrcp.f32 %v8327_v55 }
 0x52c   :  { %13839 = vrcp.f32 %v8330_v28 }
 0x52d   :  { %13841 = vrcp.f32 %v8336_v39 }
 0x52e   :  { %v8333_v13 = vpop.xlane.xlu1 %8332 }
 0x52f   :  { %13843 = vrcp.f32 %v8333_v13 }
 0x531   :  { %v13836_v63 = vpop.eup %13835 }
 0x532   :  { %v8466_v31 = vmul.f32 %v13836_v63, %v17785_v59  ;;  %v8339_v33 = vpop.xlane.xlu1 %8338 }
 0x533   :  { %13845 = vrcp.f32 %v8339_v33 }
 0x534   :  { %13847 = vrcp.f32 %v8342_v37  ;;  %v8503_v2 = vpack.c.bf16 %v8466_v31, %v8465_v0 }
 0x535   :  { %v13838_v30 = vpop.eup %13837  ;;  %13849 = vrcp.f32 %v8348_v35 }
 0x536   :  { %v13840_v38 = vpop.eup %13839  ;;  %v8345_v27 = vpop.xlane.xlu1 %8344  ;;  %13326 = vmatmul.mubr.msk.bf16.vlgmr.msra.gmra.mrb[116].mxu1 %vm7772_vm2, %v8503_v2  ;;  %v8469_v59 = vmul.f32 %v13838_v30, %v17790_v32 }
 0x537   :  { %v13842_v49 = vpop.eup %13841  ;;  %13851 = vrcp.f32 %v8345_v27  ;;  %13336 = vmatpush3.bf16.msra.mxu1 %v6178_v6  ;;  %13337 = vmatprep.mubr.msk.bf16.mxu1 %vm13973_vm0, %v19205_v53  ;;  %v8470_v50 = vmul.f32 %v13840_v38, %v19285_v18 }
 0x538   :  { %13347 = vmatprep.subr.bf16.mxu1 %v19205_v53  ;;  %v8472_v17 = vmul.f32 %v13842_v49, %v19286_v24 }
 0x539   :  { %v13844_v12 = vpop.eup %13843  ;;  %v8505_v11 = vpack.c.bf16 %v8470_v50, %v8469_v59 }
 0x53a   :  { %v8471_v44 = vmul.f32 %v13844_v12, %v17815_v54 }
 0x53c   :  { %v8506_v20 = vpack.c.bf16 %v8472_v17, %v8471_v44 }
 0x53d   :  { %v13846_v25 = vpop.eup %13845 }
 0x53e   :  { %v13848_v8 = vpop.eup %13847  ;;  %13338 = vmatmul.mubr.msk.bf16.vlgmr.msra.gmra.mrb[120].mxu1 %vm7772_vm2, %v8505_v11  ;;  %13344 = vmatmul.mubr.msk.bf16.vlgmr.msra.gmra.mrb[132].mxu0 %vm7772_vm2, %v8506_v20  ;;  %v8473_v46 = vmul.f32 %v13846_v25, %v17831_v21 }
 0x53f   :  { %v13850_v32 = vpop.eup %13849  ;;  %13348 = vmatpush3.bf16.msra.mxu1 %v6186_v36  ;;  %13354 = vmatpush3.bf16.msra.mxu0 %v6190_v41  ;;  %v8474_v4 = vmul.f32 %v13848_v8, %v17666_v9 }
 0x540   :  { %13349 = vmatprep.mubr.msk.bf16.mxu1 %vm13973_vm0, %v19205_v53  ;;  %13355 = vmatprep.mubr.msk.bf16.mxu0 %vm13973_vm0, %v19205_v53  ;;  %v8476_v15 = vmul.f32 %v13850_v32, %v17681_v34  ;;  %vm12396_vm0 = vcmask 916480  }
 0x541   :  { %v13852_v54 = vpop.eup %13851  ;;  %v8507_v45 = vpack.c.bf16 %v8474_v4, %v8473_v46 }
 0x542   :  { %v8475_v7 = vmul.f32 %v13852_v54, %v17849_v58 }
 0x544   :  { %v8508_v16 = vpack.c.bf16 %v8476_v15, %v8475_v7 }
 0x546   :  { %13350 = vmatmul.mubr.msk.bf16.vlgmr.msra.gmra.mrb[124].mxu1 %vm7772_vm2, %v8507_v45  ;;  %13356 = vmatmul.mubr.msk.bf16.vlgmr.msra.gmra.mrb[136].mxu0 %vm7772_vm2, %v8508_v16 }
 0x552   :  { %v8546_v21 = vpop.f32.mrb[64].mxu1 }
 0x553   :  { %v13171_v1 = vpop.f32.mrb[65].mxu1 }
 0x554   :  { %v8549_v5 = vpop.f32.mrb[66].mxu1 }
 0x555   :  { %v13172_v52 = vpop.f32.mrb[67].mxu1 }
 0x55a   :  { %v8590_v42 = vpop.f32.mrb[76].mxu0  ;;  %v8634_v40 = vpop.f32.mrb[68].mxu1 }
 0x55b   :  { %v13177_v53 = vpop.f32.mrb[77].mxu0  ;;  %v9917_v19 = vcombine.low %v8546_v21, %v8634_v40  ;;  %v9918_v43 = vcombine.high %v8546_v21, %v8634_v40  ;;  %v13183_v9 = vpop.f32.mrb[69].mxu1 }
 0x55c   :  { %v8593_v29 = vpop.f32.mrb[78].mxu0  ;;  %v8637_v34 = vpop.f32.mrb[70].mxu1 }
 0x55d   :  { %v13178_v56 = vpop.f32.mrb[79].mxu0  ;;  %v10189_v58 = vcombine.low %v8549_v5, %v8637_v34  ;;  %v10190_v22 = vcombine.high %v8549_v5, %v8637_v34  ;;  %v13184_v23 = vpop.f32.mrb[71].mxu1  ;;  %v9925_v55 = vrot.slane %v9917_v19, %v19181_v57  ;;  %v9932_v37 = vrot.slane %v9918_v43, %v19181_v57 }
 0x55f   :  { %v10197_v38 = vrot.slane %v10189_v58, %v19181_v57  ;;  %v10204_v27 = vrot.slane %v10190_v22, %v19181_v57 }
 0x562   :  { %v8678_v60 = vpop.f32.mrb[80].mxu0  ;;  %v18099_v39 = vpop.f32.mrb[72].mxu1 }
 0x563   :  { %v9933_v10 = vcombine.low %v8590_v42, %v8678_v60  ;;  %v9934_v28 = vcombine.high %v8590_v42, %v8678_v60  ;;  %v13189_v3 = vpop.f32.mrb[81].mxu0  ;;  %v13195_v13 = vpop.f32.mrb[73].mxu1 }
 0x564   :  { %v8681_v62 = vpop.f32.mrb[82].mxu0  ;;  %v18105_v31 = vpop.f32.mrb[74].mxu1 }
 0x565   :  { %v9941_v63 = vrot.slane %v9933_v10, %v19181_v57  ;;  %v9948_v48 = vrot.slane %v9934_v28, %v19181_v57  ;;  %v10205_v0 = vcombine.low %v8593_v29, %v8681_v62  ;;  %v10206_v35 = vcombine.high %v8593_v29, %v8681_v62  ;;  %v13190_v33 = vpop.f32.mrb[83].mxu0  ;;  %v13196_v2 = vpop.f32.mrb[75].mxu1 }
 0x567   :  { %v9981_v30 = vcombine.low %v9925_v55, %v9941_v63  ;;  %v9982_v6 = vcombine.high %v9925_v55, %v9941_v63  ;;  %v9997_v26 = vcombine.low %v9932_v37, %v9948_v48  ;;  %v9998_v61 = vcombine.high %v9932_v37, %v9948_v48 }
 0x568   :  { %v10213_v49 = vrot.slane %v10205_v0, %v19181_v57  ;;  %v10220_v59 = vrot.slane %v10206_v35, %v19181_v57 }
 0x569   :  { %v9989_v12 = vrot.slane %v9981_v30, %v19188_v14  ;;  %v9996_v51 = vrot.slane %v9982_v6, %v19188_v14  ;;  %v10005_v47 = vrot.slane %v9997_v26, %v19188_v14  ;;  %v10012_v18 = vrot.slane %v9998_v61, %v19188_v14 }
 0x56a   :  { %v10253_v50 = vcombine.low %v10197_v38, %v10213_v49  ;;  %v10254_v24 = vcombine.high %v10197_v38, %v10213_v49  ;;  %v10269_v17 = vcombine.low %v10204_v27, %v10220_v59  ;;  %v10270_v44 = vcombine.high %v10204_v27, %v10220_v59  ;;  %v18115_v11 = vpop.f32.mrb[84].mxu0  ;;  %v8810_v8 = vpop.f32.mrb[76].mxu1 }
 0x56b   :  { %v12734_v20 = vcombine.low %v9989_v12, %v9996_v51  ;;  %v12736_v25 = vcombine.high %v9989_v12, %v9996_v51  ;;  %v12738_v36 = vcombine.low %v10005_v47, %v10012_v18  ;;  %v12740_v41 = vcombine.high %v10005_v47, %v10012_v18  ;;  %v13201_v32 = vpop.f32.mrb[85].mxu0  ;;  %v13207_v7 = vpop.f32.mrb[77].mxu1 }
 0x56c   :  { %v10261_v46 = vrot.slane %v10253_v50, %v19188_v14  ;;  %v10268_v54 = vrot.slane %v10254_v24, %v19188_v14  ;;  %v10277_v4 = vrot.slane %v10269_v17, %v19188_v14  ;;  %v10284_v15 = vrot.slane %v10270_v44, %v19188_v14  ;;  %v18121_v45 = vpop.f32.mrb[86].mxu0  ;;  %v8813_v52 = vpop.f32.mrb[78].mxu1 }
 0x56d   :  { %v11013_v16 = vrot.slane %v12734_v20, %v19181_v57  ;;  %v11029_v21 = vrot.slane %v12736_v25, %v19181_v57  ;;  %v11045_v1 = vrot.slane %v12738_v36, %v19181_v57  ;;  %v11061_v5 = vrot.slane %v12740_v41, %v19181_v57  ;;  %v13202_v42 = vpop.f32.mrb[87].mxu0  ;;  %v13208_v9 = vpop.f32.mrb[79].mxu1 }
 0x56e   :  { %v12742_v40 = vcombine.low %v10261_v46, %v10268_v54  ;;  %v12744_v53 = vcombine.high %v10261_v46, %v10268_v54  ;;  %v12746_v19 = vcombine.low %v10277_v4, %v10284_v15  ;;  %v12748_v43 = vcombine.high %v10277_v4, %v10284_v15 }
 0x56f   :  { %v9949_v29 = vcombine.low %v18099_v39, %v8810_v8  ;;  %v9950_v34 = vcombine.high %v18099_v39, %v8810_v8  ;;  %v10221_v56 = vcombine.low %v18105_v31, %v8813_v52  ;;  %v10222_v58 = vcombine.high %v18105_v31, %v8813_v52 }
 0x570   :  { %v11149_v22 = vrot.slane %v12742_v40, %v19181_v57  ;;  %v11165_v23 = vrot.slane %v12744_v53, %v19181_v57  ;;  %v11181_v60 = vrot.slane %v12746_v19, %v19181_v57  ;;  %v11197_v10 = vrot.slane %v12748_v43, %v19181_v57 }
 0x571   :  { %v9957_v28 = vrot.slane %v9949_v29, %v19181_v57  ;;  %v9964_v3 = vrot.slane %v9950_v34, %v19181_v57  ;;  %v11070_v55 = vcombine.high %v11013_v16, %v11029_v21  ;;  %v11102_v37 = vcombine.high %v11045_v1, %v11061_v5 }
 0x572   :  { %v11206_v13 = vcombine.high %v11149_v22, %v11165_v23  ;;  %v11238_v39 = vcombine.high %v11181_v60, %v11197_v10  ;;  %v18137_v62 = vpop.f32.mrb[80].mxu1  ;;  %v11069_v63 = vcombine.low %v11013_v16, %v11029_v21  ;;  %v11101_v48 = vcombine.low %v11045_v1, %v11061_v5 }
 0x573   :  { %v11205_v0 = vcombine.low %v11149_v22, %v11165_v23  ;;  %v11237_v35 = vcombine.low %v11181_v60, %v11197_v10  ;;  %v13219_v31 = vpop.f32.mrb[81].mxu1  ;;  %v11084_v33 = vrot.slane %v11070_v55, %v19188_v14  ;;  %v11116_v2 = vrot.slane %v11102_v37, %v19188_v14 }
 0x574   :  { %v11220_v30 = vrot.slane %v11206_v13, %v19188_v14  ;;  %v11252_v6 = vrot.slane %v11238_v39, %v19188_v14  ;;  %v18143_v26 = vpop.f32.mrb[82].mxu1  ;;  %v18146_v61 = vrot.slane %v11069_v63, %v19188_v14  ;;  %v18149_v38 = vrot.slane %v11101_v48, %v19188_v14 }
 0x575   :  { %v18152_v27 = vrot.slane %v11205_v0, %v19188_v14  ;;  %v18155_v49 = vrot.slane %v11237_v35, %v19188_v14  ;;  %v13220_v59 = vpop.f32.mrb[83].mxu1  ;;  %v11136_v51 = vcombine.high %v11084_v33, %v11116_v2  ;;  %v11135_v18 = vcombine.low %v11084_v33, %v11116_v2 }
 0x576   :  { %v8854_v12 = vpop.f32.mrb[88].mxu0  ;;  %v11272_v47 = vcombine.high %v11220_v30, %v11252_v6  ;;  %v11271_v50 = vcombine.low %v11220_v30, %v11252_v6  ;;  %v11133_v20 = vcombine.low %v18146_v61, %v18149_v38  ;;  %v11134_v25 = vcombine.high %v18146_v61, %v18149_v38 }
 0x577   :  { %v9965_v24 = vcombine.low %v18115_v11, %v8854_v12  ;;  %v9966_v17 = vcombine.high %v18115_v11, %v8854_v12  ;;  %v13213_v44 = vpop.f32.mrb[89].mxu0  ;;  %v11270_v8 = vcombine.high %v18152_v27, %v18155_v49  ;;  %v11269_v32 = vcombine.low %v18152_v27, %v18155_v49 }
 0x578   :  { %v8857_v36 = vpop.f32.mrb[90].mxu0  ;;  %v13417_v41 = vpack.i.bf16 %v11272_v47, %v11136_v51  ;;  %v13412_v46 = vpack.i.bf16 %v11271_v50, %v11135_v18  ;;  %v10229_v16 = vrot.slane %v10221_v56, %v19181_v57  ;;  %v10236_v21 = vrot.slane %v10222_v58, %v19181_v57 }
 0x579   :  { %v9973_v54 = vrot.slane %v9965_v24, %v19181_v57  ;;  %v9980_v11 = vrot.slane %v9966_v17, %v19181_v57  ;;  %v10237_v4 = vcombine.low %v18121_v45, %v8857_v36  ;;  %v10238_v15 = vcombine.high %v18121_v45, %v8857_v36  ;;  %v13214_v7 = vpop.f32.mrb[91].mxu0 }
 0x57a   :  { %13418 = vrot.lane.b32.xlu0 %v13417_v41, %s13968_s14  ;;  %v13407_v1 = vpack.i.bf16 %v11270_v8, %v11134_v25  ;;  %v8986_v53 = vpop.f32.mrb[84].mxu1 }
 0x57b   :  { %v10013_v5 = vcombine.low %v9957_v28, %v9973_v54  ;;  %v10014_v52 = vcombine.high %v9957_v28, %v9973_v54  ;;  %v10029_v42 = vcombine.low %v9964_v3, %v9980_v11  ;;  %v10030_v40 = vcombine.high %v9964_v3, %v9980_v11  ;;  %v13231_v29 = vpop.f32.mrb[85].mxu1 }
 0x57c   :  { %v10245_v19 = vrot.slane %v10237_v4, %v19181_v57  ;;  %v10252_v43 = vrot.slane %v10238_v15, %v19181_v57  ;;  %13408 = vrot.lane.b32.xlu1 %v13407_v1, %s13952_s13  ;;  %v10053_v45 = vcombine.low %v18137_v62, %v8986_v53  ;;  %v10054_v9 = vcombine.high %v18137_v62, %v8986_v53  ;;  %v8989_v23 = vpop.f32.mrb[86].mxu1 }
 0x57d   :  { %v10021_v34 = vrot.slane %v10013_v5, %v19188_v14  ;;  %v10028_v56 = vrot.slane %v10014_v52, %v19188_v14  ;;  %v10037_v58 = vrot.slane %v10029_v42, %v19188_v14  ;;  %v10044_v22 = vrot.slane %v10030_v40, %v19188_v14  ;;  %v13232_v55 = vpop.f32.mrb[87].mxu1 }
 0x57e   :  { %v10285_v60 = vcombine.low %v10229_v16, %v10245_v19  ;;  %v10286_v10 = vcombine.high %v10229_v16, %v10245_v19  ;;  %v10301_v28 = vcombine.low %v10236_v21, %v10252_v43  ;;  %v10302_v3 = vcombine.high %v10236_v21, %v10252_v43  ;;  %v8942_v37 = vpop.f32.mrb[92].mxu0 }
 0x57f   :  { %v12735_v13 = vcombine.low %v10021_v34, %v10028_v56  ;;  %v12737_v39 = vcombine.high %v10021_v34, %v10028_v56  ;;  %v12739_v63 = vcombine.low %v10037_v58, %v10044_v22  ;;  %v12741_v62 = vcombine.high %v10037_v58, %v10044_v22  ;;  %v13225_v48 = vpop.f32.mrb[93].mxu0 }
 0x580   :  { %v10293_v0 = vrot.slane %v10285_v60, %v19188_v14  ;;  %v10300_v35 = vrot.slane %v10286_v10, %v19188_v14  ;;  %v10309_v31 = vrot.slane %v10301_v28, %v19188_v14  ;;  %v10316_v33 = vrot.slane %v10302_v3, %v19188_v14  ;;  %13413 = vrot.lane.b32.xlu1 %v13412_v46, %s13969_s15  ;;  %v8945_v2 = vpop.f32.mrb[94].mxu0 }
 0x581   :  { %v18189_v30 = vrot.slane %v12735_v13, %v19181_v57  ;;  %v18192_v6 = vrot.slane %v12737_v39, %v19181_v57  ;;  %v18195_v59 = vrot.slane %v12739_v63, %v19181_v57  ;;  %v18198_v12 = vrot.slane %v12741_v62, %v19181_v57  ;;  %v13226_v51 = vpop.f32.mrb[95].mxu0 }
 0x582   :  { %v12743_v47 = vcombine.low %v10293_v0, %v10300_v35  ;;  %v12745_v18 = vcombine.high %v10293_v0, %v10300_v35  ;;  %v12747_v50 = vcombine.low %v10309_v31, %v10316_v33  ;;  %v12749_v24 = vcombine.high %v10309_v31, %v10316_v33  ;;  %v18202_v25 = vpop.f32.mrb[88].mxu1 }
 0x583   :  { %v10325_v17 = vcombine.low %v18143_v26, %v8989_v23  ;;  %v10326_v44 = vcombine.high %v18143_v26, %v8989_v23  ;;  %v13243_v54 = vpop.f32.mrb[89].mxu1  ;;  %v10061_v11 = vrot.slane %v10053_v45, %v19181_v57  ;;  %v10068_v4 = vrot.slane %v10054_v9, %v19181_v57 }
 0x584   :  { %v18205_v36 = vrot.slane %v12743_v47, %v19181_v57  ;;  %v18208_v41 = vrot.slane %v12745_v18, %v19181_v57  ;;  %v18211_v8 = vrot.slane %v12747_v50, %v19181_v57  ;;  %v18214_v46 = vrot.slane %v12749_v24, %v19181_v57  ;;  %v18218_v26 = vpop.f32.mrb[90].mxu1 }
 0x585   :  { %v11085_v15 = vcombine.low %v18189_v30, %v18192_v6  ;;  %v11117_v7 = vcombine.low %v18195_v59, %v18198_v12  ;;  %v13244_v16 = vpop.f32.mrb[91].mxu1  ;;  %v11086_v52 = vcombine.high %v18189_v30, %v18192_v6  ;;  %v11118_v42 = vcombine.high %v18195_v59, %v18198_v12 }
 0x586   :  { %v9030_v21 = vpop.f32.mrb[96].mxu0  ;;  %v11221_v1 = vcombine.low %v18205_v36, %v18208_v41  ;;  %v11253_v5 = vcombine.low %v18211_v8, %v18214_v46  ;;  %v10333_v9 = vrot.slane %v10325_v17, %v19181_v57  ;;  %v10340_v29 = vrot.slane %v10326_v44, %v19181_v57 }
 0x587   :  { %v10069_v40 = vcombine.low %v8942_v37, %v9030_v21  ;;  %v10070_v53 = vcombine.high %v8942_v37, %v9030_v21  ;;  %v13237_v19 = vpop.f32.mrb[97].mxu0  ;;  %v18233_v43 = vrot.slane %v11085_v15, %v19188_v14  ;;  %v18236_v45 = vrot.slane %v11117_v7, %v19188_v14 }
 0x588   :  { %v9033_v34 = vpop.f32.mrb[98].mxu0  ;;  %v18241_v56 = vrot.slane %v11221_v1, %v19188_v14  ;;  %v11261_v58 = vrot.slane %v11253_v5, %v19188_v14 }
 0x589   :  { %v10077_v22 = vrot.slane %v10069_v40, %v19181_v57  ;;  %v10084_v23 = vrot.slane %v10070_v53, %v19181_v57  ;;  %v10341_v60 = vcombine.low %v8945_v2, %v9033_v34  ;;  %v10342_v10 = vcombine.high %v8945_v2, %v9033_v34  ;;  %v13238_v28 = vpop.f32.mrb[99].mxu0 }
 0x58a   :  { %v11137_v3 = vcombine.low %v18233_v43, %v18236_v45  ;;  %v11273_v55 = vcombine.low %v18241_v56, %v11261_v58  ;;  %v11138_v37 = vcombine.high %v18233_v43, %v18236_v45  ;;  %v11274_v13 = vcombine.high %v18241_v56, %v11261_v58  ;;  %v18252_v0 = vpop.f32.mrb[92].mxu1 }
 0x58b   :  { %v10117_v39 = vcombine.low %v10061_v11, %v10077_v22  ;;  %v10118_v63 = vcombine.high %v10061_v11, %v10077_v22  ;;  %v10133_v62 = vcombine.low %v10068_v4, %v10084_v23  ;;  %v10134_v48 = vcombine.high %v10068_v4, %v10084_v23  ;;  %v13255_v30 = vpop.f32.mrb[93].mxu1 }
 0x58c   :  { %v10349_v35 = vrot.slane %v10341_v60, %v19181_v57  ;;  %v10356_v31 = vrot.slane %v10342_v10, %v19181_v57  ;;  %v10085_v33 = vcombine.low %v18202_v25, %v18252_v0  ;;  %v10086_v2 = vcombine.high %v18202_v25, %v18252_v0  ;;  %v18264_v47 = vpop.f32.mrb[94].mxu1 }
 0x58d   :  { %v10125_v6 = vrot.slane %v10117_v39, %v19188_v14  ;;  %v10132_v59 = vrot.slane %v10118_v63, %v19188_v14  ;;  %v10141_v12 = vrot.slane %v10133_v62, %v19188_v14  ;;  %v10148_v51 = vrot.slane %v10134_v48, %v19188_v14  ;;  %v13256_v44 = vpop.f32.mrb[95].mxu1 }
 0x58e   :  { %v10389_v18 = vcombine.low %v10333_v9, %v10349_v35  ;;  %v10390_v50 = vcombine.high %v10333_v9, %v10349_v35  ;;  %v10405_v24 = vcombine.low %v10340_v29, %v10356_v31  ;;  %v10406_v17 = vcombine.high %v10340_v29, %v10356_v31  ;;  %v18266_v54 = vpop.f32.mrb[100].mxu0 }
 0x58f   :  { %v12766_v11 = vcombine.low %v10125_v6, %v10132_v59  ;;  %v12768_v4 = vcombine.high %v10125_v6, %v10132_v59  ;;  %v12770_v15 = vcombine.low %v10141_v12, %v10148_v51  ;;  %v12772_v7 = vcombine.high %v10141_v12, %v10148_v51  ;;  %v13249_v16 = vpop.f32.mrb[101].mxu0 }
 0x590   :  { %v10397_v21 = vrot.slane %v10389_v18, %v19188_v14  ;;  %v10404_v1 = vrot.slane %v10390_v50, %v19188_v14  ;;  %v10413_v5 = vrot.slane %v10405_v24, %v19188_v14  ;;  %v10420_v40 = vrot.slane %v10406_v17, %v19188_v14  ;;  %v18272_v53 = vpop.f32.mrb[102].mxu0 }
 0x591   :  { %v11557_v19 = vrot.slane %v12766_v11, %v19181_v57  ;;  %v11573_v43 = vrot.slane %v12768_v4, %v19181_v57  ;;  %v13250_v45 = vpop.f32.mrb[103].mxu0  ;;  %v11100_v9 = vrot.slane %v11086_v52, %v19188_v14  ;;  %v11132_v29 = vrot.slane %v11118_v42, %v19188_v14 }
 0x592   :  { %v12774_v34 = vcombine.low %v10397_v21, %v10404_v1  ;;  %v12776_v56 = vcombine.high %v10397_v21, %v10404_v1  ;;  %v12778_v58 = vcombine.low %v10413_v5, %v10420_v40  ;;  %v12780_v22 = vcombine.high %v10413_v5, %v10420_v40  ;;  %v18284_v39 = vpop.f32.mrb[96].mxu1 }
 0x593   :  { %v11589_v23 = vrot.slane %v12770_v15, %v19181_v57  ;;  %v11605_v60 = vrot.slane %v12772_v7, %v19181_v57  ;;  %v10357_v10 = vcombine.low %v18218_v26, %v18264_v47  ;;  %v10358_v28 = vcombine.high %v18218_v26, %v18264_v47  ;;  %v13267_v48 = vpop.f32.mrb[97].mxu1 }
 0x594   :  { %v11693_v52 = vrot.slane %v12774_v34, %v19181_v57  ;;  %v11709_v42 = vrot.slane %v12776_v56, %v19181_v57  ;;  %v11725_v63 = vrot.slane %v12778_v58, %v19181_v57  ;;  %v11741_v62 = vrot.slane %v12780_v22, %v19181_v57  ;;  %v18290_v30 = vpop.f32.mrb[98].mxu1 }
 0x595   :  { %v13422_v35 = vpack.i.bf16 %v11273_v55, %v11137_v3  ;;  %v13427_v31 = vpack.i.bf16 %v11274_v13, %v11138_v37  ;;  %v11139_v6 = vcombine.low %v11100_v9, %v11132_v29  ;;  %v11222_v59 = vcombine.high %v18205_v36, %v18208_v41  ;;  %v13268_v18 = vpop.f32.mrb[99].mxu1 }
 0x596   :  { %v11254_v12 = vcombine.high %v18211_v8, %v18214_v46  ;;  %v11140_v51 = vcombine.high %v11100_v9, %v11132_v29  ;;  %v11613_v50 = vcombine.low %v11557_v19, %v11573_v43  ;;  %v11645_v24 = vcombine.low %v11589_v23, %v11605_v60 }
 0x597   :  { %13423 = vrot.lane.b32.xlu0 %v13422_v35, %s13967_s12  ;;  %v11749_v17 = vcombine.low %v11693_v52, %v11709_v42  ;;  %v11781_v44 = vcombine.low %v11725_v63, %v11741_v62  ;;  %v11236_v3 = vrot.slane %v11222_v59, %v19188_v14  ;;  %v11614_v37 = vcombine.high %v11557_v19, %v11573_v43 }
 0x598   :  { %v11268_v55 = vrot.slane %v11254_v12, %v19188_v14  ;;  %v11646_v13 = vcombine.high %v11589_v23, %v11605_v60  ;;  %v11621_v11 = vrot.slane %v11613_v50, %v19188_v14  ;;  %v11653_v36 = vrot.slane %v11645_v24, %v19188_v14 }
 0x599   :  { %v11757_v41 = vrot.slane %v11749_v17, %v19188_v14  ;;  %v11789_v8 = vrot.slane %v11781_v44, %v19188_v14  ;;  %v11628_v15 = vrot.slane %v11614_v37, %v19188_v14  ;;  %v11750_v45 = vcombine.high %v11693_v52, %v11709_v42 }
 0x59a   :  { %v11275_v46 = vcombine.low %v11236_v3, %v11268_v55  ;;  %v11276_v4 = vcombine.high %v11236_v3, %v11268_v55  ;;  %v11660_v7 = vrot.slane %v11646_v13, %v19188_v14  ;;  %v11677_v16 = vcombine.low %v11621_v11, %v11653_v36 }
 0x59b   :  { %13428 = vrot.lane.b32.xlu0 %v13427_v31, %s13966_s11  ;;  %v11813_v21 = vcombine.low %v11757_v41, %v11789_v8  ;;  %v11678_v1 = vcombine.high %v11621_v11, %v11653_v36  ;;  %v11814_v5 = vcombine.high %v11757_v41, %v11789_v8  ;;  %v11782_v34 = vcombine.high %v11725_v63, %v11741_v62 }
 0x59c   :  { %v13432_v40 = vpack.i.bf16 %v11275_v46, %v11139_v6  ;;  %v13437_v19 = vpack.i.bf16 %v11276_v4, %v11140_v51  ;;  %v11679_v43 = vcombine.low %v11628_v15, %v11660_v7  ;;  %v11680_v56 = vcombine.high %v11628_v15, %v11660_v7  ;;  %v18307_v22 = vpop.f32.mrb[100].mxu1 }
 0x59d   :  { %v13442_v9 = vpack.i.bf16 %v11813_v21, %v11677_v16  ;;  %v13447_v29 = vpack.i.bf16 %v11814_v5, %v11678_v1  ;;  %v11764_v58 = vrot.slane %v11750_v45, %v19188_v14  ;;  %v11796_v23 = vrot.slane %v11782_v34, %v19188_v14  ;;  %v13279_v35 = vpop.f32.mrb[101].mxu1 }
 0x59e   :  { %v10461_v60 = vcombine.low %v18284_v39, %v18307_v22  ;;  %v10462_v48 = vcombine.high %v18284_v39, %v18307_v22  ;;  %v9206_v52 = vpop.f32.mrb[104].mxu0  ;;  %v18315_v42 = vpop.f32.mrb[102].mxu1  ;;  %v10100_v37 = vrot.slane %v10086_v2, %v19181_v57  ;;  %v10372_v36 = vrot.slane %v10358_v28, %v19181_v57 }
 0x59f   :  { %13433 = vrot.lane.b32.xlu0 %v13432_v40, %s13965_s10  ;;  %v11815_v63 = vcombine.low %v11764_v58, %v11796_v23  ;;  %v11816_v62 = vcombine.high %v11764_v58, %v11796_v23  ;;  %v13261_v31 = vpop.f32.mrb[105].mxu0  ;;  %v13280_v6 = vpop.f32.mrb[103].mxu1  ;;  %v10101_v59 = vcombine.low %v18266_v54, %v9206_v52  ;;  %v10102_v12 = vcombine.high %v18266_v54, %v9206_v52 }
 0x5a0   :  { %v10733_v51 = vcombine.low %v18290_v30, %v18315_v42  ;;  %v10734_v18 = vcombine.high %v18290_v30, %v18315_v42  ;;  %v9209_v50 = vpop.f32.mrb[106].mxu0  ;;  %v10093_v54 = vrot.slane %v10085_v33, %v19181_v57 }
 0x5a1   :  { %v13452_v24 = vpack.i.bf16 %v11815_v63, %v11679_v43  ;;  %v18324_v17 = vpack.i.bf16 %v11816_v62, %v11680_v56  ;;  %v10373_v44 = vcombine.low %v18272_v53, %v9209_v50  ;;  %v10374_v3 = vcombine.high %v18272_v53, %v9209_v50  ;;  %v13262_v55 = vpop.f32.mrb[107].mxu0 }
 0x5a2   :  { %v10109_v13 = vrot.slane %v10101_v59, %v19181_v57  ;;  %v10116_v11 = vrot.slane %v10102_v12, %v19181_v57  ;;  %v10365_v53 = vrot.slane %v10357_v10, %v19181_v57 }
 0x5a3   :  { %13438 = vrot.lane.b32.xlu0 %v13437_v19, %s13964_s9  ;;  %v10381_v33 = vrot.slane %v10373_v44, %v19181_v57  ;;  %v10388_v41 = vrot.slane %v10374_v3, %v19181_v57 }
 0x5a4   :  { %v10149_v25 = vcombine.low %v10093_v54, %v10109_v13  ;;  %v10150_v0 = vcombine.high %v10093_v54, %v10109_v13  ;;  %v10165_v2 = vcombine.low %v10100_v37, %v10116_v11  ;;  %v10166_v8 = vcombine.high %v10100_v37, %v10116_v11 }
 0x5a5   :  { %v10421_v46 = vcombine.low %v10365_v53, %v10381_v33  ;;  %v10422_v4 = vcombine.high %v10365_v53, %v10381_v33  ;;  %v10437_v15 = vcombine.low %v10372_v36, %v10388_v41  ;;  %v10438_v7 = vcombine.high %v10372_v36, %v10388_v41 }
 0x5a6   :  { %v10157_v10 = vrot.slane %v10149_v25, %v19188_v14  ;;  %v10164_v16 = vrot.slane %v10150_v0, %v19188_v14  ;;  %v10173_v26 = vrot.slane %v10165_v2, %v19188_v14  ;;  %v10180_v47 = vrot.slane %v10166_v8, %v19188_v14  ;;  %v18353_v28 = vpop.f32.mrb[108].mxu0 }
 0x5a7   :  { %13443 = vrot.lane.b32.xlu0 %v13442_v9, %s13954_s0  ;;  %v10429_v21 = vrot.slane %v10421_v46, %v19188_v14  ;;  %v10436_v1 = vrot.slane %v10422_v4, %v19188_v14  ;;  %v10445_v5 = vrot.slane %v10437_v15, %v19188_v14  ;;  %v10452_v40 = vrot.slane %v10438_v7, %v19188_v14  ;;  %v13273_v19 = vpop.f32.mrb[109].mxu0 }
 0x5a8   :  { %v12767_v43 = vcombine.low %v10157_v10, %v10164_v16  ;;  %v12769_v45 = vcombine.high %v10157_v10, %v10164_v16  ;;  %v12771_v9 = vcombine.low %v10173_v26, %v10180_v47  ;;  %v12773_v34 = vcombine.high %v10173_v26, %v10180_v47  ;;  %v18359_v56 = vpop.f32.mrb[110].mxu0 }
 0x5a9   :  { %v12775_v58 = vcombine.low %v10429_v21, %v10436_v1  ;;  %v12777_v23 = vcombine.high %v10429_v21, %v10436_v1  ;;  %v12779_v35 = vcombine.low %v10445_v5, %v10452_v40  ;;  %v12781_v52 = vcombine.high %v10445_v5, %v10452_v40  ;;  %v13274_v62 = vpop.f32.mrb[111].mxu0 }
 0x5aa   :  { %v18362_v63 = vpop.f32.mrb[104].mxu1  ;;  %v11564_v31 = vrot.slane %v12767_v43, %v19181_v57  ;;  %v11580_v6 = vrot.slane %v12769_v45, %v19181_v57  ;;  %v11596_v59 = vrot.slane %v12771_v9, %v19181_v57  ;;  %v11612_v12 = vrot.slane %v12773_v34, %v19181_v57 }
 0x5ab   :  { %13448 = vrot.lane.b32.xlu0 %v13447_v29, %s13963_s8  ;;  %v13291_v50 = vpop.f32.mrb[105].mxu1  ;;  %v11700_v44 = vrot.slane %v12775_v58, %v19181_v57  ;;  %v11716_v29 = vrot.slane %v12777_v23, %v19181_v57  ;;  %v11732_v3 = vrot.slane %v12779_v35, %v19181_v57  ;;  %v11748_v55 = vrot.slane %v12781_v52, %v19181_v57 }
 0x5ac   :  { %v18372_v54 = vpop.f32.mrb[106].mxu1  ;;  %v11629_v13 = vcombine.low %v11564_v31, %v11580_v6  ;;  %v11661_v11 = vcombine.low %v11596_v59, %v11612_v12  ;;  %v11630_v53 = vcombine.high %v11564_v31, %v11580_v6  ;;  %v11662_v36 = vcombine.high %v11596_v59, %v11612_v12 }
 0x5ad   :  { %v13292_v37 = vpop.f32.mrb[107].mxu1  ;;  %v11765_v33 = vcombine.low %v11700_v44, %v11716_v29  ;;  %v11797_v41 = vcombine.low %v11732_v3, %v11748_v55  ;;  %v11766_v25 = vcombine.high %v11700_v44, %v11716_v29  ;;  %v11798_v0 = vcombine.high %v11732_v3, %v11748_v55 }
 0x5ae   :  { %v11637_v2 = vrot.slane %v11629_v13, %v19188_v14  ;;  %v11669_v8 = vrot.slane %v11661_v11, %v19188_v14  ;;  %v11644_v46 = vrot.slane %v11630_v53, %v19188_v14  ;;  %v11676_v4 = vrot.slane %v11662_v36, %v19188_v14 }
 0x5af   :  { %13453 = vrot.lane.b32.xlu0 %v13452_v24, %s13962_s7  ;;  %v11773_v15 = vrot.slane %v11765_v33, %v19188_v14  ;;  %v11805_v7 = vrot.slane %v11797_v41, %v19188_v14  ;;  %v11780_v10 = vrot.slane %v11766_v25, %v19188_v14  ;;  %v11812_v24 = vrot.slane %v11798_v0, %v19188_v14 }
 0x5b0   :  { %v11681_v16 = vcombine.low %v11637_v2, %v11669_v8  ;;  %v11682_v26 = vcombine.high %v11637_v2, %v11669_v8  ;;  %v11683_v47 = vcombine.low %v11644_v46, %v11676_v4  ;;  %v11684_v21 = vcombine.high %v11644_v46, %v11676_v4 }
 0x5b1   :  { %v11817_v5 = vcombine.low %v11773_v15, %v11805_v7  ;;  %v11818_v40 = vcombine.high %v11773_v15, %v11805_v7  ;;  %v11819_v19 = vcombine.low %v11780_v10, %v11812_v24  ;;  %v11820_v43 = vcombine.high %v11780_v10, %v11812_v24 }
 0x5b2   :  { %v9382_v1 = vpop.f32.mrb[112].mxu0  ;;  %v10469_v45 = vrot.slane %v10461_v60, %v19181_v57  ;;  %v10476_v9 = vrot.slane %v10462_v48, %v19181_v57  ;;  %v10748_v59 = vrot.slane %v10734_v18, %v19181_v57 }
 0x5b3   :  { %13458 = vrot.lane.b32.xlu0 %v18324_v17, %s13961_s6  ;;  %v10477_v34 = vcombine.low %v18353_v28, %v9382_v1  ;;  %v10478_v58 = vcombine.high %v18353_v28, %v9382_v1  ;;  %v13285_v17 = vpop.f32.mrb[113].mxu0  ;;  %v18395_v35 = vpack.i.bf16 %v11817_v5, %v11681_v16  ;;  %v18397_v52 = vpack.i.bf16 %v11818_v40, %v11682_v26 }
 0x5b4   :  { %v9385_v23 = vpop.f32.mrb[114].mxu0  ;;  %v18399_v62 = vpack.i.bf16 %v11819_v19, %v11683_v47  ;;  %v18401_v31 = vpack.i.bf16 %v11820_v43, %v11684_v21  ;;  %v10741_v28 = vrot.slane %v10733_v51, %v19181_v57 }
 0x5b5   :  { %v10485_v60 = vrot.slane %v10477_v34, %v19181_v57  ;;  %v10492_v6 = vrot.slane %v10478_v58, %v19181_v57  ;;  %v10749_v39 = vcombine.low %v18359_v56, %v9385_v23  ;;  %v10750_v22 = vcombine.high %v18359_v56, %v9385_v23  ;;  %v13286_v48 = vpop.f32.mrb[115].mxu0 }
 0x5b6   :  { %v18415_v12 = vpop.f32.mrb[108].mxu1 }
 0x5b7   :  { %v10525_v50 = vcombine.low %v10469_v45, %v10485_v60  ;;  %v10526_v44 = vcombine.high %v10469_v45, %v10485_v60  ;;  %v10541_v29 = vcombine.low %v10476_v9, %v10492_v6  ;;  %v10542_v3 = vcombine.high %v10476_v9, %v10492_v6  ;;  %v13303_v55 = vpop.f32.mrb[109].mxu1 }
 0x5b8   :  { %v10757_v56 = vrot.slane %v10749_v39, %v19181_v57  ;;  %v10764_v37 = vrot.slane %v10750_v22, %v19181_v57  ;;  %v10493_v13 = vcombine.low %v18362_v63, %v18415_v12  ;;  %v10494_v51 = vcombine.high %v18362_v63, %v18415_v12  ;;  %v18423_v11 = vpop.f32.mrb[110].mxu1 }
 0x5b9   :  { %v10533_v30 = vrot.slane %v10525_v50, %v19188_v14  ;;  %v10540_v42 = vrot.slane %v10526_v44, %v19188_v14  ;;  %v10549_v18 = vrot.slane %v10541_v29, %v19188_v14  ;;  %v10556_v53 = vrot.slane %v10542_v3, %v19188_v14  ;;  %v13304_v36 = vpop.f32.mrb[111].mxu1 }
 0x5ba   :  { %v10797_v33 = vcombine.low %v10741_v28, %v10757_v56  ;;  %v10798_v41 = vcombine.high %v10741_v28, %v10757_v56  ;;  %v10813_v25 = vcombine.low %v10748_v59, %v10764_v37  ;;  %v10814_v0 = vcombine.high %v10748_v59, %v10764_v37 }
 0x5bb   :  { %v12750_v2 = vcombine.low %v10533_v30, %v10540_v42  ;;  %v12752_v8 = vcombine.high %v10533_v30, %v10540_v42  ;;  %v12754_v46 = vcombine.low %v10549_v18, %v10556_v53  ;;  %v12756_v4 = vcombine.high %v10549_v18, %v10556_v53 }
 0x5bc   :  { %v10805_v15 = vrot.slane %v10797_v33, %v19188_v14  ;;  %v10812_v7 = vrot.slane %v10798_v41, %v19188_v14  ;;  %v10821_v10 = vrot.slane %v10813_v25, %v19188_v14  ;;  %v10828_v24 = vrot.slane %v10814_v0, %v19188_v14 }
 0x5bd   :  { %v11285_v16 = vrot.slane %v12750_v2, %v19181_v57  ;;  %v11301_v26 = vrot.slane %v12752_v8, %v19181_v57  ;;  %v11317_v47 = vrot.slane %v12754_v46, %v19181_v57  ;;  %v11333_v21 = vrot.slane %v12756_v4, %v19181_v57 }
 0x5be   :  { %v12758_v1 = vcombine.low %v10805_v15, %v10812_v7  ;;  %v12760_v5 = vcombine.high %v10805_v15, %v10812_v7  ;;  %v12762_v40 = vcombine.low %v10821_v10, %v10828_v24  ;;  %v12764_v19 = vcombine.high %v10821_v10, %v10828_v24 }
 0x5bf   :  { %v10765_v43 = vcombine.low %v18372_v54, %v18423_v11  ;;  %v10766_v45 = vcombine.high %v18372_v54, %v18423_v11  ;;  %v11342_v23 = vcombine.high %v11285_v16, %v11301_v26  ;;  %v11374_v60 = vcombine.high %v11317_v47, %v11333_v21 }
 0x5c0   :  { %v11421_v9 = vrot.slane %v12758_v1, %v19181_v57  ;;  %v11437_v34 = vrot.slane %v12760_v5, %v19181_v57  ;;  %v11453_v58 = vrot.slane %v12762_v40, %v19181_v57  ;;  %v11469_v17 = vrot.slane %v12764_v19, %v19181_v57 }
 0x5c1   :  { %v11341_v22 = vcombine.low %v11285_v16, %v11301_v26  ;;  %v11373_v48 = vcombine.low %v11317_v47, %v11333_v21  ;;  %v11356_v28 = vrot.slane %v11342_v23, %v19188_v14  ;;  %v11388_v59 = vrot.slane %v11374_v60, %v19188_v14 }
 0x5c2   :  { %v11478_v6 = vcombine.high %v11421_v9, %v11437_v34  ;;  %v11510_v39 = vcombine.high %v11453_v58, %v11469_v17  ;;  %v11477_v50 = vcombine.low %v11421_v9, %v11437_v34  ;;  %v11509_v54 = vcombine.low %v11453_v58, %v11469_v17 }
 0x5c3   :  { %v18450_v3 = vrot.slane %v11341_v22, %v19188_v14  ;;  %v18453_v55 = vrot.slane %v11373_v48, %v19188_v14  ;;  %v11407_v56 = vcombine.low %v11356_v28, %v11388_v59  ;;  %v11408_v30 = vcombine.high %v11356_v28, %v11388_v59 }
 0x5c4   :  { %v11492_v44 = vrot.slane %v11478_v6, %v19188_v14  ;;  %v11524_v29 = vrot.slane %v11510_v39, %v19188_v14  ;;  %v18456_v37 = vrot.slane %v11477_v50, %v19188_v14  ;;  %v18459_v11 = vrot.slane %v11509_v54, %v19188_v14 }
 0x5c5   :  { %v11405_v18 = vcombine.low %v18450_v3, %v18453_v55  ;;  %v11406_v53 = vcombine.high %v18450_v3, %v18453_v55  ;;  %v10501_v26 = vrot.slane %v10493_v13, %v19181_v57  ;;  %v10508_v47 = vrot.slane %v10494_v51, %v19181_v57 }
 0x5c6   :  { %v11543_v42 = vcombine.low %v11492_v44, %v11524_v29  ;;  %v11544_v36 = vcombine.high %v11492_v44, %v11524_v29  ;;  %v11542_v41 = vcombine.high %v18456_v37, %v18459_v11  ;;  %v11541_v25 = vcombine.low %v18456_v37, %v18459_v11 }
 0x5c7   :  { %v10773_v17 = vrot.slane %v10765_v43, %v19181_v57  ;;  %v10780_v63 = vrot.slane %v10766_v45, %v19181_v57 }
 0x5c8   :  { %v9470_v33 = vpop.f32.mrb[116].mxu0  ;;  %v13482_v2 = vpack.i.bf16 %v11543_v42, %v11407_v56  ;;  %v13487_v8 = vpack.i.bf16 %v11544_v36, %v11408_v30  ;;  %v13462_v4 = vpack.i.bf16 %v11542_v41, %v11406_v53 }
 0x5c9   :  { %v13297_v0 = vpop.f32.mrb[117].mxu0 }
 0x5ca   :  { %v9473_v46 = vpop.f32.mrb[118].mxu0  ;;  %13483 = vrot.lane.b32.xlu1 %v13482_v2, %s13969_s15  ;;  %13463 = vrot.lane.b32.xlu0 %v13462_v4, %s13952_s13 }
 0x5cb   :  { %v13298_v15 = vpop.f32.mrb[119].mxu0 }
 0x5ce   :  { %13488 = vrot.lane.b32.xlu1 %v13487_v8, %s13968_s14  ;;  %13468 = vrot.lane.b32.xlu0 %v18395_v35, %s13960_s5 }
 0x5d0   :  { %v9558_v7 = vpop.f32.mrb[120].mxu0 }
 0x5d1   :  { %v10509_v10 = vcombine.low %v9470_v33, %v9558_v7  ;;  %v10510_v24 = vcombine.high %v9470_v33, %v9558_v7  ;;  %v13309_v16 = vpop.f32.mrb[121].mxu0 }
 0x5d2   :  { %v9561_v21 = vpop.f32.mrb[122].mxu0  ;;  %13473 = vrot.lane.b32.xlu0 %v18397_v52, %s13959_s30 }
 0x5d3   :  { %v10517_v1 = vrot.slane %v10509_v10, %v19181_v57  ;;  %v10524_v5 = vrot.slane %v10510_v24, %v19181_v57  ;;  %v10781_v40 = vcombine.low %v9473_v46, %v9561_v21  ;;  %v10782_v35 = vcombine.high %v9473_v46, %v9561_v21  ;;  %v13310_v19 = vpop.f32.mrb[123].mxu0 }
 0x5d5   :  { %v10557_v9 = vcombine.low %v10501_v26, %v10517_v1  ;;  %v10558_v34 = vcombine.high %v10501_v26, %v10517_v1  ;;  %v10573_v58 = vcombine.low %v10508_v47, %v10524_v5  ;;  %v10574_v13 = vcombine.high %v10508_v47, %v10524_v5 }
 0x5d6   :  { %v10789_v12 = vrot.slane %v10781_v40, %v19181_v57  ;;  %v10796_v51 = vrot.slane %v10782_v35, %v19181_v57  ;;  %13478 = vrot.lane.b32.xlu0 %v18399_v62, %s13958_s29 }
 0x5d7   :  { %v10565_v23 = vrot.slane %v10557_v9, %v19188_v14  ;;  %v10572_v60 = vrot.slane %v10558_v34, %v19188_v14  ;;  %v10581_v6 = vrot.slane %v10573_v58, %v19188_v14  ;;  %v10588_v52 = vrot.slane %v10574_v13, %v19188_v14 }
 0x5d8   :  { %v10829_v39 = vcombine.low %v10773_v17, %v10789_v12  ;;  %v10830_v22 = vcombine.high %v10773_v17, %v10789_v12  ;;  %v10845_v48 = vcombine.low %v10780_v63, %v10796_v51  ;;  %v10846_v28 = vcombine.high %v10780_v63, %v10796_v51 }
 0x5d9   :  { %v12751_v43 = vcombine.low %v10565_v23, %v10572_v60  ;;  %v12753_v45 = vcombine.high %v10565_v23, %v10572_v60  ;;  %v12755_v59 = vcombine.low %v10581_v6, %v10588_v52  ;;  %v12757_v50 = vcombine.high %v10581_v6, %v10588_v52 }
 0x5da   :  { %v10837_v54 = vrot.slane %v10829_v39, %v19188_v14  ;;  %v10844_v44 = vrot.slane %v10830_v22, %v19188_v14  ;;  %v10853_v29 = vrot.slane %v10845_v48, %v19188_v14  ;;  %v10860_v56 = vrot.slane %v10846_v28, %v19188_v14  ;;  %13548 = vrot.lane.b32.xlu0 %v18401_v31, %s13957_s2 }
 0x5db   :  { %v11292_v30 = vrot.slane %v12751_v43, %v19181_v57  ;;  %v11308_v42 = vrot.slane %v12753_v45, %v19181_v57  ;;  %v11324_v53 = vrot.slane %v12755_v59, %v19181_v57  ;;  %v11340_v62 = vrot.slane %v12757_v50, %v19181_v57 }
 0x5dc   :  { %v12759_v36 = vcombine.low %v10837_v54, %v10844_v44  ;;  %v12761_v33 = vcombine.high %v10837_v54, %v10844_v44  ;;  %v12763_v41 = vcombine.low %v10853_v29, %v10860_v56  ;;  %v12765_v0 = vcombine.high %v10853_v29, %v10860_v56 }
 0x5dd   :  { %v11357_v2 = vcombine.low %v11292_v30, %v11308_v42  ;;  %v11389_v8 = vcombine.low %v11324_v53, %v11340_v62  ;;  %v11358_v46 = vcombine.high %v11292_v30, %v11308_v42  ;;  %v11390_v4 = vcombine.high %v11324_v53, %v11340_v62 }
 0x5de   :  { %v11428_v15 = vrot.slane %v12759_v36, %v19181_v57  ;;  %v11444_v7 = vrot.slane %v12761_v33, %v19181_v57  ;;  %v11460_v10 = vrot.slane %v12763_v41, %v19181_v57  ;;  %v11476_v24 = vrot.slane %v12765_v0, %v19181_v57 }
 0x5df   :  { %v11365_v16 = vrot.slane %v11357_v2, %v19188_v14  ;;  %v11397_v26 = vrot.slane %v11389_v8, %v19188_v14  ;;  %v11372_v47 = vrot.slane %v11358_v46, %v19188_v14  ;;  %v11404_v31 = vrot.slane %v11390_v4, %v19188_v14 }
 0x5e0   :  { %v11493_v21 = vcombine.low %v11428_v15, %v11444_v7  ;;  %v11525_v1 = vcombine.low %v11460_v10, %v11476_v24  ;;  %v11494_v5 = vcombine.high %v11428_v15, %v11444_v7  ;;  %v11526_v40 = vcombine.high %v11460_v10, %v11476_v24 }
 0x5e1   :  { %v11409_v35 = vcombine.low %v11365_v16, %v11397_v26  ;;  %v11410_v19 = vcombine.high %v11365_v16, %v11397_v26  ;;  %v11411_v9 = vcombine.low %v11372_v47, %v11404_v31  ;;  %v11412_v34 = vcombine.high %v11372_v47, %v11404_v31 }
 0x5e2   :  { %v11501_v58 = vrot.slane %v11493_v21, %v19188_v14  ;;  %v11533_v13 = vrot.slane %v11525_v1, %v19188_v14  ;;  %v11508_v17 = vrot.slane %v11494_v5, %v19188_v14  ;;  %v11540_v63 = vrot.slane %v11526_v40, %v19188_v14 }
 0x5e3   :  { %v9602_v12 = vpop.f32.mrb[112].mxu1 }
 0x5e4   :  { %v11545_v51 = vcombine.low %v11501_v58, %v11533_v13  ;;  %v11546_v23 = vcombine.high %v11501_v58, %v11533_v13  ;;  %v11547_v60 = vcombine.low %v11508_v17, %v11540_v63  ;;  %v11548_v6 = vcombine.high %v11508_v17, %v11540_v63  ;;  %v13315_v52 = vpop.f32.mrb[113].mxu1 }
 0x5e5   :  { %v9605_v39 = vpop.f32.mrb[114].mxu1  ;;  %v9646_v22 = vpop.f32.mrb[124].mxu0 }
 0x5e6   :  { %v13492_v48 = vpack.i.bf16 %v11545_v51, %v11409_v35  ;;  %v13497_v28 = vpack.i.bf16 %v11546_v23, %v11410_v19  ;;  %v13502_v43 = vpack.i.bf16 %v11547_v60, %v11411_v9  ;;  %v13507_v45 = vpack.i.bf16 %v11548_v6, %v11412_v34  ;;  %v13316_v59 = vpop.f32.mrb[115].mxu1  ;;  %v13321_v50 = vpop.f32.mrb[125].mxu0 }
 0x5e7   :  { %v9649_v54 = vpop.f32.mrb[126].mxu0 }
 0x5e8   :  { %13493 = vrot.lane.b32.xlu1 %v13492_v48, %s13967_s12  ;;  %v13322_v44 = vpop.f32.mrb[127].mxu0 }
 0x5ec   :  { %13498 = vrot.lane.b32.xlu1 %v13497_v28, %s13966_s11  ;;  %v18522_v41 = vpop.permute.xlu0 %13418 }
 0x5ed   :  { %v9734_v29 = vpop.f32.mrb[128].mxu0  ;;  %v13421_v3 = vunpack.i.h.bf16 %v18522_v41  ;;  %v13420_v55 = vunpack.i.l.bf16 %v18522_v41 }
 0x5ee   :  { %v10613_v56 = vcombine.low %v9646_v22, %v9734_v29  ;;  %v10614_v30 = vcombine.high %v9646_v22, %v9734_v29  ;;  %v13333_v42 = vpop.f32.mrb[129].mxu0 }
 0x5ef   :  { %v9737_v53 = vpop.f32.mrb[130].mxu0 }
 0x5f0   :  { %13503 = vrot.lane.b32.xlu1 %v13502_v43, %s13965_s10  ;;  %v13334_v62 = vpop.f32.mrb[131].mxu0  ;;  %v10885_v36 = vcombine.low %v9649_v54, %v9737_v53  ;;  %v10886_v33 = vcombine.high %v9649_v54, %v9737_v53  ;;  %v10621_v7 = vrot.slane %v10613_v56, %v19181_v57  ;;  %v10628_v26 = vrot.slane %v10614_v30, %v19181_v57 }
 0x5f2   :  { %v10893_v5 = vrot.slane %v10885_v36, %v19181_v57  ;;  %v10900_v60 = vrot.slane %v10886_v33, %v19181_v57 }
 0x5f4   :  { %13508 = vrot.lane.b32.xlu1 %v13507_v45, %s13964_s9 }
 0x609   :  { %v9690_v0 = vpop.f32.mrb[116].mxu1  ;;  %v18524_v4 = vpop.permute.xlu0 %13423 }
 0x60a   :  { %v10597_v2 = vcombine.low %v9602_v12, %v9690_v0  ;;  %v10598_v8 = vcombine.high %v9602_v12, %v9690_v0  ;;  %v13327_v46 = vpop.f32.mrb[117].mxu1  ;;  %v13426_v49 = vunpack.i.h.bf16 %v18524_v4 }
 0x60b   :  { %v9693_v15 = vpop.f32.mrb[118].mxu1 }
 0x60c   :  { %v10605_v10 = vrot.slane %v10597_v2, %v19181_v57  ;;  %v10612_v24 = vrot.slane %v10598_v8, %v19181_v57  ;;  %v13328_v16 = vpop.f32.mrb[119].mxu1  ;;  %v10869_v47 = vcombine.low %v9605_v39, %v9693_v15  ;;  %v10870_v31 = vcombine.high %v9605_v39, %v9693_v15 }
 0x60d   :  { %v18535_v13 = vpop.permute.xlu0 %13428 }
 0x60e   :  { %v10661_v21 = vcombine.low %v10605_v10, %v10621_v7  ;;  %v10662_v1 = vcombine.high %v10605_v10, %v10621_v7  ;;  %v10677_v40 = vcombine.low %v10612_v24, %v10628_v26  ;;  %v10678_v35 = vcombine.high %v10612_v24, %v10628_v26 }
 0x60f   :  { %v10877_v19 = vrot.slane %v10869_v47, %v19181_v57  ;;  %v10884_v58 = vrot.slane %v10870_v31, %v19181_v57  ;;  %v13431_v37 = vunpack.i.h.bf16 %v18535_v13  ;;  %v13430_v11 = vunpack.i.l.bf16 %v18535_v13 }
 0x610   :  { %v10669_v9 = vrot.slane %v10661_v21, %v19188_v14  ;;  %v10676_v34 = vrot.slane %v10662_v1, %v19188_v14  ;;  %v10685_v17 = vrot.slane %v10677_v40, %v19188_v14  ;;  %v10692_v63 = vrot.slane %v10678_v35, %v19188_v14 }
 0x611   :  { %v10933_v12 = vcombine.low %v10877_v19, %v10893_v5  ;;  %v10934_v51 = vcombine.high %v10877_v19, %v10893_v5  ;;  %v9778_v23 = vpop.f32.mrb[120].mxu1  ;;  %v9822_v39 = vpop.f32.mrb[132].mxu0  ;;  %v10949_v53 = vcombine.low %v10884_v58, %v10900_v60  ;;  %v10950_v62 = vcombine.high %v10884_v58, %v10900_v60 }
 0x612   :  { %v12782_v6 = vcombine.low %v10669_v9, %v10676_v34  ;;  %v12784_v52 = vcombine.high %v10669_v9, %v10676_v34  ;;  %v13339_v22 = vpop.f32.mrb[121].mxu1  ;;  %v12786_v48 = vcombine.low %v10685_v17, %v10692_v63  ;;  %v12788_v28 = vcombine.high %v10685_v17, %v10692_v63  ;;  %v13345_v59 = vpop.f32.mrb[133].mxu0 }
 0x613   :  { %v10941_v43 = vrot.slane %v10933_v12, %v19188_v14  ;;  %v10948_v45 = vrot.slane %v10934_v51, %v19188_v14  ;;  %v9781_v50 = vpop.f32.mrb[122].mxu1  ;;  %v9825_v29 = vpop.f32.mrb[134].mxu0  ;;  %v10957_v2 = vrot.slane %v10949_v53, %v19188_v14  ;;  %v10964_v8 = vrot.slane %v10950_v62, %v19188_v14 }
 0x614   :  { %v18543_v54 = vrot.slane %v12782_v6, %v19181_v57  ;;  %v18546_v44 = vrot.slane %v12784_v52, %v19181_v57  ;;  %v13340_v56 = vpop.f32.mrb[123].mxu1  ;;  %v18549_v30 = vrot.slane %v12786_v48, %v19181_v57  ;;  %v18552_v42 = vrot.slane %v12788_v28, %v19181_v57  ;;  %v13346_v36 = vpop.f32.mrb[135].mxu0 }
 0x615   :  { %v12790_v33 = vcombine.low %v10941_v43, %v10948_v45  ;;  %v12792_v0 = vcombine.high %v10941_v43, %v10948_v45  ;;  %v18560_v7 = vpop.permute.xlu0 %13433  ;;  %v12794_v10 = vcombine.low %v10957_v2, %v10964_v8  ;;  %v12796_v24 = vcombine.high %v10957_v2, %v10964_v8 }
 0x616   :  { %v11885_v46 = vcombine.low %v18543_v54, %v18546_v44  ;;  %v11917_v15 = vcombine.low %v18549_v30, %v18552_v42 }
 0x617   :  { %v18567_v28 = vrot.slane %v12790_v33, %v19181_v57  ;;  %v11981_v43 = vrot.slane %v12792_v0, %v19181_v57 }
 0x618   :  { %v18572_v59 = vrot.slane %v11885_v46, %v19188_v14  ;;  %v11925_v2 = vrot.slane %v11917_v15, %v19188_v14 }
 0x619   :  { %v9866_v16 = vpop.f32.mrb[124].mxu1  ;;  %v9910_v31 = vpop.f32.mrb[136].mxu0 }
 0x61a   :  { %v10629_v26 = vcombine.low %v9778_v23, %v9866_v16  ;;  %v10630_v47 = vcombine.high %v9778_v23, %v9866_v16  ;;  %v13351_v21 = vpop.f32.mrb[125].mxu1  ;;  %v10645_v1 = vcombine.low %v9822_v39, %v9910_v31  ;;  %v10646_v5 = vcombine.high %v9822_v39, %v9910_v31  ;;  %v13357_v40 = vpop.f32.mrb[137].mxu0 }
 0x61b   :  { %v9869_v35 = vpop.f32.mrb[126].mxu1  ;;  %v9913_v34 = vpop.f32.mrb[138].mxu0  ;;  %v11997_v21 = vrot.slane %v12794_v10, %v19181_v57 }
 0x61c   :  { %v10637_v19 = vrot.slane %v10629_v26, %v19181_v57  ;;  %v10644_v9 = vrot.slane %v10630_v47, %v19181_v57  ;;  %v13352_v58 = vpop.f32.mrb[127].mxu1  ;;  %v10653_v17 = vrot.slane %v10645_v1, %v19181_v57  ;;  %v10660_v63 = vrot.slane %v10646_v5, %v19181_v57  ;;  %v13358_v60 = vpop.f32.mrb[139].mxu0 }
 0x61d   :  { %v10901_v12 = vcombine.low %v9781_v50, %v9869_v35  ;;  %v10902_v51 = vcombine.high %v9781_v50, %v9869_v35  ;;  %v10917_v23 = vcombine.low %v9825_v29, %v9913_v34  ;;  %v10918_v6 = vcombine.high %v9825_v29, %v9913_v34  ;;  %v18578_v62 = vpop.permute.xlu0 %13438 }
 0x61e   :  { %v10693_v52 = vcombine.low %v10637_v19, %v10653_v17  ;;  %v10694_v22 = vcombine.high %v10637_v19, %v10653_v17  ;;  %v10709_v39 = vcombine.low %v10644_v9, %v10660_v63  ;;  %v10710_v48 = vcombine.high %v10644_v9, %v10660_v63  ;;  %v13589_v19 = vld [vmem:[#allocation7] sm:$0xff]  }
 0x61f   :  { %v10909_v45 = vrot.slane %v10901_v12, %v19181_v57  ;;  %v10916_v36 = vrot.slane %v10902_v51, %v19181_v57  ;;  %v10925_v33 = vrot.slane %v10917_v23, %v19181_v57  ;;  %v10932_v0 = vrot.slane %v10918_v6, %v19181_v57  ;;  %13359 = vmatprep.subr.bf16.mxu1 %v13589_v19 }
 0x620   :  { %v10701_v56 = vrot.slane %v10693_v52, %v19188_v14  ;;  %v10708_v50 = vrot.slane %v10694_v22, %v19188_v14  ;;  %v10717_v29 = vrot.slane %v10709_v39, %v19188_v14  ;;  %v10724_v53 = vrot.slane %v10710_v48, %v19188_v14  ;;  %13360 = vmatpush3.bf16.msra.mxu1 %v13589_v19 }
 0x621   :  { %v10965_v47 = vcombine.low %v10909_v45, %v10925_v33  ;;  %v10966_v31 = vcombine.high %v10909_v45, %v10925_v33  ;;  %v12013_v1 = vrot.slane %v12796_v24, %v19181_v57  ;;  %v10981_v9 = vcombine.low %v10916_v36, %v10932_v0  ;;  %v18596_v10 = vpop.permute.xlu0 %13443 }
 0x622   :  { %v12783_v8 = vcombine.low %v10701_v56, %v10708_v50  ;;  %v12785_v46 = vcombine.high %v10701_v56, %v10708_v50  ;;  %v12787_v16 = vcombine.low %v10717_v29, %v10724_v53  ;;  %v12789_v26 = vcombine.high %v10717_v29, %v10724_v53  ;;  %v13590_v56 = vld [vmem:[#allocation7 + $0x8] sm:$0xff]  }
 0x623   :  { %v10973_v35 = vrot.slane %v10965_v47, %v19188_v14  ;;  %v10980_v15 = vrot.slane %v10966_v31, %v19188_v14  ;;  %v10982_v34 = vcombine.high %v10916_v36, %v10932_v0  ;;  %v11949_v58 = vcombine.low %v18572_v59, %v11925_v2  ;;  %13361 = vmatprep.subr.bf16.mxu1 %v13590_v56 }
 0x624   :  { %v18587_v5 = vrot.slane %v12783_v8, %v19181_v57  ;;  %v18590_v40 = vrot.slane %v12785_v46, %v19181_v57  ;;  %v12021_v17 = vcombine.low %v18567_v28, %v11981_v43  ;;  %v11868_v24 = vrot.slane %v12787_v16, %v19181_v57  ;;  %13362 = vmatpush3.bf16.msra.mxu1 %v13590_v56 }
 0x625   :  { %v11884_v63 = vrot.slane %v12789_v26, %v19181_v57  ;;  %v12791_v12 = vcombine.low %v10973_v35, %v10980_v15  ;;  %v12793_v51 = vcombine.high %v10973_v35, %v10980_v15  ;;  %v10989_v60 = vrot.slane %v10981_v9, %v19188_v14  ;;  %v18617_v16 = vpop.permute.xlu0 %13448  ;;  %v13591_v26 = vld [vmem:[#allocation7 + $0x10] sm:$0xff]  }
 0x626   :  { %v10996_v23 = vrot.slane %v10982_v34, %v19188_v14  ;;  %v12029_v6 = vrot.slane %v12021_v17, %v19188_v14  ;;  %v12053_v52 = vcombine.low %v11997_v21, %v12013_v1  ;;  %v11950_v48 = vcombine.high %v18572_v59, %v11925_v2  ;;  %13363 = vmatprep.subr.bf16.mxu1 %v13591_v26 }
 0x627   :  { %v11972_v22 = vrot.slane %v12791_v12, %v19181_v57  ;;  %v11988_v39 = vrot.slane %v12793_v51, %v19181_v57  ;;  %v11886_v45 = vcombine.high %v18543_v54, %v18546_v44  ;;  %v11918_v36 = vcombine.high %v18549_v30, %v18552_v42 }
 0x628   :  { %v12795_v50 = vcombine.low %v10989_v60, %v10996_v23  ;;  %v12797_v29 = vcombine.high %v10989_v60, %v10996_v23  ;;  %v12061_v53 = vrot.slane %v12053_v52, %v19188_v14  ;;  %v12022_v0 = vcombine.high %v18567_v28, %v11981_v43  ;;  %13364 = vmatpush3.bf16.msra.mxu1 %v13591_v26 }
 0x629   :  { %v11900_v33 = vrot.slane %v11886_v45, %v19188_v14  ;;  %v12054_v8 = vcombine.high %v11997_v21, %v12013_v1  ;;  %v11901_v46 = vcombine.low %v18587_v5, %v18590_v40  ;;  %v11932_v30 = vrot.slane %v11918_v36, %v19188_v14 }
 0x62a   :  { %v12004_v59 = vrot.slane %v12795_v50, %v19181_v57  ;;  %v12020_v54 = vrot.slane %v12797_v29, %v19181_v57  ;;  %v12085_v44 = vcombine.low %v12029_v6, %v12061_v53  ;;  %v12086_v2 = vcombine.high %v12029_v6, %v12061_v53  ;;  %v13592_v6 = vld [vmem:[#allocation7 + $0x18] sm:$0xff]   ;;  %v18630_v50 = vpop.permute.xlu0 %13453 }
 0x62b   :  { %v12036_v42 = vrot.slane %v12022_v0, %v19188_v14  ;;  %v12068_v28 = vrot.slane %v12054_v8, %v19188_v14  ;;  %v11909_v43 = vrot.slane %v11901_v46, %v19188_v14  ;;  %v11933_v21 = vcombine.low %v11868_v24, %v11884_v63  ;;  %13365 = vmatprep.subr.bf16.mxu1 %v13592_v6 }
 0x62c   :  { %v13512_v47 = vpack.i.bf16 %v12085_v44, %v11949_v58  ;;  %v13517_v31 = vpack.i.bf16 %v12086_v2, %v11950_v48  ;;  %v12037_v1 = vcombine.low %v11972_v22, %v11988_v39  ;;  %v11951_v35 = vcombine.low %v11900_v33, %v11932_v30  ;;  %13366 = vmatpush3.bf16.msra.mxu1 %v13592_v6 }
 0x62d   :  { %v12087_v57 = vcombine.low %v12036_v42, %v12068_v28  ;;  %v11952_v15 = vcombine.high %v11900_v33, %v11932_v30  ;;  %v12088_v19 = vcombine.high %v12036_v42, %v12068_v28  ;;  %v11941_v9 = vrot.slane %v11933_v21, %v19188_v14  ;;  %v13593_v33 = vld [vmem:[#allocation7 + $0x20] sm:$0xff]   ;;  %v13594_v30 = vld [vmem:[#allocation7 + $0x28] sm:$0xff]  }
 0x62e   :  { %13513 = vrot.lane.b32.xlu1 %v13512_v47, %s13954_s0  ;;  %v12045_v34 = vrot.slane %v12037_v1, %v19188_v14  ;;  %v12069_v17 = vcombine.low %v12004_v59, %v12020_v54  ;;  %v11902_v12 = vcombine.high %v18587_v5, %v18590_v40  ;;  %v11934_v60 = vcombine.high %v11868_v24, %v11884_v63  ;;  %v13409_v5 = vpop.permute.xlu1 %13408 }
 0x62f   :  { %v13522_v51 = vpack.i.bf16 %v12087_v57, %v11951_v35  ;;  %v13527_v58 = vpack.i.bf16 %v12088_v19, %v11952_v15  ;;  %v12038_v23 = vcombine.high %v11972_v22, %v11988_v39  ;;  %v11953_v52 = vcombine.low %v11909_v43, %v11941_v9  ;;  %13367 = vmatprep.subr.bf16.mxu1 %v13593_v33 }
 0x630   :  { %v12077_v48 = vrot.slane %v12069_v17, %v19188_v14  ;;  %v11954_v45 = vcombine.high %v11909_v43, %v11941_v9  ;;  %v11916_v56 = vrot.slane %v11902_v12, %v19188_v14  ;;  %v11948_v29 = vrot.slane %v11934_v60, %v19188_v14  ;;  %13368 = vmatpush3.bf16.msra.mxu1 %v13593_v33 }
 0x631   :  { %v12052_v53 = vrot.slane %v12038_v23, %v19188_v14  ;;  %v12070_v36 = vcombine.high %v12004_v59, %v12020_v54  ;;  %v18637_v59 = vpop.permute.xlu0 %13458  ;;  %13369 = vmatprep.subr.bf16.mxu1 %v13594_v30  ;;  %v13410_v28 = vunpack.i.l.bf16 %v13409_v5  ;;  %v13435_v19 = vunpack.i.l.bf16 %v18560_v7 }
 0x632   :  { %13518 = vrot.lane.b32.xlu1 %v13517_v31, %s13963_s8  ;;  %v12089_v40 = vcombine.low %v12045_v34, %v12077_v48  ;;  %v12090_v24 = vcombine.high %v12045_v34, %v12077_v48  ;;  %v11955_v63 = vcombine.low %v11916_v56, %v11948_v29  ;;  %v11956_v39 = vcombine.high %v11916_v56, %v11948_v29  ;;  %v13414_v42 = vpop.permute.xlu1 %13413  ;;  %v13595_v31 = vld [vmem:[#allocation7 + $0x30] sm:$0xff]  }
 0x633   :  { %v12084_v22 = vrot.slane %v12070_v36, %v19188_v14  ;;  %v13411_v14 = vunpack.i.h.bf16 %v13409_v5  ;;  %v13416_v43 = vunpack.i.h.bf16 %v13414_v42  ;;  %v13415_v26 = vunpack.i.l.bf16 %v13414_v42 }
 0x634   :  { %v13532_v0 = vpack.i.bf16 %v12089_v40, %v11953_v52  ;;  %v13537_v8 = vpack.i.bf16 %v12090_v24, %v11954_v45  ;;  %13370 = vmatpush3.bf16.msra.mxu1 %v13594_v30  ;;  %v12333_v35 = vsel %vm6192_vm1, %v11133_v20, %v13410_v28  ;;  %v13425_v20 = vunpack.i.l.bf16 %v18524_v4 }
 0x635   :  { %v12091_v46 = vcombine.low %v12052_v53, %v12084_v22  ;;  %v12092_v44 = vcombine.high %v12052_v53, %v12084_v22  ;;  %13371 = vmatprep.subr.bf16.mxu1 %v13595_v31  ;;  %v12334_v57 = vsel %vm6192_vm1, %v11269_v32, %v13411_v14  ;;  %v12337_v38 = vsel %vm7772_vm2, %v12333_v35, %v13415_v26 }
 0x636   :  { %13523 = vrot.lane.b32.xlu1 %v13522_v51, %s13962_s7  ;;  %v12338_v27 = vsel %vm7772_vm2, %v12334_v57, %v13416_v43  ;;  %v12342_v4 = vsel %vm12341_vm5, %v12337_v38, %v13420_v55  ;;  %v13441_v34 = vunpack.i.h.bf16 %v18578_v62  ;;  %v13440_v17 = vunpack.i.l.bf16 %v18578_v62 }
 0x637   :  { %v18639_v54 = vpack.i.bf16 %v12091_v46, %v11955_v63  ;;  %v18641_v2 = vpack.i.bf16 %v12092_v44, %v11956_v39  ;;  %v12343_v9 = vsel %vm12341_vm5, %v12338_v27, %v13421_v3  ;;  %v12347_v13 = vsel %vm12346_vm6, %v12342_v4, %v13425_v20 }
 0x638   :  { %13372 = vmatpush3.bf16.msra.mxu1 %v13595_v31  ;;  %v12348_v41 = vsel %vm12346_vm6, %v12343_v9, %v13426_v49  ;;  %v13446_v12 = vunpack.i.h.bf16 %v18596_v10  ;;  %v13451_v23 = vunpack.i.h.bf16 %v18617_v16  ;;  %v13450_v62 = vunpack.i.l.bf16 %v18617_v16 }
 0x639   :  { %v12353_v60 = vsel %vm12351_vm7, %v12348_v41, %v13431_v37  ;;  %v13456_v48 = vunpack.i.h.bf16 %v18630_v50  ;;  %v13455_v45 = vunpack.i.l.bf16 %v18630_v50  ;;  %v13461_v29 = vunpack.i.h.bf16 %v18637_v59 }
 0x63a   :  { %13528 = vrot.lane.b32.xlu1 %v13527_v58, %s13961_s6  ;;  %v12352_v58 = vsel %vm12351_vm7, %v12347_v13, %v13430_v11  ;;  %v13460_v53 = vunpack.i.l.bf16 %v18637_v59 }
 0x63b   :  { %v12357_v6 = vsel %vm12356_vm8, %v12352_v58, %v13435_v19 }
 0x63c   :  { %v13464_v47 = vpop.permute.xlu0 %13463  ;;  %v13484_v35 = vpop.permute.xlu1 %13483 }
 0x63d   :  { %v13466_v21 = vunpack.i.h.bf16 %v13464_v47  ;;  %v13465_v1 = vunpack.i.l.bf16 %v13464_v47  ;;  %v13486_v11 = vunpack.i.h.bf16 %v13484_v35 }
 0x63e   :  { %13533 = vrot.lane.b32.xlu1 %v13532_v0, %s13960_s5 }
 0x63f   :  { %v18657_v15 = vsel %vm6192_vm1, %v11405_v18, %v13465_v1  ;;  %v18663_v61 = vsel %vm6192_vm1, %v11541_v25, %v13466_v21  ;;  %v13596_v18 = vld [vmem:[#allocation7 + $0x38] sm:$0xff]   ;;  %v13436_v25 = vunpack.i.h.bf16 %v18560_v7  ;;  %v13445_v7 = vunpack.i.l.bf16 %v18596_v10 }
 0x640   :  { %v13469_v32 = vpop.permute.xlu0 %13468  ;;  %13373 = vmatprep.subr.bf16.mxu1 %v13596_v18  ;;  %v12362_v10 = vsel %vm12361_vm9, %v12357_v6, %v13440_v17  ;;  %vm12401_vm1 = vcmask 982016   ;;  %v13489_v57 = vpop.permute.xlu1 %13488 }
 0x641   :  { %13374 = vmatpush3.bf16.msra.mxu1 %v13596_v18  ;;  %v12358_v52 = vsel %vm12356_vm8, %v12353_v60, %v13436_v25  ;;  %v12367_v36 = vsel %vm12366_vm10, %v12362_v10, %v13445_v7  ;;  %v13471_v5 = vunpack.i.h.bf16 %v13469_v32  ;;  %v13470_v40 = vunpack.i.l.bf16 %v13469_v32 }
 0x642   :  { %13538 = vrot.lane.b32.xlu1 %v13537_v8, %s13959_s30  ;;  %v12363_v56 = vsel %vm12361_vm9, %v12358_v52, %v13441_v34  ;;  %v12372_v50 = vsel %vm12371_vm11, %v12367_v36, %v13450_v62  ;;  %v13485_v18 = vunpack.i.l.bf16 %v13484_v35  ;;  %v13491_v25 = vunpack.i.h.bf16 %v13489_v57 }
 0x643   :  { %v12368_v16 = vsel %vm12366_vm10, %v12363_v56, %v13446_v12  ;;  %v12377_v33 = vsel %vm12376_vm12, %v12372_v50, %v13455_v45  ;;  %v13490_v19 = vunpack.i.l.bf16 %v13489_v57  ;;  %v12340_v12 = vsel %vm7772_vm2, %v18663_v61, %v13486_v11 }
 0x644   :  { %v13474_v51 = vpop.permute.xlu0 %13473  ;;  %v12373_v63 = vsel %vm12371_vm11, %v12368_v16, %v13451_v23  ;;  %v12382_v44 = vsel %vm12381_vm13, %v12377_v33, %v13460_v53  ;;  %v12339_v13 = vsel %vm7772_vm2, %v18657_v15, %v13485_v18  ;;  %v12345_v60 = vsel %vm12341_vm5, %v12340_v12, %v13491_v25 }
 0x645   :  { %v13476_v22 = vunpack.i.h.bf16 %v13474_v51  ;;  %v13475_v39 = vunpack.i.l.bf16 %v13474_v51  ;;  %v12378_v0 = vsel %vm12376_vm12, %v12373_v63, %v13456_v48  ;;  %v12387_v30 = vsel %vm12386_vm14, %v12382_v44, %v13470_v40 }
 0x646   :  { %13543 = vrot.lane.b32.xlu1 %v18639_v54, %s13958_s29  ;;  %v12383_v59 = vsel %vm12381_vm13, %v12378_v0, %v13461_v29  ;;  %v12344_v58 = vsel %vm12341_vm5, %v12339_v13, %v13490_v19 }
 0x647   :  { %v12388_v54 = vsel %vm12386_vm14, %v12383_v59, %v13471_v5  ;;  %v12392_v14 = vsel %vm12391_vm15, %v12387_v30, %v13475_v39 }
 0x648   :  { %v13479_v24 = vpop.permute.xlu0 %13478  ;;  %v12393_v28 = vsel %vm12391_vm15, %v12388_v54, %v13476_v22 }
 0x649   :  { %v13481_v8 = vunpack.i.h.bf16 %v13479_v24  ;;  %v13480_v46 = vunpack.i.l.bf16 %v13479_v24 }
 0x64a   :  { %13553 = vrot.lane.b32.xlu1 %v18641_v2, %s13957_s2 }
 0x64b   :  { %v12397_v47 = vsel %vm12396_vm0, %v12392_v14, %v13480_v46  ;;  %v12398_v31 = vsel %vm12396_vm0, %v12393_v28, %v13481_v8 }
 0x64c   :  { %v13549_v42 = vpop.permute.xlu0 %13548 }
 0x64d   :  { %v13551_v43 = vunpack.i.h.bf16 %v13549_v42  ;;  %v13550_v26 = vunpack.i.l.bf16 %v13549_v42 }
 0x64f   :  { %v12402_v21 = vsel %vm12401_vm1, %v12397_v47, %v13550_v26  ;;  %v12403_v2 = vsel %vm12401_vm1, %v12398_v31, %v13551_v43 }
 0x650   :  { %v12406_v1 = vpack.c.bf16 %v12403_v2, %v12402_v21 }
 0x652   :  { %13375 = vmatprep.mubr.bf16.mxu1 %v12406_v1 }
 0x65a   :  { %v13494_v38 = vpop.permute.xlu1 %13493 }
 0x65b   :  { %v13496_v4 = vunpack.i.h.bf16 %v13494_v38  ;;  %v13495_v9 = vunpack.i.l.bf16 %v13494_v38 }
 0x65d   :  { %v12350_v6 = vsel %vm12346_vm6, %v12345_v60, %v13496_v4  ;;  %v12349_v52 = vsel %vm12346_vm6, %v12344_v58, %v13495_v9 }
 0x65e   :  { %v13499_v27 = vpop.permute.xlu1 %13498 }
 0x65f   :  { %v13501_v17 = vunpack.i.h.bf16 %v13499_v27  ;;  %v13500_v41 = vunpack.i.l.bf16 %v13499_v27 }
 0x661   :  { %v12354_v15 = vsel %vm12351_vm7, %v12349_v52, %v13500_v41  ;;  %v12355_v56 = vsel %vm12351_vm7, %v12350_v6, %v13501_v17 }
 0x662   :  { %v13504_v49 = vpop.permute.xlu1 %13503 }
 0x663   :  { %v13506_v7 = vunpack.i.h.bf16 %v13504_v49  ;;  %v13505_v51 = vunpack.i.l.bf16 %v13504_v49 }
 0x665   :  { %v12359_v53 = vsel %vm12356_vm8, %v12354_v15, %v13505_v51  ;;  %v12360_v16 = vsel %vm12356_vm8, %v12355_v56, %v13506_v7 }
 0x666   :  { %v13509_v20 = vpop.permute.xlu1 %13508 }
 0x667   :  { %v13511_v23 = vunpack.i.h.bf16 %v13509_v20  ;;  %v13510_v62 = vunpack.i.l.bf16 %v13509_v20 }
 0x669   :  { %v12364_v40 = vsel %vm12361_vm9, %v12359_v53, %v13510_v62  ;;  %v12365_v24 = vsel %vm12361_vm9, %v12360_v16, %v13511_v23 }
 0x6a0   :  { %v13514_v32 = vpop.permute.xlu1 %13513 }
 0x6a1   :  { %v13516_v48 = vunpack.i.h.bf16 %v13514_v32  ;;  %v13515_v45 = vunpack.i.l.bf16 %v13514_v32 }
 0x6a3   :  { %v12370_v22 = vsel %vm12366_vm10, %v12365_v24, %v13516_v48  ;;  %v12369_v39 = vsel %vm12366_vm10, %v12364_v40, %v13515_v45 }
 0x6a4   :  { %v13519_v3 = vpop.permute.xlu1 %13518 }
 0x6a5   :  { %v13521_v61 = vunpack.i.h.bf16 %v13519_v3  ;;  %v13520_v29 = vunpack.i.l.bf16 %v13519_v3  ;;  %v12798_v3 = vld [vmem:[%s18767_s3] ss:$0 sm:$0xff] }
 0x6a7   :  { %v12374_v46 = vsel %vm12371_vm11, %v12369_v39, %v13520_v29  ;;  %v12375_v44 = vsel %vm12371_vm11, %v12370_v22, %v13521_v61 }
 0x6a8   :  { %v13524_v55 = vpop.permute.xlu1 %13523 }
 0x6a9   :  { %v13526_v36 = vunpack.i.h.bf16 %v13524_v55  ;;  %v13525_v5 = vunpack.i.l.bf16 %v13524_v55 }
 0x6ab   :  { %v12379_v30 = vsel %vm12376_vm12, %v12374_v46, %v13525_v5  ;;  %v12380_v42 = vsel %vm12376_vm12, %v12375_v44, %v13526_v36 }
 0x6ac   :  { %v13529_v37 = vpop.permute.xlu1 %13528 }
 0x6ad   :  { %v13531_v50 = vunpack.i.h.bf16 %v13529_v37  ;;  %v13530_v63 = vunpack.i.l.bf16 %v13529_v37 }
 0x6af   :  { %v12384_v43 = vsel %vm12381_vm13, %v12379_v30, %v13530_v63  ;;  %v12385_v26 = vsel %vm12381_vm13, %v12380_v42, %v13531_v50 }
 0x6b0   :  { %v13534_v34 = vpop.permute.xlu1 %13533 }
 0x6b1   :  { %v13536_v33 = vunpack.i.h.bf16 %v13534_v34  ;;  %v13535_v0 = vunpack.i.l.bf16 %v13534_v34 }
 0x6b3   :  { %v12390_v47 = vsel %vm12386_vm14, %v12385_v26, %v13536_v33  ;;  %v12389_v31 = vsel %vm12386_vm14, %v12384_v43, %v13535_v0 }
 0x6b4   :  { %v13539_v10 = vpop.permute.xlu1 %13538 }
 0x6b5   :  { %v13541_v59 = vunpack.i.h.bf16 %v13539_v10  ;;  %v13540_v54 = vunpack.i.l.bf16 %v13539_v10 }
 0x6b7   :  { %v12394_v2 = vsel %vm12391_vm15, %v12389_v31, %v13540_v54  ;;  %v12395_v1 = vsel %vm12391_vm15, %v12390_v47, %v13541_v59 }
 0x6b8   :  { %v13544_v8 = vpop.permute.xlu1 %13543 }
 0x6b9   :  { %v13546_v14 = vunpack.i.h.bf16 %v13544_v8  ;;  %v13545_v28 = vunpack.i.l.bf16 %v13544_v8 }
 0x6bb   :  { %v12399_v38 = vsel %vm12396_vm0, %v12394_v2, %v13545_v28  ;;  %v12400_v27 = vsel %vm12396_vm0, %v12395_v1, %v13546_v14 }
 0x6bc   :  { %v13554_v21 = vpop.permute.xlu1 %13553 }
 0x6bd   :  { %v13556_v35 = vunpack.i.h.bf16 %v13554_v21  ;;  %v13555_v57 = vunpack.i.l.bf16 %v13554_v21 }
 0x6bf   :  { %v12404_v49 = vsel %vm12401_vm1, %v12399_v38, %v13555_v57  ;;  %v12405_v20 = vsel %vm12401_vm1, %v12400_v27, %v13556_v35 }
 0x6c0   :  { %v12407_v32 = vpack.c.bf16 %v12405_v20, %v12404_v49 }
 0x6c2   :  { %13376 = vmatmul.mubr.bf16.vlgmr.msra.gmra.mrb[128].mxu1 %v12407_v32 }
 0x795   :  { %v13377_v55 = vpop.f32.mrb[128].mxu1 }
 0x796   :  { %v12522_v37 = vadd.f32 %v13377_v55, %v12798_v3  ;;  %v12513_v11 = vpop.f32.mrb[129].mxu1 }
 0x797   :  { %v12514_v18 = vadd.f32 %v12798_v3, %v12513_v11  ;;  %v13378_v25 = vpop.f32.mrb[130].mxu1 }
 0x798   :  { %12530 = vst [vmem:[#allocation8 + $0x10] sm:$0xff] %v12522_v37  ;;  %v12525_v19 = vadd.f32 %v13378_v25, %v12798_v3  ;;  %v12516_v4 = vpop.f32.mrb[131].mxu1 }
 0x799   :  { %12528 = vst [vmem:[#allocation8] sm:$0xff] %v12514_v18  ;;  %v12517_v9 = vadd.f32 %v12798_v3, %v12516_v4 }
 0x79a   :  { %12531 = vst [vmem:[#allocation8 + $0x18] sm:$0xff] %v12525_v19 }
 0x79b   :  { %12529 = vst [vmem:[#allocation8 + $0x8] sm:$0xff] %v12517_v9 }
 0x79c   :  { %13930 = shalt.err (!%p13927_p0)
}
 0x79d   :  { %s13931_s22 = scalar_lea.hbm %s18768_s4, 512 }
 0x79e   :  { %p13932_p1 = scmp.ne.s32.totalorder %s18768_s4, %s13931_s22  ;;  %p13935_p2 = scmp.lt.u32.totalorder %s13931_s22, %s18768_s4 }
 0x7a0   :  { %p13937_p3 = pnand %p13935_p2, %p13932_p1 }
 0x7a2   :  { %13940 = shalt.err (!%p13937_p3)
}
 0x7a3   :  { %12543 = dma.vmem_to_hbm [thread:$0]  %s12538_s19, 512, %s18768_s4, [#allocation4], %s13951_s1, %s13951_s1, %s13952_s13  }
 0x7a4   :  { %13945 = dma.done.wait [#allocation4], 512  }
 0x7a5   :  { %13946 = vsyncadd [#allocation4], 4294966784 }
 0x7a6   :  { %12547 = vsyncpa [#allocation3], 1 }
 0x7a7   :  { %12548 = vsyncpa [#allocation6], 1 }
 0x7a8   :  { %12549 = vsyncpa [#allocation4], 1 }

</bundles_post_ra>
